<compile_context>
chip_gen: v6e
topology: v6e:2x2x1
jax: 0.10.0
libtpu: 0.0.40
codegen_flags: <defaults>
</compile_context>

<pallas_src>
import jax
import jax.numpy as jnp
from jax import lax
from jax.experimental import pallas as pl
from jax.experimental.pallas import tpu as pltpu

LEAKY_SLOPE = 0.01          # nn.LeakyReLU default negative_slope
BN_EPS = 1e-5               # nn.BatchNorm2d default eps


def _vmem_limit_bytes():
    # ~3/4 of physical VMEM: ~96 MiB on v5e/v6e (128 MiB parts), ~48 MiB on v7x (64 MiB).
    try:
        cap = pltpu.get_tpu_info().vmem_capacity_bytes
    except Exception:
        cap = 64 * 1024 * 1024
    return int(min(cap * 3 // 4, 96 * 1024 * 1024))


def _pick_row_tile(H, W, max_rows=1024):
    """Largest TH dividing H with legal (8,128) blocks and TH*W <= max_rows."""
    cands = [t for t in range(1, H + 1)
             if H % t == 0 and (t == H or (t % 8 == 0 and (t * W) % 128 == 0))]
    good = [t for t in cands if t * W <= max_rows]
    return max(good) if good else min(cands)


# -----------------------------------------------------------------------------
# Fused kernel: conv1 + BN1 + LeakyReLU -> VMEM scratch -> conv2 + BN2 + LeakyReLU
# -----------------------------------------------------------------------------
def _convblock_kernel(x_ref, w1_ref, s1_ref, b1_ref, w2t_ref, s2_ref, b2_ref,
                      o_ref, mid_ref):
    """One (image n, row-tile h) grid cell.

    x_ref  : (1, H+4, W+4, Cin) bf16  whole image, zero-padded by 2 (resident per n)
    w1_ref : (3, 3, Cin, Cout)  bf16  conv1 weights (HWIO)
    s1/b1  : (1, Cout)          f32   folded BN1 scale / bias (row vectors)
    w2t_ref: (3, 3, Cout, Cout) bf16  conv2 weights (HWOI, for the NT matmul)
    s2/b2  : (Cout, 1)          f32   folded BN2 scale / bias (column vectors)
    o_ref  : (1, Cout, TH*W)    f32   NCHW-flat output tile (lane-dense store)
    mid_ref: (TH+2, W+2, Cout)  bf16  conv1 rows r0-1..r0+TH with a 1-pixel zero halo
    """
    KH = KW = 3
    TH2, Wp2, Cout = mid_ref.shape
    TH, W = TH2 - 2, Wp2 - 2
    Cin = x_ref.shape[3]
    h = pl.program_id(1)
    row0 = pl.multiple_of(h * TH, TH)   # xp row of original row r0-2 (xp is padded by 2)

    # The scratch halo (columns 0 / W+1, and boundary rows below) is conv2's zero
    # 'same' padding.  Clearing every step keeps the kernel state-free across grid
    # iterations (megacore-safe) and costs only a small VMEM-local write.
    mid_ref[...] = jnp.zeros_like(mid_ref)

    # -- Conv1 + BN1 + LeakyReLU over the TH+2 halo rows (r0-1 .. r0+TH) ------------
    m1 = (TH + 2) * W
    acc1 = jnp.zeros((m1, Cout), jnp.float32)
    for i in range(KH):
        for j in range(KW):
            patch = x_ref[0, pl.ds(row0 + i, TH + 2), pl.ds(1 + j, W), :]
            acc1 = acc1 + jnp.dot(patch.reshape(m1, Cin), w1_ref[i, j],
                                  preferred_element_type=jnp.float32)
    y1 = acc1 * s1_ref[...] + b1_ref[...]
    y1 = jnp.where(y1 >= 0, y1, LEAKY_SLOPE * y1)
    mid_ref[:, 1:1 + W, :] = y1.reshape(TH + 2, W, Cout).astype(mid_ref.dtype)

    # Rows outside the image are conv2's 'same' padding -> force them back to zero.
    @pl.when(h == 0)
    def _():
        mid_ref[0, :, :] = jnp.zeros((Wp2, Cout), jnp.bfloat16)

    @pl.when(h == pl.num_programs(1) - 1)
    def _():
        mid_ref[TH + 1, :, :] = jnp.zeros((Wp2, Cout), jnp.bfloat16)

    # -- Conv2 + BN2 + LeakyReLU over the TH output rows ----------------------------
    # NT matmul: (Cout, K) x (M, K)^T -> (Cout, M).  The result is channel-major, so
    # the store is lane-dense (M = TH*W lanes) and already NCHW-ordered.
    m2 = TH * W
    nt = (((1,), (1,)), ((), ()))                    # contract K: lhs dim 1, rhs dim 1
    acc2 = jnp.zeros((Cout, m2), jnp.float32)
    for i in range(KH):
        for j in range(KW):
            patch = mid_ref[i:i + TH, j:j + W, :]
            acc2 = acc2 + lax.dot_general(w2t_ref[i, j], patch.reshape(m2, Cout),
                                          nt, preferred_element_type=jnp.float32)
    y2 = acc2 * s2_ref[...] + b2_ref[...]
    y2 = jnp.where(y2 >= 0, y2, LEAKY_SLOPE * y2)
    o_ref[0] = y2.astype(o_ref.dtype)


# -----------------------------------------------------------------------------
# Wrapper
# -----------------------------------------------------------------------------
def _fold_bn(conv_bias, bn):
    scale = bn["gamma"] / jnp.sqrt(bn["var"] + BN_EPS)
    shift = (conv_bias - bn["mean"]) * scale + bn["beta"]
    return scale.astype(jnp.float32), shift.astype(jnp.float32)


def convblock_forward(p, x):
    """Convblock forward: x (N, Cin, H, W) NCHW f32 -> (N, Cout, H, W) NCHW f32."""
    N, Cin, H, W = x.shape
    Cout = p["w1"].shape[0]
    KH = KW = 3
    Hp, Wp = H + 4, W + 4          # 2-pixel halo: conv1 'same' pad (1) + conv2 halo (1)

    # Single fused boundary pass: NCHW->NHWC transpose + bf16 cast + zero pad.
    xp = jnp.pad(jnp.transpose(x, (0, 2, 3, 1)).astype(jnp.bfloat16),
                 ((0, 0), (2, 2), (2, 2), (0, 0)))

    w1 = jnp.transpose(p["w1"], (2, 3, 1, 0)).astype(jnp.bfloat16)    # (3,3,Cin,Cout)
    w2t = jnp.transpose(p["w2"], (2, 3, 0, 1)).astype(jnp.bfloat16)   # (3,3,Cout,Cin2)

    s1, b1 = _fold_bn(p["b1"], p["bn1"])
    s2, b2 = _fold_bn(p["b2"], p["bn2"])
    s1, b1 = s1.reshape(1, Cout), b1.reshape(1, Cout)    # conv1 epilogue: row vectors
    s2, b2 = s2.reshape(Cout, 1), b2.reshape(Cout, 1)    # conv2 epilogue: column vectors

    TH = _pick_row_tile(H, W)
    grid = (N, H // TH)

    out = pl.pallas_call(
        _convblock_kernel,
        out_shape=jax.ShapeDtypeStruct((N, Cout, H * W), jnp.float32),
        grid=grid,
        in_specs=[
            pl.BlockSpec((1, Hp, Wp, Cin), lambda n, h: (n, 0, 0, 0)),
            pl.BlockSpec((KH, KW, Cin, Cout), lambda n, h: (0, 0, 0, 0)),
            pl.BlockSpec((1, Cout), lambda n, h: (0, 0)),
            pl.BlockSpec((1, Cout), lambda n, h: (0, 0)),
            pl.BlockSpec((KH, KW, Cout, Cout), lambda n, h: (0, 0, 0, 0)),
            pl.BlockSpec((Cout, 1), lambda n, h: (0, 0)),
            pl.BlockSpec((Cout, 1), lambda n, h: (0, 0)),
        ],
        out_specs=pl.BlockSpec((1, Cout, TH * W), lambda n, h: (n, 0, h)),
        scratch_shapes=[pltpu.VMEM((TH + 2, W + 2, Cout), jnp.bfloat16)],
        compiler_params=pltpu.CompilerParams(
            dimension_semantics=("parallel", "parallel"),
            vmem_limit_bytes=_vmem_limit_bytes()),
    )(xp, w1, s1, b1, w2t, s2, b2)

    # (N, Cout, H*W) is already NCHW-flat -> reshape is metadata only (no HBM pass).
    return out.reshape(N, Cout, H, W)


# -----------------------------------------------------------------------------
# Pure-JAX reference (eval-mode semantics) for the correctness check
# -----------------------------------------------------------------------------
def convblock_reference(p, x):
    def step(xx, w, b, bn):
        y = lax.conv_general_dilated(xx, w, window_strides=(1, 1),
                                     padding=((1, 1), (1, 1)),
                                     dimension_numbers=("NCHW", "OIHW", "NCHW"))
        y = y + b[None, :, None, None]
        s = bn["gamma"] / jnp.sqrt(bn["var"] + BN_EPS)
        y = (y - bn["mean"][None, :, None, None]) * s[None, :, None, None] \
            + bn["beta"][None, :, None, None]
        return jnp.where(y >= 0, y, LEAKY_SLOPE * y)

    y = step(x, p["w1"], p["b1"], p["bn1"])
    return step(y, p["w2"], p["b2"], p["bn2"])


# -----------------------------------------------------------------------------
# Deterministic parameter init (shapes follow the PyTorch __init__)
# -----------------------------------------------------------------------------
class _KeyGen:
    def __init__(self, seed):
        self._key = jax.random.PRNGKey(seed)

    def __call__(self):
        self._key, sub = jax.random.split(self._key)
        return sub


def _randn(kg, shape, scale=0.02):
    return (scale * jax.random.normal(kg(), shape)).astype(jnp.float32)


def _init_bn(kg, C):
    return {
        "gamma": (1.0 + 0.1 * jax.random.normal(kg(), (C,))).astype(jnp.float32),
        "beta": _randn(kg, (C,), 0.1),
        "mean": _randn(kg, (C,), 0.1),
        "var": (1.0 + 0.1 * jnp.abs(jax.random.normal(kg(), (C,)))).astype(jnp.float32),
    }


def init_params(seed, Cin, Cout):
    kg = _KeyGen(seed)
    return {
        "w1": _randn(kg, (Cout, Cin, 3, 3)), "b1": _randn(kg, (Cout,)),
        "bn1": _init_bn(kg, Cout),
        "w2": _randn(kg, (Cout, Cout, 3, 3)), "b2": _randn(kg, (Cout,)),
        "bn2": _init_bn(kg, Cout),
    }


# -----------------------------------------------------------------------------
if __name__ == "__main__":
    N, Cin, Cout, H, W = 2, 32, 64, 16, 16
    params = init_params(42, Cin, Cout)
    x = jax.random.normal(jax.random.PRNGKey(0), (N, Cin, H, W), dtype=jnp.float32)

    fwd = jax.jit(convblock_forward)
    y = fwd(params, x)
    jax.block_until_ready(y)

    assert y.shape == (N, Cout, H, W), y.shape
    assert bool(jnp.all(jnp.isfinite(y)))

    # Cross-check against the pure-JAX reference (bf16 MXU inputs vs f32 ref -> loose tol).
    y_ref = convblock_reference(params, x)
    max_err = float(jnp.max(jnp.abs(y - y_ref)))
    assert max_err < 2e-2, f"max abs error vs reference: {max_err}"

    print("KERNEL_OK")
</pallas_src>

<mosaic_0001>
module attributes {stable_mosaic.version = 11 : i64} {
  func.func @_convblock_kernel(%arg0: i32, %arg1: i32, %arg2: memref<1x20x20x32xbf16, #tpu.memory_space<vmem>>, %arg3: memref<3x3x32x64xbf16, #tpu.memory_space<vmem>>, %arg4: memref<1x64xf32, #tpu.memory_space<vmem>>, %arg5: memref<1x64xf32, #tpu.memory_space<vmem>>, %arg6: memref<3x3x64x64xbf16, #tpu.memory_space<vmem>>, %arg7: memref<64x1xf32, #tpu.memory_space<vmem>>, %arg8: memref<64x1xf32, #tpu.memory_space<vmem>>, %arg9: memref<1x64x256xf32, #tpu.memory_space<vmem>>, %arg10: memref<18x18x64xbf16, #tpu.memory_space<vmem>>) attributes {dimension_semantics = [#tpu.dimension_semantics<parallel>, #tpu.dimension_semantics<parallel>], iteration_bounds = array<i64: 2, 1>, scalar_prefetch = 0 : i64, scratch_operands = 1 : i64, tpu.core_type = #tpu.core_type<tc>, window_params = [{transform_indices = @transform_0, window_bounds = array<i64: 1, 20, 20, 32>}, {pipeline_mode = #tpu.pipeline_mode<synchronous>, transform_indices = @transform_1, window_bounds = array<i64: 3, 3, 32, 64>}, {pipeline_mode = #tpu.pipeline_mode<synchronous>, transform_indices = @transform_2, window_bounds = array<i64: 1, 64>}, {pipeline_mode = #tpu.pipeline_mode<synchronous>, transform_indices = @transform_3, window_bounds = array<i64: 1, 64>}, {pipeline_mode = #tpu.pipeline_mode<synchronous>, transform_indices = @transform_4, window_bounds = array<i64: 3, 3, 64, 64>}, {pipeline_mode = #tpu.pipeline_mode<synchronous>, transform_indices = @transform_5, window_bounds = array<i64: 64, 1>}, {pipeline_mode = #tpu.pipeline_mode<synchronous>, transform_indices = @transform_6, window_bounds = array<i64: 64, 1>}, {transform_indices = @transform_7, window_bounds = array<i64: 1, 64, 256>}]} {
    %c16_i32 = arith.constant 16 : i32
    %0 = arith.muli %arg1, %c16_i32 : i32
    %1 = tpu.assume_multiple %0, 16 : i32
    %cst = arith.constant 0.000000e+00 : bf16
    %2 = vector.broadcast %cst : bf16 to vector<18x18x64xbf16>
    %c0 = arith.constant 0 : index
    %c0_0 = arith.constant 0 : index
    %c0_1 = arith.constant 0 : index
    %3 = vector.load %arg10[%c0, %c0_0, %c0_1] : memref<18x18x64xbf16, #tpu.memory_space<vmem>>, vector<18x18x64xbf16>
    tpu.vector_store %arg10[%c0, %c0_0, %c0_1], %2 {strides = array<i32>} : memref<18x18x64xbf16, #tpu.memory_space<vmem>>, vector<18x18x64xbf16>,
    %cst_2 = arith.constant 0.000000e+00 : f32
    %4 = vector.broadcast %cst_2 : f32 to vector<288x64xf32>
    %c0_i32 = arith.constant 0 : i32
    %5 = arith.addi %1, %c0_i32 : i32
    %c0_3 = arith.constant 0 : index
    %6 = arith.index_cast %5 : i32 to index
    %c1 = arith.constant 1 : index
    %c0_4 = arith.constant 0 : index
    %7 = vector.load %arg2[%c0_3, %6, %c1, %c0_4] : memref<1x20x20x32xbf16, #tpu.memory_space<vmem>>, vector<1x18x16x32xbf16>
    %8 = vector.shape_cast %7 : vector<1x18x16x32xbf16> to vector<18x16x32xbf16>
    %9 = vector.shape_cast %8 : vector<18x16x32xbf16> to vector<288x32xbf16>
    %c0_5 = arith.constant 0 : index
    %c0_6 = arith.constant 0 : index
    %c0_7 = arith.constant 0 : index
    %c0_8 = arith.constant 0 : index
    %10 = vector.load %arg3[%c0_5, %c0_6, %c0_7, %c0_8] : memref<3x3x32x64xbf16, #tpu.memory_space<vmem>>, vector<1x1x32x64xbf16>
    %11 = vector.shape_cast %10 : vector<1x1x32x64xbf16> to vector<32x64xbf16>
    %cst_9 = arith.constant dense<0.000000e+00> : vector<288x64xf32>
    %12 = tpu.matmul %9, %11, %cst_9 {dimension_numbers = #tpu.dot_dimension_numbers<[1], [0], [0], [1], [0, 0, 1, 1], [], []>} : vector<288x32xbf16>, vector<32x64xbf16>, vector<288x64xf32> -> vector<288x64xf32>
    %13 = arith.addf %4, %12 : vector<288x64xf32>
    %c0_i32_10 = arith.constant 0 : i32
    %14 = arith.addi %1, %c0_i32_10 : i32
    %c0_11 = arith.constant 0 : index
    %15 = arith.index_cast %14 : i32 to index
    %c2 = arith.constant 2 : index
    %c0_12 = arith.constant 0 : index
    %16 = vector.load %arg2[%c0_11, %15, %c2, %c0_12] : memref<1x20x20x32xbf16, #tpu.memory_space<vmem>>, vector<1x18x16x32xbf16>
    %17 = vector.shape_cast %16 : vector<1x18x16x32xbf16> to vector<18x16x32xbf16>
    %18 = vector.shape_cast %17 : vector<18x16x32xbf16> to vector<288x32xbf16>
    %c0_13 = arith.constant 0 : index
    %c1_14 = arith.constant 1 : index
    %c0_15 = arith.constant 0 : index
    %c0_16 = arith.constant 0 : index
    %19 = vector.load %arg3[%c0_13, %c1_14, %c0_15, %c0_16] : memref<3x3x32x64xbf16, #tpu.memory_space<vmem>>, vector<1x1x32x64xbf16>
    %20 = vector.shape_cast %19 : vector<1x1x32x64xbf16> to vector<32x64xbf16>
    %cst_17 = arith.constant dense<0.000000e+00> : vector<288x64xf32>
    %21 = tpu.matmul %18, %20, %cst_17 {dimension_numbers = #tpu.dot_dimension_numbers<[1], [0], [0], [1], [0, 0, 1, 1], [], []>} : vector<288x32xbf16>, vector<32x64xbf16>, vector<288x64xf32> -> vector<288x64xf32>
    %22 = arith.addf %13, %21 : vector<288x64xf32>
    %c0_i32_18 = arith.constant 0 : i32
    %23 = arith.addi %1, %c0_i32_18 : i32
    %c0_19 = arith.constant 0 : index
    %24 = arith.index_cast %23 : i32 to index
    %c3 = arith.constant 3 : index
    %c0_20 = arith.constant 0 : index
    %25 = vector.load %arg2[%c0_19, %24, %c3, %c0_20] : memref<1x20x20x32xbf16, #tpu.memory_space<vmem>>, vector<1x18x16x32xbf16>
    %26 = vector.shape_cast %25 : vector<1x18x16x32xbf16> to vector<18x16x32xbf16>
    %27 = vector.shape_cast %26 : vector<18x16x32xbf16> to vector<288x32xbf16>
    %c0_21 = arith.constant 0 : index
    %c2_22 = arith.constant 2 : index
    %c0_23 = arith.constant 0 : index
    %c0_24 = arith.constant 0 : index
    %28 = vector.load %arg3[%c0_21, %c2_22, %c0_23, %c0_24] : memref<3x3x32x64xbf16, #tpu.memory_space<vmem>>, vector<1x1x32x64xbf16>
    %29 = vector.shape_cast %28 : vector<1x1x32x64xbf16> to vector<32x64xbf16>
    %cst_25 = arith.constant dense<0.000000e+00> : vector<288x64xf32>
    %30 = tpu.matmul %27, %29, %cst_25 {dimension_numbers = #tpu.dot_dimension_numbers<[1], [0], [0], [1], [0, 0, 1, 1], [], []>} : vector<288x32xbf16>, vector<32x64xbf16>, vector<288x64xf32> -> vector<288x64xf32>
    %31 = arith.addf %22, %30 : vector<288x64xf32>
    %c1_i32 = arith.constant 1 : i32
    %32 = arith.addi %1, %c1_i32 : i32
    %c0_26 = arith.constant 0 : index
    %33 = arith.index_cast %32 : i32 to index
    %c1_27 = arith.constant 1 : index
    %c0_28 = arith.constant 0 : index
    %34 = vector.load %arg2[%c0_26, %33, %c1_27, %c0_28] : memref<1x20x20x32xbf16, #tpu.memory_space<vmem>>, vector<1x18x16x32xbf16>
    %35 = vector.shape_cast %34 : vector<1x18x16x32xbf16> to vector<18x16x32xbf16>
    %36 = vector.shape_cast %35 : vector<18x16x32xbf16> to vector<288x32xbf16>
    %c1_29 = arith.constant 1 : index
    %c0_30 = arith.constant 0 : index
    %c0_31 = arith.constant 0 : index
    %c0_32 = arith.constant 0 : index
    %37 = vector.load %arg3[%c1_29, %c0_30, %c0_31, %c0_32] : memref<3x3x32x64xbf16, #tpu.memory_space<vmem>>, vector<1x1x32x64xbf16>
    %38 = vector.shape_cast %37 : vector<1x1x32x64xbf16> to vector<32x64xbf16>
    %cst_33 = arith.constant dense<0.000000e+00> : vector<288x64xf32>
    %39 = tpu.matmul %36, %38, %cst_33 {dimension_numbers = #tpu.dot_dimension_numbers<[1], [0], [0], [1], [0, 0, 1, 1], [], []>} : vector<288x32xbf16>, vector<32x64xbf16>, vector<288x64xf32> -> vector<288x64xf32>
    %40 = arith.addf %31, %39 : vector<288x64xf32>
    %c1_i32_34 = arith.constant 1 : i32
    %41 = arith.addi %1, %c1_i32_34 : i32
    %c0_35 = arith.constant 0 : index
    %42 = arith.index_cast %41 : i32 to index
    %c2_36 = arith.constant 2 : index
    %c0_37 = arith.constant 0 : index
    %43 = vector.load %arg2[%c0_35, %42, %c2_36, %c0_37] : memref<1x20x20x32xbf16, #tpu.memory_space<vmem>>, vector<1x18x16x32xbf16>
    %44 = vector.shape_cast %43 : vector<1x18x16x32xbf16> to vector<18x16x32xbf16>
    %45 = vector.shape_cast %44 : vector<18x16x32xbf16> to vector<288x32xbf16>
    %c1_38 = arith.constant 1 : index
    %c1_39 = arith.constant 1 : index
    %c0_40 = arith.constant 0 : index
    %c0_41 = arith.constant 0 : index
    %46 = vector.load %arg3[%c1_38, %c1_39, %c0_40, %c0_41] : memref<3x3x32x64xbf16, #tpu.memory_space<vmem>>, vector<1x1x32x64xbf16>
    %47 = vector.shape_cast %46 : vector<1x1x32x64xbf16> to vector<32x64xbf16>
    %cst_42 = arith.constant dense<0.000000e+00> : vector<288x64xf32>
    %48 = tpu.matmul %45, %47, %cst_42 {dimension_numbers = #tpu.dot_dimension_numbers<[1], [0], [0], [1], [0, 0, 1, 1], [], []>} : vector<288x32xbf16>, vector<32x64xbf16>, vector<288x64xf32> -> vector<288x64xf32>
    %49 = arith.addf %40, %48 : vector<288x64xf32>
    %c1_i32_43 = arith.constant 1 : i32
    %50 = arith.addi %1, %c1_i32_43 : i32
    %c0_44 = arith.constant 0 : index
    %51 = arith.index_cast %50 : i32 to index
    %c3_45 = arith.constant 3 : index
    %c0_46 = arith.constant 0 : index
    %52 = vector.load %arg2[%c0_44, %51, %c3_45, %c0_46] : memref<1x20x20x32xbf16, #tpu.memory_space<vmem>>, vector<1x18x16x32xbf16>
    %53 = vector.shape_cast %52 : vector<1x18x16x32xbf16> to vector<18x16x32xbf16>
    %54 = vector.shape_cast %53 : vector<18x16x32xbf16> to vector<288x32xbf16>
    %c1_47 = arith.constant 1 : index
    %c2_48 = arith.constant 2 : index
    %c0_49 = arith.constant 0 : index
    %c0_50 = arith.constant 0 : index
    %55 = vector.load %arg3[%c1_47, %c2_48, %c0_49, %c0_50] : memref<3x3x32x64xbf16, #tpu.memory_space<vmem>>, vector<1x1x32x64xbf16>
    %56 = vector.shape_cast %55 : vector<1x1x32x64xbf16> to vector<32x64xbf16>
    %cst_51 = arith.constant dense<0.000000e+00> : vector<288x64xf32>
    %57 = tpu.matmul %54, %56, %cst_51 {dimension_numbers = #tpu.dot_dimension_numbers<[1], [0], [0], [1], [0, 0, 1, 1], [], []>} : vector<288x32xbf16>, vector<32x64xbf16>, vector<288x64xf32> -> vector<288x64xf32>
    %58 = arith.addf %49, %57 : vector<288x64xf32>
    %c2_i32 = arith.constant 2 : i32
    %59 = arith.addi %1, %c2_i32 : i32
    %c0_52 = arith.constant 0 : index
    %60 = arith.index_cast %59 : i32 to index
    %c1_53 = arith.constant 1 : index
    %c0_54 = arith.constant 0 : index
    %61 = vector.load %arg2[%c0_52, %60, %c1_53, %c0_54] : memref<1x20x20x32xbf16, #tpu.memory_space<vmem>>, vector<1x18x16x32xbf16>
    %62 = vector.shape_cast %61 : vector<1x18x16x32xbf16> to vector<18x16x32xbf16>
    %63 = vector.shape_cast %62 : vector<18x16x32xbf16> to vector<288x32xbf16>
    %c2_55 = arith.constant 2 : index
    %c0_56 = arith.constant 0 : index
    %c0_57 = arith.constant 0 : index
    %c0_58 = arith.constant 0 : index
    %64 = vector.load %arg3[%c2_55, %c0_56, %c0_57, %c0_58] : memref<3x3x32x64xbf16, #tpu.memory_space<vmem>>, vector<1x1x32x64xbf16>
    %65 = vector.shape_cast %64 : vector<1x1x32x64xbf16> to vector<32x64xbf16>
    %cst_59 = arith.constant dense<0.000000e+00> : vector<288x64xf32>
    %66 = tpu.matmul %63, %65, %cst_59 {dimension_numbers = #tpu.dot_dimension_numbers<[1], [0], [0], [1], [0, 0, 1, 1], [], []>} : vector<288x32xbf16>, vector<32x64xbf16>, vector<288x64xf32> -> vector<288x64xf32>
    %67 = arith.addf %58, %66 : vector<288x64xf32>
    %c2_i32_60 = arith.constant 2 : i32
    %68 = arith.addi %1, %c2_i32_60 : i32
    %c0_61 = arith.constant 0 : index
    %69 = arith.index_cast %68 : i32 to index
    %c2_62 = arith.constant 2 : index
    %c0_63 = arith.constant 0 : index
    %70 = vector.load %arg2[%c0_61, %69, %c2_62, %c0_63] : memref<1x20x20x32xbf16, #tpu.memory_space<vmem>>, vector<1x18x16x32xbf16>
    %71 = vector.shape_cast %70 : vector<1x18x16x32xbf16> to vector<18x16x32xbf16>
    %72 = vector.shape_cast %71 : vector<18x16x32xbf16> to vector<288x32xbf16>
    %c2_64 = arith.constant 2 : index
    %c1_65 = arith.constant 1 : index
    %c0_66 = arith.constant 0 : index
    %c0_67 = arith.constant 0 : index
    %73 = vector.load %arg3[%c2_64, %c1_65, %c0_66, %c0_67] : memref<3x3x32x64xbf16, #tpu.memory_space<vmem>>, vector<1x1x32x64xbf16>
    %74 = vector.shape_cast %73 : vector<1x1x32x64xbf16> to vector<32x64xbf16>
    %cst_68 = arith.constant dense<0.000000e+00> : vector<288x64xf32>
    %75 = tpu.matmul %72, %74, %cst_68 {dimension_numbers = #tpu.dot_dimension_numbers<[1], [0], [0], [1], [0, 0, 1, 1], [], []>} : vector<288x32xbf16>, vector<32x64xbf16>, vector<288x64xf32> -> vector<288x64xf32>
    %76 = arith.addf %67, %75 : vector<288x64xf32>
    %c2_i32_69 = arith.constant 2 : i32
    %77 = arith.addi %1, %c2_i32_69 : i32
    %c0_70 = arith.constant 0 : index
    %78 = arith.index_cast %77 : i32 to index
    %c3_71 = arith.constant 3 : index
    %c0_72 = arith.constant 0 : index
    %79 = vector.load %arg2[%c0_70, %78, %c3_71, %c0_72] : memref<1x20x20x32xbf16, #tpu.memory_space<vmem>>, vector<1x18x16x32xbf16>
    %80 = vector.shape_cast %79 : vector<1x18x16x32xbf16> to vector<18x16x32xbf16>
    %81 = vector.shape_cast %80 : vector<18x16x32xbf16> to vector<288x32xbf16>
    %c2_73 = arith.constant 2 : index
    %c2_74 = arith.constant 2 : index
    %c0_75 = arith.constant 0 : index
    %c0_76 = arith.constant 0 : index
    %82 = vector.load %arg3[%c2_73, %c2_74, %c0_75, %c0_76] : memref<3x3x32x64xbf16, #tpu.memory_space<vmem>>, vector<1x1x32x64xbf16>
    %83 = vector.shape_cast %82 : vector<1x1x32x64xbf16> to vector<32x64xbf16>
    %cst_77 = arith.constant dense<0.000000e+00> : vector<288x64xf32>
    %84 = tpu.matmul %81, %83, %cst_77 {dimension_numbers = #tpu.dot_dimension_numbers<[1], [0], [0], [1], [0, 0, 1, 1], [], []>} : vector<288x32xbf16>, vector<32x64xbf16>, vector<288x64xf32> -> vector<288x64xf32>
    %85 = arith.addf %76, %84 : vector<288x64xf32>
    %c0_78 = arith.constant 0 : index
    %c0_79 = arith.constant 0 : index
    %86 = vector.load %arg4[%c0_78, %c0_79] : memref<1x64xf32, #tpu.memory_space<vmem>>, vector<1x64xf32>
    %87 = vector.broadcast %86 : vector<1x64xf32> to vector<288x64xf32>
    %88 = arith.mulf %85, %87 : vector<288x64xf32>
    %c0_80 = arith.constant 0 : index
    %c0_81 = arith.constant 0 : index
    %89 = vector.load %arg5[%c0_80, %c0_81] : memref<1x64xf32, #tpu.memory_space<vmem>>, vector<1x64xf32>
    %90 = vector.broadcast %89 : vector<1x64xf32> to vector<288x64xf32>
    %91 = arith.addf %88, %90 : vector<288x64xf32>
    %cst_82 = arith.constant 0.000000e+00 : f32
    %92 = vector.broadcast %cst_82 : f32 to vector<288x64xf32>
    %93 = arith.cmpf oge, %91, %92 : vector<288x64xf32>
    %cst_83 = arith.constant 0.00999999977 : f32
    %94 = vector.broadcast %cst_83 : f32 to vector<288x64xf32>
    %95 = arith.mulf %94, %91 : vector<288x64xf32>
    %96 = arith.select %93, %91, %95 : vector<288x64xi1>, vector<288x64xf32>
    %97 = vector.shape_cast %96 : vector<288x64xf32> to vector<18x16x64xf32>
    %98 = arith.truncf %97 : vector<18x16x64xf32> to vector<18x16x64xbf16>
    %c0_84 = arith.constant 0 : index
    %c1_85 = arith.constant 1 : index
    %c0_86 = arith.constant 0 : index
    %99 = vector.load %arg10[%c0_84, %c1_85, %c0_86] : memref<18x18x64xbf16, #tpu.memory_space<vmem>>, vector<18x16x64xbf16>
    tpu.vector_store %arg10[%c0_84, %c1_85, %c0_86], %98 {strides = array<i32>} : memref<18x18x64xbf16, #tpu.memory_space<vmem>>, vector<18x16x64xbf16>,
    %c0_i32_87 = arith.constant 0 : i32
    %100 = arith.cmpi eq, %arg1, %c0_i32_87 : i32
    %101 = arith.extui %100 : i1 to i32
    %c0_i32_88 = arith.constant 0 : i32
    %102 = arith.cmpi ne, %101, %c0_i32_88 : i32
    scf.if %102 {
      %cst_173 = arith.constant 0.000000e+00 : bf16
      %175 = vector.broadcast %cst_173 : bf16 to vector<18x64xbf16>
      %c0_174 = arith.constant 0 : index
      %c0_175 = arith.constant 0 : index
      %c0_176 = arith.constant 0 : index
      %176 = vector.load %arg10[%c0_174, %c0_175, %c0_176] : memref<18x18x64xbf16, #tpu.memory_space<vmem>>, vector<1x18x64xbf16>
      %177 = vector.shape_cast %176 : vector<1x18x64xbf16> to vector<18x64xbf16>
      %178 = vector.shape_cast %175 : vector<18x64xbf16> to vector<1x18x64xbf16>
      tpu.vector_store %arg10[%c0_174, %c0_175, %c0_176], %178 {strides = array<i32>} : memref<18x18x64xbf16, #tpu.memory_space<vmem>>, vector<1x18x64xbf16>,
    } else {
    }
    %c0_i32_89 = arith.constant 0 : i32
    %103 = arith.cmpi eq, %arg1, %c0_i32_89 : i32
    %104 = arith.extui %103 : i1 to i32
    %c0_i32_90 = arith.constant 0 : i32
    %105 = arith.cmpi ne, %104, %c0_i32_90 : i32
    scf.if %105 {
      %cst_173 = arith.constant 0.000000e+00 : bf16
      %175 = vector.broadcast %cst_173 : bf16 to vector<18x64xbf16>
      %c17 = arith.constant 17 : index
      %c0_174 = arith.constant 0 : index
      %c0_175 = arith.constant 0 : index
      %176 = vector.load %arg10[%c17, %c0_174, %c0_175] : memref<18x18x64xbf16, #tpu.memory_space<vmem>>, vector<1x18x64xbf16>
      %177 = vector.shape_cast %176 : vector<1x18x64xbf16> to vector<18x64xbf16>
      %178 = vector.shape_cast %175 : vector<18x64xbf16> to vector<1x18x64xbf16>
      tpu.vector_store %arg10[%c17, %c0_174, %c0_175], %178 {strides = array<i32>} : memref<18x18x64xbf16, #tpu.memory_space<vmem>>, vector<1x18x64xbf16>,
    } else {
    }
    %cst_91 = arith.constant 0.000000e+00 : f32
    %106 = vector.broadcast %cst_91 : f32 to vector<64x256xf32>
    %c0_92 = arith.constant 0 : index
    %c0_93 = arith.constant 0 : index
    %c0_94 = arith.constant 0 : index
    %107 = vector.load %arg10[%c0_92, %c0_93, %c0_94] : memref<18x18x64xbf16, #tpu.memory_space<vmem>>, vector<16x16x64xbf16>
    %c0_95 = arith.constant 0 : index
    %c0_96 = arith.constant 0 : index
    %c0_97 = arith.constant 0 : index
    %c0_98 = arith.constant 0 : index
    %108 = vector.load %arg6[%c0_95, %c0_96, %c0_97, %c0_98] : memref<3x3x64x64xbf16, #tpu.memory_space<vmem>>, vector<1x1x64x64xbf16>
    %109 = vector.shape_cast %108 : vector<1x1x64x64xbf16> to vector<64x64xbf16>
    %110 = vector.shape_cast %107 : vector<16x16x64xbf16> to vector<256x64xbf16>
    %cst_99 = arith.constant dense<0.000000e+00> : vector<64x256xf32>
    %111 = tpu.matmul %109, %110, %cst_99 {dimension_numbers = #tpu.dot_dimension_numbers<[1], [1], [0], [0], [0, 0, 1, 0], [], []>} : vector<64x64xbf16>, vector<256x64xbf16>, vector<64x256xf32> -> vector<64x256xf32>
    %112 = arith.addf %106, %111 : vector<64x256xf32>
    %c0_100 = arith.constant 0 : index
    %c1_101 = arith.constant 1 : index
    %c0_102 = arith.constant 0 : index
    %113 = vector.load %arg10[%c0_100, %c1_101, %c0_102] : memref<18x18x64xbf16, #tpu.memory_space<vmem>>, vector<16x16x64xbf16>
    %c0_103 = arith.constant 0 : index
    %c1_104 = arith.constant 1 : index
    %c0_105 = arith.constant 0 : index
    %c0_106 = arith.constant 0 : index
    %114 = vector.load %arg6[%c0_103, %c1_104, %c0_105, %c0_106] : memref<3x3x64x64xbf16, #tpu.memory_space<vmem>>, vector<1x1x64x64xbf16>
    %115 = vector.shape_cast %114 : vector<1x1x64x64xbf16> to vector<64x64xbf16>
    %116 = vector.shape_cast %113 : vector<16x16x64xbf16> to vector<256x64xbf16>
    %cst_107 = arith.constant dense<0.000000e+00> : vector<64x256xf32>
    %117 = tpu.matmul %115, %116, %cst_107 {dimension_numbers = #tpu.dot_dimension_numbers<[1], [1], [0], [0], [0, 0, 1, 0], [], []>} : vector<64x64xbf16>, vector<256x64xbf16>, vector<64x256xf32> -> vector<64x256xf32>
    %118 = arith.addf %112, %117 : vector<64x256xf32>
    %c0_108 = arith.constant 0 : index
    %c2_109 = arith.constant 2 : index
    %c0_110 = arith.constant 0 : index
    %119 = vector.load %arg10[%c0_108, %c2_109, %c0_110] : memref<18x18x64xbf16, #tpu.memory_space<vmem>>, vector<16x16x64xbf16>
    %c0_111 = arith.constant 0 : index
    %c2_112 = arith.constant 2 : index
    %c0_113 = arith.constant 0 : index
    %c0_114 = arith.constant 0 : index
    %120 = vector.load %arg6[%c0_111, %c2_112, %c0_113, %c0_114] : memref<3x3x64x64xbf16, #tpu.memory_space<vmem>>, vector<1x1x64x64xbf16>
    %121 = vector.shape_cast %120 : vector<1x1x64x64xbf16> to vector<64x64xbf16>
    %122 = vector.shape_cast %119 : vector<16x16x64xbf16> to vector<256x64xbf16>
    %cst_115 = arith.constant dense<0.000000e+00> : vector<64x256xf32>
    %123 = tpu.matmul %121, %122, %cst_115 {dimension_numbers = #tpu.dot_dimension_numbers<[1], [1], [0], [0], [0, 0, 1, 0], [], []>} : vector<64x64xbf16>, vector<256x64xbf16>, vector<64x256xf32> -> vector<64x256xf32>
    %124 = arith.addf %118, %123 : vector<64x256xf32>
    %c1_116 = arith.constant 1 : index
    %c0_117 = arith.constant 0 : index
    %c0_118 = arith.constant 0 : index
    %125 = vector.load %arg10[%c1_116, %c0_117, %c0_118] : memref<18x18x64xbf16, #tpu.memory_space<vmem>>, vector<16x16x64xbf16>
    %c1_119 = arith.constant 1 : index
    %c0_120 = arith.constant 0 : index
    %c0_121 = arith.constant 0 : index
    %c0_122 = arith.constant 0 : index
    %126 = vector.load %arg6[%c1_119, %c0_120, %c0_121, %c0_122] : memref<3x3x64x64xbf16, #tpu.memory_space<vmem>>, vector<1x1x64x64xbf16>
    %127 = vector.shape_cast %126 : vector<1x1x64x64xbf16> to vector<64x64xbf16>
    %128 = vector.shape_cast %125 : vector<16x16x64xbf16> to vector<256x64xbf16>
    %cst_123 = arith.constant dense<0.000000e+00> : vector<64x256xf32>
    %129 = tpu.matmul %127, %128, %cst_123 {dimension_numbers = #tpu.dot_dimension_numbers<[1], [1], [0], [0], [0, 0, 1, 0], [], []>} : vector<64x64xbf16>, vector<256x64xbf16>, vector<64x256xf32> -> vector<64x256xf32>
    %130 = arith.addf %124, %129 : vector<64x256xf32>
    %c1_124 = arith.constant 1 : index
    %c1_125 = arith.constant 1 : index
    %c0_126 = arith.constant 0 : index
    %131 = vector.load %arg10[%c1_124, %c1_125, %c0_126] : memref<18x18x64xbf16, #tpu.memory_space<vmem>>, vector<16x16x64xbf16>
    %c1_127 = arith.constant 1 : index
    %c1_128 = arith.constant 1 : index
    %c0_129 = arith.constant 0 : index
    %c0_130 = arith.constant 0 : index
    %132 = vector.load %arg6[%c1_127, %c1_128, %c0_129, %c0_130] : memref<3x3x64x64xbf16, #tpu.memory_space<vmem>>, vector<1x1x64x64xbf16>
    %133 = vector.shape_cast %132 : vector<1x1x64x64xbf16> to vector<64x64xbf16>
    %134 = vector.shape_cast %131 : vector<16x16x64xbf16> to vector<256x64xbf16>
    %cst_131 = arith.constant dense<0.000000e+00> : vector<64x256xf32>
    %135 = tpu.matmul %133, %134, %cst_131 {dimension_numbers = #tpu.dot_dimension_numbers<[1], [1], [0], [0], [0, 0, 1, 0], [], []>} : vector<64x64xbf16>, vector<256x64xbf16>, vector<64x256xf32> -> vector<64x256xf32>
    %136 = arith.addf %130, %135 : vector<64x256xf32>
    %c1_132 = arith.constant 1 : index
    %c2_133 = arith.constant 2 : index
    %c0_134 = arith.constant 0 : index
    %137 = vector.load %arg10[%c1_132, %c2_133, %c0_134] : memref<18x18x64xbf16, #tpu.memory_space<vmem>>, vector<16x16x64xbf16>
    %c1_135 = arith.constant 1 : index
    %c2_136 = arith.constant 2 : index
    %c0_137 = arith.constant 0 : index
    %c0_138 = arith.constant 0 : index
    %138 = vector.load %arg6[%c1_135, %c2_136, %c0_137, %c0_138] : memref<3x3x64x64xbf16, #tpu.memory_space<vmem>>, vector<1x1x64x64xbf16>
    %139 = vector.shape_cast %138 : vector<1x1x64x64xbf16> to vector<64x64xbf16>
    %140 = vector.shape_cast %137 : vector<16x16x64xbf16> to vector<256x64xbf16>
    %cst_139 = arith.constant dense<0.000000e+00> : vector<64x256xf32>
    %141 = tpu.matmul %139, %140, %cst_139 {dimension_numbers = #tpu.dot_dimension_numbers<[1], [1], [0], [0], [0, 0, 1, 0], [], []>} : vector<64x64xbf16>, vector<256x64xbf16>, vector<64x256xf32> -> vector<64x256xf32>
    %142 = arith.addf %136, %141 : vector<64x256xf32>
    %c2_140 = arith.constant 2 : index
    %c0_141 = arith.constant 0 : index
    %c0_142 = arith.constant 0 : index
    %143 = vector.load %arg10[%c2_140, %c0_141, %c0_142] : memref<18x18x64xbf16, #tpu.memory_space<vmem>>, vector<16x16x64xbf16>
    %c2_143 = arith.constant 2 : index
    %c0_144 = arith.constant 0 : index
    %c0_145 = arith.constant 0 : index
    %c0_146 = arith.constant 0 : index
    %144 = vector.load %arg6[%c2_143, %c0_144, %c0_145, %c0_146] : memref<3x3x64x64xbf16, #tpu.memory_space<vmem>>, vector<1x1x64x64xbf16>
    %145 = vector.shape_cast %144 : vector<1x1x64x64xbf16> to vector<64x64xbf16>
    %146 = vector.shape_cast %143 : vector<16x16x64xbf16> to vector<256x64xbf16>
    %cst_147 = arith.constant dense<0.000000e+00> : vector<64x256xf32>
    %147 = tpu.matmul %145, %146, %cst_147 {dimension_numbers = #tpu.dot_dimension_numbers<[1], [1], [0], [0], [0, 0, 1, 0], [], []>} : vector<64x64xbf16>, vector<256x64xbf16>, vector<64x256xf32> -> vector<64x256xf32>
    %148 = arith.addf %142, %147 : vector<64x256xf32>
    %c2_148 = arith.constant 2 : index
    %c1_149 = arith.constant 1 : index
    %c0_150 = arith.constant 0 : index
    %149 = vector.load %arg10[%c2_148, %c1_149, %c0_150] : memref<18x18x64xbf16, #tpu.memory_space<vmem>>, vector<16x16x64xbf16>
    %c2_151 = arith.constant 2 : index
    %c1_152 = arith.constant 1 : index
    %c0_153 = arith.constant 0 : index
    %c0_154 = arith.constant 0 : index
    %150 = vector.load %arg6[%c2_151, %c1_152, %c0_153, %c0_154] : memref<3x3x64x64xbf16, #tpu.memory_space<vmem>>, vector<1x1x64x64xbf16>
    %151 = vector.shape_cast %150 : vector<1x1x64x64xbf16> to vector<64x64xbf16>
    %152 = vector.shape_cast %149 : vector<16x16x64xbf16> to vector<256x64xbf16>
    %cst_155 = arith.constant dense<0.000000e+00> : vector<64x256xf32>
    %153 = tpu.matmul %151, %152, %cst_155 {dimension_numbers = #tpu.dot_dimension_numbers<[1], [1], [0], [0], [0, 0, 1, 0], [], []>} : vector<64x64xbf16>, vector<256x64xbf16>, vector<64x256xf32> -> vector<64x256xf32>
    %154 = arith.addf %148, %153 : vector<64x256xf32>
    %c2_156 = arith.constant 2 : index
    %c2_157 = arith.constant 2 : index
    %c0_158 = arith.constant 0 : index
    %155 = vector.load %arg10[%c2_156, %c2_157, %c0_158] : memref<18x18x64xbf16, #tpu.memory_space<vmem>>, vector<16x16x64xbf16>
    %c2_159 = arith.constant 2 : index
    %c2_160 = arith.constant 2 : index
    %c0_161 = arith.constant 0 : index
    %c0_162 = arith.constant 0 : index
    %156 = vector.load %arg6[%c2_159, %c2_160, %c0_161, %c0_162] : memref<3x3x64x64xbf16, #tpu.memory_space<vmem>>, vector<1x1x64x64xbf16>
    %157 = vector.shape_cast %156 : vector<1x1x64x64xbf16> to vector<64x64xbf16>
    %158 = vector.shape_cast %155 : vector<16x16x64xbf16> to vector<256x64xbf16>
    %cst_163 = arith.constant dense<0.000000e+00> : vector<64x256xf32>
    %159 = tpu.matmul %157, %158, %cst_163 {dimension_numbers = #tpu.dot_dimension_numbers<[1], [1], [0], [0], [0, 0, 1, 0], [], []>} : vector<64x64xbf16>, vector<256x64xbf16>, vector<64x256xf32> -> vector<64x256xf32>
    %160 = arith.addf %154, %159 : vector<64x256xf32>
    %c0_164 = arith.constant 0 : index
    %c0_165 = arith.constant 0 : index
    %161 = vector.load %arg7[%c0_164, %c0_165] : memref<64x1xf32, #tpu.memory_space<vmem>>, vector<64x1xf32>
    %162 = vector.broadcast %161 : vector<64x1xf32> to vector<64x256xf32>
    %163 = arith.mulf %160, %162 : vector<64x256xf32>
    %c0_166 = arith.constant 0 : index
    %c0_167 = arith.constant 0 : index
    %164 = vector.load %arg8[%c0_166, %c0_167] : memref<64x1xf32, #tpu.memory_space<vmem>>, vector<64x1xf32>
    %165 = vector.broadcast %164 : vector<64x1xf32> to vector<64x256xf32>
    %166 = arith.addf %163, %165 : vector<64x256xf32>
    %cst_168 = arith.constant 0.000000e+00 : f32
    %167 = vector.broadcast %cst_168 : f32 to vector<64x256xf32>
    %168 = arith.cmpf oge, %166, %167 : vector<64x256xf32>
    %cst_169 = arith.constant 0.00999999977 : f32
    %169 = vector.broadcast %cst_169 : f32 to vector<64x256xf32>
    %170 = arith.mulf %169, %166 : vector<64x256xf32>
    %171 = arith.select %168, %166, %170 : vector<64x256xi1>, vector<64x256xf32>
    %c0_170 = arith.constant 0 : index
    %c0_171 = arith.constant 0 : index
    %c0_172 = arith.constant 0 : index
    %172 = vector.load %arg9[%c0_170, %c0_171, %c0_172] : memref<1x64x256xf32, #tpu.memory_space<vmem>>, vector<1x64x256xf32>
    %173 = vector.shape_cast %172 : vector<1x64x256xf32> to vector<64x256xf32>
    %174 = vector.shape_cast %171 : vector<64x256xf32> to vector<1x64x256xf32>
    tpu.vector_store %arg9[%c0_170, %c0_171, %c0_172], %174 {strides = array<i32>} : memref<1x64x256xf32, #tpu.memory_space<vmem>>, vector<1x64x256xf32>,
    return
  }
  func.func @transform_0(%arg0: i32, %arg1: i32) -> (i32, i32, i32, i32) {
    %c0_i32 = arith.constant 0 : i32
    %c0_i32_0 = arith.constant 0 : i32
    %c0_i32_1 = arith.constant 0 : i32
    %c0_i32_2 = arith.constant 0 : i32
    return %arg0, %c0_i32, %c0_i32_0, %c0_i32_1 : i32, i32, i32, i32
  }
  func.func @transform_1(%arg0: i32, %arg1: i32) -> (i32, i32, i32, i32) {
    %c0_i32 = arith.constant 0 : i32
    %c0_i32_0 = arith.constant 0 : i32
    %c0_i32_1 = arith.constant 0 : i32
    %c0_i32_2 = arith.constant 0 : i32
    %c0_i32_3 = arith.constant 0 : i32
    return %c0_i32, %c0_i32_0, %c0_i32_1, %c0_i32_2 : i32, i32, i32, i32
  }
  func.func @transform_2(%arg0: i32, %arg1: i32) -> (i32, i32) {
    %c0_i32 = arith.constant 0 : i32
    %c0_i32_0 = arith.constant 0 : i32
    %c0_i32_1 = arith.constant 0 : i32
    return %c0_i32, %c0_i32_0 : i32, i32
  }
  func.func @transform_3(%arg0: i32, %arg1: i32) -> (i32, i32) {
    %c0_i32 = arith.constant 0 : i32
    %c0_i32_0 = arith.constant 0 : i32
    %c0_i32_1 = arith.constant 0 : i32
    return %c0_i32, %c0_i32_0 : i32, i32
  }
  func.func @transform_4(%arg0: i32, %arg1: i32) -> (i32, i32, i32, i32) {
    %c0_i32 = arith.constant 0 : i32
    %c0_i32_0 = arith.constant 0 : i32
    %c0_i32_1 = arith.constant 0 : i32
    %c0_i32_2 = arith.constant 0 : i32
    %c0_i32_3 = arith.constant 0 : i32
    return %c0_i32, %c0_i32_0, %c0_i32_1, %c0_i32_2 : i32, i32, i32, i32
  }
  func.func @transform_5(%arg0: i32, %arg1: i32) -> (i32, i32) {
    %c0_i32 = arith.constant 0 : i32
    %c0_i32_0 = arith.constant 0 : i32
    %c0_i32_1 = arith.constant 0 : i32
    return %c0_i32, %c0_i32_0 : i32, i32
  }
  func.func @transform_6(%arg0: i32, %arg1: i32) -> (i32, i32) {
    %c0_i32 = arith.constant 0 : i32
    %c0_i32_0 = arith.constant 0 : i32
    %c0_i32_1 = arith.constant 0 : i32
    return %c0_i32, %c0_i32_0 : i32, i32
  }
  func.func @transform_7(%arg0: i32, %arg1: i32) -> (i32, i32, i32) {
    %c0_i32 = arith.constant 0 : i32
    %c0_i32_0 = arith.constant 0 : i32
    return %arg0, %c0_i32, %arg1 : i32, i32, i32
  }
}

</mosaic_0001>

<bundles_post_ra>
// kernel: convblock_forward.1
= control target key start
LH: loop header
LB: loop body
LE: loop exit
PB: predicated region body
PF: predicated region fallthrough
CT: control target
= control target key end

     0   :  { %s13894_s24 = smov 0   ;;  %s13896_s25 = smov 0   ;;  %s19296_s0 = inlined_call_operand.vmem [shape: bf16[2,20,20,32], index: 0, kind: input, shape index: {}]   ;;  %s19297_s1 = inlined_call_operand.vmem [shape: bf16[3,3,32,64], index: 1, kind: input, shape index: {}]   ;;  %s19298_s2 = inlined_call_operand.vmem [shape: f32[1,64], index: 2, kind: input, shape index: {}]   ;;  %s19299_s3 = inlined_call_operand.vmem [shape: f32[1,64], index: 3, kind: input, shape index: {}]   ;;  %s19300_s4 = inlined_call_operand.vmem [shape: bf16[3,3,64,64], index: 4, kind: input, shape index: {}]   ;;  %s19301_s5 = inlined_call_operand.vmem [shape: f32[64,1], index: 5, kind: input, shape index: {}]   ;;  %s19302_s6 = inlined_call_operand.vmem [shape: f32[64,1], index: 6, kind: input, shape index: {}]   ;;  %s19303_s7 = inlined_call_operand.vmem [shape: f32[2,64,256], index: 7, kind: output, shape index: {}]  }
   0x1   :  { %s13898_s26 = smov 0  }
   0x2 LB: > { %s29_s27 = sadd.s32 1, %s13847_s25  ;;  %p11764_p0 = scmp.ge.s32.totalorder %s13851_s26, 1  ;;  %s13851_s26 = sphi %s13898_s26, %s17_s26   ;;  %s13847_s25 = sphi %s13896_s25, %s20130_s25   ;;  %s13843_s24 = sphi %s13894_s24, %s20129_s24  }
   0x3   : > { %p31_p1 = scmp.ge.s32.totalorder %s29_s27, 2  ;;  %p251_p2 = scmp.lt.s32.totalorder %s13851_s26, 3 }
   0x5   : > { %s20132_s27 = smov (%p31_p1, %s29_s27), 0  ;;  %p252_p3 = pnand %p11764_p0, %p251_p2 }
   0x7   : > { %255 = sbr.rel (%p252_p3) target bundleno = 1475 (0x5c3), region = 48 }
   0xc   : > { %v13637_v0 = vld [vmem:[%s19297_s1 + $0x18] sm:$0xff]   ;;  %p287_p4 = scmp.lt.s32.totalorder %s13843_s24, 1  ;;  %v13638_v1 = vld [vmem:[%s19297_s1 + $0x10] sm:$0xff]   ;;  %vm928_vm0 = vcmask 1042432   ;;  %v13639_v2 = vld [vmem:[%s19297_s1 + $0x8] sm:$0xff]   ;;  %vm929_vm1 = vcmask 1046532  }
   0xd   : > { %13177 = vmatprep.subr.bf16.mxu0 %v13637_v0  ;;  %13217 = vmatprep.subr.bf16.mxu1 %v13639_v2  ;;  %v13640_v3 = vld [vmem:[%s19297_s1] sm:$0xff]   ;;  %vm13927_vm2 = vmor %vm928_vm0, %vm929_vm1  ;;  %v19417_v4 = vmov 0  ;;  %vm1128_vm3 = vcmask 261120   ;;  %v13641_v5 = vld [vmem:[%s19297_s1 + $0x28] sm:$0xff]   ;;  %vm417_vm4 = vsmask.f32 3328 }
   0xe   : > { %s20134_s24 = smov (!%p287_p4, %s13843_s24), 1  ;;  %13178 = vmatpush3.bf16.msra.mxu0 %v13637_v0  ;;  %13218 = vmatpush3.bf16.msra.mxu1 %v13639_v2  ;;  %v19418_v4 = vsel %vm13927_vm2, 4294967295, %v19417_v4  ;;  %vm418_vm5 = vsmask.f32 7440  ;;  %v13642_v40 = vld [vmem:[%s19297_s1 + $0x20] sm:$0xff]   ;;  %v13971_v41 = vld [vmem:[%s19297_s1 + $0x38] sm:$0xff]  }
   0xf   : > { %13179 = vmatprep.subr.bf16.mxu0 %v13638_v1  ;;  %s13609_s11 = smul.u32 240, %s20134_s24  ;;  %19419 = vst [vmem:[#allocation3_spill] sm:$0xff] %v19418_v4  ;;  %13219 = vmatprep.subr.bf16.mxu1 %v13640_v3  ;;  %vm13991_vm6 = vmor %vm417_vm4, %vm418_vm5  ;;  %v19420_v58 = vmov 0  ;;  %v13645_v62 = vld [vmem:[%s19297_s1 + $0x48] sm:$0xff]   ;;  %vm1675_vm7 = vsmask.f32 2304 }
  0x10   : > { %v19421_v58 = vsel %vm13991_vm6, 4294967295, %v19420_v58  ;;  %vm1676_vm8 = vsmask.f32 6416  ;;  %vm304_vm10 = vcmask 519168   ;;  %vm307_vm11 = vcmask 516096   ;;  %s12744_s15 = sshll.u32 %s20134_s24, 7 }
  0x11   : > { %s13934_s16 = scalar_lea.vmem %s19296_s0, %s13609_s11  ;;  %19422 = vst [vmem:[#allocation4_spill] sm:$0xff] %v19421_v58  ;;  %vm14415_vm9 = vmor %vm1675_vm7, %vm1676_vm8  ;;  %vm7364_vm12 = vsmask.f32 7938  ;;  %vm7000_vm14 = vsmask.f32 256  ;;  %s19229_s24 = scalar_lea.vmem %s19303_s7, %s12744_s15 }
  0x12   : > { %13180 = vmatpush3.bf16.msra.mxu0 %v13638_v1  ;;  %v364_v6 = vld [vmem:[%s13934_s16 + $0x4] sm:$0xf]  ;;  %v365_v7 = vld [vmem:[%s13934_s16 + $0x8] sm:$0x1]  ;;  %v856_v8 = vld [vmem:[%s13934_s16] sm:$0xe]  ;;  %13220 = vmatpush3.bf16.msra.mxu1 %v13640_v3 }
  0x13   : > { %v11768_v9 = vrot.slane %v856_v8, 9  ;;  %v933_v10 = vrot.slane %v364_v6, 5  ;;  %v936_v11 = vrot.slane %v365_v7, 5  ;;  %v1679_v12 = vshrl.u32 %v856_v8, 16  ;;  %v13943_v13 = vld [vmem:[%s13934_s16 + $0x10] sm:$0xf]  ;;  %13257 = vmatprep.subr.bf16.mxu0 %v13641_v5  ;;  %13297 = vmatprep.subr.bf16.mxu1 %v13971_v41  ;;  %vm17076_vm7 = vmand %vm307_vm11, %vm7000_vm14 }
  0x14   : > { %v1682_v14 = vshll.u32 %v856_v8, 16  ;;  %v13946_v15 = vld [vmem:[%s13934_s16 + $0x14] sm:$0x1]  ;;  %v857_v16 = vld [vmem:[%s13934_s16 + $0xc] sm:$0xe]  ;;  %v940_v17 = vrot.slane %v13943_v13, 5 }
  0x15   : > { %v934_v18 = vsel %vm13927_vm2, %v11768_v9, %v933_v10  ;;  %v935_v19 = vrot.slane %v933_v10, 4  ;;  %v13952_v20 = vrot.slane %v1679_v12, 5  ;;  %v11769_v21 = vrot.slane %v857_v16, 9  ;;  %v363_v22 = vld [vmem:[%s13934_s16] sm:$0xf] }
  0x16   : > { %v13955_v23 = vrot.slane %v1682_v14, 6  ;;  %v942_v24 = vrot.slane %v940_v17, 4  ;;  %v943_v25 = vrot.slane %v13946_v15, 5  ;;  %v1702_v26 = vshrl.u32 %v857_v16, 16  ;;  %v366_v31 = vld [vmem:[%s13934_s16 + $0xc] sm:$0xf] }
  0x17   : > { %v937_v27 = vsel %vm13927_vm2, %v935_v19, %v936_v11  ;;  %v941_v28 = vsel %vm13927_vm2, %v11769_v21, %v940_v17  ;;  %v1705_v29 = vshll.u32 %v857_v16, 16  ;;  %v421_v30 = vshrl.u32 %v363_v22, 16  ;;  %v13981_v54 = vld [vmem:[%s13934_s16 + $0x1c] sm:$0xf]  ;;  %v13984_v55 = vld [vmem:[%s13934_s16 + $0x20] sm:$0x1] }
  0x18   : > { %v11790_v32 = vcombine.low %v934_v18, %v937_v27  ;;  %v944_v33 = vsel %vm13927_vm2, %v942_v24, %v943_v25  ;;  %v1704_v34 = vrot.slane %v1702_v26, 5  ;;  %v424_v35 = vshll.u32 %v363_v22, 16  ;;  %v858_v56 = vld [vmem:[%s13934_s16 + $0x18] sm:$0xe]  ;;  %v14002_v3 = vld [vmem:[%s13934_s16 + $0x28] sm:$0xf] }
  0x19   : > { %v11791_v36 = vcombine.low %v941_v28, %v944_v33  ;;  %v1707_v37 = vrot.slane %v1705_v29, 6  ;;  %v423_v38 = vrot.slane %v421_v30, 4  ;;  %v430_v39 = vshll.u32 %v364_v6, 16  ;;  %v859_v9 = vld [vmem:[%s13934_s16 + $0x24] sm:$0xe] }
  0x1a   : > { %13181 = vmatprep.mubr.msk.bf16.mxu0 %vm1128_vm3, %v11790_v32  ;;  %v426_v42 = vrot.slane %v424_v35, 5  ;;  %v434_v43 = vshrl.u32 %v364_v6, 16  ;;  %v440_v44 = vshll.u32 %v365_v7, 16  ;;  %v445_v45 = vshrl.u32 %v366_v31, 16  ;;  %v374_v21 = vld [vmem:[%s13934_s16 + $0x2c] sm:$0x1] }
  0x1b   : > { %13182 = vmatmul.mubr.msk.bf16.vlgmr.msra.gmra.mxu0 %vm1128_vm3, %v11791_v36  ;;  %v1708_v46 = vor.u32 %v1707_v37, %v1704_v34  ;;  %v432_v47 = vrot.slane %v430_v39, 5  ;;  %v13975_v48 = vrot.slane %v430_v39, 6  ;;  %v448_v49 = vshll.u32 %v366_v31, 16  ;;  %v369_v25 = vld [vmem:[%s13934_s16 + $0x18] sm:$0xf] }
  0x1c   : > { %v427_v50 = vor.u32 %v426_v42, %v423_v38  ;;  %v436_v51 = vrot.slane %v434_v43, 4  ;;  %v442_v52 = vrot.slane %v440_v44, 5  ;;  %v13978_v53 = vrot.slane %v434_v43, 5  ;;  %13258 = vmatpush3.bf16.msra.mxu0 %v13641_v5  ;;  %v372_v43 = vld [vmem:[%s13934_s16 + $0x24] sm:$0xf] }
  0x1d   : > { %v13987_v57 = vrot.slane %v1708_v46, 4  ;;  %v447_v59 = vrot.slane %v445_v45, 4  ;;  %v450_v60 = vrot.slane %v448_v49, 5  ;;  %v454_v61 = vshll.u32 %v13943_v13, 16  ;;  %13259 = vmatprep.subr.bf16.mxu0 %v13642_v40  ;;  %v13644_v49 = vld [vmem:[%s19297_s1 + $0x30] sm:$0xff]  }
  0x1e   : > { %v428_v63 = vrot.slane %v427_v50, 4  ;;  %v437_v0 = vor.u32 %v436_v51, %v432_v47  ;;  %v458_v1 = vshrl.u32 %v13943_v13, 16  ;;  %v464_v2 = vshll.u32 %v13946_v15, 16 }
  0x1f   : > { %v451_v5 = vor.u32 %v450_v60, %v447_v59  ;;  %v456_v6 = vrot.slane %v454_v61, 5  ;;  %v1711_v7 = vrot.slane %v454_v61, 6  ;;  %v11770_v8 = vrot.slane %v858_v56, 9 }
  0x20   : > { %v433_v10 = vsel %vm13991_vm6, %v428_v63, %v432_v47  ;;  %v438_v11 = vrot.slane %v437_v0, 4  ;;  %v460_v12 = vrot.slane %v458_v1, 4  ;;  %v466_v14 = vrot.slane %v464_v2, 5  ;;  %13260 = vmatpush3.bf16.msra.mxu0 %v13642_v40  ;;  %v14045_v63 = vld [vmem:[%s13934_s16 + $0x34] sm:$0xf] }
  0x21   : > { %v452_v16 = vrot.slane %v451_v5, 4  ;;  %v1710_v13 = vrot.slane %v458_v1, 5  ;;  %v947_v15 = vrot.slane %v13981_v54, 5  ;;  %v950_v17 = vrot.slane %v13984_v55, 5  ;;  %13337 = vmatprep.subr.bf16.mxu0 %v13645_v62 }
  0x22   : > { %v443_v18 = vsel %vm13991_vm6, %v438_v11, %v442_v52  ;;  %v461_v19 = vor.u32 %v460_v12, %v456_v6  ;;  %v11771_v22 = vrot.slane %v859_v9, 9  ;;  %v954_v24 = vrot.slane %v14002_v3, 5  ;;  %v14055_v11 = vld [vmem:[%s13934_s16 + $0x40] sm:$0xf]  ;;  %v861_v12 = vld [vmem:[%s13934_s16 + $0x3c] sm:$0xe] }
  0x23   : > { %v11828_v26 = vcombine.low %v433_v10, %v443_v18  ;;  %v457_v27 = vsel %vm13991_vm6, %v452_v16, %v456_v6  ;;  %v14016_v28 = vor.u32 %v1711_v7, %v1710_v13  ;;  %v948_v29 = vsel %vm13927_vm2, %v11770_v8, %v947_v15  ;;  %v377_v6 = vld [vmem:[%s13934_s16 + $0x38] sm:$0x1]  ;;  %v860_v7 = vld [vmem:[%s13934_s16 + $0x30] sm:$0xe] }
  0x24   : > { %v462_v30 = vrot.slane %v461_v19, 4  ;;  %v949_v31 = vrot.slane %v947_v15, 4  ;;  %v955_v32 = vsel %vm13927_vm2, %v11771_v22, %v954_v24  ;;  %v956_v33 = vrot.slane %v954_v24, 4  ;;  %v375_v22 = vld [vmem:[%s13934_s16 + $0x30] sm:$0xf] }
  0x25   : > { %13221 = vmatprep.mubr.msk.bf16.mxu1 %vm1128_vm3, %v11828_v26  ;;  %v1714_v34 = vrot.slane %v14016_v28, 4  ;;  %v957_v35 = vrot.slane %v374_v21, 5  ;;  %v469_v36 = vshrl.u32 %v369_v25, 16  ;;  %v472_v37 = vshll.u32 %v369_v25, 16 }
  0x26   : > { %v467_v38 = vsel %vm13991_vm6, %v462_v30, %v466_v14  ;;  %v951_v39 = vsel %vm13927_vm2, %v949_v31, %v950_v17  ;;  %v478_v40 = vshll.u32 %v13981_v54, 16  ;;  %v482_v42 = vshrl.u32 %v13981_v54, 16  ;;  %v14061_v17 = vld [vmem:[%s13934_s16 + $0x44] sm:$0x1] }
  0x27   : > { %v11829_v44 = vcombine.low %v457_v27, %v467_v38  ;;  %v11792_v45 = vcombine.low %v948_v29, %v951_v39  ;;  %v958_v46 = vsel %vm13927_vm2, %v956_v33, %v957_v35  ;;  %v471_v47 = vrot.slane %v469_v36, 4 }
  0x28   : > { %v11793_v50 = vcombine.low %v955_v32, %v958_v46  ;;  %v474_v51 = vrot.slane %v472_v37, 5  ;;  %v480_v52 = vrot.slane %v478_v40, 5  ;;  %v484_v56 = vrot.slane %v482_v42, 4 }
  0x29   : > { %13222 = vmatmul.mubr.msk.bf16.vlgmr.msra.gmra.mxu1 %vm1128_vm3, %v11829_v44  ;;  %13185 = vmatprep.mubr.msk.bf16.mxu0 %vm1128_vm3, %v11792_v45  ;;  %v488_v59 = vshll.u32 %v13984_v55, 16  ;;  %v493_v60 = vshrl.u32 %v372_v43, 16  ;;  %v496_v61 = vshll.u32 %v372_v43, 16  ;;  %v502_v62 = vshll.u32 %v14002_v3, 16  ;;  %v378_v45 = vld [vmem:[%s13934_s16 + $0x3c] sm:$0xf] }
  0x2a   : > { %13186 = vmatmul.mubr.msk.bf16.gmra.mxu0 %vm1128_vm3, %v11793_v50  ;;  %v475_v0 = vor.u32 %v474_v51, %v471_v47  ;;  %v485_v1 = vor.u32 %v484_v56, %v480_v52  ;;  %v506_v2 = vshrl.u32 %v14002_v3, 16  ;;  %v512_v5 = vshll.u32 %v374_v21, 16  ;;  %13298 = vmatpush3.bf16.msra.mxu1 %v13971_v41 }
  0x2b   : > { %v490_v55 = vrot.slane %v488_v59, 5  ;;  %v495_v8 = vrot.slane %v493_v60, 4  ;;  %v498_v9 = vrot.slane %v496_v61, 5  ;;  %v504_v10 = vrot.slane %v502_v62, 5  ;;  %13299 = vmatprep.subr.bf16.mxu1 %v13644_v49 }
  0x2c   : > { %v476_v14 = vrot.slane %v475_v0, 4  ;;  %v486_v16 = vrot.slane %v485_v1, 4  ;;  %v508_v13 = vrot.slane %v506_v2, 4  ;;  %v514_v15 = vrot.slane %v512_v5, 5  ;;  %v14091_v5 = vld [vmem:[%s13934_s16 + $0x4c] sm:$0xf] }
  0x2d   : > { %v499_v41 = vor.u32 %v498_v9, %v495_v8  ;;  %v11772_v18 = vrot.slane %v860_v7, 9  ;;  %v961_v19 = vrot.slane %v14045_v63, 5  ;;  %v964_v21 = vrot.slane %v377_v6, 5 }
  0x2e   : > { %v481_v24 = vsel %vm13991_vm6, %v476_v14, %v480_v52  ;;  %v491_v25 = vsel %vm13991_vm6, %v486_v16, %v490_v55  ;;  %v509_v26 = vor.u32 %v508_v13, %v504_v10  ;;  %v11773_v27 = vrot.slane %v861_v12, 9  ;;  %13300 = vmatpush3.bf16.msra.mxu1 %v13644_v49  ;;  %v862_v12 = vld [vmem:[%s13934_s16 + $0x48] sm:$0xe] }
  0x2f   : > { %v11830_v29 = vcombine.low %v481_v24, %v491_v25  ;;  %v500_v30 = vrot.slane %v499_v41, 4  ;;  %v962_v31 = vsel %vm13927_vm2, %v11772_v18, %v961_v19  ;;  %v963_v32 = vrot.slane %v961_v19, 4 }
  0x30   : > { %v510_v33 = vrot.slane %v509_v26, 4  ;;  %v968_v35 = vrot.slane %v14055_v11, 5  ;;  %v971_v36 = vrot.slane %v14061_v17, 5  ;;  %v517_v37 = vshrl.u32 %v375_v22, 16 }
  0x31   : > { %13225 = vmatprep.mubr.msk.bf16.mxu1 %vm1128_vm3, %v11830_v29  ;;  %v505_v38 = vsel %vm13991_vm6, %v500_v30, %v504_v10  ;;  %v965_v39 = vsel %vm13927_vm2, %v963_v32, %v964_v21  ;;  %v520_v43 = vshll.u32 %v375_v22, 16  ;;  %v526_v44 = vshll.u32 %v14045_v63, 16  ;;  %v383_v10 = vld [vmem:[%s13934_s16 + $0x50] sm:$0x1]  ;;  %v14108_v22 = vld [vmem:[%s13934_s16 + $0x5c] sm:$0x1] }
  0x32   : > { %v515_v46 = vsel %vm13991_vm6, %v510_v33, %v514_v15  ;;  %v11794_v47 = vcombine.low %v962_v31, %v965_v39  ;;  %v969_v49 = vsel %vm13927_vm2, %v11773_v27, %v968_v35  ;;  %v970_v50 = vrot.slane %v968_v35, 4  ;;  %v14101_v15 = vld [vmem:[%s13934_s16 + $0x58] sm:$0xf]  ;;  %v863_v29 = vld [vmem:[%s13934_s16 + $0x54] sm:$0xe] }
  0x33   : > { %v11831_v51 = vcombine.low %v505_v38, %v515_v46  ;;  %v519_v52 = vrot.slane %v517_v37, 4  ;;  %v522_v56 = vrot.slane %v520_v43, 5  ;;  %v528_v59 = vrot.slane %v526_v44, 5  ;;  %v381_v35 = vld [vmem:[%s13934_s16 + $0x48] sm:$0xf] }
  0x34   : > { %13189 = vmatprep.mubr.msk.bf16.mxu0 %vm1128_vm3, %v11794_v47  ;;  %v972_v60 = vsel %vm13927_vm2, %v970_v50, %v971_v36  ;;  %v530_v61 = vshrl.u32 %v14045_v63, 16  ;;  %v536_v0 = vshll.u32 %v377_v6, 16  ;;  %v541_v1 = vshrl.u32 %v378_v45, 16  ;;  %v13648_v63 = vld [vmem:[%s19297_s1 + $0x50] sm:$0xff]  }
  0x35   : > { %13226 = vmatmul.mubr.msk.bf16.gmra.mxu1 %vm1128_vm3, %v11831_v51  ;;  %v11795_v7 = vcombine.low %v969_v49, %v972_v60  ;;  %v523_v55 = vor.u32 %v522_v56, %v519_v52  ;;  %v544_v8 = vshll.u32 %v378_v45, 16  ;;  %v550_v9 = vshll.u32 %v14055_v11, 16 }
  0x36   : > { %v532_v14 = vrot.slane %v530_v61, 4  ;;  %v538_v16 = vrot.slane %v536_v0, 5  ;;  %v543_v13 = vrot.slane %v541_v1, 4  ;;  %v554_v6 = vshrl.u32 %v14055_v11, 16  ;;  %v384_v0 = vld [vmem:[%s13934_s16 + $0x54] sm:$0xf] }
  0x37   : > { %13190 = vmatmul.mubr.msk.bf16.gmra.mxu0 %vm1128_vm3, %v11795_v7  ;;  %v524_v41 = vrot.slane %v523_v55, 4  ;;  %v546_v18 = vrot.slane %v544_v8, 5  ;;  %v552_v19 = vrot.slane %v550_v9, 5  ;;  %v560_v21 = vshll.u32 %v14061_v17, 16  ;;  %v11923_v11 = vld [vmem:[%s13934_s16 + $0x48] sm:$0xf] }
  0x38   : > { %v533_v24 = vor.u32 %v532_v14, %v528_v59  ;;  %v556_v25 = vrot.slane %v554_v6, 4  ;;  %v11774_v26 = vrot.slane %v862_v12, 9  ;;  %v975_v27 = vrot.slane %v14091_v5, 5 }
  0x39   : > { %v529_v30 = vsel %vm13991_vm6, %v524_v41, %v528_v59  ;;  %v547_v31 = vor.u32 %v546_v18, %v543_v13  ;;  %v562_v32 = vrot.slane %v560_v21, 5  ;;  %v978_v33 = vrot.slane %v383_v10, 5  ;;  %v14137_v41 = vld [vmem:[%s13934_s16 + $0x64] sm:$0xf] }
  0x3a   : > { %v534_v36 = vrot.slane %v533_v24, 4  ;;  %v557_v17 = vor.u32 %v556_v25, %v552_v19  ;;  %v976_v37 = vsel %vm13927_vm2, %v11774_v26, %v975_v27  ;;  %v977_v38 = vrot.slane %v975_v27, 4  ;;  %v864_v25 = vld [vmem:[%s13934_s16 + $0x60] sm:$0xe] }
  0x3b   : > { %v548_v39 = vrot.slane %v547_v31, 4  ;;  %v11775_v43 = vrot.slane %v863_v29, 9  ;;  %v982_v45 = vrot.slane %v14101_v15, 5  ;;  %v985_v46 = vrot.slane %v14108_v22, 5 }
  0x3c   : > { %v539_v47 = vsel %vm13991_vm6, %v534_v36, %v538_v16  ;;  %v558_v49 = vrot.slane %v557_v17, 4  ;;  %v979_v50 = vsel %vm13927_vm2, %v977_v38, %v978_v33  ;;  %v565_v51 = vshrl.u32 %v381_v35, 16  ;;  %v14150_v36 = vld [vmem:[%s13934_s16 + $0x70] sm:$0xf] }
  0x3d   : > { %v11832_v52 = vcombine.low %v529_v30, %v539_v47  ;;  %v553_v56 = vsel %vm13991_vm6, %v548_v39, %v552_v19  ;;  %v11796_v59 = vcombine.low %v976_v37, %v979_v50  ;;  %v983_v60 = vsel %vm13927_vm2, %v11775_v43, %v982_v45  ;;  %v389_v30 = vld [vmem:[%s13934_s16 + $0x68] sm:$0x1]  ;;  %v14156_v43 = vld [vmem:[%s13934_s16 + $0x74] sm:$0x1]  ;;  %v865_v50 = vld [vmem:[%s13934_s16 + $0x6c] sm:$0xe] }
  0x3e   : > { %v563_v1 = vsel %vm13991_vm6, %v558_v49, %v562_v32  ;;  %v984_v7 = vrot.slane %v982_v45, 4  ;;  %v567_v55 = vrot.slane %v565_v51, 4  ;;  %v568_v8 = vshll.u32 %v381_v35, 16 }
  0x3f   : > { %13229 = vmatprep.mubr.msk.bf16.mxu1 %vm1128_vm3, %v11832_v52  ;;  %v11833_v12 = vcombine.low %v553_v56, %v563_v1  ;;  %13193 = vmatprep.mubr.msk.bf16.mxu0 %vm1128_vm3, %v11796_v59  ;;  %v574_v14 = vshll.u32 %v14091_v5, 16  ;;  %v578_v16 = vshrl.u32 %v14091_v5, 16  ;;  %v584_v13 = vshll.u32 %v383_v10, 16 }
  0x40   : > { %v986_v18 = vsel %vm13927_vm2, %v984_v7, %v985_v46  ;;  %v570_v19 = vrot.slane %v568_v8, 5  ;;  %v589_v21 = vshrl.u32 %v384_v0, 16  ;;  %v592_v24 = vshll.u32 %v384_v0, 16 }
  0x41   : > { %13230 = vmatmul.mubr.msk.bf16.gmra.mxu1 %vm1128_vm3, %v11833_v12  ;;  %v11797_v26 = vcombine.low %v983_v60, %v986_v18  ;;  %v576_v27 = vrot.slane %v574_v14, 5  ;;  %v580_v10 = vrot.slane %v578_v16, 4  ;;  %v586_v29 = vrot.slane %v584_v13, 5  ;;  %v387_v13 = vld [vmem:[%s13934_s16 + $0x60] sm:$0xf] }
  0x42   : > { %v571_v31 = vor.u32 %v570_v19, %v567_v55  ;;  %v591_v32 = vrot.slane %v589_v21, 4  ;;  %v594_v33 = vrot.slane %v592_v24, 5  ;;  %v598_v35 = vshll.u32 %v14101_v15, 16 }
  0x43   : > { %13194 = vmatmul.mubr.msk.bf16.gmra.mxu0 %vm1128_vm3, %v11797_v26  ;;  %v581_v17 = vor.u32 %v580_v10, %v576_v27  ;;  %v602_v37 = vshrl.u32 %v14101_v15, 16  ;;  %v608_v38 = vshll.u32 %v14108_v22, 16  ;;  %v11776_v39 = vrot.slane %v864_v25, 9  ;;  %v390_v25 = vld [vmem:[%s13934_s16 + $0x6c] sm:$0xf] }
  0x44   : > { %v572_v45 = vrot.slane %v571_v31, 4  ;;  %v595_v46 = vor.u32 %v594_v33, %v591_v32  ;;  %v600_v47 = vrot.slane %v598_v35, 5  ;;  %v989_v49 = vrot.slane %v14137_v41, 5 }
  0x45   : > { %v582_v51 = vrot.slane %v581_v17, 4  ;;  %v604_v52 = vrot.slane %v602_v37, 4  ;;  %v610_v56 = vrot.slane %v608_v38, 5  ;;  %v992_v59 = vrot.slane %v389_v30, 5 }
  0x46   : > { %v577_v22 = vsel %vm13991_vm6, %v572_v45, %v576_v27  ;;  %v596_v60 = vrot.slane %v595_v46, 4  ;;  %v990_v0 = vsel %vm13927_vm2, %v11776_v39, %v989_v49  ;;  %v991_v1 = vrot.slane %v989_v49, 4 }
  0x47   : > { %v587_v7 = vsel %vm13991_vm6, %v582_v51, %v586_v29  ;;  %v605_v55 = vor.u32 %v604_v52, %v600_v47  ;;  %v11777_v8 = vrot.slane %v865_v50, 9  ;;  %v996_v12 = vrot.slane %v14150_v36, 5 }
  0x48   : > { %v11834_v18 = vcombine.low %v577_v22, %v587_v7  ;;  %v601_v19 = vsel %vm13991_vm6, %v596_v60, %v600_v47  ;;  %v993_v21 = vsel %vm13927_vm2, %v991_v1, %v992_v59  ;;  %v999_v24 = vrot.slane %v14156_v43, 5  ;;  %v14189_v47 = vld [vmem:[%s13934_s16 + $0x7c] sm:$0xf]  ;;  %v866_v59 = vld [vmem:[%s13934_s16 + $0x78] sm:$0xe] }
  0x49   : > { %v606_v26 = vrot.slane %v605_v55, 4  ;;  %v11798_v27 = vcombine.low %v990_v0, %v993_v21  ;;  %v997_v10 = vsel %vm13927_vm2, %v11777_v8, %v996_v12  ;;  %v998_v29 = vrot.slane %v996_v12, 4  ;;  %v14197_v1 = vld [vmem:[%s13934_s16 + $0x80] sm:$0x1]  ;;  %v14204_v12 = vld [vmem:[%s13934_s16 + $0x88] sm:$0xf] }
  0x4a   : > { %13233 = vmatprep.mubr.msk.bf16.mxu1 %vm1128_vm3, %v11834_v18  ;;  %v613_v31 = vshrl.u32 %v387_v13, 16  ;;  %v616_v32 = vshll.u32 %v387_v13, 16  ;;  %v622_v33 = vshll.u32 %v14137_v41, 16  ;;  %v626_v17 = vshrl.u32 %v14137_v41, 16 }
  0x4b   : > { %v611_v38 = vsel %vm13991_vm6, %v606_v26, %v610_v56  ;;  %13197 = vmatprep.mubr.msk.bf16.mxu0 %vm1128_vm3, %v11798_v27  ;;  %v1000_v39 = vsel %vm13927_vm2, %v998_v29, %v999_v24  ;;  %v632_v45 = vshll.u32 %v389_v30, 16  ;;  %v637_v46 = vshrl.u32 %v390_v25, 16  ;;  %v14209_v24 = vld [vmem:[%s13934_s16 + $0x8c] sm:$0x1]  ;;  %v867_v29 = vld [vmem:[%s13934_s16 + $0x84] sm:$0xe] }
  0x4c   : > { %v11835_v49 = vcombine.low %v601_v19, %v611_v38  ;;  %v11799_v50 = vcombine.low %v997_v10, %v1000_v39  ;;  %v615_v51 = vrot.slane %v613_v31, 4  ;;  %v618_v52 = vrot.slane %v616_v32, 5 }
  0x4d   : > { %v624_v22 = vrot.slane %v622_v33, 5  ;;  %v628_v56 = vrot.slane %v626_v17, 4  ;;  %v634_v60 = vrot.slane %v632_v45, 5  ;;  %v639_v0 = vrot.slane %v637_v46, 4 }
  0x4e   : > { %13234 = vmatmul.mubr.msk.bf16.gmra.mxu1 %vm1128_vm3, %v11835_v49  ;;  %13198 = vmatmul.mubr.msk.bf16.gmra.mxu0 %vm1128_vm3, %v11799_v50  ;;  %v619_v30 = vor.u32 %v618_v52, %v615_v51  ;;  %v640_v7 = vshll.u32 %v390_v25, 16  ;;  %v19314_v55 = vshll.u32 %v14150_v36, 16  ;;  %v19315_v8 = vshrl.u32 %v14150_v36, 16  ;;  %v393_v50 = vld [vmem:[%s13934_s16 + $0x78] sm:$0xf] }
  0x4f   : > { %v629_v13 = vor.u32 %v628_v56, %v624_v22  ;;  %v656_v18 = vshll.u32 %v14156_v43, 16  ;;  %v11778_v19 = vrot.slane %v866_v59, 9  ;;  %v1003_v21 = vrot.slane %v14189_v47, 5 }
  0x50   : > { %v620_v26 = vrot.slane %v619_v30, 4  ;;  %v642_v27 = vrot.slane %v640_v7, 5  ;;  %v648_v25 = vrot.slane %v19314_v55, 5  ;;  %v652_v10 = vrot.slane %v19315_v8, 4 }
  0x51   : > { %v630_v31 = vrot.slane %v629_v13, 4  ;;  %v658_v32 = vrot.slane %v656_v18, 5  ;;  %v1004_v43 = vsel %vm13927_vm2, %v11778_v19, %v1003_v21  ;;  %v1005_v38 = vrot.slane %v1003_v21, 4 }
  0x52   : > { %v625_v39 = vsel %vm13991_vm6, %v620_v26, %v624_v22  ;;  %v643_v45 = vor.u32 %v642_v27, %v639_v0  ;;  %v653_v46 = vor.u32 %v652_v10, %v648_v25  ;;  %v1006_v49 = vrot.slane %v14197_v1, 5 }
  0x53   : > { %v635_v51 = vsel %vm13991_vm6, %v630_v31, %v634_v60  ;;  %v11779_v52 = vrot.slane %v867_v29, 9  ;;  %v1010_v59 = vrot.slane %v14204_v12, 5  ;;  %v1013_v56 = vrot.slane %v14209_v24, 5  ;;  %v396_v29 = vld [vmem:[%s13934_s16 + $0x84] sm:$0xf] }
  0x54   : > { %v11836_v30 = vcombine.low %v625_v39, %v635_v51  ;;  %v644_v7 = vrot.slane %v643_v45, 4  ;;  %v654_v13 = vrot.slane %v653_v46, 4  ;;  %v1007_v22 = vsel %vm13927_vm2, %v1005_v38, %v1006_v49  ;;  %v14245_v49 = vld [vmem:[%s13934_s16 + $0x94] sm:$0xf] }
  0x55   : > { %v11800_v0 = vcombine.low %v1004_v43, %v1007_v22  ;;  %v1011_v18 = vsel %vm13927_vm2, %v11779_v52, %v1010_v59  ;;  %v1012_v19 = vrot.slane %v1010_v59, 4  ;;  %v661_v21 = vshrl.u32 %v393_v50, 16 }
  0x56   : > { %13237 = vmatprep.mubr.msk.bf16.mxu1 %vm1128_vm3, %v11836_v30  ;;  %v649_v60 = vsel %vm13991_vm6, %v644_v7, %v648_v25  ;;  %v659_v26 = vsel %vm13991_vm6, %v654_v13, %v658_v32  ;;  %v664_v27 = vshll.u32 %v393_v50, 16  ;;  %v19306_v10 = vshll.u32 %v14189_v47, 16  ;;  %v14248_v50 = vld [vmem:[%s13934_s16 + $0x98] sm:$0x1]  ;;  %v868_v30 = vld [vmem:[%s13934_s16 + $0x90] sm:$0xe] }
  0x57   : > { %v11837_v31 = vcombine.low %v649_v60, %v659_v26  ;;  %13201 = vmatprep.mubr.msk.bf16.mxu0 %vm1128_vm3, %v11800_v0  ;;  %v1014_v43 = vsel %vm13927_vm2, %v1012_v19, %v1013_v56  ;;  %v663_v38 = vrot.slane %v661_v21, 4  ;;  %v19309_v39 = vshrl.u32 %v14189_v47, 16  ;;  %v14259_v0 = vld [vmem:[%s13934_s16 + $0xa0] sm:$0xf]  ;;  %v869_v26 = vld [vmem:[%s13934_s16 + $0x9c] sm:$0xe] }
  0x58   : > { %v11801_v45 = vcombine.low %v1011_v18, %v1014_v43  ;;  %v666_v46 = vrot.slane %v664_v27, 5  ;;  %v672_v25 = vrot.slane %v19306_v10, 5  ;;  %v680_v32 = vshll.u32 %v14197_v1, 16 }
  0x59   : > { %13238 = vmatmul.mubr.msk.bf16.gmra.mxu1 %vm1128_vm3, %v11837_v31  ;;  %v676_v51 = vrot.slane %v19309_v39, 4  ;;  %v685_v52 = vshrl.u32 %v396_v29, 16  ;;  %v688_v59 = vshll.u32 %v396_v29, 16  ;;  %v19304_v56 = vshll.u32 %v14204_v12, 16 }
  0x5a   : > { %13202 = vmatmul.mubr.msk.bf16.gmra.mxu0 %vm1128_vm3, %v11801_v45  ;;  %v667_v7 = vor.u32 %v666_v46, %v663_v38  ;;  %v682_v13 = vrot.slane %v680_v32, 5  ;;  %v19305_v1 = vshrl.u32 %v14204_v12, 16  ;;  %v704_v22 = vshll.u32 %v14209_v24, 16 }
  0x5b   : > { %v677_v18 = vor.u32 %v676_v51, %v672_v25  ;;  %v687_v19 = vrot.slane %v685_v52, 4  ;;  %v690_v21 = vrot.slane %v688_v59, 5  ;;  %v696_v60 = vrot.slane %v19304_v56, 5  ;;  %v404_v52 = vld [vmem:[%s13934_s16 + $0xa4] sm:$0x1] }
  0x5c   : > { %v668_v27 = vrot.slane %v667_v7, 4  ;;  %v700_v29 = vrot.slane %v19305_v1, 4  ;;  %v706_v31 = vrot.slane %v704_v22, 5  ;;  %v11780_v43 = vrot.slane %v868_v30, 9  ;;  %v399_v7 = vld [vmem:[%s13934_s16 + $0x90] sm:$0xf] }
  0x5d   : > { %v678_v38 = vrot.slane %v677_v18, 4  ;;  %v691_v45 = vor.u32 %v690_v21, %v687_v19  ;;  %v1017_v24 = vrot.slane %v14245_v49, 5  ;;  %v1020_v46 = vrot.slane %v14248_v50, 5 }
  0x5e   : > { %v673_v32 = vsel %vm13991_vm6, %v668_v27, %v672_v25  ;;  %v701_v51 = vor.u32 %v700_v29, %v696_v60  ;;  %v11781_v59 = vrot.slane %v869_v26, 9  ;;  %v1024_v56 = vrot.slane %v14259_v0, 5 }
  0x5f   : > { %v683_v1 = vsel %vm13991_vm6, %v678_v38, %v682_v13  ;;  %v692_v22 = vrot.slane %v691_v45, 4  ;;  %v1018_v30 = vsel %vm13927_vm2, %v11780_v43, %v1017_v24  ;;  %v1019_v18 = vrot.slane %v1017_v24, 4  ;;  %v402_v45 = vld [vmem:[%s13934_s16 + $0x9c] sm:$0xf] }
  0x60   : > { %v11838_v19 = vcombine.low %v673_v32, %v683_v1  ;;  %v702_v21 = vrot.slane %v701_v51, 4  ;;  %v1025_v25 = vsel %vm13927_vm2, %v11781_v59, %v1024_v56  ;;  %v1026_v27 = vrot.slane %v1024_v56, 4 }
  0x61   : > { %v697_v26 = vsel %vm13991_vm6, %v692_v22, %v696_v60  ;;  %v1021_v29 = vsel %vm13927_vm2, %v1019_v18, %v1020_v46  ;;  %v1027_v10 = vrot.slane %v404_v52, 5  ;;  %v709_v13 = vshrl.u32 %v399_v7, 16  ;;  %v14296_v22 = vld [vmem:[%s13934_s16 + $0xac] sm:$0xf]  ;;  %v870_v18 = vld [vmem:[%s13934_s16 + $0xa8] sm:$0xe] }
  0x62   : > { %13241 = vmatprep.mubr.msk.bf16.mxu1 %vm1128_vm3, %v11838_v19  ;;  %v707_v1 = vsel %vm13991_vm6, %v702_v21, %v706_v31  ;;  %v11802_v43 = vcombine.low %v1018_v30, %v1021_v29  ;;  %v712_v38 = vshll.u32 %v399_v7, 16  ;;  %v19307_v56 = vshll.u32 %v14245_v49, 16  ;;  %v14299_v30 = vld [vmem:[%s13934_s16 + $0xb0] sm:$0x1] }
  0x63   : > { %v11839_v24 = vcombine.low %v697_v26, %v707_v1  ;;  %v1028_v60 = vsel %vm13927_vm2, %v1026_v27, %v1027_v10  ;;  %v711_v46 = vrot.slane %v709_v13, 4  ;;  %v19308_v32 = vshrl.u32 %v14245_v49, 16  ;;  %v14307_v27 = vld [vmem:[%s13934_s16 + $0xb8] sm:$0xf]  ;;  %v871_v1 = vld [vmem:[%s13934_s16 + $0xb4] sm:$0xe] }
  0x64   : > { %13205 = vmatprep.mubr.msk.bf16.mxu0 %vm1128_vm3, %v11802_v43  ;;  %v11803_v51 = vcombine.low %v1025_v25, %v1028_v60  ;;  %v714_v59 = vrot.slane %v712_v38, 5  ;;  %v720_v31 = vrot.slane %v19307_v56, 5  ;;  %v728_v7 = vshll.u32 %v14248_v50, 16 }
  0x65   : > { %13242 = vmatmul.mubr.msk.bf16.gmra.mxu1 %vm1128_vm3, %v11839_v24  ;;  %v724_v10 = vrot.slane %v19308_v32, 4  ;;  %v733_v19 = vshrl.u32 %v402_v45, 16  ;;  %v736_v21 = vshll.u32 %v402_v45, 16  ;;  %v19310_v25 = vshll.u32 %v14259_v0, 16 }
  0x66   : > { %13206 = vmatmul.mubr.msk.bf16.gmra.mxu0 %vm1128_vm3, %v11803_v51  ;;  %v715_v26 = vor.u32 %v714_v59, %v711_v46  ;;  %v730_v50 = vrot.slane %v728_v7, 5  ;;  %v19311_v29 = vshrl.u32 %v14259_v0, 16  ;;  %v752_v13 = vshll.u32 %v404_v52, 16 }
  0x67   : > { %v725_v43 = vor.u32 %v724_v10, %v720_v31  ;;  %v735_v38 = vrot.slane %v733_v19, 4  ;;  %v738_v24 = vrot.slane %v736_v21, 5  ;;  %v744_v45 = vrot.slane %v19310_v25, 5  ;;  %v410_v21 = vld [vmem:[%s13934_s16 + $0xbc] sm:$0x1] }
  0x68   : > { %v716_v60 = vrot.slane %v715_v26, 4  ;;  %v748_v56 = vrot.slane %v19311_v29, 4  ;;  %v754_v32 = vrot.slane %v752_v13, 5  ;;  %v11782_v51 = vrot.slane %v870_v18, 9  ;;  %v405_v26 = vld [vmem:[%s13934_s16 + $0xa8] sm:$0xf] }
  0x69   : > { %v726_v46 = vrot.slane %v725_v43, 4  ;;  %v739_v59 = vor.u32 %v738_v24, %v735_v38  ;;  %v1031_v7 = vrot.slane %v14296_v22, 5  ;;  %v1034_v52 = vrot.slane %v14299_v30, 5 }
  0x6a   : > { %v721_v10 = vsel %vm13991_vm6, %v716_v60, %v720_v31  ;;  %v749_v19 = vor.u32 %v748_v56, %v744_v45  ;;  %v11783_v39 = vrot.slane %v871_v1, 9  ;;  %v1038_v25 = vrot.slane %v14307_v27, 5 }
  0x6b   : > { %v731_v29 = vsel %vm13991_vm6, %v726_v46, %v730_v50  ;;  %v740_v13 = vrot.slane %v739_v59, 4  ;;  %v1032_v18 = vsel %vm13927_vm2, %v11782_v51, %v1031_v7  ;;  %v1033_v43 = vrot.slane %v1031_v7, 4 }
  0x6c   : > { %v11840_v38 = vcombine.low %v721_v10, %v731_v29  ;;  %v750_v24 = vrot.slane %v749_v19, 4  ;;  %v1039_v31 = vsel %vm13927_vm2, %v11783_v39, %v1038_v25  ;;  %v1040_v56 = vrot.slane %v1038_v25, 4  ;;  %v408_v25 = vld [vmem:[%s13934_s16 + $0xb4] sm:$0xf]  ;;  %v872_v19 = vld [vmem:[%s13934_s16 + $0xc0] sm:$0xe] }
  0x6d   : > { %v745_v1 = vsel %vm13991_vm6, %v740_v13, %v744_v45  ;;  %v1035_v60 = vsel %vm13927_vm2, %v1033_v43, %v1034_v52  ;;  %v1041_v50 = vrot.slane %v410_v21, 5  ;;  %v757_v46 = vshrl.u32 %v405_v26, 16 }
  0x6e   : > { %13245 = vmatprep.mubr.msk.bf16.mxu1 %vm1128_vm3, %v11840_v38  ;;  %v755_v29 = vsel %vm13991_vm6, %v750_v24, %v754_v32  ;;  %v11804_v51 = vcombine.low %v1032_v18, %v1035_v60  ;;  %v760_v59 = vshll.u32 %v405_v26, 16  ;;  %v19312_v39 = vshll.u32 %v14296_v22, 16  ;;  %v14347_v18 = vld [vmem:[%s13934_s16 + $0xc4] sm:$0xf]  ;;  %v14350_v38 = vld [vmem:[%s13934_s16 + $0xc8] sm:$0x1] }
  0x6f   : > { %v11841_v7 = vcombine.low %v745_v1, %v755_v29  ;;  %v1042_v45 = vsel %vm13927_vm2, %v1040_v56, %v1041_v50  ;;  %v759_v10 = vrot.slane %v757_v46, 4  ;;  %v19313_v52 = vshrl.u32 %v14296_v22, 16  ;;  %v14359_v29 = vld [vmem:[%s13934_s16 + $0xd0] sm:$0xf] }
  0x70   : > { %13209 = vmatprep.mubr.msk.bf16.mxu0 %vm1128_vm3, %v11804_v51  ;;  %v11805_v13 = vcombine.low %v1039_v31, %v1042_v45  ;;  %v762_v43 = vrot.slane %v760_v59, 5  ;;  %v768_v32 = vrot.slane %v19312_v39, 5  ;;  %v776_v26 = vshll.u32 %v14299_v30, 16 }
  0x71   : > { %13246 = vmatmul.mubr.msk.bf16.gmra.mxu1 %vm1128_vm3, %v11841_v7  ;;  %v772_v24 = vrot.slane %v19313_v52, 4  ;;  %v781_v56 = vshrl.u32 %v408_v25, 16  ;;  %v784_v1 = vshll.u32 %v408_v25, 16  ;;  %v19316_v31 = vshll.u32 %v14307_v27, 16  ;;  %v873_v25 = vld [vmem:[%s13934_s16 + $0xcc] sm:$0xe] }
  0x72   : > { %13210 = vmatmul.mubr.msk.bf16.gmra.mxu0 %vm1128_vm3, %v11805_v13  ;;  %v763_v60 = vor.u32 %v762_v43, %v759_v10  ;;  %v778_v50 = vrot.slane %v776_v26, 5  ;;  %v19317_v30 = vshrl.u32 %v14307_v27, 16  ;;  %v800_v46 = vshll.u32 %v410_v21, 16  ;;  %v416_v43 = vld [vmem:[%s13934_s16 + $0xd4] sm:$0x1] }
  0x73   : > { %v773_v51 = vor.u32 %v772_v24, %v768_v32  ;;  %v783_v59 = vrot.slane %v781_v56, 4  ;;  %v786_v7 = vrot.slane %v784_v1, 5  ;;  %v792_v45 = vrot.slane %v19316_v31, 5 }
  0x74   : > { %v764_v39 = vrot.slane %v763_v60, 4  ;;  %v796_v52 = vrot.slane %v19317_v30, 4  ;;  %v802_v13 = vrot.slane %v800_v46, 5  ;;  %v11784_v10 = vrot.slane %v872_v19, 9  ;;  %v411_v60 = vld [vmem:[%s13934_s16 + $0xc0] sm:$0xf] }
  0x75   : > { %v774_v26 = vrot.slane %v773_v51, 4  ;;  %v787_v55 = vor.u32 %v786_v7, %v783_v59  ;;  %v1045_v21 = vrot.slane %v14347_v18, 5  ;;  %v1048_v24 = vrot.slane %v14350_v38, 5 }
  0x76   : > { %v769_v56 = vsel %vm13991_vm6, %v764_v39, %v768_v32  ;;  %v797_v1 = vor.u32 %v796_v52, %v792_v45  ;;  %v11785_v8 = vrot.slane %v873_v25, 9  ;;  %v1052_v31 = vrot.slane %v14359_v29, 5 }
  0x77   : > { %v779_v30 = vsel %vm13991_vm6, %v774_v26, %v778_v50  ;;  %v788_v46 = vrot.slane %v787_v55, 4  ;;  %v1046_v19 = vsel %vm13927_vm2, %v11784_v10, %v1045_v21  ;;  %v1047_v51 = vrot.slane %v1045_v21, 4 }
  0x78   : > { %v11842_v59 = vcombine.low %v769_v56, %v779_v30  ;;  %v798_v7 = vrot.slane %v797_v1, 4  ;;  %v1053_v39 = vsel %vm13927_vm2, %v11785_v8, %v1052_v31  ;;  %v1054_v52 = vrot.slane %v1052_v31, 4  ;;  %v414_v8 = vld [vmem:[%s13934_s16 + $0xcc] sm:$0xf] }
  0x79   : > { %v793_v32 = vsel %vm13991_vm6, %v788_v46, %v792_v45  ;;  %v1049_v25 = vsel %vm13927_vm2, %v1047_v51, %v1048_v24  ;;  %v1055_v50 = vrot.slane %v416_v43, 5  ;;  %v805_v55 = vshrl.u32 %v411_v60, 16 }
  0x7a   : > { %13249 = vmatprep.mubr.msk.bf16.mxu1 %vm1128_vm3, %v11842_v59  ;;  %v803_v10 = vsel %vm13991_vm6, %v798_v7, %v802_v13  ;;  %v11806_v26 = vcombine.low %v1046_v19, %v1049_v25  ;;  %v808_v30 = vshll.u32 %v411_v60, 16  ;;  %v814_v21 = vshll.u32 %v14347_v18, 16 }
  0x7b   : > { %v11843_v31 = vcombine.low %v793_v32, %v803_v10  ;;  %v1056_v45 = vsel %vm13927_vm2, %v1054_v52, %v1055_v50  ;;  %v807_v56 = vrot.slane %v805_v55, 4  ;;  %v818_v24 = vshrl.u32 %v14347_v18, 16  ;;  %v1657_v52 = vld [vmem:[%s13934_s16 + $0x8] sm:$0x3] }
  0x7c   : > { %13213 = vmatprep.mubr.msk.bf16.mxu0 %vm1128_vm3, %v11806_v26  ;;  %v11807_v1 = vcombine.low %v1053_v39, %v1056_v45  ;;  %v810_v46 = vrot.slane %v808_v30, 5  ;;  %v816_v13 = vrot.slane %v814_v21, 5  ;;  %v824_v60 = vshll.u32 %v14350_v38, 16 }
  0x7d   : > { %13250 = vmatmul.mubr.msk.bf16.gmra.mxu1 %vm1128_vm3, %v11843_v31  ;;  %v820_v19 = vrot.slane %v818_v24, 4  ;;  %v829_v51 = vshrl.u32 %v414_v8, 16  ;;  %v832_v59 = vshll.u32 %v414_v8, 16  ;;  %v19318_v7 = vshll.u32 %v14359_v29, 16 }
  0x7e   : > { %13214 = vmatmul.mubr.msk.bf16.gmra.mxu0 %vm1128_vm3, %v11807_v1  ;;  %v811_v32 = vor.u32 %v810_v46, %v807_v56  ;;  %v826_v39 = vrot.slane %v824_v60, 5  ;;  %v19319_v25 = vshrl.u32 %v14359_v29, 16  ;;  %v848_v50 = vshll.u32 %v416_v43, 16  ;;  %v1658_v46 = vld [vmem:[%s13934_s16 + $0x14] sm:$0x3] }
  0x7f   : > { %v821_v38 = vor.u32 %v820_v19, %v816_v13  ;;  %v831_v55 = vrot.slane %v829_v51, 4  ;;  %v834_v10 = vrot.slane %v832_v59, 5  ;;  %v840_v26 = vrot.slane %v19318_v7, 5  ;;  %v11908_v60 = vld [vmem:[%s13934_s16 + $0xc] sm:$0xf] }
  0x80   : > { %v812_v30 = vrot.slane %v811_v32, 4  ;;  %v844_v8 = vrot.slane %v19319_v25, 4  ;;  %v850_v31 = vrot.slane %v848_v50, 5  ;;  %v1685_v1 = vor.u32 %v13955_v23, %v13952_v20 }
  0x81   : > { %v822_v45 = vrot.slane %v821_v38, 4  ;;  %v835_v56 = vor.u32 %v834_v10, %v831_v55  ;;  %v1689_v43 = vor.u32 %v13975_v48, %v13978_v53  ;;  %v1693_v32 = vshrl.u32 %v1657_v52, 16  ;;  %v14422_v38 = vld [vmem:[%s13934_s16 + $0x10] sm:$0xf] }
  0x82   : > { %v817_v19 = vsel %vm13991_vm6, %v812_v30, %v816_v13  ;;  %v845_v51 = vor.u32 %v844_v8, %v840_v26  ;;  %v1696_v50 = vshll.u32 %v1657_v52, 16  ;;  %v1686_v48 = vrot.slane %v1685_v1, 4  ;;  %v11910_v8 = vld [vmem:[%s13934_s16 + $0x14] sm:$0x1] }
  0x83   : > { %v827_v20 = vsel %vm13991_vm6, %v822_v45, %v826_v39  ;;  %v836_v23 = vrot.slane %v835_v56, 4  ;;  %v1691_v53 = vrot.slane %v1689_v43, 4  ;;  %v1695_v13 = vrot.slane %v1693_v32, 5  ;;  %v11911_v56 = vld [vmem:[%s13934_s16 + $0x18] sm:$0xf] }
  0x84   : > { %v11844_v55 = vcombine.low %v817_v19, %v827_v20  ;;  %v846_v10 = vrot.slane %v845_v51, 4  ;;  %v1698_v30 = vrot.slane %v1696_v50, 6  ;;  %v1690_v52 = vsel %vm14415_vm9, %v1686_v48, %v1689_v43 }
  0x85   : > { %v841_v7 = vsel %vm13991_vm6, %v836_v23, %v840_v26  ;;  %v1713_v39 = vsel %vm14415_vm9, %v13987_v57, %v14016_v28  ;;  %v1716_v45 = vshrl.u32 %v1658_v46, 16  ;;  %v1719_v51 = vshll.u32 %v1658_v46, 16  ;;  %v14439_v23 = vld [vmem:[%s13934_s16 + $0x1c] sm:$0xf] }
  0x86   : > { %13253 = vmatprep.mubr.msk.bf16.mxu1 %vm1128_vm3, %v11844_v55  ;;  %v851_v1 = vsel %vm13991_vm6, %v846_v10, %v850_v31  ;;  %v1699_v19 = vor.u32 %v1698_v30, %v1695_v13  ;;  %v2489_v32 = vshrl.u32 %v11908_v60, 16  ;;  %v2492_v20 = vshll.u32 %v11908_v60, 16 }
  0x87   : > { %v11845_v50 = vcombine.low %v841_v7, %v851_v1  ;;  %v1718_v26 = vrot.slane %v1716_v45, 5  ;;  %v19350_v43 = vshll.u32 %v14422_v38, 16  ;;  %v1721_v48 = vrot.slane %v1719_v51, 6 }
  0x88   : > { %v1700_v57 = vsel %vm14415_vm9, %v1691_v53, %v1699_v19  ;;  %v2491_v25 = vrot.slane %v2489_v32, 4  ;;  %v19351_v55 = vshrl.u32 %v14422_v38, 16  ;;  %v2494_v46 = vrot.slane %v2492_v20, 5  ;;  %v11913_v19 = vld [vmem:[%s13934_s16 + $0x20] sm:$0x1] }
  0x89   : > { %13254 = vmatmul.mubr.msk.bf16.gmra.mxu1 %vm1128_vm3, %v11845_v50  ;;  %v11870_v31 = vcombine.low %v1690_v52, %v1700_v57  ;;  %v2500_v7 = vrot.slane %v19350_v43, 5  ;;  %v2508_v60 = vshll.u32 %v11910_v8, 16  ;;  %v1722_v10 = vor.u32 %v1721_v48, %v1718_v26  ;;  %v1659_v48 = vld [vmem:[%s13934_s16 + $0x20] sm:$0x3] }
  0x8a   : > { %v2504_v13 = vrot.slane %v19351_v55, 4  ;;  %v2513_v30 = vshrl.u32 %v11911_v56, 16  ;;  %v2516_v53 = vshll.u32 %v11911_v56, 16  ;;  %v2495_v45 = vor.u32 %v2494_v46, %v2491_v25 }
  0x8b   : > { %13261 = vmatprep.mubr.msk.bf16.mxu0 %vm1128_vm3, %v11870_v31  ;;  %v2510_v1 = vrot.slane %v2508_v60, 5  ;;  %v19320_v52 = vshll.u32 %v14439_v23, 16  ;;  %v19349_v51 = vshrl.u32 %v14439_v23, 16  ;;  %v1723_v8 = vsel %vm14415_vm9, %v1714_v34, %v1722_v10  ;;  %v13646_v31 = vld [vmem:[%s19297_s1 + $0x40] sm:$0xff]   ;;  %v13739_v34 = vld [vmem:[%s13934_s16 + $0x18] sm:$0xe] }
  0x8c   : > { %v2505_v32 = vor.u32 %v2504_v13, %v2500_v7  ;;  %v2515_v50 = vrot.slane %v2513_v30, 4  ;;  %v2518_v26 = vrot.slane %v2516_v53, 5  ;;  %v11871_v20 = vcombine.low %v1713_v39, %v1723_v8 }
  0x8d   : > { %v2496_v56 = vrot.slane %v2495_v45, 4  ;;  %v2524_v25 = vrot.slane %v19320_v52, 5  ;;  %v2528_v57 = vrot.slane %v19349_v51, 4  ;;  %v2532_v60 = vshll.u32 %v11913_v19, 16 }
  0x8e   : > { %v2506_v28 = vrot.slane %v2505_v32, 4  ;;  %v2519_v46 = vor.u32 %v2518_v26, %v2515_v50  ;;  %v1725_v10 = vshrl.u32 %v13739_v34, 16  ;;  %13262 = vmatmul.mubr.msk.bf16.vlgmr.msra.gmra.mxu0 %vm1128_vm3, %v11871_v20  ;;  %v1728_v30 = vshll.u32 %v13739_v34, 16  ;;  %v13740_v50 = vld [vmem:[%s19297_s1 + $0x48] sm:$0xff]   ;;  %v11914_v34 = vld [vmem:[%s13934_s16 + $0x24] sm:$0xf] }
  0x8f   : > { %v2501_v39 = vsel %vm13991_vm6, %v2496_v56, %v2500_v7  ;;  %v2529_v13 = vor.u32 %v2528_v57, %v2524_v25  ;;  %v1733_v53 = vrot.slane %v482_v42, 5  ;;  %v2534_v19 = vrot.slane %v2532_v60, 5  ;;  %13338 = vmatpush3.bf16.msra.mxu0 %v13740_v50  ;;  %v1660_v42 = vld [vmem:[%s13934_s16 + $0x2c] sm:$0x3] }
  0x90   : > { %v2511_v45 = vsel %vm13991_vm6, %v2506_v28, %v2510_v1  ;;  %v2520_v8 = vrot.slane %v2519_v46, 4  ;;  %v1727_v32 = vrot.slane %v1725_v10, 5  ;;  %v1730_v20 = vrot.slane %v1728_v30, 6  ;;  %13339 = vmatprep.subr.bf16.mxu0 %v13646_v31  ;;  %v13741_v46 = vld [vmem:[%s13934_s16 + $0x24] sm:$0xe] }
  0x91   : > { %v11966_v26 = vcombine.low %v2501_v39, %v2511_v45  ;;  %v2530_v7 = vrot.slane %v2529_v13, 4  ;;  %v1734_v56 = vrot.slane %v478_v40, 6  ;;  %v1739_v57 = vshrl.u32 %v1659_v48, 16 }
  0x92   : > { %v2525_v1 = vsel %vm13991_vm6, %v2520_v8, %v2524_v25  ;;  %v1742_v28 = vshll.u32 %v1659_v48, 16  ;;  %v1748_v60 = vshrl.u32 %v13741_v46, 16  ;;  %v1731_v39 = vor.u32 %v1730_v20, %v1727_v32  ;;  %v11916_v20 = vld [vmem:[%s13934_s16 + $0x2c] sm:$0x1] }
  0x93   : > { %13301 = vmatprep.mubr.msk.bf16.mxu1 %vm1128_vm3, %v11966_v26  ;;  %v2535_v10 = vsel %vm13991_vm6, %v2530_v7, %v2534_v19  ;;  %v1735_v13 = vor.u32 %v1734_v56, %v1733_v53  ;;  %v1751_v54 = vshll.u32 %v13741_v46, 16  ;;  %v1741_v30 = vrot.slane %v1739_v57, 5  ;;  %13340 = vmatpush3.bf16.msra.mxu0 %v13646_v31  ;;  %v14489_v26 = vld [vmem:[%s13934_s16 + $0x28] sm:$0xf] }
  0x94   : > { %v11967_v40 = vcombine.low %v2525_v1, %v2535_v10  ;;  %v1744_v45 = vrot.slane %v1742_v28, 6  ;;  %v1750_v50 = vrot.slane %v1748_v60, 5  ;;  %v1732_v25 = vrot.slane %v1731_v39, 4 }
  0x95   : > { %v1737_v48 = vrot.slane %v1735_v13, 4  ;;  %v1753_v8 = vrot.slane %v1751_v54, 6  ;;  %v1756_v52 = vrot.slane %v506_v2, 5  ;;  %v1757_v53 = vrot.slane %v502_v62, 6  ;;  %v11917_v2 = vld [vmem:[%s13934_s16 + $0x30] sm:$0xf] }
  0x96   : > { %13302 = vmatmul.mubr.msk.bf16.vlgmr.msra.gmra.mxu1 %vm1128_vm3, %v11967_v40  ;;  %v1745_v19 = vor.u32 %v1744_v45, %v1741_v30  ;;  %v1762_v32 = vshrl.u32 %v1660_v42, 16  ;;  %v1765_v7 = vshll.u32 %v1660_v42, 16  ;;  %v1736_v31 = vsel %vm14415_vm9, %v1732_v25, %v1735_v13  ;;  %v14501_v42 = vld [vmem:[%s13934_s16 + $0x34] sm:$0xf] }
  0x97   : > { %v1754_v56 = vor.u32 %v1753_v8, %v1750_v50  ;;  %v2537_v1 = vshrl.u32 %v11914_v34, 16  ;;  %v2540_v57 = vshll.u32 %v11914_v34, 16  ;;  %v1758_v46 = vor.u32 %v1757_v53, %v1756_v52  ;;  %v11919_v34 = vld [vmem:[%s13934_s16 + $0x38] sm:$0x1] }
  0x98   : > { %v1746_v28 = vsel %vm14415_vm9, %v1737_v48, %v1745_v19  ;;  %v1764_v60 = vrot.slane %v1762_v32, 5  ;;  %v1767_v10 = vrot.slane %v1765_v7, 6  ;;  %v19347_v13 = vshll.u32 %v14489_v26, 16 }
  0x99   : > { %v11872_v3 = vcombine.low %v1736_v31, %v1746_v28  ;;  %v1755_v62 = vrot.slane %v1754_v56, 4  ;;  %v2539_v39 = vrot.slane %v2537_v1, 4  ;;  %v2542_v54 = vrot.slane %v2540_v57, 5 }
  0x9a   : > { %v1760_v40 = vrot.slane %v1758_v46, 4  ;;  %v1768_v30 = vor.u32 %v1767_v10, %v1764_v60  ;;  %v19348_v45 = vshrl.u32 %v14489_v26, 16  ;;  %v2556_v25 = vshll.u32 %v11916_v20, 16 }
  0x9b   : > { %13265 = vmatprep.mubr.msk.bf16.mxu0 %vm1128_vm3, %v11872_v3  ;;  %v1759_v52 = vsel %vm14415_vm9, %v1755_v62, %v1758_v46  ;;  %v2543_v50 = vor.u32 %v2542_v54, %v2539_v39  ;;  %v2561_v48 = vshrl.u32 %v11917_v2, 16  ;;  %v2548_v19 = vrot.slane %v19347_v13, 5  ;;  %v13742_v3 = vld [vmem:[%s13934_s16 + $0x30] sm:$0xe] }
  0x9c   : > { %v1769_v8 = vsel %vm14415_vm9, %v1760_v40, %v1768_v30  ;;  %v2552_v53 = vrot.slane %v19348_v45, 4  ;;  %v2564_v32 = vshll.u32 %v11917_v2, 16  ;;  %v2558_v56 = vrot.slane %v2556_v25, 5 }
  0x9d   : > { %v11873_v7 = vcombine.low %v1759_v52, %v1769_v8  ;;  %v2544_v31 = vrot.slane %v2543_v50, 4  ;;  %v2563_v1 = vrot.slane %v2561_v48, 4  ;;  %v19342_v20 = vshll.u32 %v14501_v42, 16  ;;  %v1661_v52 = vld [vmem:[%s13934_s16 + $0x38] sm:$0x3] }
  0x9e   : > { %v2553_v57 = vor.u32 %v2552_v53, %v2548_v19  ;;  %v2566_v28 = vrot.slane %v2564_v32, 5  ;;  %v19344_v46 = vshrl.u32 %v14501_v42, 16  ;;  %v2580_v10 = vshll.u32 %v11919_v34, 16 }
  0x9f   : > { %13266 = vmatmul.mubr.msk.bf16.gmra.mxu0 %vm1128_vm3, %v11873_v7  ;;  %v2549_v60 = vsel %vm13991_vm6, %v2544_v31, %v2548_v19  ;;  %v1771_v62 = vshrl.u32 %v13742_v3, 16  ;;  %v1774_v2 = vshll.u32 %v13742_v3, 16  ;;  %v2572_v40 = vrot.slane %v19342_v20, 5  ;;  %v13647_v7 = vld [vmem:[%s19297_s1 + $0x58] sm:$0xff]  }
  0xa0   : > { %v2554_v39 = vrot.slane %v2553_v57, 4  ;;  %v2567_v54 = vor.u32 %v2566_v28, %v2563_v1  ;;  %v2576_v30 = vrot.slane %v19344_v46, 4  ;;  %v2582_v50 = vrot.slane %v2580_v10, 5  ;;  %v1662_v10 = vld [vmem:[%s13934_s16 + $0x44] sm:$0x3]  ;;  %13377 = vmatprep.subr.bf16.mxu1 %v13647_v7 }
  0xa1   : > { %v1773_v25 = vrot.slane %v1771_v62, 5  ;;  %v1776_v48 = vrot.slane %v1774_v2, 6  ;;  %v1779_v34 = vrot.slane %v530_v61, 5  ;;  %v1780_v32 = vrot.slane %v526_v44, 6  ;;  %v11920_v3 = vld [vmem:[%s13934_s16 + $0x3c] sm:$0xf]  ;;  %13378 = vmatpush3.bf16.msra.mxu1 %v13647_v7 }
  0xa2   : > { %v2559_v8 = vsel %vm13991_vm6, %v2554_v39, %v2558_v56  ;;  %v2568_v19 = vrot.slane %v2567_v54, 4  ;;  %v2577_v53 = vor.u32 %v2576_v30, %v2572_v40  ;;  %v1785_v57 = vshrl.u32 %v1661_v52, 16  ;;  %v13743_v2 = vld [vmem:[%s13934_s16 + $0x3c] sm:$0xe]  ;;  %v14541_v54 = vld [vmem:[%s13934_s16 + $0x40] sm:$0xf]  ;;  %13379 = vmatprep.subr.bf16.mxu1 %v13648_v63 }
  0xa3   : > { %v11968_v31 = vcombine.low %v2549_v60, %v2559_v8  ;;  %v1777_v1 = vor.u32 %v1776_v48, %v1773_v25  ;;  %v1788_v28 = vshll.u32 %v1661_v52, 16  ;;  %v1781_v62 = vor.u32 %v1780_v32, %v1779_v34 }
  0xa4   : > { %v2573_v61 = vsel %vm13991_vm6, %v2568_v19, %v2572_v40  ;;  %v2578_v56 = vrot.slane %v2577_v53, 4  ;;  %v1794_v39 = vshrl.u32 %v13743_v2, 16  ;;  %v1787_v60 = vrot.slane %v1785_v57, 5 }
  0xa5   : > { %13305 = vmatprep.mubr.msk.bf16.mxu1 %vm1128_vm3, %v11968_v31  ;;  %v1778_v44 = vrot.slane %v1777_v1, 4  ;;  %v1790_v30 = vrot.slane %v1788_v28, 6  ;;  %v1797_v52 = vshll.u32 %v13743_v2, 16  ;;  %v1783_v25 = vrot.slane %v1781_v62, 4  ;;  %v11922_v31 = vld [vmem:[%s13934_s16 + $0x44] sm:$0x1]  ;;  %13380 = vmatpush3.bf16.msra.mxu1 %v13648_v63 }
  0xa6   : > { %v2583_v40 = vsel %vm13991_vm6, %v2578_v56, %v2582_v50  ;;  %v1796_v48 = vrot.slane %v1794_v39, 5  ;;  %v1802_v34 = vrot.slane %v554_v6, 5  ;;  %v1803_v7 = vrot.slane %v550_v9, 6 }
  0xa7   : > { %v11969_v8 = vcombine.low %v2573_v61, %v2583_v40  ;;  %v1782_v19 = vsel %vm14415_vm9, %v1778_v44, %v1781_v62  ;;  %v1791_v53 = vor.u32 %v1790_v30, %v1787_v60  ;;  %v1799_v32 = vrot.slane %v1797_v52, 6  ;;  %v14564_v52 = vld [vmem:[%s13934_s16 + $0x4c] sm:$0xf] }
  0xa8   : > { %v1808_v1 = vshrl.u32 %v1662_v10, 16  ;;  %v1811_v57 = vshll.u32 %v1662_v10, 16  ;;  %v2585_v50 = vshrl.u32 %v11920_v3, 16  ;;  %v2588_v61 = vshll.u32 %v11920_v3, 16 }
  0xa9   : > { %13306 = vmatmul.mubr.msk.bf16.gmra.mxu1 %vm1128_vm3, %v11969_v8  ;;  %v1792_v6 = vsel %vm14415_vm9, %v1783_v25, %v1791_v53  ;;  %v1800_v28 = vor.u32 %v1799_v32, %v1796_v48  ;;  %v19339_v56 = vshll.u32 %v14541_v54, 16  ;;  %v1804_v2 = vor.u32 %v1803_v7, %v1802_v34  ;;  %v11925_v34 = vld [vmem:[%s13934_s16 + $0x50] sm:$0x1] }
  0xaa   : > { %v11874_v62 = vcombine.low %v1782_v19, %v1792_v6  ;;  %v1810_v39 = vrot.slane %v1808_v1, 5  ;;  %v1813_v44 = vrot.slane %v1811_v57, 6  ;;  %v2587_v10 = vrot.slane %v2585_v50, 4 }
  0xab   : > { %v1801_v9 = vrot.slane %v1800_v28, 4  ;;  %v2590_v60 = vrot.slane %v2588_v61, 5  ;;  %v2596_v30 = vrot.slane %v19339_v56, 5  ;;  %v1806_v3 = vrot.slane %v1804_v2, 4  ;;  %v1663_v61 = vld [vmem:[%s13934_s16 + $0x50] sm:$0x3] }
  0xac   : > { %13269 = vmatprep.mubr.msk.bf16.mxu0 %vm1128_vm3, %v11874_v62  ;;  %v1814_v40 = vor.u32 %v1813_v44, %v1810_v39  ;;  %v19340_v25 = vshrl.u32 %v14541_v54, 16  ;;  %v2604_v48 = vshll.u32 %v11922_v31, 16  ;;  %v2609_v19 = vshrl.u32 %v11923_v11, 16  ;;  %v13649_v62 = vld [vmem:[%s19297_s1 + $0x68] sm:$0xff]  }
  0xad   : > { %v1805_v63 = vsel %vm14415_vm9, %v1801_v9, %v1804_v2  ;;  %v2591_v8 = vor.u32 %v2590_v60, %v2587_v10  ;;  %v2612_v53 = vshll.u32 %v11923_v11, 16  ;;  %v19337_v57 = vshll.u32 %v14564_v52, 16  ;;  %v13744_v60 = vld [vmem:[%s13934_s16 + $0x48] sm:$0xe]  ;;  %13417 = vmatprep.subr.bf16.mxu0 %v13649_v62 }
  0xae   : > { %v1815_v32 = vsel %vm14415_vm9, %v1806_v3, %v1814_v40  ;;  %v2600_v7 = vrot.slane %v19340_v25, 4  ;;  %v2606_v1 = vrot.slane %v2604_v48, 5  ;;  %v2611_v31 = vrot.slane %v2609_v19, 4  ;;  %v14857_v25 = vld [vmem:[%s13934_s16 + $0xc4] sm:$0xf] }
  0xaf   : > { %v11875_v50 = vcombine.low %v1805_v63, %v1815_v32  ;;  %v2592_v6 = vrot.slane %v2591_v8, 4  ;;  %v2614_v28 = vrot.slane %v2612_v53, 5  ;;  %v2620_v39 = vrot.slane %v19337_v57, 5 }
  0xb0   : > { %v2601_v2 = vor.u32 %v2600_v7, %v2596_v30  ;;  %v19338_v44 = vshrl.u32 %v14564_v52, 16  ;;  %v2628_v11 = vshll.u32 %v11925_v34, 16  ;;  %v1817_v3 = vshrl.u32 %v13744_v60, 16 }
  0xb1   : > { %13270 = vmatmul.mubr.msk.bf16.gmra.mxu0 %vm1128_vm3, %v11875_v50  ;;  %v2597_v9 = vsel %vm13991_vm6, %v2592_v6, %v2596_v30  ;;  %v2615_v10 = vor.u32 %v2614_v28, %v2611_v31  ;;  %v1820_v40 = vshll.u32 %v13744_v60, 16  ;;  %v1825_v19 = vrot.slane %v578_v16, 5  ;;  %v1664_v28 = vld [vmem:[%s13934_s16 + $0x5c] sm:$0x3] }
  0xb2   : > { %v2602_v48 = vrot.slane %v2601_v2, 4  ;;  %v2624_v63 = vrot.slane %v19338_v44, 4  ;;  %v2630_v8 = vrot.slane %v2628_v11, 5  ;;  %v1819_v53 = vrot.slane %v1817_v3, 5  ;;  %v13745_v3 = vld [vmem:[%s13934_s16 + $0x54] sm:$0xe] }
  0xb3   : > { %v2616_v34 = vrot.slane %v2615_v10, 4  ;;  %v1822_v32 = vrot.slane %v1820_v40, 6  ;;  %v1826_v30 = vrot.slane %v574_v14, 6  ;;  %v1831_v6 = vshrl.u32 %v1663_v61, 16  ;;  %v11926_v40 = vld [vmem:[%s13934_s16 + $0x54] sm:$0xf] }
  0xb4   : > { %v2607_v7 = vsel %vm13991_vm6, %v2602_v48, %v2606_v1  ;;  %v2625_v50 = vor.u32 %v2624_v63, %v2620_v39  ;;  %v1834_v31 = vshll.u32 %v1663_v61, 16  ;;  %v1840_v14 = vshrl.u32 %v13745_v3, 16  ;;  %v14604_v63 = vld [vmem:[%s13934_s16 + $0x58] sm:$0xf] }
  0xb5   : > { %v11970_v62 = vcombine.low %v2597_v9, %v2607_v7  ;;  %v2621_v16 = vsel %vm13991_vm6, %v2616_v34, %v2620_v39  ;;  %v1823_v2 = vor.u32 %v1822_v32, %v1819_v53  ;;  %v1827_v11 = vor.u32 %v1826_v30, %v1825_v19  ;;  %v11928_v32 = vld [vmem:[%s13934_s16 + $0x5c] sm:$0x1] }
  0xb6   : > { %v2626_v10 = vrot.slane %v2625_v50, 4  ;;  %v1833_v60 = vrot.slane %v1831_v6, 5  ;;  %v1836_v5 = vrot.slane %v1834_v31, 6  ;;  %v1843_v48 = vshll.u32 %v13745_v3, 16  ;;  %v11929_v31 = vld [vmem:[%s13934_s16 + $0x60] sm:$0xf] }
  0xb7   : > { %13309 = vmatprep.mubr.msk.bf16.mxu1 %vm1128_vm3, %v11970_v62  ;;  %v1824_v1 = vrot.slane %v1823_v2, 4  ;;  %v1829_v61 = vrot.slane %v1827_v11, 4  ;;  %v1848_v9 = vrot.slane %v602_v37, 5  ;;  %v1842_v34 = vrot.slane %v1840_v14, 5 }
  0xb8   : > { %v2631_v39 = vsel %vm13991_vm6, %v2626_v10, %v2630_v8  ;;  %v1837_v19 = vor.u32 %v1836_v5, %v1833_v60  ;;  %v1849_v53 = vrot.slane %v598_v35, 6  ;;  %v1845_v50 = vrot.slane %v1843_v48, 6 }
  0xb9   : > { %v11971_v30 = vcombine.low %v2621_v16, %v2631_v39  ;;  %v1828_v7 = vsel %vm14415_vm9, %v1824_v1, %v1827_v11  ;;  %v1854_v6 = vshrl.u32 %v1664_v28, 16  ;;  %v1857_v2 = vshll.u32 %v1664_v28, 16  ;;  %v14618_v16 = vld [vmem:[%s13934_s16 + $0x64] sm:$0xf] }
  0xba   : > { %v1838_v37 = vsel %vm14415_vm9, %v1829_v61, %v1837_v19  ;;  %v1850_v62 = vor.u32 %v1849_v53, %v1848_v9  ;;  %v2633_v8 = vshrl.u32 %v11926_v40, 16  ;;  %v1846_v35 = vor.u32 %v1845_v50, %v1842_v34  ;;  %v11931_v9 = vld [vmem:[%s13934_s16 + $0x68] sm:$0x1] }
  0xbb   : > { %13310 = vmatmul.mubr.msk.bf16.gmra.mxu1 %vm1128_vm3, %v11971_v30  ;;  %v11876_v15 = vcombine.low %v1828_v7, %v1838_v37  ;;  %v1856_v10 = vrot.slane %v1854_v6, 5  ;;  %v2636_v60 = vshll.u32 %v11926_v40, 16  ;;  %v1859_v11 = vrot.slane %v1857_v2, 6 }
  0xbc   : > { %v1852_v5 = vrot.slane %v1850_v62, 4  ;;  %v2635_v3 = vrot.slane %v2633_v8, 4  ;;  %v19335_v14 = vshll.u32 %v14604_v63, 16  ;;  %v1847_v1 = vrot.slane %v1846_v35, 4 }
  0xbd   : > { %13273 = vmatprep.mubr.msk.bf16.mxu0 %vm1128_vm3, %v11876_v15  ;;  %v2638_v61 = vrot.slane %v2636_v60, 5  ;;  %v19336_v28 = vshrl.u32 %v14604_v63, 16  ;;  %v2652_v48 = vshll.u32 %v11928_v32, 16  ;;  %v1860_v39 = vor.u32 %v1859_v11, %v1856_v10  ;;  %v13746_v11 = vld [vmem:[%s13934_s16 + $0x60] sm:$0xe] }
  0xbe   : > { %v2644_v19 = vrot.slane %v19335_v14, 5  ;;  %v2657_v40 = vshrl.u32 %v11929_v31, 16  ;;  %v2660_v34 = vshll.u32 %v11929_v31, 16  ;;  %v1851_v53 = vsel %vm14415_vm9, %v1847_v1, %v1850_v62  ;;  %v1672_v14 = vld [vmem:[%s13934_s16 + $0xbc] sm:$0x3] }
  0xbf   : > { %v2639_v30 = vor.u32 %v2638_v61, %v2635_v3  ;;  %v2648_v7 = vrot.slane %v19336_v28, 4  ;;  %v2654_v50 = vrot.slane %v2652_v48, 5  ;;  %v1861_v6 = vsel %vm14415_vm9, %v1852_v5, %v1860_v39  ;;  %v1665_v48 = vld [vmem:[%s13934_s16 + $0x68] sm:$0x3]  ;;  %v13753_v28 = vld [vmem:[%s13934_s16 + $0xb4] sm:$0xe] }
  0xc0   : > { %v2659_v32 = vrot.slane %v2657_v40, 4  ;;  %v2662_v37 = vrot.slane %v2660_v34, 5  ;;  %v19331_v2 = vshll.u32 %v14618_v16, 16  ;;  %v11877_v8 = vcombine.low %v1851_v53, %v1861_v6 }
  0xc1   : > { %v2640_v15 = vrot.slane %v2639_v30, 4  ;;  %v2649_v31 = vor.u32 %v2648_v7, %v2644_v19  ;;  %v19332_v35 = vshrl.u32 %v14618_v16, 16  ;;  %v2676_v60 = vshll.u32 %v11931_v9, 16 }
  0xc2   : > { %v2663_v10 = vor.u32 %v2662_v37, %v2659_v32  ;;  %v2668_v62 = vrot.slane %v19331_v2, 5  ;;  %v1863_v3 = vshrl.u32 %v13746_v11, 16  ;;  %13274 = vmatmul.mubr.msk.bf16.gmra.mxu0 %vm1128_vm3, %v11877_v8  ;;  %v1866_v39 = vshll.u32 %v13746_v11, 16  ;;  %v1666_v11 = vld [vmem:[%s13934_s16 + $0x74] sm:$0x3] }
  0xc3   : > { %v2645_v5 = vsel %vm13991_vm6, %v2640_v15, %v2644_v19  ;;  %v2650_v1 = vrot.slane %v2649_v31, 4  ;;  %v2672_v61 = vrot.slane %v19332_v35, 4  ;;  %v2678_v34 = vrot.slane %v2676_v60, 5 }
  0xc4   : > { %v2664_v40 = vrot.slane %v2663_v10, 4  ;;  %v1865_v53 = vrot.slane %v1863_v3, 5  ;;  %v1871_v9 = vrot.slane %v626_v17, 5  ;;  %v1868_v6 = vrot.slane %v1866_v39, 6  ;;  %v13747_v17 = vld [vmem:[%s13934_s16 + $0x6c] sm:$0xe] }
  0xc5   : > { %v2655_v30 = vsel %vm13991_vm6, %v2650_v1, %v2654_v50  ;;  %v2673_v7 = vor.u32 %v2672_v61, %v2668_v62  ;;  %v1872_v19 = vrot.slane %v622_v33, 6  ;;  %v1877_v8 = vshrl.u32 %v1665_v48, 16  ;;  %v11932_v61 = vld [vmem:[%s13934_s16 + $0x6c] sm:$0xf] }
  0xc6   : > { %v11972_v32 = vcombine.low %v2645_v5, %v2655_v30  ;;  %v2669_v37 = vsel %vm13991_vm6, %v2664_v40, %v2668_v62  ;;  %v1880_v15 = vshll.u32 %v1665_v48, 16  ;;  %v1869_v10 = vor.u32 %v1868_v6, %v1865_v53 }
  0xc7   : > { %v2674_v31 = vrot.slane %v2673_v7, 4  ;;  %v1873_v60 = vor.u32 %v1872_v19, %v1871_v9  ;;  %v1886_v3 = vshrl.u32 %v13747_v17, 16  ;;  %v1879_v50 = vrot.slane %v1877_v8, 5 }
  0xc8   : > { %13313 = vmatprep.mubr.msk.bf16.mxu1 %vm1128_vm3, %v11972_v32  ;;  %v1882_v1 = vrot.slane %v1880_v15, 6  ;;  %v1889_v41 = vshll.u32 %v13747_v17, 16  ;;  %v19425_v33 = vshrl.u32 %v14150_v36, 16  ;;  %v1870_v48 = vrot.slane %v1869_v10, 4  ;;  %v14664_v15 = vld [vmem:[%s13934_s16 + $0x70] sm:$0xf] }
  0xc9   : > { %v2679_v62 = vsel %vm13991_vm6, %v2674_v31, %v2678_v34  ;;  %v1875_v39 = vrot.slane %v1873_v60, 4  ;;  %v1888_v40 = vrot.slane %v1886_v3, 5  ;;  %v19426_v7 = vshll.u32 %v14150_v36, 16  ;;  %v11934_v10 = vld [vmem:[%s13934_s16 + $0x74] sm:$0x1] }
  0xca   : > { %v1894_v5 = vrot.slane %v19425_v33, 5  ;;  %v11973_v53 = vcombine.low %v2669_v37, %v2679_v62  ;;  %v1883_v9 = vor.u32 %v1882_v1, %v1879_v50  ;;  %v1891_v30 = vrot.slane %v1889_v41, 6  ;;  %v11935_v36 = vld [vmem:[%s13934_s16 + $0x78] sm:$0xf] }
  0xcb   : > { %v1895_v6 = vrot.slane %v19426_v7, 6  ;;  %v1874_v19 = vsel %vm14415_vm9, %v1870_v48, %v1873_v60  ;;  %v1900_v32 = vshrl.u32 %v1666_v11, 16  ;;  %v1903_v8 = vshll.u32 %v1666_v11, 16 }
  0xcc   : > { %v2681_v17 = vshrl.u32 %v11932_v61, 16  ;;  %13314 = vmatmul.mubr.msk.bf16.gmra.mxu1 %vm1128_vm3, %v11973_v53  ;;  %v1884_v34 = vsel %vm14415_vm9, %v1875_v39, %v1883_v9  ;;  %v1892_v31 = vor.u32 %v1891_v30, %v1888_v40  ;;  %v2684_v3 = vshll.u32 %v11932_v61, 16  ;;  %v14675_v40 = vld [vmem:[%s13934_s16 + $0x7c] sm:$0xf] }
  0xcd   : > { %v1896_v37 = vor.u32 %v1895_v6, %v1894_v5  ;;  %v11878_v50 = vcombine.low %v1874_v19, %v1884_v34  ;;  %v1902_v1 = vrot.slane %v1900_v32, 5  ;;  %v1905_v60 = vrot.slane %v1903_v8, 6  ;;  %v11937_v6 = vld [vmem:[%s13934_s16 + $0x80] sm:$0x1] }
  0xce   : > { %v2683_v41 = vrot.slane %v2681_v17, 4  ;;  %v1893_v11 = vrot.slane %v1892_v31, 4  ;;  %v2686_v62 = vrot.slane %v2684_v3, 5  ;;  %v19323_v48 = vshll.u32 %v14664_v15, 16 }
  0xcf   : > { %v1898_v33 = vrot.slane %v1896_v37, 4  ;;  %13277 = vmatprep.mubr.msk.bf16.mxu0 %vm1128_vm3, %v11878_v50  ;;  %v1906_v53 = vor.u32 %v1905_v60, %v1902_v1  ;;  %v19324_v39 = vshrl.u32 %v14664_v15, 16  ;;  %v2700_v5 = vshll.u32 %v11934_v10, 16 }
  0xd0   : > { %v2705_v61 = vshrl.u32 %v11935_v36, 16  ;;  %v1897_v9 = vsel %vm14415_vm9, %v1893_v11, %v1896_v37  ;;  %v2687_v30 = vor.u32 %v2686_v62, %v2683_v41  ;;  %v2692_v7 = vrot.slane %v19323_v48, 5  ;;  %v13748_v41 = vld [vmem:[%s13934_s16 + $0x78] sm:$0xe] }
  0xd1   : > { %v2708_v19 = vshll.u32 %v11935_v36, 16  ;;  %v1907_v32 = vsel %vm14415_vm9, %v1898_v33, %v1906_v53  ;;  %v2696_v8 = vrot.slane %v19324_v39, 4  ;;  %v2702_v17 = vrot.slane %v2700_v5, 5  ;;  %v1667_v53 = vld [vmem:[%s13934_s16 + $0x80] sm:$0x3] }
  0xd2   : > { %v2707_v34 = vrot.slane %v2705_v61, 4  ;;  %v11879_v31 = vcombine.low %v1897_v9, %v1907_v32  ;;  %v2688_v10 = vrot.slane %v2687_v30, 4  ;;  %v19321_v37 = vshll.u32 %v14675_v40, 16  ;;  %v13749_v39 = vld [vmem:[%s13934_s16 + $0x84] sm:$0xe] }
  0xd3   : > { %v2710_v3 = vrot.slane %v2708_v19, 5  ;;  %v2697_v50 = vor.u32 %v2696_v8, %v2692_v7  ;;  %v19322_v1 = vshrl.u32 %v14675_v40, 16  ;;  %v2724_v60 = vshll.u32 %v11937_v6, 16 }
  0xd4   : > { %v1909_v36 = vshrl.u32 %v13748_v41, 16  ;;  %13278 = vmatmul.mubr.msk.bf16.gmra.mxu0 %vm1128_vm3, %v11879_v31  ;;  %v2693_v11 = vsel %vm13991_vm6, %v2688_v10, %v2692_v7  ;;  %v2716_v62 = vrot.slane %v19321_v37, 5  ;;  %v1912_v5 = vshll.u32 %v13748_v41, 16 }
  0xd5   : > { %v2711_v33 = vor.u32 %v2710_v3, %v2707_v34  ;;  %v2698_v61 = vrot.slane %v2697_v50, 4  ;;  %v2720_v9 = vrot.slane %v19322_v1, 4  ;;  %v2726_v30 = vrot.slane %v2724_v60, 5 }
  0xd6   : > { %v1911_v19 = vrot.slane %v1909_v36, 5  ;;  %v1914_v32 = vrot.slane %v1912_v5, 6  ;;  %v19427_v8 = vshrl.u32 %v14189_v47, 16  ;;  %v19428_v7 = vshll.u32 %v14189_v47, 16 }
  0xd7   : > { %v2712_v6 = vrot.slane %v2711_v33, 4  ;;  %v2703_v10 = vsel %vm13991_vm6, %v2698_v61, %v2702_v17  ;;  %v2721_v3 = vor.u32 %v2720_v9, %v2716_v62  ;;  %v1923_v50 = vshrl.u32 %v1667_v53, 16 }
  0xd8   : > { %v1917_v31 = vrot.slane %v19427_v8, 5  ;;  %v1918_v34 = vrot.slane %v19428_v7, 6  ;;  %v1926_v41 = vshll.u32 %v1667_v53, 16  ;;  %v11974_v37 = vcombine.low %v2693_v11, %v2703_v10  ;;  %v1668_v8 = vld [vmem:[%s13934_s16 + $0x8c] sm:$0x3] }
  0xd9   : > { %v2717_v60 = vsel %vm13991_vm6, %v2712_v6, %v2716_v62  ;;  %v1915_v36 = vor.u32 %v1914_v32, %v1911_v19  ;;  %v2722_v5 = vrot.slane %v2721_v3, 4  ;;  %v1925_v1 = vrot.slane %v1923_v50, 5  ;;  %v11938_v7 = vld [vmem:[%s13934_s16 + $0x84] sm:$0xf] }
  0xda   : > { %v1919_v33 = vor.u32 %v1918_v34, %v1917_v31  ;;  %v1928_v48 = vrot.slane %v1926_v41, 6  ;;  %v1932_v47 = vshrl.u32 %v13749_v39, 16  ;;  %13317 = vmatprep.mubr.msk.bf16.mxu1 %vm1128_vm3, %v11974_v37  ;;  %v1935_v53 = vshll.u32 %v13749_v39, 16  ;;  %v14718_v39 = vld [vmem:[%s13934_s16 + $0x88] sm:$0xf] }
  0xdb   : > { %v1916_v17 = vrot.slane %v1915_v36, 4  ;;  %v19429_v11 = vshrl.u32 %v14204_v12, 16  ;;  %v2727_v62 = vsel %vm13991_vm6, %v2722_v5, %v2726_v30  ;;  %v19430_v32 = vshll.u32 %v14204_v12, 16  ;;  %v11940_v30 = vld [vmem:[%s13934_s16 + $0x8c] sm:$0x1] }
  0xdc   : > { %v1921_v61 = vrot.slane %v1919_v33, 4  ;;  %v1929_v19 = vor.u32 %v1928_v48, %v1925_v1  ;;  %v1934_v6 = vrot.slane %v1932_v47, 5  ;;  %v11975_v34 = vcombine.low %v2717_v60, %v2727_v62  ;;  %v11941_v47 = vld [vmem:[%s13934_s16 + $0x90] sm:$0xf] }
  0xdd   : > { %v1940_v9 = vrot.slane %v19429_v11, 5  ;;  %v1941_v31 = vrot.slane %v19430_v32, 6  ;;  %v1920_v37 = vsel %vm14415_vm9, %v1916_v17, %v1919_v33  ;;  %v1937_v10 = vrot.slane %v1935_v53, 6 }
  0xde   : > { %v1946_v3 = vshrl.u32 %v1668_v8, 16  ;;  %v1930_v50 = vsel %vm14415_vm9, %v1921_v61, %v1929_v19  ;;  %v1949_v36 = vshll.u32 %v1668_v8, 16  ;;  %v2729_v48 = vshrl.u32 %v11938_v7, 16  ;;  %13318 = vmatmul.mubr.msk.bf16.gmra.mxu1 %vm1128_vm3, %v11975_v34  ;;  %v14729_v19 = vld [vmem:[%s13934_s16 + $0x94] sm:$0xf] }
  0xdf   : > { %v1942_v41 = vor.u32 %v1941_v31, %v1940_v9  ;;  %v11880_v12 = vcombine.low %v1920_v37, %v1930_v50  ;;  %v1938_v1 = vor.u32 %v1937_v10, %v1934_v6  ;;  %v2732_v5 = vshll.u32 %v11938_v7, 16  ;;  %v11943_v50 = vld [vmem:[%s13934_s16 + $0x98] sm:$0x1] }
  0xe0   : > { %v1948_v60 = vrot.slane %v1946_v3, 5  ;;  %v1951_v17 = vrot.slane %v1949_v36, 6  ;;  %v2731_v53 = vrot.slane %v2729_v48, 4  ;;  %v19327_v11 = vshll.u32 %v14718_v39, 16 }
  0xe1   : > { %v1944_v33 = vrot.slane %v1942_v41, 4  ;;  %13281 = vmatprep.mubr.msk.bf16.mxu0 %vm1128_vm3, %v11880_v12  ;;  %v1939_v61 = vrot.slane %v1938_v1, 4  ;;  %v2734_v8 = vrot.slane %v2732_v5, 5  ;;  %v19328_v9 = vshrl.u32 %v14718_v39, 16 }
  0xe2   : > { %v2748_v62 = vshll.u32 %v11940_v30, 16  ;;  %v1952_v32 = vor.u32 %v1951_v17, %v1948_v60  ;;  %v2740_v7 = vrot.slane %v19327_v11, 5  ;;  %v2753_v6 = vshrl.u32 %v11941_v47, 16  ;;  %v1670_v11 = vld [vmem:[%s13934_s16 + $0xa4] sm:$0x3] }
  0xe3   : > { %v2756_v31 = vshll.u32 %v11941_v47, 16  ;;  %v1943_v34 = vsel %vm14415_vm9, %v1939_v61, %v1942_v41  ;;  %v2735_v37 = vor.u32 %v2734_v8, %v2731_v53  ;;  %v2744_v10 = vrot.slane %v19328_v9, 4  ;;  %v13750_v61 = vld [vmem:[%s13934_s16 + $0x90] sm:$0xe] }
  0xe4   : > { %v2750_v3 = vrot.slane %v2748_v62, 5  ;;  %v1953_v36 = vsel %vm14415_vm9, %v1944_v33, %v1952_v32  ;;  %v2755_v30 = vrot.slane %v2753_v6, 4  ;;  %v19325_v12 = vshll.u32 %v14729_v19, 16  ;;  %v1669_v6 = vld [vmem:[%s13934_s16 + $0x98] sm:$0x3] }
  0xe5   : > { %v2758_v48 = vrot.slane %v2756_v31, 5  ;;  %v11881_v1 = vcombine.low %v1943_v34, %v1953_v36  ;;  %v2736_v60 = vrot.slane %v2735_v37, 4  ;;  %v2745_v5 = vor.u32 %v2744_v10, %v2740_v7 }
  0xe6   : > { %v19326_v41 = vshrl.u32 %v14729_v19, 16  ;;  %v2764_v17 = vrot.slane %v19325_v12, 5  ;;  %v2772_v53 = vshll.u32 %v11943_v50, 16  ;;  %v1955_v8 = vshrl.u32 %v13750_v61, 16 }
  0xe7   : > { %v2759_v47 = vor.u32 %v2758_v48, %v2755_v30  ;;  %13282 = vmatmul.mubr.msk.bf16.gmra.mxu0 %vm1128_vm3, %v11881_v1  ;;  %v2741_v33 = vsel %vm13991_vm6, %v2736_v60, %v2740_v7  ;;  %v2746_v62 = vrot.slane %v2745_v5, 4  ;;  %v1958_v31 = vshll.u32 %v13750_v61, 16 }
  0xe8   : > { %v2768_v32 = vrot.slane %v19326_v41, 4  ;;  %v2774_v37 = vrot.slane %v2772_v53, 5  ;;  %v1957_v10 = vrot.slane %v1955_v8, 5  ;;  %v19431_v50 = vshrl.u32 %v14245_v49, 16 }
  0xe9   : > { %v2760_v34 = vrot.slane %v2759_v47, 4  ;;  %v2751_v30 = vsel %vm13991_vm6, %v2746_v62, %v2750_v3  ;;  %v1960_v1 = vrot.slane %v1958_v31, 6  ;;  %v19432_v7 = vshll.u32 %v14245_v49, 16  ;;  %v11944_v31 = vld [vmem:[%s13934_s16 + $0x9c] sm:$0xf] }
  0xea   : > { %v1963_v36 = vrot.slane %v19431_v50, 5  ;;  %v2769_v48 = vor.u32 %v2768_v32, %v2764_v17  ;;  %v11976_v5 = vcombine.low %v2741_v33, %v2751_v30  ;;  %v1969_v47 = vshrl.u32 %v1669_v6, 16  ;;  %v13751_v50 = vld [vmem:[%s13934_s16 + $0x9c] sm:$0xe] }
  0xeb   : > { %v1964_v60 = vrot.slane %v19432_v7, 6  ;;  %v2765_v61 = vsel %vm13991_vm6, %v2760_v34, %v2764_v17  ;;  %v1972_v12 = vshll.u32 %v1669_v6, 16  ;;  %v1961_v8 = vor.u32 %v1960_v1, %v1957_v10 }
  0xec   : > { %v2770_v53 = vrot.slane %v2769_v48, 4  ;;  %v1978_v9 = vshrl.u32 %v13751_v50, 16  ;;  %13321 = vmatprep.mubr.msk.bf16.mxu1 %vm1128_vm3, %v11976_v5  ;;  %v1971_v3 = vrot.slane %v1969_v47, 5  ;;  %v1981_v49 = vshll.u32 %v13751_v50, 16  ;;  %v14772_v47 = vld [vmem:[%s13934_s16 + $0xa0] sm:$0xf] }
  0xed   : > { %v1965_v41 = vor.u32 %v1964_v60, %v1963_v36  ;;  %v1974_v62 = vrot.slane %v1972_v12, 6  ;;  %v19433_v32 = vshrl.u32 %v14259_v0, 16  ;;  %v1962_v6 = vrot.slane %v1961_v8, 4 }
  0xee   : > { %v2775_v17 = vsel %vm13991_vm6, %v2770_v53, %v2774_v37  ;;  %v1980_v10 = vrot.slane %v1978_v9, 5  ;;  %v1983_v48 = vrot.slane %v1981_v49, 6  ;;  %v19434_v1 = vshll.u32 %v14259_v0, 16  ;;  %v14774_v37 = vpop.f32.mrf.mxu0  ;;  %v11946_v0 = vld [vmem:[%s13934_s16 + $0xa4] sm:$0x1] }
  0xef   : > { %v1986_v33 = vrot.slane %v19433_v32, 5  ;;  %v1967_v34 = vrot.slane %v1965_v41, 4  ;;  %v11977_v36 = vcombine.low %v2765_v61, %v2775_v17  ;;  %v1975_v30 = vor.u32 %v1974_v62, %v1971_v3  ;;  %19435 = vst [vmem:[#allocation5_spill] sm:$0xff] %v14774_v37  ;;  %v11947_v3 = vld [vmem:[%s13934_s16 + $0xa8] sm:$0xf] }
  0xf0   : > { %v1987_v7 = vrot.slane %v19434_v1, 6  ;;  %v1966_v12 = vsel %vm14415_vm9, %v1962_v6, %v1965_v41  ;;  %v1992_v60 = vshrl.u32 %v1670_v11, 16  ;;  %v1995_v5 = vshll.u32 %v1670_v11, 16 }
  0xf1   : > { %v2777_v50 = vshrl.u32 %v11944_v31, 16  ;;  %13322 = vmatmul.mubr.msk.bf16.gmra.mxu1 %vm1128_vm3, %v11977_v36  ;;  %v1976_v9 = vsel %vm14415_vm9, %v1967_v34, %v1975_v30  ;;  %v1984_v61 = vor.u32 %v1983_v48, %v1980_v10  ;;  %v2780_v8 = vshll.u32 %v11944_v31, 16  ;;  %v14785_v10 = vld [vmem:[%s13934_s16 + $0xac] sm:$0xf]  ;;  %v14787_v30 = vpop.f32.mrf.mxu0 }
  0xf2   : > { %v1988_v53 = vor.u32 %v1987_v7, %v1986_v33  ;;  %v11882_v62 = vcombine.low %v1966_v12, %v1976_v9  ;;  %v1994_v41 = vrot.slane %v1992_v60, 5  ;;  %v1997_v49 = vrot.slane %v1995_v5, 6  ;;  %19436 = vst [vmem:[#allocation6_spill] sm:$0xff] %v14787_v30  ;;  %v11949_v60 = vld [vmem:[%s13934_s16 + $0xb0] sm:$0x1] }
  0xf3   : > { %v2779_v11 = vrot.slane %v2777_v50, 4  ;;  %v1985_v32 = vrot.slane %v1984_v61, 4  ;;  %v2782_v6 = vrot.slane %v2780_v8, 5  ;;  %v19329_v1 = vshll.u32 %v14772_v47, 16 }
  0xf4   : > { %v1990_v17 = vrot.slane %v1988_v53, 4  ;;  %13285 = vmatprep.mubr.msk.bf16.mxu0 %vm1128_vm3, %v11882_v62  ;;  %v1998_v36 = vor.u32 %v1997_v49, %v1994_v41  ;;  %v19330_v34 = vshrl.u32 %v14772_v47, 16  ;;  %v2796_v33 = vshll.u32 %v11946_v0, 16 }
  0xf5   : > { %v2801_v31 = vshrl.u32 %v11947_v3, 16  ;;  %v1989_v48 = vsel %vm14415_vm9, %v1985_v32, %v1988_v53  ;;  %v2783_v7 = vor.u32 %v2782_v6, %v2779_v11  ;;  %v2788_v12 = vrot.slane %v19329_v1, 5  ;;  %v13752_v6 = vld [vmem:[%s13934_s16 + $0xa8] sm:$0xe]  ;;  %v14801_v1 = vpop.f32.mrf.mxu0 }
  0xf6   : > { %v2804_v5 = vshll.u32 %v11947_v3, 16  ;;  %v1999_v50 = vsel %vm14415_vm9, %v1990_v17, %v1998_v36  ;;  %v2792_v9 = vrot.slane %v19330_v34, 4  ;;  %v2798_v61 = vrot.slane %v2796_v33, 5  ;;  %19437 = vst [vmem:[#allocation7_spill] sm:$0xff] %v14801_v1  ;;  %v14803_v17 = vpop.f32.mrf.mxu1 }
  0xf7   : > { %v2803_v0 = vrot.slane %v2801_v31, 4  ;;  %v11883_v8 = vcombine.low %v1989_v48, %v1999_v50  ;;  %v2784_v62 = vrot.slane %v2783_v7, 4  ;;  %v19333_v53 = vshll.u32 %v14785_v10, 16  ;;  %19438 = vst [vmem:[#allocation8_spill] sm:$0xff] %v14803_v17  ;;  %v1671_v48 = vld [vmem:[%s13934_s16 + $0xb0] sm:$0x3] }
  0xf8   : > { %v2806_v41 = vrot.slane %v2804_v5, 5  ;;  %v2793_v49 = vor.u32 %v2792_v9, %v2788_v12  ;;  %v19334_v11 = vshrl.u32 %v14785_v10, 16  ;;  %v2820_v32 = vshll.u32 %v11949_v60, 16 }
  0xf9   : > { %v2001_v3 = vshrl.u32 %v13752_v6, 16  ;;  %13286 = vmatmul.mubr.msk.bf16.gmra.mxu0 %vm1128_vm3, %v11883_v8  ;;  %v2789_v36 = vsel %vm13991_vm6, %v2784_v62, %v2788_v12  ;;  %v2812_v31 = vrot.slane %v19333_v53, 5  ;;  %v2004_v7 = vshll.u32 %v13752_v6, 16  ;;  %v14819_v53 = vpop.f32.mrf.mxu0 }
  0xfa   : > { %v2807_v33 = vor.u32 %v2806_v41, %v2803_v0  ;;  %v2794_v5 = vrot.slane %v2793_v49, 4  ;;  %v2816_v60 = vrot.slane %v19334_v11, 4  ;;  %v2822_v50 = vrot.slane %v2820_v32, 5  ;;  %19441 = vst [vmem:[#allocation9_spill] sm:$0xff] %v14819_v53  ;;  %v14821_v32 = vpop.f32.mrf.mxu1 }
  0xfb   : > { %v2003_v9 = vrot.slane %v2001_v3, 5  ;;  %v2006_v2 = vrot.slane %v2004_v7, 6  ;;  %v19439_v35 = vshrl.u32 %v14296_v22, 16  ;;  %v19440_v12 = vshll.u32 %v14296_v22, 16  ;;  %19442 = vst [vmem:[#allocation10_spill] sm:$0xff] %v14821_v32 }
  0xfc   : > { %v2808_v34 = vrot.slane %v2807_v33, 4  ;;  %v2799_v62 = vsel %vm13991_vm6, %v2794_v5, %v2798_v61  ;;  %v2817_v41 = vor.u32 %v2816_v60, %v2812_v31  ;;  %v2015_v49 = vshrl.u32 %v1671_v48, 16  ;;  %v14827_v5 = vpop.f32.mrf.mxu0 }
  0xfd   : > { %v2009_v8 = vrot.slane %v19439_v35, 5  ;;  %v2010_v0 = vrot.slane %v19440_v12, 6  ;;  %v2018_v6 = vshll.u32 %v1671_v48, 16  ;;  %v11978_v3 = vcombine.low %v2789_v36, %v2799_v62  ;;  %19443 = vst [vmem:[#allocation11_spill] sm:$0xff] %v14827_v5  ;;  %v14829_v48 = vpop.f32.mrf.mxu1  ;;  %v12160_v5 = vld [vmem:[%s13934_s16 + $0x60] sm:$0xf] }
  0xfe   : > { %v2813_v33 = vsel %vm13991_vm6, %v2808_v34, %v2812_v31  ;;  %v2007_v35 = vor.u32 %v2006_v2, %v2003_v9  ;;  %v2818_v22 = vrot.slane %v2817_v41, 4  ;;  %v2017_v11 = vrot.slane %v2015_v49, 5  ;;  %19444 = vst [vmem:[#allocation12_spill] sm:$0xff] %v14829_v48  ;;  %v11950_v9 = vld [vmem:[%s13934_s16 + $0xb4] sm:$0xf] }
  0xff   : > { %v2011_v7 = vor.u32 %v2010_v0, %v2009_v8  ;;  %v2020_v12 = vrot.slane %v2018_v6, 6  ;;  %v2024_v61 = vshrl.u32 %v13753_v28, 16  ;;  %13325 = vmatprep.mubr.msk.bf16.mxu1 %vm1128_vm3, %v11978_v3  ;;  %v2027_v34 = vshll.u32 %v13753_v28, 16  ;;  %v14842_v28 = vld [vmem:[%s13934_s16 + $0xb8] sm:$0xf] }
 0x100   : > { %v2008_v36 = vrot.slane %v2007_v35, 4  ;;  %v19445_v2 = vshrl.u32 %v14307_v27, 16  ;;  %v2823_v8 = vsel %vm13991_vm6, %v2818_v22, %v2822_v50  ;;  %v19446_v41 = vshll.u32 %v14307_v27, 16  ;;  %v11952_v50 = vld [vmem:[%s13934_s16 + $0xbc] sm:$0x1]  ;;  %v14847_v22 = vpop.f32.mrf.mxu0  ;;  %v14849_v27 = vpop.f32.mrf.mxu1 }
 0x101   : > { %v2013_v60 = vrot.slane %v2011_v7, 4  ;;  %v2021_v0 = vor.u32 %v2020_v12, %v2017_v11  ;;  %v2026_v62 = vrot.slane %v2024_v61, 5  ;;  %v11979_v6 = vcombine.low %v2813_v33, %v2823_v8  ;;  %19447 = vst [vmem:[#allocation13_spill] sm:$0xff] %v14847_v22  ;;  %19448 = vst [vmem:[#allocation14_spill] sm:$0xff] %v14849_v27 }
 0x102   : > { %v2032_v31 = vrot.slane %v19445_v2, 5  ;;  %v2033_v49 = vrot.slane %v19446_v41, 6  ;;  %v2012_v3 = vsel %vm14415_vm9, %v2008_v36, %v2011_v7  ;;  %v2029_v35 = vrot.slane %v2027_v34, 6  ;;  %v11953_v36 = vld [vmem:[%s13934_s16 + $0xc0] sm:$0xf] }
 0x103   : > { %v2038_v57 = vshrl.u32 %v1672_v14, 16  ;;  %v2022_v2 = vsel %vm14415_vm9, %v2013_v60, %v2021_v0  ;;  %v2041_v56 = vshll.u32 %v1672_v14, 16  ;;  %v2825_v11 = vshrl.u32 %v11950_v9, 16  ;;  %13326 = vmatmul.mubr.msk.bf16.gmra.mxu1 %vm1128_vm3, %v11979_v6 }
 0x104   : > { %v2034_v44 = vor.u32 %v2033_v49, %v2032_v31  ;;  %v11884_v33 = vcombine.low %v2012_v3, %v2022_v2  ;;  %v2030_v7 = vor.u32 %v2029_v35, %v2026_v62  ;;  %v2828_v61 = vshll.u32 %v11950_v9, 16  ;;  %v14863_v3 = vpop.f32.mrf.mxu1 }
 0x105   : > { %v2040_v12 = vrot.slane %v2038_v57, 5  ;;  %v2043_v8 = vrot.slane %v2041_v56, 6  ;;  %v2827_v41 = vrot.slane %v2825_v11, 4  ;;  %v19341_v60 = vshll.u32 %v14842_v28, 16  ;;  %v14861_v56 = vpop.f32.mrf.mxu0  ;;  %19450 = vst [vmem:[#allocation16_spill] sm:$0xff] %v14863_v3 }
 0x106   : > { %v2036_v34 = vrot.slane %v2034_v44, 4  ;;  %13289 = vmatprep.mubr.msk.bf16.mxu0 %vm1128_vm3, %v11884_v33  ;;  %v2031_v14 = vrot.slane %v2030_v7, 4  ;;  %v2830_v31 = vrot.slane %v2828_v61, 5  ;;  %v19343_v0 = vshrl.u32 %v14842_v28, 16  ;;  %19449 = vst [vmem:[#allocation15_spill] sm:$0xff] %v14861_v56 }
 0x107   : > { %v2844_v49 = vshll.u32 %v11952_v50, 16  ;;  %v2044_v6 = vor.u32 %v2043_v8, %v2040_v12  ;;  %v2836_v57 = vrot.slane %v19341_v60, 5  ;;  %v2849_v9 = vshrl.u32 %v11953_v36, 16  ;;  %v11955_v33 = vld [vmem:[%s13934_s16 + $0xc8] sm:$0x1] }
 0x108   : > { %v2852_v62 = vshll.u32 %v11953_v36, 16  ;;  %v2035_v35 = vsel %vm14415_vm9, %v2031_v14, %v2034_v44  ;;  %v2831_v2 = vor.u32 %v2830_v31, %v2827_v41  ;;  %v2840_v11 = vrot.slane %v19343_v0, 4  ;;  %v14874_v41 = vpop.f32.mrf.mxu0  ;;  %v14876_v14 = vpop.f32.mrf.mxu1  ;;  %v12017_v3 = vld [vmem:[%s13934_s16 + $0xa8] sm:$0xe] }
 0x109   : > { %v2846_v50 = vrot.slane %v2844_v49, 5  ;;  %v2045_v7 = vsel %vm14415_vm9, %v2036_v34, %v2044_v6  ;;  %v2851_v12 = vrot.slane %v2849_v9, 4  ;;  %v19345_v36 = vshll.u32 %v14857_v25, 16  ;;  %19451 = vst [vmem:[#allocation17_spill] sm:$0xff] %v14874_v41  ;;  %19452 = vst [vmem:[#allocation18_spill] sm:$0xff] %v14876_v14 }
 0x10a   : > { %v2854_v61 = vrot.slane %v2852_v62, 5  ;;  %v11885_v8 = vcombine.low %v2035_v35, %v2045_v7  ;;  %v2832_v60 = vrot.slane %v2831_v2, 4  ;;  %v2841_v20 = vor.u32 %v2840_v11, %v2836_v57  ;;  %v13754_v34 = vld [vmem:[%s13934_s16 + $0xc0] sm:$0xe]  ;;  %v1673_v2 = vld [vmem:[%s13934_s16 + $0xc8] sm:$0x3] }
 0x10b   : > { %v19346_v44 = vshrl.u32 %v14857_v25, 16  ;;  %v2860_v49 = vrot.slane %v19345_v36, 5  ;;  %v2868_v0 = vshll.u32 %v11955_v33, 16  ;;  %v2047_v6 = vshrl.u32 %v13754_v34, 16  ;;  %v13778_v41 = vld [vmem:[%s13934_s16 + $0x8c] sm:$0x1] }
 0x10c   : > { %v2855_v31 = vor.u32 %v2854_v61, %v2851_v12  ;;  %13290 = vmatmul.mubr.msk.bf16.gmra.mxu0 %vm1128_vm3, %v11885_v8  ;;  %v2837_v9 = vsel %vm13991_vm6, %v2832_v60, %v2836_v57  ;;  %v2842_v62 = vrot.slane %v2841_v20, 4  ;;  %v2050_v11 = vshll.u32 %v13754_v34, 16  ;;  %v14893_v60 = vpop.f32.mrf.mxu0  ;;  %v14895_v57 = vpop.f32.mrf.mxu1  ;;  %v13782_v14 = vld [vmem:[%s13934_s16 + $0xa4] sm:$0x1] }
 0x10d   : > { %v2864_v35 = vrot.slane %v19346_v44, 4  ;;  %v2870_v46 = vrot.slane %v2868_v0, 5  ;;  %v2049_v12 = vrot.slane %v2047_v6, 5  ;;  %v2055_v33 = vrot.slane %v818_v24, 5  ;;  %19453 = vst [vmem:[#allocation19_spill] sm:$0xff] %v14893_v60  ;;  %19454 = vst [vmem:[#allocation20_spill] sm:$0xff] %v14895_v57 }
 0x10e   : > { %v2856_v7 = vrot.slane %v2855_v31, 4  ;;  %v2847_v61 = vsel %vm13991_vm6, %v2842_v62, %v2846_v50  ;;  %v2052_v36 = vrot.slane %v2050_v11, 6  ;;  %v2056_v20 = vrot.slane %v814_v21, 6  ;;  %v1674_v50 = vld [vmem:[%s13934_s16 + $0xd4] sm:$0x3] }
 0x10f   : > { %v2865_v8 = vor.u32 %v2864_v35, %v2860_v49  ;;  %v11980_v0 = vcombine.low %v2837_v9, %v2847_v61  ;;  %v2061_v34 = vshrl.u32 %v1673_v2, 16  ;;  %v2064_v6 = vshll.u32 %v1673_v2, 16  ;;  %v13755_v62 = vld [vmem:[%s13934_s16 + $0xcc] sm:$0xe] }
 0x110   : > { %v2861_v31 = vsel %vm13991_vm6, %v2856_v7, %v2860_v49  ;;  %v2053_v44 = vor.u32 %v2052_v36, %v2049_v12  ;;  %v2057_v13 = vor.u32 %v2056_v20, %v2055_v33  ;;  %v2070_v35 = vshrl.u32 %v13755_v62, 16  ;;  %v11956_v61 = vld [vmem:[%s13934_s16 + $0xcc] sm:$0xf]  ;;  %v14907_v12 = vpop.f32.mrf.mxu0  ;;  %v14909_v33 = vpop.f32.mrf.mxu1 }
 0x111   : > { %v2866_v24 = vrot.slane %v2865_v8, 4  ;;  %13329 = vmatprep.mubr.msk.bf16.mxu1 %vm1128_vm3, %v11980_v0  ;;  %v2063_v18 = vrot.slane %v2061_v34, 5  ;;  %v2066_v21 = vrot.slane %v2064_v6, 6  ;;  %v2073_v11 = vshll.u32 %v13755_v62, 16  ;;  %19456 = vst [vmem:[#allocation21_spill] sm:$0xff] %v14907_v12  ;;  %19457 = vst [vmem:[#allocation22_spill] sm:$0xff] %v14909_v33 }
 0x112   : > { %v19455_v45 = vshrl.u32 %v14359_v29, 16  ;;  %v2054_v2 = vrot.slane %v2053_v44, 4  ;;  %v2059_v7 = vrot.slane %v2057_v13, 4  ;;  %v2072_v36 = vrot.slane %v2070_v35, 5  ;;  %v14916_v44 = vld [vmem:[%s13934_s16 + $0xd0] sm:$0xf] }
 0x113   : > { %v2871_v49 = vsel %vm13991_vm6, %v2866_v24, %v2870_v46  ;;  %v2067_v20 = vor.u32 %v2066_v21, %v2063_v18  ;;  %v2075_v0 = vrot.slane %v2073_v11, 6  ;;  %v19458_v34 = vshll.u32 %v14359_v29, 16  ;;  %v11958_v18 = vld [vmem:[%s13934_s16 + $0xd4] sm:$0x1]  ;;  %v11959_v11 = vld [vmem:[%s13934_s16 + $0xd8] sm:$0xf] }
 0x114   : > { %v2078_v9 = vrot.slane %v19455_v45, 5  ;;  %v11981_v8 = vcombine.low %v2861_v31, %v2871_v49  ;;  %v2058_v45 = vsel %vm14415_vm9, %v2054_v2, %v2057_v13  ;;  %v2084_v62 = vshrl.u32 %v1674_v50, 16  ;;  %v14923_v2 = vpop.f32.mrf.mxu0  ;;  %v13759_v12 = vld [vmem:[%s13934_s16 + $0x20] sm:$0x1] }
 0x115   : > { %v2079_v6 = vrot.slane %v19458_v34, 6  ;;  %v2087_v46 = vshll.u32 %v1674_v50, 16  ;;  %v2873_v24 = vshrl.u32 %v11956_v61, 16  ;;  %v2068_v35 = vsel %vm14415_vm9, %v2059_v7, %v2067_v20  ;;  %19459 = vst [vmem:[#allocation23_spill] sm:$0xff] %v14923_v2  ;;  %v14925_v50 = vpop.f32.mrf.mxu1 }
 0x116   : > { %13330 = vmatmul.mubr.msk.bf16.gmra.mxu1 %vm1128_vm3, %v11981_v8  ;;  %v2076_v51 = vor.u32 %v2075_v0, %v2072_v36  ;;  %v2876_v21 = vshll.u32 %v11956_v61, 16  ;;  %v11886_v29 = vcombine.low %v2058_v45, %v2068_v35  ;;  %v2086_v49 = vrot.slane %v2084_v62, 5  ;;  %19460 = vst [vmem:[#allocation24_spill] sm:$0xff] %v14925_v50  ;;  %v14930_v8 = vld [vmem:[%s19297_s1 + $0x78] sm:$0xff]   ;;  %v11961_v35 = vld [vmem:[%s13934_s16 + $0xe0] sm:$0x1]  ;;  %v14948_v43 = vpop.f32.mrf.mxu0 }
 0x117   : > { %v2080_v31 = vor.u32 %v2079_v6, %v2078_v9  ;;  %v2089_v34 = vrot.slane %v2087_v46, 6  ;;  %v2875_v13 = vrot.slane %v2873_v24, 4  ;;  %v19352_v61 = vshll.u32 %v14916_v44, 16  ;;  %v14936_v45 = vld [vmem:[%s13934_s16 + $0xdc] sm:$0xf]  ;;  %13457 = vmatprep.subr.bf16.mxu1 %v14930_v8  ;;  %19461 = vst [vmem:[#allocation25_spill] sm:$0xff] %v14948_v43  ;;  %v14950_v55 = vpop.f32.mrf.mxu1 }
 0x118   : > { %v2077_v7 = vrot.slane %v2076_v51, 4  ;;  %v2878_v36 = vrot.slane %v2876_v21, 5  ;;  %13293 = vmatprep.mubr.msk.bf16.mxu0 %vm1128_vm3, %v11886_v29  ;;  %v19353_v0 = vshrl.u32 %v14916_v44, 16  ;;  %v2892_v6 = vshll.u32 %v11958_v18, 16  ;;  %19462 = vst [vmem:[#allocation26_spill] sm:$0xff] %v14950_v55 }
 0x119   : > { %v2082_v9 = vrot.slane %v2080_v31, 4  ;;  %v2090_v20 = vor.u32 %v2089_v34, %v2086_v49  ;;  %v2897_v62 = vshrl.u32 %v11959_v11, 16  ;;  %v2884_v24 = vrot.slane %v19352_v61, 5  ;;  %v12005_v55 = vld [vmem:[%s13934_s16 + $0x18] sm:$0xe] }
 0x11a   : > { %v2081_v46 = vsel %vm14415_vm9, %v2077_v7, %v2080_v31  ;;  %v2879_v51 = vor.u32 %v2878_v36, %v2875_v13  ;;  %v2900_v21 = vshll.u32 %v11959_v11, 16  ;;  %v2888_v18 = vrot.slane %v19353_v0, 4  ;;  %v12004_v11 = vld [vmem:[%s13934_s16 + $0xc] sm:$0xe] }
 0x11b   : > { %v2091_v29 = vsel %vm14415_vm9, %v2082_v9, %v2090_v20  ;;  %v2894_v49 = vrot.slane %v2892_v6, 5  ;;  %v2899_v34 = vrot.slane %v2897_v62, 4  ;;  %v19354_v36 = vshll.u32 %v14936_v45, 16 }
 0x11c   : > { %v11887_v31 = vcombine.low %v2081_v46, %v2091_v29  ;;  %v2880_v13 = vrot.slane %v2879_v51, 4  ;;  %v2902_v7 = vrot.slane %v2900_v21, 5  ;;  %v2889_v61 = vor.u32 %v2888_v18, %v2884_v24  ;;  %v13756_v51 = vld [vmem:[%s13934_s16 + $0x10] sm:$0xf] }
 0x11d   : > { %v19355_v9 = vshrl.u32 %v14936_v45, 16  ;;  %v2916_v20 = vshll.u32 %v11961_v35, 16  ;;  %v12022_v0 = vrot.slane %v12004_v11, 9  ;;  %v2908_v46 = vrot.slane %v19354_v36, 5  ;;  %v13757_v35 = vld [vmem:[%s13934_s16 + $0x14] sm:$0x1] }
 0x11e   : > { %13294 = vmatmul.mubr.msk.bf16.gmra.mxu0 %vm1128_vm3, %v11887_v31  ;;  %v2885_v6 = vsel %vm13991_vm6, %v2880_v13, %v2884_v24  ;;  %v2903_v62 = vor.u32 %v2902_v7, %v2899_v34  ;;  %v3332_v21 = vrot.slane %v13756_v51, 5  ;;  %v2890_v29 = vrot.slane %v2889_v61, 4  ;;  %v14965_v31 = vpop.f32.mrf.mxu0  ;;  %v14967_v24 = vpop.f32.mrf.mxu1 }
 0x11f   : > { %v2912_v18 = vrot.slane %v19355_v9, 4  ;;  %v2918_v43 = vrot.slane %v2916_v20, 5  ;;  %v3335_v2 = vrot.slane %v13757_v35, 5  ;;  %19463 = vst [vmem:[#allocation27_spill] sm:$0xff] %v14965_v31  ;;  %19464 = vst [vmem:[#allocation28_spill] sm:$0xff] %v14967_v24  ;;  %v12023_v51 = vrot.slane %v12005_v55, 9 }
 0x120   : > { %v2904_v34 = vrot.slane %v2903_v62, 4  ;;  %v3333_v13 = vsel %vm13927_vm2, %v12022_v0, %v3332_v21  ;;  %v3334_v7 = vrot.slane %v3332_v21, 4  ;;  %v2895_v61 = vsel %vm13991_vm6, %v2890_v29, %v2894_v49  ;;  %v13758_v9 = vld [vmem:[%s13934_s16 + $0x1c] sm:$0xf]  ;;  %v12082_v24 = vld [vmem:[%s13934_s16 + $0x14] sm:$0x3]  ;;  %v14982_v29 = vpop.f32.mrf.mxu0 }
 0x121   : > { %v2913_v36 = vor.u32 %v2912_v18, %v2908_v46  ;;  %v3339_v20 = vrot.slane %v13758_v9, 5  ;;  %v3342_v35 = vrot.slane %v13759_v12, 5  ;;  %v11982_v50 = vcombine.low %v2885_v6, %v2895_v61  ;;  %19465 = vst [vmem:[#allocation29_spill] sm:$0xff] %v14982_v29  ;;  %v14984_v9 = vpop.f32.mrf.mxu1 }
 0x122   : > { %v2909_v31 = vsel %vm13991_vm6, %v2904_v34, %v2908_v46  ;;  %v3336_v62 = vsel %vm13927_vm2, %v3334_v7, %v3335_v2  ;;  %v3813_v60 = vshrl.u32 %v12004_v11, 16  ;;  %19466 = vst [vmem:[#allocation30_spill] sm:$0xff] %v14984_v9  ;;  %v3816_v6 = vshll.u32 %v12004_v11, 16 }
 0x123   : > { %v2914_v0 = vrot.slane %v2913_v36, 4  ;;  %v12044_v21 = vcombine.low %v3333_v13, %v3336_v62  ;;  %v3340_v33 = vsel %vm13927_vm2, %v12023_v51, %v3339_v20  ;;  %v3341_v49 = vrot.slane %v3339_v20, 4  ;;  %13333 = vmatprep.mubr.msk.bf16.mxu1 %vm1128_vm3, %v11982_v50  ;;  %v12083_v20 = vld [vmem:[%s13934_s16 + $0x20] sm:$0x3]  ;;  %v15000_v62 = vpop.f32.mrf.mxu0 }
 0x124   : > { %v3815_v12 = vrot.slane %v3813_v60, 5  ;;  %v19467_v46 = vshrl.u32 %v14422_v38, 16  ;;  %v19468_v18 = vshll.u32 %v14422_v38, 16  ;;  %v3827_v7 = vshrl.u32 %v12082_v24, 16  ;;  %v13650_v38 = vld [vmem:[%s19297_s1 + $0x60] sm:$0xff]   ;;  %19469 = vst [vmem:[#allocation31_spill] sm:$0xff] %v15000_v62 }
 0x125   : > { %v2919_v34 = vsel %vm13991_vm6, %v2914_v0, %v2918_v43  ;;  %13341 = vmatprep.mubr.msk.bf16.mxu0 %vm1128_vm3, %v12044_v21  ;;  %v3343_v13 = vsel %vm13927_vm2, %v3341_v49, %v3342_v35  ;;  %v3830_v51 = vshll.u32 %v12082_v24, 16  ;;  %v3818_v60 = vrot.slane %v3816_v6, 6  ;;  %v15002_v43 = vpop.f32.mrf.mxu1 }
 0x126   : > { %v3821_v2 = vrot.slane %v19467_v46, 5  ;;  %v3822_v36 = vrot.slane %v19468_v18, 6  ;;  %v11983_v61 = vcombine.low %v2909_v31, %v2919_v34  ;;  %v12045_v50 = vcombine.low %v3340_v33, %v3343_v13  ;;  %19470 = vst [vmem:[#allocation32_spill] sm:$0xff] %v15002_v43 }
 0x127   : > { %v3829_v0 = vrot.slane %v3827_v7, 5  ;;  %v3832_v21 = vrot.slane %v3830_v51, 6  ;;  %v3836_v46 = vshrl.u32 %v12005_v55, 16  ;;  %v3839_v35 = vshll.u32 %v12005_v55, 16  ;;  %v12006_v7 = vld [vmem:[%s13934_s16 + $0x24] sm:$0xe] }
 0x128   : > { %v3823_v11 = vor.u32 %v3822_v36, %v3821_v2  ;;  %13334 = vmatmul.mubr.msk.bf16.gmra.mxu1 %vm1128_vm3, %v11983_v61  ;;  %13342 = vmatmul.mubr.msk.bf16.vlgmr.msra.gmra.mxu0 %vm1128_vm3, %v12045_v50  ;;  %v3819_v33 = vor.u32 %v3818_v60, %v3815_v12  ;;  %v19471_v24 = vshrl.u32 %v14439_v23, 16  ;;  %v19472_v6 = vshll.u32 %v14439_v23, 16  ;;  %v13760_v55 = vld [vmem:[%s19297_s1 + $0x68] sm:$0xff]   ;;  %v15014_v60 = vpop.f32.mrf.mxu0  ;;  %v15016_v23 = vpop.f32.mrf.mxu1 }
 0x129   : > { %v3833_v18 = vor.u32 %v3832_v21, %v3829_v0  ;;  %v3838_v36 = vrot.slane %v3836_v46, 5  ;;  %v3841_v34 = vrot.slane %v3839_v35, 6  ;;  %v3850_v13 = vshrl.u32 %v12083_v20, 16  ;;  %13418 = vmatpush3.bf16.msra.mxu0 %v13760_v55  ;;  %19473 = vst [vmem:[#allocation33_spill] sm:$0xff] %v15014_v60  ;;  %19474 = vst [vmem:[#allocation34_spill] sm:$0xff] %v15016_v23 }
 0x12a   : > { %v3825_v31 = vrot.slane %v3823_v11, 4  ;;  %v3844_v49 = vrot.slane %v19471_v24, 5  ;;  %v3845_v2 = vrot.slane %v19472_v6, 6  ;;  %v3820_v12 = vrot.slane %v3819_v33, 4  ;;  %13419 = vmatprep.subr.bf16.mxu0 %v13650_v38  ;;  %v13761_v35 = vld [vmem:[%s13934_s16 + $0x28] sm:$0xf] }
 0x12b   : > { %v3853_v61 = vshll.u32 %v12083_v20, 16  ;;  %v12024_v50 = vrot.slane %v12006_v7, 9  ;;  %v3842_v21 = vor.u32 %v3841_v34, %v3838_v36  ;;  %v3852_v46 = vrot.slane %v3850_v13, 5  ;;  %v13762_v6 = vld [vmem:[%s13934_s16 + $0x2c] sm:$0x1] }
 0x12c   : > { %v3846_v51 = vor.u32 %v3845_v2, %v3844_v49  ;;  %v3834_v0 = vsel %vm14415_vm9, %v3825_v31, %v3833_v18  ;;  %v3346_v24 = vrot.slane %v13761_v35, 5  ;;  %v3824_v33 = vsel %vm14415_vm9, %v3820_v12, %v3823_v11  ;;  %v12007_v18 = vld [vmem:[%s13934_s16 + $0x30] sm:$0xe]  ;;  %v13763_v13 = vld [vmem:[%s13934_s16 + $0x34] sm:$0xf]  ;;  %v13653_v11 = vld [vmem:[%s19297_s1 + $0x88] sm:$0xff]   ;;  %v15032_v12 = vpop.f32.mrf.mxu0 }
 0x12d   : > { %v3855_v49 = vrot.slane %v3853_v61, 6  ;;  %v3349_v2 = vrot.slane %v13762_v6, 5  ;;  %v12104_v55 = vcombine.low %v3824_v33, %v3834_v0  ;;  %v3843_v60 = vrot.slane %v3842_v21, 4  ;;  %13420 = vmatpush3.bf16.msra.mxu0 %v13650_v38  ;;  %v13764_v23 = vld [vmem:[%s13934_s16 + $0x38] sm:$0x1]  ;;  %19475 = vst [vmem:[#allocation35_spill] sm:$0xff] %v15032_v12  ;;  %v15034_v61 = vpop.f32.mrf.mxu1 }
 0x12e   : > { %v3848_v20 = vrot.slane %v3846_v51, 4  ;;  %v3347_v62 = vsel %vm13927_vm2, %v12024_v50, %v3346_v24  ;;  %v3348_v31 = vrot.slane %v3346_v24, 4  ;;  %v12025_v34 = vrot.slane %v12007_v18, 9  ;;  %19476 = vst [vmem:[#allocation36_spill] sm:$0xff] %v15034_v61  ;;  %v12084_v0 = vld [vmem:[%s13934_s16 + $0x2c] sm:$0x3]  ;;  %13497 = vmatprep.subr.bf16.mxu0 %v13653_v11 }
 0x12f   : > { %v3856_v36 = vor.u32 %v3855_v49, %v3852_v46  ;;  %v3353_v35 = vrot.slane %v13763_v13, 5  ;;  %v3356_v29 = vrot.slane %v13764_v23, 5  ;;  %13381 = vmatprep.mubr.msk.bf16.mxu1 %vm1128_vm3, %v12104_v55  ;;  %v3847_v50 = vsel %vm14415_vm9, %v3843_v60, %v3846_v51 }
 0x130   : > { %v3350_v38 = vsel %vm13927_vm2, %v3348_v31, %v3349_v2  ;;  %v3859_v21 = vshrl.u32 %v12006_v7, 16  ;;  %v3862_v46 = vshll.u32 %v12006_v7, 16  ;;  %v19477_v51 = vshrl.u32 %v14489_v26, 16  ;;  %v13652_v7 = vld [vmem:[%s19297_s1 + $0x70] sm:$0xff]   ;;  %v15051_v2 = vpop.f32.mrf.mxu0 }
 0x131   : > { %v3857_v23 = vsel %vm14415_vm9, %v3848_v20, %v3856_v36  ;;  %v12046_v24 = vcombine.low %v3347_v62, %v3350_v38  ;;  %v3354_v33 = vsel %vm13927_vm2, %v12025_v34, %v3353_v35  ;;  %v3355_v49 = vrot.slane %v3353_v35, 4  ;;  %19478 = vst [vmem:[#allocation37_spill] sm:$0xff] %v15051_v2  ;;  %v15053_v20 = vpop.f32.mrf.mxu1  ;;  %v12085_v38 = vld [vmem:[%s13934_s16 + $0x38] sm:$0x3] }
 0x132   : > { %v12105_v6 = vcombine.low %v3847_v50, %v3857_v23  ;;  %v3861_v55 = vrot.slane %v3859_v21, 5  ;;  %v3864_v13 = vrot.slane %v3862_v46, 6  ;;  %v3867_v60 = vrot.slane %v19477_v51, 5  ;;  %19479 = vst [vmem:[#allocation38_spill] sm:$0xff] %v15053_v20  ;;  %v15062_v23 = vpop.f32.mrf.mxu0 }
 0x133   : > { %13345 = vmatprep.mubr.msk.bf16.mxu0 %vm1128_vm3, %v12046_v24  ;;  %v3357_v62 = vsel %vm13927_vm2, %v3355_v49, %v3356_v29  ;;  %v19480_v31 = vshll.u32 %v14489_v26, 16  ;;  %v3873_v34 = vshrl.u32 %v12084_v0, 16  ;;  %v3876_v35 = vshll.u32 %v12084_v0, 16  ;;  %19481 = vst [vmem:[#allocation39_spill] sm:$0xff] %v15062_v23  ;;  %v15064_v51 = vpop.f32.mrf.mxu1 }
 0x134   : > { %13382 = vmatmul.mubr.msk.bf16.vlgmr.msra.gmra.mxu1 %vm1128_vm3, %v12105_v6  ;;  %v12047_v11 = vcombine.low %v3354_v33, %v3357_v62  ;;  %v3865_v50 = vor.u32 %v3864_v13, %v3861_v55  ;;  %v3882_v21 = vshrl.u32 %v12007_v18, 16  ;;  %v3885_v46 = vshll.u32 %v12007_v18, 16  ;;  %19482 = vst [vmem:[#allocation40_spill] sm:$0xff] %v15064_v51 }
 0x135   : > { %v3868_v36 = vrot.slane %v19480_v31, 6  ;;  %v3875_v2 = vrot.slane %v3873_v34, 5  ;;  %v3878_v29 = vrot.slane %v3876_v35, 6  ;;  %v19483_v26 = vshrl.u32 %v14501_v42, 16  ;;  %13458 = vmatpush3.bf16.msra.mxu1 %v14930_v8 }
 0x136   : > { %13346 = vmatmul.mubr.msk.bf16.gmra.mxu0 %vm1128_vm3, %v12047_v11  ;;  %v3866_v0 = vrot.slane %v3865_v50, 4  ;;  %v3884_v33 = vrot.slane %v3882_v21, 5  ;;  %v3887_v6 = vrot.slane %v3885_v46, 6  ;;  %v19484_v18 = vshll.u32 %v14501_v42, 16  ;;  %13459 = vmatprep.subr.bf16.mxu1 %v13652_v7  ;;  %v15075_v50 = vpop.f32.mrf.mxu0  ;;  %v15077_v21 = vpop.f32.mrf.mxu1 }
 0x137   : > { %v3869_v24 = vor.u32 %v3868_v36, %v3867_v60  ;;  %v3890_v49 = vrot.slane %v19483_v26, 5  ;;  %v3879_v62 = vor.u32 %v3878_v29, %v3875_v2  ;;  %v3896_v60 = vshrl.u32 %v12085_v38, 16  ;;  %v12008_v36 = vld [vmem:[%s13934_s16 + $0x3c] sm:$0xe]  ;;  %19485 = vst [vmem:[#allocation41_spill] sm:$0xff] %v15075_v50  ;;  %19486 = vst [vmem:[#allocation42_spill] sm:$0xff] %v15077_v21 }
 0x138   : > { %v3891_v55 = vrot.slane %v19484_v18, 6  ;;  %v3899_v31 = vshll.u32 %v12085_v38, 16  ;;  %v3888_v8 = vor.u32 %v3887_v6, %v3884_v33  ;;  %v12026_v11 = vrot.slane %v12008_v36, 9  ;;  %v13765_v38 = vld [vmem:[%s13934_s16 + $0x40] sm:$0xf] }
 0x139   : > { %v3871_v13 = vrot.slane %v3869_v24, 4  ;;  %v3870_v34 = vsel %vm14415_vm9, %v3866_v0, %v3869_v24  ;;  %v3898_v46 = vrot.slane %v3896_v60, 5  ;;  %v3360_v29 = vrot.slane %v13765_v38, 5  ;;  %13460 = vmatpush3.bf16.msra.mxu1 %v13652_v7  ;;  %v12009_v6 = vld [vmem:[%s13934_s16 + $0x48] sm:$0xe]  ;;  %v15092_v38 = vpop.f32.mrf.mxu0 }
 0x13a   : > { %v3892_v35 = vor.u32 %v3891_v55, %v3890_v49  ;;  %v3901_v2 = vrot.slane %v3899_v31, 6  ;;  %v3889_v24 = vrot.slane %v3888_v8, 4  ;;  %v13766_v49 = vld [vmem:[%s13934_s16 + $0x44] sm:$0x1]  ;;  %v13767_v60 = vld [vmem:[%s13934_s16 + $0x4c] sm:$0xf] }
 0x13b   : > { %v3880_v42 = vsel %vm14415_vm9, %v3871_v13, %v3879_v62  ;;  %v3363_v33 = vrot.slane %v13766_v49, 5  ;;  %v3361_v55 = vsel %vm13927_vm2, %v12026_v11, %v3360_v29  ;;  %v3362_v50 = vrot.slane %v3360_v29, 4  ;;  %v13768_v31 = vld [vmem:[%s13934_s16 + $0x50] sm:$0x1]  ;;  %v12086_v8 = vld [vmem:[%s13934_s16 + $0x44] sm:$0x3]  ;;  %v15094_v49 = vpop.f32.mrf.mxu1 }
 0x13c   : > { %v12106_v26 = vcombine.low %v3870_v34, %v3880_v42  ;;  %v3894_v0 = vrot.slane %v3892_v35, 4  ;;  %v3902_v18 = vor.u32 %v3901_v2, %v3898_v46  ;;  %v12027_v13 = vrot.slane %v12009_v6, 9  ;;  %19487 = vst [vmem:[#allocation43_spill] sm:$0xff] %v15092_v38  ;;  %19488 = vst [vmem:[#allocation44_spill] sm:$0xff] %v15094_v49 }
 0x13d   : > { %v3893_v62 = vsel %vm14415_vm9, %v3889_v24, %v3892_v35  ;;  %v3367_v7 = vrot.slane %v13767_v60, 5  ;;  %v3370_v34 = vrot.slane %v13768_v31, 5  ;;  %v3905_v42 = vshrl.u32 %v12008_v36, 16 }
 0x13e   : > { %13385 = vmatprep.mubr.msk.bf16.mxu1 %vm1128_vm3, %v12106_v26  ;;  %v3903_v11 = vsel %vm14415_vm9, %v3894_v0, %v3902_v18  ;;  %v3364_v46 = vsel %vm13927_vm2, %v3362_v50, %v3363_v33  ;;  %v3908_v2 = vshll.u32 %v12008_v36, 16  ;;  %v19489_v35 = vshrl.u32 %v14541_v54, 16  ;;  %v12087_v33 = vld [vmem:[%s13934_s16 + $0x50] sm:$0x3] }
 0x13f   : > { %v12107_v26 = vcombine.low %v3893_v62, %v3903_v11  ;;  %v12048_v24 = vcombine.low %v3361_v55, %v3364_v46  ;;  %v3368_v60 = vsel %vm13927_vm2, %v12027_v13, %v3367_v7  ;;  %v3369_v31 = vrot.slane %v3367_v7, 4  ;;  %v15111_v62 = vpop.f32.mrf.mxu0  ;;  %v15113_v13 = vpop.f32.mrf.mxu1 }
 0x140   : > { %v3913_v29 = vrot.slane %v19489_v35, 5  ;;  %v3907_v38 = vrot.slane %v3905_v42, 5  ;;  %v3910_v23 = vrot.slane %v3908_v2, 6  ;;  %v19490_v49 = vshll.u32 %v14541_v54, 16  ;;  %19491 = vst [vmem:[#allocation45_spill] sm:$0xff] %v15111_v62  ;;  %19492 = vst [vmem:[#allocation46_spill] sm:$0xff] %v15113_v13 }
 0x141   : > { %v3919_v0 = vshrl.u32 %v12086_v8, 16  ;;  %13386 = vmatmul.mubr.msk.bf16.gmra.mxu1 %vm1128_vm3, %v12107_v26  ;;  %13349 = vmatprep.mubr.msk.bf16.mxu0 %vm1128_vm3, %v12048_v24  ;;  %v3371_v36 = vsel %vm13927_vm2, %v3369_v31, %v3370_v34  ;;  %v3922_v50 = vshll.u32 %v12086_v8, 16  ;;  %v3928_v18 = vshrl.u32 %v12009_v6, 16  ;;  %v15117_v34 = vpop.f32.mrf.mxu0  ;;  %v15119_v8 = vpop.f32.mrf.mxu1 }
 0x142   : > { %v3914_v21 = vrot.slane %v19490_v49, 6  ;;  %v3931_v55 = vshll.u32 %v12009_v6, 16  ;;  %v12049_v7 = vcombine.low %v3368_v60, %v3371_v36  ;;  %v3911_v54 = vor.u32 %v3910_v23, %v3907_v38  ;;  %19494 = vst [vmem:[#allocation47_spill] sm:$0xff] %v15117_v34  ;;  %19495 = vst [vmem:[#allocation48_spill] sm:$0xff] %v15119_v8  ;;  %v12010_v38 = vld [vmem:[%s13934_s16 + $0x54] sm:$0xe] }
 0x143   : > { %v3921_v49 = vrot.slane %v3919_v0, 5  ;;  %v3924_v11 = vrot.slane %v3922_v50, 6  ;;  %v3930_v46 = vrot.slane %v3928_v18, 5  ;;  %v19493_v35 = vshrl.u32 %v14564_v52, 16  ;;  %v13771_v8 = vld [vmem:[%s13934_s16 + $0x64] sm:$0xf] }
 0x144   : > { %v3915_v42 = vor.u32 %v3914_v21, %v3913_v29  ;;  %v3933_v2 = vrot.slane %v3931_v55, 6  ;;  %13350 = vmatmul.mubr.msk.bf16.gmra.mxu0 %vm1128_vm3, %v12049_v7  ;;  %v3912_v6 = vrot.slane %v3911_v54, 4  ;;  %v19496_v60 = vshll.u32 %v14564_v52, 16  ;;  %v15128_v54 = vpop.f32.mrf.mxu0  ;;  %v15130_v52 = vpop.f32.mrf.mxu1  ;;  %v12172_v34 = vld [vmem:[%s13934_s16 + $0x90] sm:$0xf] }
 0x145   : > { %v3936_v26 = vrot.slane %v19493_v35, 5  ;;  %v3942_v21 = vshrl.u32 %v12087_v33, 16  ;;  %v3925_v29 = vor.u32 %v3924_v11, %v3921_v49  ;;  %v3945_v0 = vshll.u32 %v12087_v33, 16  ;;  %v13769_v35 = vld [vmem:[%s13934_s16 + $0x58] sm:$0xf]  ;;  %19497 = vst [vmem:[#allocation49_spill] sm:$0xff] %v15128_v54 }
 0x146   : > { %v3917_v24 = vrot.slane %v3915_v42, 4  ;;  %v3937_v23 = vrot.slane %v19496_v60, 6  ;;  %v3934_v31 = vor.u32 %v3933_v2, %v3930_v46  ;;  %v12028_v36 = vrot.slane %v12010_v38, 9  ;;  %19498 = vst [vmem:[#allocation50_spill] sm:$0xff] %v15130_v52  ;;  %v13770_v11 = vld [vmem:[%s13934_s16 + $0x5c] sm:$0x1] }
 0x147   : > { %v3916_v50 = vsel %vm14415_vm9, %v3912_v6, %v3915_v42  ;;  %v3944_v55 = vrot.slane %v3942_v21, 5  ;;  %v3374_v7 = vrot.slane %v13769_v35, 5  ;;  %v3947_v33 = vrot.slane %v3945_v0, 6 }
 0x148   : > { %v3938_v18 = vor.u32 %v3937_v23, %v3936_v26  ;;  %v3926_v60 = vsel %vm14415_vm9, %v3917_v24, %v3925_v29  ;;  %v3935_v49 = vrot.slane %v3934_v31, 4  ;;  %v3377_v46 = vrot.slane %v13770_v11, 5  ;;  %v12011_v23 = vld [vmem:[%s13934_s16 + $0x60] sm:$0xe]  ;;  %v13772_v31 = vld [vmem:[%s13934_s16 + $0x68] sm:$0x1] }
 0x149   : > { %v12108_v42 = vcombine.low %v3916_v50, %v3926_v60  ;;  %v3375_v26 = vsel %vm13927_vm2, %v12028_v36, %v3374_v7  ;;  %v3376_v6 = vrot.slane %v3374_v7, 4  ;;  %v3948_v35 = vor.u32 %v3947_v33, %v3944_v55  ;;  %v12088_v50 = vld [vmem:[%s13934_s16 + $0x5c] sm:$0x3]  ;;  %v15146_v36 = vpop.f32.mrf.mxu0  ;;  %v15148_v7 = vpop.f32.mrf.mxu1 }
 0x14a   : > { %v3940_v2 = vrot.slane %v3938_v18, 4  ;;  %v3939_v21 = vsel %vm14415_vm9, %v3935_v49, %v3938_v18  ;;  %v12029_v54 = vrot.slane %v12011_v23, 9  ;;  %v3381_v24 = vrot.slane %v13771_v8, 5  ;;  %19499 = vst [vmem:[#allocation51_spill] sm:$0xff] %v15148_v7 }
 0x14b   : > { %13389 = vmatprep.mubr.msk.bf16.mxu1 %vm1128_vm3, %v12108_v42  ;;  %v3378_v29 = vsel %vm13927_vm2, %v3376_v6, %v3377_v46  ;;  %v3384_v0 = vrot.slane %v13772_v31, 5  ;;  %v3951_v60 = vshrl.u32 %v12010_v38, 16  ;;  %v3954_v11 = vshll.u32 %v12010_v38, 16 }
 0x14c   : > { %v3949_v18 = vsel %vm14415_vm9, %v3940_v2, %v3948_v35  ;;  %v12050_v55 = vcombine.low %v3375_v26, %v3378_v29  ;;  %v3382_v8 = vsel %vm13927_vm2, %v12029_v54, %v3381_v24  ;;  %v3383_v49 = vrot.slane %v3381_v24, 4  ;;  %v15161_v29 = vpop.f32.mrf.mxu0  ;;  %v15163_v54 = vpop.f32.mrf.mxu1 }
 0x14d   : > { %v12109_v33 = vcombine.low %v3939_v21, %v3949_v18  ;;  %v3953_v46 = vrot.slane %v3951_v60, 5  ;;  %v3956_v42 = vrot.slane %v3954_v11, 6  ;;  %v19500_v6 = vshrl.u32 %v14604_v63, 16  ;;  %19502 = vst [vmem:[#allocation52_spill] sm:$0xff] %v15163_v54  ;;  %v12089_v60 = vld [vmem:[%s13934_s16 + $0x68] sm:$0x3] }
 0x14e   : > { %13353 = vmatprep.mubr.msk.bf16.mxu0 %vm1128_vm3, %v12050_v55  ;;  %v3385_v38 = vsel %vm13927_vm2, %v3383_v49, %v3384_v0  ;;  %v19501_v13 = vshll.u32 %v14604_v63, 16  ;;  %v3965_v26 = vshrl.u32 %v12088_v50, 16  ;;  %v3968_v35 = vshll.u32 %v12088_v50, 16  ;;  %v15169_v49 = vpop.f32.mrf.mxu0  ;;  %v15171_v50 = vpop.f32.mrf.mxu1 }
 0x14f   : > { %v3959_v31 = vrot.slane %v19500_v6, 5  ;;  %13390 = vmatmul.mubr.msk.bf16.gmra.mxu1 %vm1128_vm3, %v12109_v33  ;;  %v12051_v21 = vcombine.low %v3382_v8, %v3385_v38  ;;  %v3957_v24 = vor.u32 %v3956_v42, %v3953_v46  ;;  %v3974_v11 = vshrl.u32 %v12011_v23, 16 }
 0x150   : > { %v3960_v2 = vrot.slane %v19501_v13, 6  ;;  %v3977_v18 = vshll.u32 %v12011_v23, 16  ;;  %v3967_v6 = vrot.slane %v3965_v26, 5  ;;  %v3970_v0 = vrot.slane %v3968_v35, 6  ;;  %v12012_v26 = vld [vmem:[%s13934_s16 + $0x6c] sm:$0xe] }
 0x151   : > { %v19503_v63 = vshrl.u32 %v14618_v16, 16  ;;  %13354 = vmatmul.mubr.msk.bf16.gmra.mxu0 %vm1128_vm3, %v12051_v21  ;;  %v3958_v54 = vrot.slane %v3957_v24, 4  ;;  %v3976_v8 = vrot.slane %v3974_v11, 5  ;;  %v19504_v46 = vshll.u32 %v14618_v16, 16  ;;  %v13773_v16 = vld [vmem:[%s13934_s16 + $0x70] sm:$0xf] }
 0x152   : > { %v3961_v55 = vor.u32 %v3960_v2, %v3959_v31  ;;  %v3979_v33 = vrot.slane %v3977_v18, 6  ;;  %v3971_v31 = vor.u32 %v3970_v0, %v3967_v6  ;;  %v3988_v38 = vshrl.u32 %v12089_v60, 16  ;;  %v15182_v6 = vpop.f32.mrf.mxu0 }
 0x153   : > { %v3982_v13 = vrot.slane %v19503_v63, 5  ;;  %v3983_v23 = vrot.slane %v19504_v46, 6  ;;  %v3991_v2 = vshll.u32 %v12089_v60, 16  ;;  %v12030_v21 = vrot.slane %v12012_v26, 9  ;;  %19505 = vst [vmem:[#allocation53_spill] sm:$0xff] %v15182_v6  ;;  %v15184_v60 = vpop.f32.mrf.mxu1 }
 0x154   : > { %v3963_v42 = vrot.slane %v3961_v55, 4  ;;  %v3962_v35 = vsel %vm14415_vm9, %v3958_v54, %v3961_v55  ;;  %v3980_v63 = vor.u32 %v3979_v33, %v3976_v8  ;;  %v3990_v11 = vrot.slane %v3988_v38, 5  ;;  %v13774_v8 = vld [vmem:[%s13934_s16 + $0x74] sm:$0x1]  ;;  %v12013_v33 = vld [vmem:[%s13934_s16 + $0x78] sm:$0xe] }
 0x155   : > { %v3984_v51 = vor.u32 %v3983_v23, %v3982_v13  ;;  %v3993_v18 = vrot.slane %v3991_v2, 6  ;;  %v3388_v46 = vrot.slane %v13773_v16, 5  ;;  %v3391_v13 = vrot.slane %v13774_v8, 5  ;;  %v13775_v16 = vld [vmem:[%s13934_s16 + $0x7c] sm:$0xf] }
 0x156   : > { %v3972_v24 = vsel %vm14415_vm9, %v3963_v42, %v3971_v31  ;;  %v3981_v54 = vrot.slane %v3980_v63, 4  ;;  %v12031_v38 = vrot.slane %v12013_v33, 9  ;;  %v3395_v6 = vrot.slane %v13775_v16, 5  ;;  %v12090_v63 = vld [vmem:[%s13934_s16 + $0x74] sm:$0x3] }
 0x157   : > { %v12110_v0 = vcombine.low %v3962_v35, %v3972_v24  ;;  %v3986_v55 = vrot.slane %v3984_v51, 4  ;;  %v3994_v23 = vor.u32 %v3993_v18, %v3990_v11  ;;  %v3389_v42 = vsel %vm13927_vm2, %v12030_v21, %v3388_v46  ;;  %v13776_v35 = vld [vmem:[%s13934_s16 + $0x80] sm:$0x1] }
 0x158   : > { %v3390_v31 = vrot.slane %v3388_v46, 4  ;;  %v3985_v2 = vsel %vm14415_vm9, %v3981_v54, %v3984_v51  ;;  %v3398_v24 = vrot.slane %v13776_v35, 5  ;;  %v3997_v12 = vshrl.u32 %v12012_v26, 16  ;;  %v15204_v51 = vpop.f32.mrf.mxu1 }
 0x159   : > { %13393 = vmatprep.mubr.msk.bf16.mxu1 %vm1128_vm3, %v12110_v0  ;;  %v3995_v8 = vsel %vm14415_vm9, %v3986_v55, %v3994_v23  ;;  %v4000_v21 = vshll.u32 %v12012_v26, 16  ;;  %v19506_v18 = vshrl.u32 %v14664_v15, 16  ;;  %v15202_v0 = vpop.f32.mrf.mxu0  ;;  %v3396_v35 = vsel %vm13927_vm2, %v12031_v38, %v3395_v6 }
 0x15a   : > { %v3392_v11 = vsel %vm13927_vm2, %v3390_v31, %v3391_v13  ;;  %v12111_v54 = vcombine.low %v3985_v2, %v3995_v8  ;;  %v3397_v20 = vrot.slane %v3395_v6, 4  ;;  %v3999_v61 = vrot.slane %v3997_v12, 5  ;;  %v12091_v2 = vld [vmem:[%s13934_s16 + $0x80] sm:$0x3] }
 0x15b   : > { %v4005_v46 = vrot.slane %v19506_v18, 5  ;;  %v12052_v16 = vcombine.low %v3389_v42, %v3392_v11  ;;  %v4002_v55 = vrot.slane %v4000_v21, 6  ;;  %v19507_v23 = vshll.u32 %v14664_v15, 16  ;;  %v15215_v21 = vpop.f32.mrf.mxu0  ;;  %v15217_v15 = vpop.f32.mrf.mxu1 }
 0x15c   : > { %v4011_v26 = vshrl.u32 %v12090_v63, 16  ;;  %13394 = vmatmul.mubr.msk.bf16.gmra.mxu1 %vm1128_vm3, %v12111_v54  ;;  %v3399_v31 = vsel %vm13927_vm2, %v3397_v20, %v3398_v24  ;;  %v4014_v18 = vshll.u32 %v12090_v63, 16  ;;  %v4020_v42 = vshrl.u32 %v12013_v33, 16  ;;  %19508 = vst [vmem:[#allocation54_spill] sm:$0xff] %v15215_v21  ;;  %19509 = vst [vmem:[#allocation55_spill] sm:$0xff] %v15217_v15 }
 0x15d   : > { %v4006_v13 = vrot.slane %v19507_v23, 6  ;;  %13357 = vmatprep.mubr.msk.bf16.mxu0 %vm1128_vm3, %v12052_v16  ;;  %v4023_v8 = vshll.u32 %v12013_v33, 16  ;;  %v12053_v38 = vcombine.low %v3396_v35, %v3399_v31  ;;  %v4003_v6 = vor.u32 %v4002_v55, %v3999_v61  ;;  %v15225_v35 = vpop.f32.mrf.mxu0  ;;  %v15227_v55 = vpop.f32.mrf.mxu1 }
 0x15e   : > { %v4013_v11 = vrot.slane %v4011_v26, 5  ;;  %v4016_v23 = vrot.slane %v4014_v18, 6  ;;  %v4022_v54 = vrot.slane %v4020_v42, 5  ;;  %v19510_v16 = vshrl.u32 %v14675_v40, 16  ;;  %19512 = vst [vmem:[#allocation56_spill] sm:$0xff] %v15225_v35 }
 0x15f   : > { %v4007_v12 = vor.u32 %v4006_v13, %v4005_v46  ;;  %v4025_v43 = vrot.slane %v4023_v8, 6  ;;  %13358 = vmatmul.mubr.msk.bf16.gmra.mxu0 %vm1128_vm3, %v12053_v38  ;;  %v4004_v20 = vrot.slane %v4003_v6, 4  ;;  %v19511_v24 = vshll.u32 %v14675_v40, 16  ;;  %v12014_v46 = vld [vmem:[%s13934_s16 + $0x84] sm:$0xe] }
 0x160   : > { %v4028_v9 = vrot.slane %v19510_v16, 5  ;;  %v4034_v63 = vshrl.u32 %v12091_v2, 16  ;;  %v4017_v13 = vor.u32 %v4016_v23, %v4013_v11  ;;  %v4037_v31 = vshll.u32 %v12091_v2, 16  ;;  %v13777_v6 = vld [vmem:[%s13934_s16 + $0x88] sm:$0xf]  ;;  %v15237_v2 = vpop.f32.mrf.mxu1 }
 0x161   : > { %v4009_v33 = vrot.slane %v4007_v12, 4  ;;  %v4029_v61 = vrot.slane %v19511_v24, 6  ;;  %v4026_v26 = vor.u32 %v4025_v43, %v4022_v54  ;;  %v12032_v18 = vrot.slane %v12014_v46, 9  ;;  %v15235_v43 = vpop.f32.mrf.mxu0  ;;  %19514 = vst [vmem:[#allocation58_spill] sm:$0xff] %v15237_v2 }
 0x162   : > { %v4008_v42 = vsel %vm14415_vm9, %v4004_v20, %v4007_v12  ;;  %v4036_v38 = vrot.slane %v4034_v63, 5  ;;  %v3402_v40 = vrot.slane %v13777_v6, 5  ;;  %v4039_v15 = vrot.slane %v4037_v31, 6  ;;  %19513 = vst [vmem:[#allocation57_spill] sm:$0xff] %v15235_v43  ;;  %v12015_v20 = vld [vmem:[%s13934_s16 + $0x90] sm:$0xe] }
 0x163   : > { %v4030_v8 = vor.u32 %v4029_v61, %v4028_v9  ;;  %v4018_v16 = vsel %vm14415_vm9, %v4009_v33, %v4017_v13  ;;  %v4027_v24 = vrot.slane %v4026_v26, 4  ;;  %v3405_v11 = vrot.slane %v13778_v41, 5  ;;  %v13779_v13 = vld [vmem:[%s13934_s16 + $0x94] sm:$0xf]  ;;  %v13780_v31 = vld [vmem:[%s13934_s16 + $0x98] sm:$0x1] }
 0x164   : > { %v12112_v12 = vcombine.low %v4008_v42, %v4018_v16  ;;  %v3403_v9 = vsel %vm13927_vm2, %v12032_v18, %v3402_v40  ;;  %v3404_v54 = vrot.slane %v3402_v40, 4  ;;  %v4040_v61 = vor.u32 %v4039_v15, %v4036_v38  ;;  %v12092_v6 = vld [vmem:[%s13934_s16 + $0x8c] sm:$0x3]  ;;  %v15254_v38 = vpop.f32.mrf.mxu0 }
 0x165   : > { %v4032_v23 = vrot.slane %v4030_v8, 4  ;;  %v4031_v33 = vsel %vm14415_vm9, %v4027_v24, %v4030_v8  ;;  %v12033_v63 = vrot.slane %v12015_v20, 9  ;;  %v3409_v26 = vrot.slane %v13779_v13, 5  ;;  %19515 = vst [vmem:[#allocation59_spill] sm:$0xff] %v15254_v38  ;;  %v15256_v24 = vpop.f32.mrf.mxu1 }
 0x166   : > { %13397 = vmatprep.mubr.msk.bf16.mxu1 %vm1128_vm3, %v12112_v12  ;;  %v3406_v41 = vsel %vm13927_vm2, %v3404_v54, %v3405_v11  ;;  %v3412_v42 = vrot.slane %v13780_v31, 5  ;;  %v4043_v16 = vshrl.u32 %v12014_v46, 16  ;;  %v4046_v43 = vshll.u32 %v12014_v46, 16  ;;  %19516 = vst [vmem:[#allocation60_spill] sm:$0xff] %v15256_v24 }
 0x167   : > { %v4041_v18 = vsel %vm14415_vm9, %v4032_v23, %v4040_v61  ;;  %v12054_v40 = vcombine.low %v3403_v9, %v3406_v41  ;;  %v3410_v15 = vsel %vm13927_vm2, %v12033_v63, %v3409_v26  ;;  %v3411_v8 = vrot.slane %v3409_v26, 4 }
 0x168   : > { %v12113_v12 = vcombine.low %v4031_v33, %v4041_v18  ;;  %v4045_v11 = vrot.slane %v4043_v16, 5  ;;  %v4048_v54 = vrot.slane %v4046_v43, 6  ;;  %v19517_v13 = vshrl.u32 %v14718_v39, 16  ;;  %v12093_v33 = vld [vmem:[%s13934_s16 + $0x98] sm:$0x3]  ;;  %v15267_v18 = vpop.f32.mrf.mxu0 }
 0x169   : > { %13361 = vmatprep.mubr.msk.bf16.mxu0 %vm1128_vm3, %v12054_v40  ;;  %v3413_v46 = vsel %vm13927_vm2, %v3411_v8, %v3412_v42  ;;  %v19518_v23 = vshll.u32 %v14718_v39, 16  ;;  %v4057_v61 = vshrl.u32 %v12092_v6, 16  ;;  %v4060_v63 = vshll.u32 %v12092_v6, 16  ;;  %19519 = vst [vmem:[#allocation61_spill] sm:$0xff] %v15267_v18 }
 0x16a   : > { %v4051_v31 = vrot.slane %v19517_v13, 5  ;;  %13398 = vmatmul.mubr.msk.bf16.gmra.mxu1 %vm1128_vm3, %v12113_v12  ;;  %v12055_v26 = vcombine.low %v3410_v15, %v3413_v46  ;;  %v4049_v41 = vor.u32 %v4048_v54, %v4045_v11  ;;  %v4066_v16 = vshrl.u32 %v12015_v20, 16  ;;  %v15269_v13 = vpop.f32.mrf.mxu1  ;;  %v15276_v54 = vpop.f32.mrf.mxu0 }
 0x16b   : > { %v4052_v9 = vrot.slane %v19518_v23, 6  ;;  %v4069_v43 = vshll.u32 %v12015_v20, 16  ;;  %19520 = vst [vmem:[#allocation62_spill] sm:$0xff] %v15269_v13  ;;  %v4059_v57 = vrot.slane %v4057_v61, 5  ;;  %v4062_v42 = vrot.slane %v4060_v63, 6  ;;  %19523 = vst [vmem:[#allocation63_spill] sm:$0xff] %v15276_v54 }
 0x16c   : > { %v19521_v39 = vshrl.u32 %v14729_v19, 16  ;;  %13362 = vmatmul.mubr.msk.bf16.gmra.mxu0 %vm1128_vm3, %v12055_v26  ;;  %v4050_v6 = vrot.slane %v4049_v41, 4  ;;  %v4068_v12 = vrot.slane %v4066_v16, 5  ;;  %v19522_v11 = vshll.u32 %v14729_v19, 16  ;;  %v15278_v46 = vpop.f32.mrf.mxu1  ;;  %v12016_v63 = vld [vmem:[%s13934_s16 + $0x9c] sm:$0xe] }
 0x16d   : > { %v4053_v40 = vor.u32 %v4052_v9, %v4051_v31  ;;  %v4071_v15 = vrot.slane %v4069_v43, 6  ;;  %19524 = vst [vmem:[#allocation64_spill] sm:$0xff] %v15278_v46  ;;  %v4063_v31 = vor.u32 %v4062_v42, %v4059_v57  ;;  %v4080_v9 = vshrl.u32 %v12093_v33, 16  ;;  %v13781_v13 = vld [vmem:[%s13934_s16 + $0xa0] sm:$0xf] }
 0x16e   : > { %v4074_v8 = vrot.slane %v19521_v39, 5  ;;  %v4075_v20 = vrot.slane %v19522_v11, 6  ;;  %v4083_v61 = vshll.u32 %v12093_v33, 16  ;;  %v12034_v43 = vrot.slane %v12016_v63, 9 }
 0x16f   : > { %v4055_v23 = vrot.slane %v4053_v40, 4  ;;  %v4054_v26 = vsel %vm14415_vm9, %v4050_v6, %v4053_v40  ;;  %v4072_v41 = vor.u32 %v4071_v15, %v4068_v12  ;;  %v4082_v39 = vrot.slane %v4080_v9, 5  ;;  %v15288_v40 = vpop.f32.mrf.mxu0  ;;  %v13784_v9 = vld [vmem:[%s13934_s16 + $0xb0] sm:$0x1] }
 0x170   : > { %v4076_v16 = vor.u32 %v4075_v20, %v4074_v8  ;;  %v4085_v11 = vrot.slane %v4083_v61, 6  ;;  %v3416_v56 = vrot.slane %v13781_v13, 5  ;;  %v3419_v22 = vrot.slane %v13782_v14, 5  ;;  %19525 = vst [vmem:[#allocation65_spill] sm:$0xff] %v15288_v40  ;;  %v15290_v8 = vpop.f32.mrf.mxu1  ;;  %v12094_v61 = vld [vmem:[%s13934_s16 + $0xa4] sm:$0x3] }
 0x171   : > { %v4064_v19 = vsel %vm14415_vm9, %v4055_v23, %v4063_v31  ;;  %v4073_v42 = vrot.slane %v4072_v41, 4  ;;  %19526 = vst [vmem:[#allocation66_spill] sm:$0xff] %v15290_v8  ;;  %v12035_v20 = vrot.slane %v12017_v3, 9  ;;  %v13783_v23 = vld [vmem:[%s13934_s16 + $0xac] sm:$0xf]  ;;  %v3426_v14 = vrot.slane %v13784_v9, 5  ;;  %v15310_v9 = vpop.f32.mrf.mxu0 }
 0x172   : > { %v12114_v57 = vcombine.low %v4054_v26, %v4064_v19  ;;  %v4078_v33 = vrot.slane %v4076_v16, 4  ;;  %v4086_v6 = vor.u32 %v4085_v11, %v4082_v39  ;;  %v3417_v12 = vsel %vm13927_vm2, %v12034_v43, %v3416_v56  ;;  %19529 = vst [vmem:[#allocation68_spill] sm:$0xff] %v15310_v9 }
 0x173   : > { %v3418_v15 = vrot.slane %v3416_v56, 4  ;;  %v4077_v13 = vsel %vm14415_vm9, %v4073_v42, %v4076_v16  ;;  %v3423_v31 = vrot.slane %v13783_v23, 5  ;;  %v4089_v26 = vshrl.u32 %v12016_v63, 16  ;;  %v15308_v23 = vpop.f32.mrf.mxu1 }
 0x174   : > { %13401 = vmatprep.mubr.msk.bf16.mxu1 %vm1128_vm3, %v12114_v57  ;;  %v4087_v41 = vsel %vm14415_vm9, %v4078_v33, %v4086_v6  ;;  %v4092_v43 = vshll.u32 %v12016_v63, 16  ;;  %v19527_v56 = vshrl.u32 %v14772_v47, 16  ;;  %19528 = vst [vmem:[#allocation67_spill] sm:$0xff] %v15308_v23  ;;  %v19530_v6 = vshll.u32 %v14772_v47, 16 }
 0x175   : > { %v3420_v19 = vsel %vm13927_vm2, %v3418_v15, %v3419_v22  ;;  %v12115_v11 = vcombine.low %v4077_v13, %v4087_v41  ;;  %v3424_v16 = vsel %vm13927_vm2, %v12035_v20, %v3423_v31  ;;  %v3425_v42 = vrot.slane %v3423_v31, 4  ;;  %v12095_v20 = vld [vmem:[%s13934_s16 + $0xb0] sm:$0x3] }
 0x176   : > { %v4097_v39 = vrot.slane %v19527_v56, 5  ;;  %v12056_v57 = vcombine.low %v3417_v12, %v3420_v19  ;;  %v4091_v40 = vrot.slane %v4089_v26, 5  ;;  %v4094_v33 = vrot.slane %v4092_v43, 6 }
 0x177   : > { %v4098_v22 = vrot.slane %v19530_v6, 6  ;;  %v4103_v63 = vshrl.u32 %v12094_v61, 16  ;;  %13402 = vmatmul.mubr.msk.bf16.gmra.mxu1 %vm1128_vm3, %v12115_v11  ;;  %v3427_v12 = vsel %vm13927_vm2, %v3425_v42, %v3426_v14  ;;  %v4106_v15 = vshll.u32 %v12094_v61, 16  ;;  %v15321_v11 = vpop.f32.mrf.mxu1 }
 0x178   : > { %13365 = vmatprep.mubr.msk.bf16.mxu0 %vm1128_vm3, %v12056_v57  ;;  %v4112_v13 = vshrl.u32 %v12017_v3, 16  ;;  %v12057_v31 = vcombine.low %v3424_v16, %v3427_v12  ;;  %v4095_v41 = vor.u32 %v4094_v33, %v4091_v40  ;;  %v4115_v47 = vshll.u32 %v12017_v3, 16  ;;  %19532 = vst [vmem:[#allocation69_spill] sm:$0xff] %v15321_v11  ;;  %v15323_v57 = vpop.f32.mrf.mxu0 }
 0x179   : > { %v4099_v19 = vor.u32 %v4098_v22, %v4097_v39  ;;  %v4105_v26 = vrot.slane %v4103_v63, 5  ;;  %v4108_v43 = vrot.slane %v4106_v15, 6  ;;  %v19531_v6 = vshrl.u32 %v14785_v10, 16  ;;  %19533 = vst [vmem:[#allocation70_spill] sm:$0xff] %v15323_v57  ;;  %v12018_v22 = vld [vmem:[%s13934_s16 + $0xb4] sm:$0xe]  ;;  %v15331_v12 = vpop.f32.mrf.mxu1 }
 0x17a   : > { %v4114_v56 = vrot.slane %v4112_v13, 5  ;;  %13366 = vmatmul.mubr.msk.bf16.gmra.mxu0 %vm1128_vm3, %v12057_v31  ;;  %v4096_v14 = vrot.slane %v4095_v41, 4  ;;  %v19534_v16 = vshll.u32 %v14785_v10, 16  ;;  %v4126_v39 = vshrl.u32 %v12095_v20, 16  ;;  %v15329_v63 = vpop.f32.mrf.mxu0  ;;  %19536 = vst [vmem:[#allocation72_spill] sm:$0xff] %v15331_v12 }
 0x17b   : > { %v4120_v9 = vrot.slane %v19531_v6, 5  ;;  %v4101_v61 = vrot.slane %v4099_v19, 4  ;;  %v4109_v42 = vor.u32 %v4108_v43, %v4105_v26  ;;  %v4117_v33 = vrot.slane %v4115_v47, 6  ;;  %19535 = vst [vmem:[#allocation71_spill] sm:$0xff] %v15329_v63  ;;  %v13785_v43 = vld [vmem:[%s13934_s16 + $0xb8] sm:$0xf] }
 0x17c   : > { %v4121_v40 = vrot.slane %v19534_v16, 6  ;;  %v4129_v3 = vshll.u32 %v12095_v20, 16  ;;  %v4100_v15 = vsel %vm14415_vm9, %v4096_v14, %v4099_v19  ;;  %v4128_v31 = vrot.slane %v4126_v39, 5  ;;  %v13786_v63 = vld [vmem:[%s13934_s16 + $0xbc] sm:$0x1]  ;;  %v15342_v39 = vpop.f32.mrf.mxu0 }
 0x17d   : > { %v12036_v41 = vrot.slane %v12018_v22, 9  ;;  %v4110_v10 = vsel %vm14415_vm9, %v4101_v61, %v4109_v42  ;;  %v4118_v6 = vor.u32 %v4117_v33, %v4114_v56  ;;  %v3430_v20 = vrot.slane %v13785_v43, 5  ;;  %19537 = vst [vmem:[#allocation73_spill] sm:$0xff] %v15342_v39  ;;  %v15344_v56 = vpop.f32.mrf.mxu1  ;;  %v13787_v42 = vld [vmem:[%s13934_s16 + $0xc4] sm:$0xf] }
 0x17e   : > { %v4122_v13 = vor.u32 %v4121_v40, %v4120_v9  ;;  %v4131_v26 = vrot.slane %v4129_v3, 6  ;;  %v12116_v47 = vcombine.low %v4100_v15, %v4110_v10  ;;  %v3433_v12 = vrot.slane %v13786_v63, 5  ;;  %v12019_v40 = vld [vmem:[%s13934_s16 + $0xc0] sm:$0xe]  ;;  %19538 = vst [vmem:[#allocation74_spill] sm:$0xff] %v15344_v56 }
 0x17f   : > { %v4119_v11 = vrot.slane %v4118_v6, 4  ;;  %v3431_v9 = vsel %vm13927_vm2, %v12036_v41, %v3430_v20  ;;  %v3432_v14 = vrot.slane %v3430_v20, 4  ;;  %v12037_v61 = vrot.slane %v12019_v40, 9  ;;  %v13788_v3 = vld [vmem:[%s13934_s16 + $0xc8] sm:$0x1] }
 0x180   : > { %v4124_v16 = vrot.slane %v4122_v13, 4  ;;  %v4132_v19 = vor.u32 %v4131_v26, %v4128_v31  ;;  %13405 = vmatprep.mubr.msk.bf16.mxu1 %vm1128_vm3, %v12116_v47  ;;  %v3437_v33 = vrot.slane %v13787_v42, 5  ;;  %v3440_v15 = vrot.slane %v13788_v3, 5  ;;  %v12096_v10 = vld [vmem:[%s13934_s16 + $0xbc] sm:$0x3] }
 0x181   : > { %v4123_v63 = vsel %vm14415_vm9, %v4119_v11, %v4122_v13  ;;  %v3434_v41 = vsel %vm13927_vm2, %v3432_v14, %v3433_v12  ;;  %v4135_v6 = vshrl.u32 %v12018_v22, 16  ;;  %v4138_v3 = vshll.u32 %v12018_v22, 16  ;;  %v15364_v12 = vpop.f32.mrf.mxu1  ;;  %v12239_v39 = vld [vmem:[%s13934_s16 + $0x24] sm:$0xe] }
 0x182   : > { %v4133_v31 = vsel %vm14415_vm9, %v4124_v16, %v4132_v19  ;;  %v12058_v43 = vcombine.low %v3431_v9, %v3434_v41  ;;  %v3438_v20 = vsel %vm13927_vm2, %v12037_v61, %v3437_v33  ;;  %v3439_v47 = vrot.slane %v3437_v33, 4  ;;  %v15362_v19 = vpop.f32.mrf.mxu0  ;;  %19542 = vst [vmem:[#allocation76_spill] sm:$0xff] %v15364_v12 }
 0x183   : > { %v12117_v26 = vcombine.low %v4123_v63, %v4133_v31  ;;  %v4137_v42 = vrot.slane %v4135_v6, 5  ;;  %v19539_v56 = vshrl.u32 %v14842_v28, 16  ;;  %v19540_v13 = vshll.u32 %v14842_v28, 16  ;;  %19541 = vst [vmem:[#allocation75_spill] sm:$0xff] %v15362_v19 }
 0x184   : > { %13369 = vmatprep.mubr.msk.bf16.mxu0 %vm1128_vm3, %v12058_v43  ;;  %v3441_v9 = vsel %vm13927_vm2, %v3439_v47, %v3440_v15  ;;  %v4149_v14 = vshrl.u32 %v12096_v10, 16  ;;  %v4152_v61 = vshll.u32 %v12096_v10, 16  ;;  %v4140_v33 = vrot.slane %v4138_v3, 6  ;;  %v15378_v47 = vpop.f32.mrf.mxu1 }
 0x185   : > { %v4143_v11 = vrot.slane %v19539_v56, 5  ;;  %v4144_v16 = vrot.slane %v19540_v13, 6  ;;  %13406 = vmatmul.mubr.msk.bf16.gmra.mxu1 %vm1128_vm3, %v12117_v26  ;;  %v12059_v22 = vcombine.low %v3438_v20, %v3441_v9  ;;  %v12097_v56 = vld [vmem:[%s13934_s16 + $0xc8] sm:$0x3]  ;;  %v4158_v31 = vshrl.u32 %v12019_v40, 16  ;;  %v15376_v20 = vpop.f32.mrf.mxu0  ;;  %19546 = vst [vmem:[#allocation78_spill] sm:$0xff] %v15378_v47 }
 0x186   : > { %v4151_v28 = vrot.slane %v4149_v14, 5  ;;  %v4154_v41 = vrot.slane %v4152_v61, 6  ;;  %v4161_v6 = vshll.u32 %v12019_v40, 16  ;;  %v19543_v13 = vshrl.u32 %v14857_v25, 16  ;;  %19545 = vst [vmem:[#allocation77_spill] sm:$0xff] %v15376_v20 }
 0x187   : > { %v4145_v63 = vor.u32 %v4144_v16, %v4143_v11  ;;  %13370 = vmatmul.mubr.msk.bf16.gmra.mxu0 %vm1128_vm3, %v12059_v22  ;;  %v4141_v26 = vor.u32 %v4140_v33, %v4137_v42  ;;  %v4160_v19 = vrot.slane %v4158_v31, 5  ;;  %v19544_v15 = vshll.u32 %v14857_v25, 16  ;;  %v12020_v9 = vld [vmem:[%s13934_s16 + $0xcc] sm:$0xe]  ;;  %v15381_v42 = vpop.f32.mrf.mxu0  ;;  %v15383_v33 = vpop.f32.mrf.mxu1  ;;  %v12021_v47 = vld [vmem:[%s13934_s16 + $0xd8] sm:$0xe] }
 0x188   : > { %v4166_v12 = vrot.slane %v19543_v13, 5  ;;  %v4155_v3 = vor.u32 %v4154_v41, %v4151_v28  ;;  %v4163_v11 = vrot.slane %v4161_v6, 6  ;;  %v4172_v16 = vshrl.u32 %v12097_v56, 16  ;;  %19547 = vst [vmem:[#allocation79_spill] sm:$0xff] %v15381_v42  ;;  %19548 = vst [vmem:[#allocation80_spill] sm:$0xff] %v15383_v33 }
 0x189   : > { %v4147_v43 = vrot.slane %v4145_v63, 4  ;;  %v4167_v10 = vrot.slane %v19544_v15, 6  ;;  %v4175_v40 = vshll.u32 %v12097_v56, 16  ;;  %v4142_v14 = vrot.slane %v4141_v26, 4  ;;  %v13789_v13 = vld [vmem:[%s13934_s16 + $0xd0] sm:$0xf] }
 0x18a   : > { %v12038_v22 = vrot.slane %v12020_v9, 9  ;;  %v4164_v31 = vor.u32 %v4163_v11, %v4160_v19  ;;  %v4174_v28 = vrot.slane %v4172_v16, 5  ;;  %v3444_v26 = vrot.slane %v13789_v13, 5  ;;  %v13791_v11 = vld [vmem:[%s13934_s16 + $0xdc] sm:$0xf] }
 0x18b   : > { %v4168_v61 = vor.u32 %v4167_v10, %v4166_v12  ;;  %v4156_v25 = vsel %vm14415_vm9, %v4147_v43, %v4155_v3  ;;  %v4177_v41 = vrot.slane %v4175_v40, 6  ;;  %v4146_v6 = vsel %vm14415_vm9, %v4142_v14, %v4145_v63  ;;  %v13790_v12 = vld [vmem:[%s13934_s16 + $0xd4] sm:$0x1]  ;;  %v15395_v40 = vpop.f32.mrf.mxu0  ;;  %v15397_v63 = vpop.f32.mrf.mxu1 }
 0x18c   : > { %v3447_v15 = vrot.slane %v13790_v12, 5  ;;  %v12118_v10 = vcombine.low %v4146_v6, %v4156_v25  ;;  %v4165_v42 = vrot.slane %v4164_v31, 4  ;;  %v3445_v19 = vsel %vm13927_vm2, %v12038_v22, %v3444_v26  ;;  %19549 = vst [vmem:[#allocation81_spill] sm:$0xff] %v15395_v40  ;;  %19550 = vst [vmem:[#allocation82_spill] sm:$0xff] %v15397_v63  ;;  %v13792_v31 = vld [vmem:[%s13934_s16 + $0xe0] sm:$0x1] }
 0x18d   : > { %v4170_v56 = vrot.slane %v4168_v61, 4  ;;  %v4178_v33 = vor.u32 %v4177_v41, %v4174_v28  ;;  %v3446_v43 = vrot.slane %v3444_v26, 4  ;;  %v12039_v3 = vrot.slane %v12021_v47, 9  ;;  %v12098_v41 = vld [vmem:[%s13934_s16 + $0xd4] sm:$0x3] }
 0x18e   : > { %v3451_v16 = vrot.slane %v13791_v11, 5  ;;  %13409 = vmatprep.mubr.msk.bf16.mxu1 %vm1128_vm3, %v12118_v10  ;;  %v4169_v14 = vsel %vm14415_vm9, %v4165_v42, %v4168_v61  ;;  %v3454_v28 = vrot.slane %v13792_v31, 5  ;;  %v4181_v10 = vshrl.u32 %v12020_v9, 16  ;;  %v12099_v31 = vld [vmem:[%s13934_s16 + $0xe0] sm:$0x3] }
 0x18f   : > { %v4179_v25 = vsel %vm14415_vm9, %v4170_v56, %v4178_v33  ;;  %v3448_v6 = vsel %vm13927_vm2, %v3446_v43, %v3447_v15  ;;  %v4184_v11 = vshll.u32 %v12020_v9, 16  ;;  %v19551_v61 = vshrl.u32 %v14916_v44, 16  ;;  %v15452_v63 = vld [vmem:[%s13934_s16 + $0x28] sm:$0xf] }
 0x190   : > { %v12119_v22 = vcombine.low %v4169_v14, %v4179_v25  ;;  %v3452_v13 = vsel %vm13927_vm2, %v12039_v3, %v3451_v16  ;;  %v3453_v26 = vrot.slane %v3451_v16, 4  ;;  %v12060_v12 = vcombine.low %v3445_v19, %v3448_v6  ;;  %v15417_v25 = vpop.f32.mrf.mxu0  ;;  %v15419_v3 = vpop.f32.mrf.mxu1 }
 0x191   : > { %v4189_v42 = vrot.slane %v19551_v61, 5  ;;  %v19552_v56 = vshll.u32 %v14916_v44, 16  ;;  %v4195_v15 = vshrl.u32 %v12098_v41, 16  ;;  %v4198_v43 = vshll.u32 %v12098_v41, 16  ;;  %19553 = vst [vmem:[#allocation83_spill] sm:$0xff] %v15417_v25  ;;  %19554 = vst [vmem:[#allocation84_spill] sm:$0xff] %v15419_v3 }
 0x192   : > { %13410 = vmatmul.mubr.msk.bf16.gmra.mxu1 %vm1128_vm3, %v12119_v22  ;;  %v3455_v33 = vsel %vm13927_vm2, %v3453_v26, %v3454_v28  ;;  %13373 = vmatprep.mubr.msk.bf16.mxu0 %vm1128_vm3, %v12060_v12  ;;  %v4183_v19 = vrot.slane %v4181_v10, 5  ;;  %v4186_v16 = vrot.slane %v4184_v11, 6  ;;  %v4204_v28 = vshrl.u32 %v12021_v47, 16 }
 0x193   : > { %v4190_v14 = vrot.slane %v19552_v56, 6  ;;  %v12061_v9 = vcombine.low %v3452_v13, %v3455_v33  ;;  %v4197_v6 = vrot.slane %v4195_v15, 5  ;;  %v4200_v61 = vrot.slane %v4198_v43, 6  ;;  %v12142_v13 = vld [vmem:[%s13934_s16 + $0x18] sm:$0xf]  ;;  %v15431_v15 = vpop.f32.mrf.mxu1 }
 0x194   : > { %v4187_v44 = vor.u32 %v4186_v16, %v4183_v19  ;;  %v4207_v41 = vshll.u32 %v12021_v47, 16  ;;  %v19555_v26 = vshrl.u32 %v14936_v45, 16  ;;  %v19556_v3 = vshll.u32 %v14936_v45, 16  ;;  %19558 = vst [vmem:[#allocation86_spill] sm:$0xff] %v15431_v15  ;;  %v15434_v16 = vld [vmem:[%s13934_s16 + $0x1c] sm:$0xf] }
 0x195   : > { %v4191_v22 = vor.u32 %v4190_v14, %v4189_v42  ;;  %13374 = vmatmul.mubr.msk.bf16.gmra.mxu0 %vm1128_vm3, %v12061_v9  ;;  %v4201_v11 = vor.u32 %v4200_v61, %v4197_v6  ;;  %v4206_v33 = vrot.slane %v4204_v28, 5  ;;  %v4218_v42 = vshrl.u32 %v12099_v31, 16  ;;  %v15429_v14 = vpop.f32.mrf.mxu0  ;;  %v15443_v28 = vpop.f32.mrf.mxu1 }
 0x196   : > { %v4212_v56 = vrot.slane %v19555_v26, 5  ;;  %v4213_v12 = vrot.slane %v19556_v3, 6  ;;  %19557 = vst [vmem:[#allocation85_spill] sm:$0xff] %v15429_v14  ;;  %v4188_v43 = vrot.slane %v4187_v44, 4  ;;  %v4209_v9 = vrot.slane %v4207_v41, 6  ;;  %19560 = vst [vmem:[#allocation88_spill] sm:$0xff] %v15443_v28 }
 0x197   : > { %v4193_v10 = vrot.slane %v4191_v22, 4  ;;  %v4221_v19 = vshll.u32 %v12099_v31, 16  ;;  %v4220_v3 = vrot.slane %v4218_v42, 5  ;;  %v15439_v26 = vld [vmem:[%s13934_s16 + $0x20] sm:$0x1]  ;;  %v4623_v6 = vshrl.u32 %v12142_v13, 16  ;;  %v15441_v61 = vpop.f32.mrf.mxu0 }
 0x198   : > { %v4214_v47 = vor.u32 %v4213_v12, %v4212_v56  ;;  %19559 = vst [vmem:[#allocation87_spill] sm:$0xff] %v15441_v61  ;;  %v4192_v44 = vsel %vm14415_vm9, %v4188_v43, %v4191_v22  ;;  %v4210_v41 = vor.u32 %v4209_v9, %v4206_v33  ;;  %v12145_v12 = vld [vmem:[%s13934_s16 + $0x24] sm:$0xf]  ;;  %v19357_v61 = vshrl.u32 %v15434_v16, 16  ;;  %v15456_v33 = vpop.f32.mrf.mxu1  ;;  %v15462_v9 = vld [vmem:[%s13934_s16 + $0x2c] sm:$0x1] }
 0x199   : > { %v4202_v45 = vsel %vm14415_vm9, %v4193_v10, %v4201_v11  ;;  %v4223_v31 = vrot.slane %v4221_v19, 6  ;;  %v4625_v14 = vrot.slane %v4623_v6, 4  ;;  %v4626_v10 = vshll.u32 %v12142_v13, 16  ;;  %v15454_v22 = vpop.f32.mrf.mxu0  ;;  %19562 = vst [vmem:[#allocation90_spill] sm:$0xff] %v15456_v33 }
 0x19a   : > { %v4216_v56 = vrot.slane %v4214_v47, 4  ;;  %v12120_v15 = vcombine.low %v4192_v44, %v4202_v45  ;;  %v19356_v11 = vshll.u32 %v15434_v16, 16  ;;  %v4211_v42 = vrot.slane %v4210_v41, 4  ;;  %19561 = vst [vmem:[#allocation89_spill] sm:$0xff] %v15454_v22  ;;  %v12238_v41 = vld [vmem:[%s13934_s16 + $0x18] sm:$0xe] }
 0x19b   : > { %v4224_v25 = vor.u32 %v4223_v31, %v4220_v3  ;;  %v4642_v28 = vshll.u32 %v15439_v26, 16  ;;  %v4628_v43 = vrot.slane %v4626_v10, 5  ;;  %v4647_v19 = vshrl.u32 %v12145_v12, 16 }
 0x19c   : > { %13413 = vmatprep.mubr.msk.bf16.mxu1 %vm1128_vm3, %v12120_v15  ;;  %v4634_v13 = vrot.slane %v19356_v11, 5  ;;  %v4215_v45 = vsel %vm14415_vm9, %v4211_v42, %v4214_v47  ;;  %v4638_v6 = vrot.slane %v19357_v61, 4  ;;  %v4650_v33 = vshll.u32 %v12145_v12, 16  ;;  %v15474_v42 = vpop.f32.mrf.mxu0 }
 0x19d   : > { %v4225_v3 = vsel %vm14415_vm9, %v4216_v56, %v4224_v25  ;;  %v4644_v44 = vrot.slane %v4642_v28, 5  ;;  %v4629_v15 = vor.u32 %v4628_v43, %v4625_v14  ;;  %v4649_v10 = vrot.slane %v4647_v19, 4  ;;  %19563 = vst [vmem:[#allocation91_spill] sm:$0xff] %v15474_v42  ;;  %v15476_v25 = vpop.f32.mrf.mxu1 }
 0x19e   : > { %v12121_v31 = vcombine.low %v4215_v45, %v4225_v3  ;;  %v4639_v22 = vor.u32 %v4638_v6, %v4634_v13  ;;  %v4656_v11 = vshll.u32 %v15452_v63, 16  ;;  %v4660_v40 = vshrl.u32 %v15452_v63, 16  ;;  %19564 = vst [vmem:[#allocation92_spill] sm:$0xff] %v15476_v25  ;;  %v15482_v57 = vpop.f32.mrf.mxu0 }
 0x19f   : > { %v4666_v47 = vshll.u32 %v15462_v9, 16  ;;  %v4630_v28 = vrot.slane %v4629_v15, 4  ;;  %v4652_v56 = vrot.slane %v4650_v33, 5  ;;  %v12256_v45 = vrot.slane %v12238_v41, 9  ;;  %19565 = vst [vmem:[#allocation93_spill] sm:$0xff] %v15482_v57  ;;  %v15484_v42 = vpop.f32.mrf.mxu1 }
 0x1a0   : > { %13414 = vmatmul.mubr.msk.bf16.gmra.mxu1 %vm1128_vm3, %v12121_v31  ;;  %v4640_v14 = vrot.slane %v4639_v22, 4  ;;  %v4658_v43 = vrot.slane %v4656_v11, 5  ;;  %v4662_v12 = vrot.slane %v4660_v40, 4  ;;  %v5978_v61 = vrot.slane %v4660_v40, 5  ;;  %19566 = vst [vmem:[#allocation94_spill] sm:$0xff] %v15484_v42  ;;  %v15492_v40 = vpop.f32.mrf.mxu0 }
 0x1a1   : > { %v4668_v19 = vrot.slane %v4666_v47, 5  ;;  %v4635_v3 = vsel %vm13991_vm6, %v4630_v28, %v4634_v13  ;;  %v4653_v6 = vor.u32 %v4652_v56, %v4649_v10  ;;  %v5979_v20 = vrot.slane %v4656_v11, 6  ;;  %19567 = vst [vmem:[#allocation95_spill] sm:$0xff] %v15492_v40  ;;  %v15494_v11 = vpop.f32.mrf.mxu1 }
 0x1a2   : > { %v4645_v31 = vsel %vm13991_vm6, %v4640_v14, %v4644_v44  ;;  %v4663_v33 = vor.u32 %v4662_v12, %v4658_v43  ;;  %v5466_v22 = vrot.slane %v15434_v16, 5  ;;  %v5469_v41 = vrot.slane %v15439_v26, 5  ;;  %19568 = vst [vmem:[#allocation96_spill] sm:$0xff] %v15494_v11  ;;  %v12148_v14 = vld [vmem:[%s13934_s16 + $0x30] sm:$0xf]  ;;  %v15504_v12 = vpop.f32.mrf.mxu0 }
 0x1a3   : > { %v12200_v15 = vcombine.low %v4635_v3, %v4645_v31  ;;  %v4654_v47 = vrot.slane %v4653_v6, 4  ;;  %v15490_v13 = vor.u32 %v5979_v20, %v5978_v61  ;;  %v12257_v56 = vrot.slane %v12239_v39, 9  ;;  %19569 = vst [vmem:[#allocation97_spill] sm:$0xff] %v15504_v12  ;;  %v15506_v3 = vpop.f32.mrf.mxu1  ;;  %v15513_v6 = vld [vmem:[%s13934_s16 + $0x34] sm:$0xf] }
 0x1a4   : > { %v4664_v10 = vrot.slane %v4663_v33, 4  ;;  %v5467_v44 = vsel %vm13927_vm2, %v12256_v45, %v5466_v22  ;;  %v5468_v28 = vrot.slane %v5466_v22, 4  ;;  %v5473_v20 = vrot.slane %v15452_v63, 5  ;;  %19570 = vst [vmem:[#allocation98_spill] sm:$0xff] %v15506_v3  ;;  %v15516_v31 = vld [vmem:[%s13934_s16 + $0x38] sm:$0x1] }
 0x1a5   : > { %13421 = vmatprep.mubr.msk.bf16.mxu0 %vm1128_vm3, %v12200_v15  ;;  %v4659_v26 = vsel %vm13991_vm6, %v4654_v47, %v4658_v43  ;;  %v5476_v61 = vrot.slane %v15462_v9, 5  ;;  %v13654_v22 = vld [vmem:[%s19297_s1 + $0x80] sm:$0xff]   ;;  %v4674_v15 = vshll.u32 %v12148_v14, 16  ;;  %v12151_v47 = vld [vmem:[%s13934_s16 + $0x3c] sm:$0xf] }
 0x1a6   : > { %v4669_v45 = vsel %vm13991_vm6, %v4664_v10, %v4668_v19  ;;  %v5470_v39 = vsel %vm13927_vm2, %v5468_v28, %v5469_v41  ;;  %v5474_v9 = vsel %vm13927_vm2, %v12257_v56, %v5473_v20  ;;  %v5475_v33 = vrot.slane %v5473_v20, 4  ;;  %v15524_v41 = vpop.f32.mrf.mxu0  ;;  %v15526_v10 = vpop.f32.mrf.mxu1  ;;  %v15536_v20 = vld [vmem:[%s13934_s16 + $0x40] sm:$0xf] }
 0x1a7   : > { %v12201_v43 = vcombine.low %v4659_v26, %v4669_v45  ;;  %v12278_v63 = vcombine.low %v5467_v44, %v5470_v39  ;;  %v4671_v19 = vshrl.u32 %v12148_v14, 16  ;;  %19571 = vst [vmem:[#allocation99_spill] sm:$0xff] %v15524_v41  ;;  %19572 = vst [vmem:[#allocation100_spill] sm:$0xff] %v15526_v10  ;;  %v19358_v28 = vshll.u32 %v15513_v6, 16  ;;  %v15539_v10 = vld [vmem:[%s13934_s16 + $0x44] sm:$0x1] }
 0x1a8   : > { %v5477_v44 = vsel %vm13927_vm2, %v5475_v33, %v5476_v61  ;;  %v19359_v56 = vshrl.u32 %v15513_v6, 16  ;;  %v4690_v26 = vshll.u32 %v15516_v31, 16  ;;  %v4676_v39 = vrot.slane %v4674_v15, 5  ;;  %v12240_v41 = vld [vmem:[%s13934_s16 + $0x30] sm:$0xe]  ;;  %v15552_v3 = vpop.f32.mrf.mxu0 }
 0x1a9   : > { %13422 = vmatmul.mubr.msk.bf16.vlgmr.msra.gmra.mxu0 %vm1128_vm3, %v12201_v43  ;;  %13461 = vmatprep.mubr.msk.bf16.mxu1 %vm1128_vm3, %v12278_v63  ;;  %v12279_v14 = vcombine.low %v5474_v9, %v5477_v44  ;;  %v4673_v45 = vrot.slane %v4671_v19, 4  ;;  %v13793_v43 = vld [vmem:[%s19297_s1 + $0x88] sm:$0xff]   ;;  %v4682_v61 = vrot.slane %v19358_v28, 5  ;;  %v4695_v33 = vshrl.u32 %v12151_v47, 16  ;;  %19573 = vst [vmem:[#allocation101_spill] sm:$0xff] %v15552_v3 }
 0x1aa   : > { %13498 = vmatpush3.bf16.msra.mxu0 %v13793_v43  ;;  %v4686_v63 = vrot.slane %v19359_v56, 4  ;;  %v4698_v19 = vshll.u32 %v12151_v47, 16  ;;  %v19360_v15 = vshll.u32 %v15536_v20, 16  ;;  %v19361_v44 = vshrl.u32 %v15536_v20, 16  ;;  %v15554_v43 = vpop.f32.mrf.mxu1  ;;  %v12241_v3 = vld [vmem:[%s13934_s16 + $0x3c] sm:$0xe] }
 0x1ab   : > { %13499 = vmatprep.subr.bf16.mxu0 %v13654_v22  ;;  %13462 = vmatmul.mubr.msk.bf16.vlgmr.msra.gmra.mxu1 %vm1128_vm3, %v12279_v14  ;;  %v4677_v9 = vor.u32 %v4676_v39, %v4673_v45  ;;  %19574 = vst [vmem:[#allocation102_spill] sm:$0xff] %v15554_v43  ;;  %v4692_v11 = vrot.slane %v4690_v26, 5  ;;  %v4697_v12 = vrot.slane %v4695_v33, 4  ;;  %v4714_v56 = vshll.u32 %v15539_v10, 16  ;;  %v15561_v45 = vpop.f32.mrf.mxu0 }
 0x1ac   : > { %v4687_v28 = vor.u32 %v4686_v63, %v4682_v61  ;;  %v4700_v42 = vrot.slane %v4698_v19, 5  ;;  %v4706_v47 = vrot.slane %v19360_v15, 5  ;;  %v4710_v14 = vrot.slane %v19361_v44, 4  ;;  %19575 = vst [vmem:[#allocation103_spill] sm:$0xff] %v15561_v45  ;;  %v15563_v39 = vpop.f32.mrf.mxu1 }
 0x1ad   : > { %v4678_v40 = vrot.slane %v4677_v9, 4  ;;  %19576 = vst [vmem:[#allocation104_spill] sm:$0xff] %v15563_v39  ;;  %v4716_v63 = vrot.slane %v4714_v56, 5  ;;  %v12258_v26 = vrot.slane %v12240_v41, 9  ;;  %v5480_v33 = vrot.slane %v15513_v6, 5  ;;  %v15570_v44 = vpop.f32.mrf.mxu0 }
 0x1ae   : > { %13500 = vmatpush3.bf16.msra.mxu0 %v13654_v22  ;;  %v4688_v43 = vrot.slane %v4687_v28, 4  ;;  %v4701_v19 = vor.u32 %v4700_v42, %v4697_v12  ;;  %v4711_v15 = vor.u32 %v4710_v14, %v4706_v47  ;;  %v5483_v22 = vrot.slane %v15516_v31, 5  ;;  %19577 = vst [vmem:[#allocation105_spill] sm:$0xff] %v15570_v44  ;;  %v12154_v56 = vld [vmem:[%s13934_s16 + $0x48] sm:$0xf]  ;;  %v15577_v12 = vpop.f32.mrf.mxu1 }
 0x1af   : > { %v4683_v9 = vsel %vm13991_vm6, %v4678_v40, %v4682_v61  ;;  %v5481_v41 = vsel %vm13927_vm2, %v12258_v26, %v5480_v33  ;;  %v5482_v28 = vrot.slane %v5480_v33, 4  ;;  %v12259_v42 = vrot.slane %v12241_v3, 9  ;;  %19578 = vst [vmem:[#allocation106_spill] sm:$0xff] %v15577_v12  ;;  %v12157_v33 = vld [vmem:[%s13934_s16 + $0x54] sm:$0xf] }
 0x1b0   : > { %v4693_v39 = vsel %vm13991_vm6, %v4688_v43, %v4692_v11  ;;  %v4702_v25 = vrot.slane %v4701_v19, 4  ;;  %v4712_v40 = vrot.slane %v4711_v15, 4  ;;  %v5487_v61 = vrot.slane %v15536_v20, 5  ;;  %v15584_v11 = vld [vmem:[%s13934_s16 + $0x4c] sm:$0xf] }
 0x1b1   : > { %v12202_v45 = vcombine.low %v4683_v9, %v4693_v39  ;;  %v5484_v31 = vsel %vm13927_vm2, %v5482_v28, %v5483_v22  ;;  %v5490_v14 = vrot.slane %v15539_v10, 5  ;;  %v15587_v43 = vld [vmem:[%s13934_s16 + $0x50] sm:$0x1]  ;;  %v4719_v26 = vshrl.u32 %v12154_v56, 16  ;;  %v15595_v9 = vpop.f32.mrf.mxu0 }
 0x1b2   : > { %v4707_v15 = vsel %vm13991_vm6, %v4702_v25, %v4706_v47  ;;  %v4717_v3 = vsel %vm13991_vm6, %v4712_v40, %v4716_v63  ;;  %v12280_v39 = vcombine.low %v5481_v41, %v5484_v31  ;;  %19579 = vst [vmem:[#allocation107_spill] sm:$0xff] %v15595_v9  ;;  %v5488_v19 = vsel %vm13927_vm2, %v12259_v42, %v5487_v61  ;;  %v15604_v41 = vld [vmem:[%s13934_s16 + $0x58] sm:$0xf]  ;;  %v15606_v40 = vpop.f32.mrf.mxu1  ;;  %v12159_v31 = vld [vmem:[%s13934_s16 + $0x5c] sm:$0x1] }
 0x1b3   : > { %13425 = vmatprep.mubr.msk.bf16.mxu0 %vm1128_vm3, %v12202_v45  ;;  %v12203_v10 = vcombine.low %v4707_v15, %v4717_v3  ;;  %v5489_v22 = vrot.slane %v5487_v61, 4  ;;  %v4722_v28 = vshll.u32 %v12154_v56, 16  ;;  %v4721_v45 = vrot.slane %v4719_v26, 4  ;;  %19580 = vst [vmem:[#allocation108_spill] sm:$0xff] %v15606_v40  ;;  %v12242_v26 = vld [vmem:[%s13934_s16 + $0x48] sm:$0xe]  ;;  %v15617_v9 = vpop.f32.mrf.mxu0 }
 0x1b4   : > { %13465 = vmatprep.mubr.msk.bf16.mxu1 %vm1128_vm3, %v12280_v39  ;;  %v19362_v25 = vshll.u32 %v15584_v11, 16  ;;  %v19363_v47 = vshrl.u32 %v15584_v11, 16  ;;  %v4738_v63 = vshll.u32 %v15587_v43, 16  ;;  %v4743_v61 = vshrl.u32 %v12157_v33, 16  ;;  %19581 = vst [vmem:[#allocation109_spill] sm:$0xff] %v15617_v9 }
 0x1b5   : > { %13426 = vmatmul.mubr.msk.bf16.gmra.mxu0 %vm1128_vm3, %v12203_v10  ;;  %v5491_v42 = vsel %vm13927_vm2, %v5489_v22, %v5490_v14  ;;  %v4724_v56 = vrot.slane %v4722_v28, 5  ;;  %v4746_v10 = vshll.u32 %v12157_v33, 16  ;;  %v19364_v44 = vshll.u32 %v15604_v41, 16 }
 0x1b6   : > { %v12281_v15 = vcombine.low %v5488_v19, %v5491_v42  ;;  %v4730_v3 = vrot.slane %v19362_v25, 5  ;;  %v4734_v39 = vrot.slane %v19363_v47, 4  ;;  %v4745_v40 = vrot.slane %v4743_v61, 4  ;;  %v15622_v42 = vpop.f32.mrf.mxu1 }
 0x1b7   : > { %v4725_v12 = vor.u32 %v4724_v56, %v4721_v45  ;;  %v4740_v22 = vrot.slane %v4738_v63, 5  ;;  %v19365_v19 = vshrl.u32 %v15604_v41, 16  ;;  %v4762_v28 = vshll.u32 %v12159_v31, 16  ;;  %19582 = vst [vmem:[#allocation110_spill] sm:$0xff] %v15622_v42  ;;  %v15630_v63 = vpop.f32.mrf.mxu0 }
 0x1b8   : > { %13466 = vmatmul.mubr.msk.bf16.gmra.mxu1 %vm1128_vm3, %v12281_v15  ;;  %v4735_v14 = vor.u32 %v4734_v39, %v4730_v3  ;;  %v4748_v47 = vrot.slane %v4746_v10, 5  ;;  %v4754_v45 = vrot.slane %v19364_v44, 5  ;;  %v12260_v56 = vrot.slane %v12242_v26, 9  ;;  %v12243_v39 = vld [vmem:[%s13934_s16 + $0x54] sm:$0xe]  ;;  %19583 = vst [vmem:[#allocation111_spill] sm:$0xff] %v15630_v63  ;;  %v15640_v27 = vpop.f32.mrf.mxu1 }
 0x1b9   : > { %v4726_v25 = vrot.slane %v4725_v12, 4  ;;  %v4758_v33 = vrot.slane %v19365_v19, 4  ;;  %v5494_v15 = vrot.slane %v15584_v11, 5  ;;  %v4764_v10 = vrot.slane %v4762_v28, 5  ;;  %19584 = vst [vmem:[#allocation112_spill] sm:$0xff] %v15640_v27  ;;  %v15651_v28 = vpop.f32.mrf.mxu0 }
 0x1ba   : > { %v4736_v61 = vrot.slane %v4735_v14, 4  ;;  %v4749_v12 = vor.u32 %v4748_v47, %v4745_v40  ;;  %v5497_v57 = vrot.slane %v15587_v43, 5  ;;  %v12261_v1 = vrot.slane %v12243_v39, 9  ;;  %v15644_v47 = vld [vmem:[%s13934_s16 + $0x64] sm:$0xf]  ;;  %19585 = vst [vmem:[#allocation113_spill] sm:$0xff] %v15651_v28 }
 0x1bb   : > { %v4731_v42 = vsel %vm13991_vm6, %v4726_v25, %v4730_v3  ;;  %v4759_v14 = vor.u32 %v4758_v33, %v4754_v45  ;;  %v5495_v44 = vsel %vm13927_vm2, %v12260_v56, %v5494_v15  ;;  %v5496_v19 = vrot.slane %v5494_v15, 4  ;;  %v12163_v39 = vld [vmem:[%s13934_s16 + $0x6c] sm:$0xf] }
 0x1bc   : > { %v4741_v26 = vsel %vm13991_vm6, %v4736_v61, %v4740_v22  ;;  %v4750_v48 = vrot.slane %v4749_v12, 4  ;;  %v5501_v25 = vrot.slane %v15604_v41, 5  ;;  %v5504_v3 = vrot.slane %v12159_v31, 5  ;;  %v15649_v22 = vld [vmem:[%s13934_s16 + $0x68] sm:$0x1]  ;;  %v15662_v12 = vpop.f32.mrf.mxu1 }
 0x1bd   : > { %v12204_v53 = vcombine.low %v4731_v42, %v4741_v26  ;;  %v4760_v43 = vrot.slane %v4759_v14, 4  ;;  %v5498_v40 = vsel %vm13927_vm2, %v5496_v19, %v5497_v57  ;;  %v4767_v57 = vshrl.u32 %v12160_v5, 16  ;;  %19586 = vst [vmem:[#allocation114_spill] sm:$0xff] %v15662_v12 }
 0x1be   : > { %v4755_v42 = vsel %vm13991_vm6, %v4750_v48, %v4754_v45  ;;  %v12282_v56 = vcombine.low %v5495_v44, %v5498_v40  ;;  %v5502_v61 = vsel %vm13927_vm2, %v12261_v1, %v5501_v25  ;;  %v5503_v33 = vrot.slane %v5501_v25, 4  ;;  %v15670_v45 = vld [vmem:[%s13934_s16 + $0x70] sm:$0xf]  ;;  %v15675_v25 = vld [vmem:[%s13934_s16 + $0x74] sm:$0x1] }
 0x1bf   : > { %13429 = vmatprep.mubr.msk.bf16.mxu0 %vm1128_vm3, %v12204_v53  ;;  %v4765_v15 = vsel %vm13991_vm6, %v4760_v43, %v4764_v10  ;;  %v4770_v31 = vshll.u32 %v12160_v5, 16  ;;  %v19366_v19 = vshll.u32 %v15644_v47, 16  ;;  %v19367_v1 = vshrl.u32 %v15644_v47, 16  ;;  %v15677_v43 = vpop.f32.mrf.mxu0 }
 0x1c0   : > { %v12205_v53 = vcombine.low %v4755_v42, %v4765_v15  ;;  %13469 = vmatprep.mubr.msk.bf16.mxu1 %vm1128_vm3, %v12282_v56  ;;  %v5505_v48 = vsel %vm13927_vm2, %v5503_v33, %v5504_v3  ;;  %v4786_v44 = vshll.u32 %v15649_v22, 16  ;;  %v4769_v5 = vrot.slane %v4767_v57, 4  ;;  %19587 = vst [vmem:[#allocation115_spill] sm:$0xff] %v15677_v43  ;;  %v12244_v15 = vld [vmem:[%s13934_s16 + $0x60] sm:$0xe]  ;;  %v15686_v57 = vpop.f32.mrf.mxu1 }
 0x1c1   : > { %v12283_v10 = vcombine.low %v5502_v61, %v5505_v48  ;;  %v4772_v26 = vrot.slane %v4770_v31, 5  ;;  %v4778_v14 = vrot.slane %v19366_v19, 5  ;;  %v4782_v40 = vrot.slane %v19367_v1, 4  ;;  %19588 = vst [vmem:[#allocation116_spill] sm:$0xff] %v15686_v57 }
 0x1c2   : > { %13430 = vmatmul.mubr.msk.bf16.gmra.mxu0 %vm1128_vm3, %v12205_v53  ;;  %v4791_v3 = vshrl.u32 %v12163_v39, 16  ;;  %v4794_v56 = vshll.u32 %v12163_v39, 16  ;;  %v19368_v61 = vshll.u32 %v15670_v45, 16  ;;  %v19369_v33 = vshrl.u32 %v15670_v45, 16  ;;  %v15700_v30 = vpop.f32.mrf.mxu1 }
 0x1c3   : > { %13470 = vmatmul.mubr.msk.bf16.gmra.mxu1 %vm1128_vm3, %v12283_v10  ;;  %v4773_v42 = vor.u32 %v4772_v26, %v4769_v5  ;;  %v4783_v31 = vor.u32 %v4782_v40, %v4778_v14  ;;  %v4788_v48 = vrot.slane %v4786_v44, 5  ;;  %v4810_v53 = vshll.u32 %v15675_v25, 16  ;;  %v15693_v5 = vpop.f32.mrf.mxu0  ;;  %v12245_v44 = vld [vmem:[%s13934_s16 + $0x6c] sm:$0xe]  ;;  %19590 = vst [vmem:[#allocation118_spill] sm:$0xff] %v15700_v30 }
 0x1c4   : > { %v4793_v19 = vrot.slane %v4791_v3, 4  ;;  %v4796_v1 = vrot.slane %v4794_v56, 5  ;;  %v4802_v10 = vrot.slane %v19368_v61, 5  ;;  %v4806_v39 = vrot.slane %v19369_v33, 4  ;;  %19589 = vst [vmem:[#allocation117_spill] sm:$0xff] %v15693_v5 }
 0x1c5   : > { %v4774_v27 = vrot.slane %v4773_v42, 4  ;;  %v4784_v26 = vrot.slane %v4783_v31, 4  ;;  %v4812_v28 = vrot.slane %v4810_v53, 5  ;;  %v12262_v32 = vrot.slane %v12244_v15, 9  ;;  %v12166_v53 = vld [vmem:[%s13934_s16 + $0x78] sm:$0xf] }
 0x1c6   : > { %v5508_v40 = vrot.slane %v15644_v47, 5  ;;  %v4797_v42 = vor.u32 %v4796_v1, %v4793_v19  ;;  %v4807_v56 = vor.u32 %v4806_v39, %v4802_v10  ;;  %v5511_v61 = vrot.slane %v15649_v22, 5  ;;  %v15707_v1 = vpop.f32.mrf.mxu0 }
 0x1c7   : > { %v4779_v3 = vsel %vm13991_vm6, %v4774_v27, %v4778_v14  ;;  %v4789_v33 = vsel %vm13991_vm6, %v4784_v26, %v4788_v48  ;;  %v12263_v19 = vrot.slane %v12245_v44, 9  ;;  %19591 = vst [vmem:[#allocation119_spill] sm:$0xff] %v15707_v1  ;;  %v5515_v14 = vrot.slane %v15670_v45, 5  ;;  %v15714_v48 = vld [vmem:[%s13934_s16 + $0x7c] sm:$0xf] }
 0x1c8   : > { %v5509_v15 = vsel %vm13927_vm2, %v12262_v32, %v5508_v40  ;;  %v5510_v31 = vrot.slane %v5508_v40, 4  ;;  %v12206_v17 = vcombine.low %v4779_v3, %v4789_v33  ;;  %v4798_v37 = vrot.slane %v4797_v42, 4  ;;  %v15717_v26 = vld [vmem:[%s13934_s16 + $0x80] sm:$0x1]  ;;  %v15725_v3 = vpop.f32.mrf.mxu1 }
 0x1c9   : > { %v4808_v27 = vrot.slane %v4807_v56, 4  ;;  %v5518_v39 = vrot.slane %v15675_v25, 5  ;;  %v4815_v44 = vshrl.u32 %v12166_v53, 16  ;;  %19592 = vst [vmem:[#allocation120_spill] sm:$0xff] %v15725_v3  ;;  %v5516_v42 = vsel %vm13927_vm2, %v12263_v19, %v5515_v14 }
 0x1ca   : > { %v5512_v22 = vsel %vm13927_vm2, %v5510_v31, %v5511_v61  ;;  %13433 = vmatprep.mubr.msk.bf16.mxu0 %vm1128_vm3, %v12206_v17  ;;  %v4803_v32 = vsel %vm13991_vm6, %v4798_v37, %v4802_v10  ;;  %v12169_v61 = vld [vmem:[%s13934_s16 + $0x84] sm:$0xf]  ;;  %v5517_v56 = vrot.slane %v5515_v14, 4  ;;  %v4818_v31 = vshll.u32 %v12166_v53, 16  ;;  %v15749_v30 = vpop.f32.mrf.mxu1 }
 0x1cb   : > { %v4813_v33 = vsel %vm13991_vm6, %v4808_v27, %v4812_v28  ;;  %v12284_v40 = vcombine.low %v5509_v15, %v5512_v22  ;;  %v4817_v17 = vrot.slane %v4815_v44, 4  ;;  %v19370_v37 = vshll.u32 %v15714_v48, 16  ;;  %v15734_v15 = vld [vmem:[%s13934_s16 + $0x88] sm:$0xf]  ;;  %v15736_v27 = vpop.f32.mrf.mxu0  ;;  %v12171_v22 = vld [vmem:[%s13934_s16 + $0x8c] sm:$0x1] }
 0x1cc   : > { %v12207_v25 = vcombine.low %v4803_v32, %v4813_v33  ;;  %v19371_v28 = vshrl.u32 %v15714_v48, 16  ;;  %v4834_v10 = vshll.u32 %v15717_v26, 16  ;;  %19593 = vst [vmem:[#allocation121_spill] sm:$0xff] %v15736_v27  ;;  %v5519_v19 = vsel %vm13927_vm2, %v5517_v56, %v5518_v39  ;;  %v15747_v44 = vld [vmem:[%s13934_s16 + $0x78] sm:$0xe]  ;;  %19594 = vst [vmem:[#allocation122_spill] sm:$0xff] %v15749_v30 }
 0x1cd   : > { %13473 = vmatprep.mubr.msk.bf16.mxu1 %vm1128_vm3, %v12284_v40  ;;  %v4820_v53 = vrot.slane %v4818_v31, 5  ;;  %v4839_v14 = vshrl.u32 %v12169_v61, 16  ;;  %v12285_v32 = vcombine.low %v5516_v42, %v5519_v19  ;;  %v4826_v33 = vrot.slane %v19370_v37, 5  ;;  %v15754_v37 = vpop.f32.mrf.mxu0  ;;  %v12178_v30 = vld [vmem:[%s13934_s16 + $0xa8] sm:$0xf] }
 0x1ce   : > { %13434 = vmatmul.mubr.msk.bf16.gmra.mxu0 %vm1128_vm3, %v12207_v25  ;;  %v4830_v40 = vrot.slane %v19371_v28, 4  ;;  %v4842_v25 = vshll.u32 %v12169_v61, 16  ;;  %v19372_v39 = vshll.u32 %v15734_v15, 16  ;;  %v4836_v42 = vrot.slane %v4834_v10, 5  ;;  %19595 = vst [vmem:[#allocation123_spill] sm:$0xff] %v15754_v37 }
 0x1cf   : > { %v4821_v27 = vor.u32 %v4820_v53, %v4817_v17  ;;  %v4841_v57 = vrot.slane %v4839_v14, 4  ;;  %13474 = vmatmul.mubr.msk.bf16.gmra.mxu1 %vm1128_vm3, %v12285_v32  ;;  %v19373_v31 = vshrl.u32 %v15734_v15, 16  ;;  %v4858_v19 = vshll.u32 %v12171_v22, 16  ;;  %v15763_v10 = vld [vmem:[%s13934_s16 + $0x84] sm:$0xe]  ;;  %v15775_v52 = vpop.f32.mrf.mxu0 }
 0x1d0   : > { %v4831_v56 = vor.u32 %v4830_v40, %v4826_v33  ;;  %v4844_v12 = vrot.slane %v4842_v25, 5  ;;  %v4850_v17 = vrot.slane %v19372_v39, 5  ;;  %v12264_v53 = vrot.slane %v15747_v44, 9  ;;  %v15765_v40 = vpop.f32.mrf.mxu1  ;;  %19597 = vst [vmem:[#allocation125_spill] sm:$0xff] %v15775_v52  ;;  %v19708_v59 = vld [vmem:[#allocation120_spill] sm:$0xff] }
 0x1d1   : > { %v4822_v28 = vrot.slane %v4821_v27, 4  ;;  %v4854_v14 = vrot.slane %v19373_v31, 4  ;;  %v5522_v32 = vrot.slane %v15714_v48, 5  ;;  %19596 = vst [vmem:[#allocation124_spill] sm:$0xff] %v15765_v40  ;;  %v4860_v63 = vrot.slane %v4858_v19, 5 }
 0x1d2   : > { %v4832_v61 = vrot.slane %v4831_v56, 4  ;;  %v4845_v25 = vor.u32 %v4844_v12, %v4841_v57  ;;  %v5525_v39 = vrot.slane %v15717_v26, 5  ;;  %v5529_v12 = vrot.slane %v15734_v15, 5  ;;  %v15780_v57 = vld [vmem:[%s13934_s16 + $0x94] sm:$0xf] }
 0x1d3   : > { %v4827_v27 = vsel %vm13991_vm6, %v4822_v28, %v4826_v33  ;;  %v4855_v9 = vor.u32 %v4854_v14, %v4850_v17  ;;  %v5523_v31 = vsel %vm13927_vm2, %v12264_v53, %v5522_v32  ;;  %v5524_v7 = vrot.slane %v5522_v32, 4  ;;  %v15785_v19 = vld [vmem:[%s13934_s16 + $0x98] sm:$0x1]  ;;  %v15787_v53 = vpop.f32.mrf.mxu1 }
 0x1d4   : > { %v4837_v56 = vsel %vm13991_vm6, %v4832_v61, %v4836_v42  ;;  %v4846_v40 = vrot.slane %v4845_v25, 4  ;;  %v12265_v28 = vrot.slane %v15763_v10, 9  ;;  %v5532_v42 = vrot.slane %v12171_v22, 5  ;;  %19598 = vst [vmem:[#allocation126_spill] sm:$0xff] %v15787_v53  ;;  %v12175_v25 = vld [vmem:[%s13934_s16 + $0x9c] sm:$0xf] }
 0x1d5   : > { %v12208_v62 = vcombine.low %v4827_v27, %v4837_v56  ;;  %v4856_v26 = vrot.slane %v4855_v9, 4  ;;  %v5526_v33 = vsel %vm13927_vm2, %v5524_v7, %v5525_v39  ;;  %v5531_v27 = vrot.slane %v5529_v12, 4  ;;  %v15798_v56 = vpop.f32.mrf.mxu0 }
 0x1d6   : > { %v4851_v61 = vsel %vm13991_vm6, %v4846_v40, %v4850_v17  ;;  %v12286_v14 = vcombine.low %v5523_v31, %v5526_v33  ;;  %v5530_v32 = vsel %vm13927_vm2, %v12265_v28, %v5529_v12  ;;  %v4863_v7 = vshrl.u32 %v12172_v34, 16  ;;  %19599 = vst [vmem:[#allocation127_spill] sm:$0xff] %v15798_v56  ;;  %v15811_v33 = vld [vmem:[%s13934_s16 + $0xa4] sm:$0x1] }
 0x1d7   : > { %13437 = vmatprep.mubr.msk.bf16.mxu0 %vm1128_vm3, %v12208_v62  ;;  %v4861_v9 = vsel %vm13991_vm6, %v4856_v26, %v4860_v63  ;;  %v4866_v22 = vshll.u32 %v12172_v34, 16  ;;  %v19374_v39 = vshll.u32 %v15780_v57, 16  ;;  %v5533_v31 = vsel %vm13927_vm2, %v5531_v27, %v5532_v42  ;;  %v15806_v63 = vld [vmem:[%s13934_s16 + $0xa0] sm:$0xf] }
 0x1d8   : > { %v12209_v62 = vcombine.low %v4851_v61, %v4861_v9  ;;  %13477 = vmatprep.mubr.msk.bf16.mxu1 %vm1128_vm3, %v12286_v14  ;;  %v19375_v17 = vshrl.u32 %v15780_v57, 16  ;;  %v4882_v40 = vshll.u32 %v15785_v19, 16  ;;  %v12287_v28 = vcombine.low %v5530_v32, %v5533_v31  ;;  %v15813_v61 = vpop.f32.mrf.mxu1  ;;  %v15824_v31 = vpop.f32.mrf.mxu0 }
 0x1d9   : > { %v4865_v34 = vrot.slane %v4863_v7, 4  ;;  %v4868_v12 = vrot.slane %v4866_v22, 5  ;;  %v4874_v26 = vrot.slane %v19374_v39, 5  ;;  %19600 = vst [vmem:[#allocation128_spill] sm:$0xff] %v15813_v61  ;;  %v4887_v14 = vshrl.u32 %v12175_v25, 16  ;;  %19601 = vst [vmem:[#allocation129_spill] sm:$0xff] %v15824_v31 }
 0x1da   : > { %13438 = vmatmul.mubr.msk.bf16.gmra.mxu0 %vm1128_vm3, %v12209_v62  ;;  %v4878_v42 = vrot.slane %v19375_v17, 4  ;;  %13478 = vmatmul.mubr.msk.bf16.gmra.mxu1 %vm1128_vm3, %v12287_v28  ;;  %v4890_v9 = vshll.u32 %v12175_v25, 16  ;;  %v19376_v32 = vshll.u32 %v15806_v63, 16  ;;  %v19377_v7 = vshrl.u32 %v15806_v63, 16  ;;  %v15822_v22 = vld [vmem:[%s13934_s16 + $0x90] sm:$0xe] }
 0x1db   : > { %v4869_v27 = vor.u32 %v4868_v12, %v4865_v34  ;;  %v4884_v53 = vrot.slane %v4882_v40, 5  ;;  %v4889_v62 = vrot.slane %v4887_v14, 4  ;;  %v4906_v61 = vshll.u32 %v15811_v33, 16  ;;  %v15831_v34 = vpop.f32.mrf.mxu1 }
 0x1dc   : > { %v4879_v39 = vor.u32 %v4878_v42, %v4874_v26  ;;  %v4892_v56 = vrot.slane %v4890_v9, 5  ;;  %v4898_v28 = vrot.slane %v19376_v32, 5  ;;  %v4902_v25 = vrot.slane %v19377_v7, 4  ;;  %19602 = vst [vmem:[#allocation130_spill] sm:$0xff] %v15831_v34  ;;  %v15836_v42 = vld [vmem:[%s13934_s16 + $0x9c] sm:$0xe] }
 0x1dd   : > { %v4870_v17 = vrot.slane %v4869_v27, 4  ;;  %v4908_v52 = vrot.slane %v4906_v61, 5  ;;  %v12266_v31 = vrot.slane %v15822_v22, 9  ;;  %v5536_v40 = vrot.slane %v15780_v57, 5 }
 0x1de   : > { %v4880_v12 = vrot.slane %v4879_v39, 4  ;;  %v4893_v27 = vor.u32 %v4892_v56, %v4889_v62  ;;  %v4903_v9 = vor.u32 %v4902_v25, %v4898_v28  ;;  %v5539_v32 = vrot.slane %v15785_v19, 5  ;;  %v15841_v7 = vpop.f32.mrf.mxu0  ;;  %v15861_v25 = vld [vmem:[%s13934_s16 + $0xb0] sm:$0x1] }
 0x1df   : > { %v4875_v14 = vsel %vm13991_vm6, %v4870_v17, %v4874_v26  ;;  %19603 = vst [vmem:[#allocation131_spill] sm:$0xff] %v15841_v7  ;;  %v5537_v61 = vsel %vm13927_vm2, %v12266_v31, %v5536_v40  ;;  %v5538_v34 = vrot.slane %v5536_v40, 4  ;;  %v12267_v56 = vrot.slane %v15836_v42, 9  ;;  %v15849_v17 = vpop.f32.mrf.mxu1  ;;  %v15858_v31 = vld [vmem:[%s13934_s16 + $0xac] sm:$0xf] }
 0x1e0   : > { %v4885_v39 = vsel %vm13991_vm6, %v4880_v12, %v4884_v53  ;;  %v4894_v3 = vrot.slane %v4893_v27, 4  ;;  %v4904_v23 = vrot.slane %v4903_v9, 4  ;;  %19604 = vst [vmem:[#allocation132_spill] sm:$0xff] %v15849_v17  ;;  %v15851_v26 = vpop.f32.mrf.mxu0  ;;  %v5543_v53 = vrot.slane %v15806_v63, 5  ;;  %v12181_v17 = vld [vmem:[%s13934_s16 + $0xb4] sm:$0xf] }
 0x1e1   : > { %v12210_v37 = vcombine.low %v4875_v14, %v4885_v39  ;;  %19605 = vst [vmem:[#allocation133_spill] sm:$0xff] %v15851_v26  ;;  %v5540_v19 = vsel %vm13927_vm2, %v5538_v34, %v5539_v32  ;;  %v5546_v62 = vrot.slane %v15811_v33, 5  ;;  %v4911_v27 = vshrl.u32 %v12178_v30, 16 }
 0x1e2   : > { %v4899_v12 = vsel %vm13991_vm6, %v4894_v3, %v4898_v28  ;;  %v4909_v40 = vsel %vm13991_vm6, %v4904_v23, %v4908_v52  ;;  %v12288_v14 = vcombine.low %v5537_v61, %v5540_v19  ;;  %v15868_v32 = vpop.f32.mrf.mxu0  ;;  %v5544_v33 = vsel %vm13927_vm2, %v12267_v56, %v5543_v53  ;;  %v15878_v23 = vld [vmem:[%s13934_s16 + $0xb8] sm:$0xf]  ;;  %v15880_v61 = vpop.f32.mrf.mxu1 }
 0x1e3   : > { %13441 = vmatprep.mubr.msk.bf16.mxu0 %vm1128_vm3, %v12210_v37  ;;  %19606 = vst [vmem:[#allocation134_spill] sm:$0xff] %v15868_v32  ;;  %v12211_v34 = vcombine.low %v4899_v12, %v4909_v40  ;;  %v5545_v9 = vrot.slane %v5543_v53, 4  ;;  %v4914_v39 = vshll.u32 %v12178_v30, 16  ;;  %v4913_v37 = vrot.slane %v4911_v27, 4  ;;  %19607 = vst [vmem:[#allocation135_spill] sm:$0xff] %v15880_v61 }
 0x1e4   : > { %13481 = vmatprep.mubr.msk.bf16.mxu1 %vm1128_vm3, %v12288_v14  ;;  %v19378_v3 = vshll.u32 %v15858_v31, 16  ;;  %v19379_v28 = vshrl.u32 %v15858_v31, 16  ;;  %v4930_v52 = vshll.u32 %v15861_v25, 16  ;;  %v15882_v19 = vpop.f32.mrf.mxu0  ;;  %v12183_v53 = vld [vmem:[%s13934_s16 + $0xbc] sm:$0x1]  ;;  %v4935_v32 = vshrl.u32 %v12181_v17, 16 }
 0x1e5   : > { %19608 = vst [vmem:[#allocation136_spill] sm:$0xff] %v15882_v19  ;;  %13442 = vmatmul.mubr.msk.bf16.gmra.mxu0 %vm1128_vm3, %v12211_v34  ;;  %v5547_v30 = vsel %vm13927_vm2, %v5545_v9, %v5546_v62  ;;  %v4916_v56 = vrot.slane %v4914_v39, 5  ;;  %v4938_v61 = vshll.u32 %v12181_v17, 16  ;;  %v19380_v19 = vshll.u32 %v15878_v23, 16 }
 0x1e6   : > { %v12289_v12 = vcombine.low %v5544_v33, %v5547_v30  ;;  %v4922_v40 = vrot.slane %v19378_v3, 5  ;;  %v4926_v14 = vrot.slane %v19379_v28, 4  ;;  %v4932_v26 = vrot.slane %v4930_v52, 5  ;;  %v15896_v33 = vld [vmem:[%s13934_s16 + $0xa8] sm:$0xe] }
 0x1e7   : > { %v4917_v27 = vor.u32 %v4916_v56, %v4913_v37  ;;  %v19381_v62 = vshrl.u32 %v15878_v23, 16  ;;  %v4954_v9 = vshll.u32 %v12183_v53, 16  ;;  %v4937_v37 = vrot.slane %v4935_v32, 4 }
 0x1e8   : > { %13482 = vmatmul.mubr.msk.bf16.gmra.mxu1 %vm1128_vm3, %v12289_v12  ;;  %v4927_v34 = vor.u32 %v4926_v14, %v4922_v40  ;;  %v15898_v39 = vpop.f32.mrf.mxu1  ;;  %v15900_v30 = vpop.f32.mrf.mxu0  ;;  %v4940_v56 = vrot.slane %v4938_v61, 5  ;;  %v4946_v17 = vrot.slane %v19380_v19, 5  ;;  %v5550_v32 = vrot.slane %v15858_v31, 5  ;;  %v15915_v61 = vld [vmem:[%s13934_s16 + $0xb4] sm:$0xe] }
 0x1e9   : > { %19609 = vst [vmem:[#allocation137_spill] sm:$0xff] %v15898_v39  ;;  %19610 = vst [vmem:[#allocation138_spill] sm:$0xff] %v15900_v30  ;;  %v4918_v3 = vrot.slane %v4917_v27, 4  ;;  %v4950_v52 = vrot.slane %v19381_v62, 4  ;;  %v12268_v30 = vrot.slane %v15896_v33, 9  ;;  %v4956_v19 = vrot.slane %v4954_v9, 5 }
 0x1ea   : > { %v4928_v28 = vrot.slane %v4927_v34, 4  ;;  %v15906_v12 = vpop.f32.mrf.mxu1  ;;  %v15908_v14 = vpop.f32.mrf.mxu0  ;;  %v4941_v39 = vor.u32 %v4940_v56, %v4937_v37  ;;  %v5553_v62 = vrot.slane %v15861_v25, 5  ;;  %v5552_v56 = vrot.slane %v5550_v32, 4 }
 0x1eb   : > { %19611 = vst [vmem:[#allocation139_spill] sm:$0xff] %v15906_v12  ;;  %19612 = vst [vmem:[#allocation140_spill] sm:$0xff] %v15908_v14  ;;  %v4923_v7 = vsel %vm13991_vm6, %v4918_v3, %v4922_v40  ;;  %v4951_v34 = vor.u32 %v4950_v52, %v4946_v17  ;;  %v5551_v37 = vsel %vm13927_vm2, %v12268_v30, %v5550_v32  ;;  %v12269_v8 = vrot.slane %v15915_v61, 9  ;;  %v15938_v30 = vld [vmem:[%s13934_s16 + $0xc8] sm:$0x1] }
 0x1ec   : > { %v4933_v27 = vsel %vm13991_vm6, %v4928_v28, %v4932_v26  ;;  %v15920_v14 = vpop.f32.mrf.mxu1  ;;  %v4942_v40 = vrot.slane %v4941_v39, 4  ;;  %v15924_v12 = vpop.f32.mrf.mxu0  ;;  %v5557_v26 = vrot.slane %v15878_v23, 5  ;;  %v12184_v28 = vld [vmem:[%s13934_s16 + $0xc0] sm:$0xf]  ;;  %v5560_v9 = vrot.slane %v12183_v53, 5 }
 0x1ed   : > { %19613 = vst [vmem:[#allocation141_spill] sm:$0xff] %v15920_v14  ;;  %v12212_v3 = vcombine.low %v4923_v7, %v4933_v27  ;;  %19614 = vst [vmem:[#allocation142_spill] sm:$0xff] %v15924_v12  ;;  %v4952_v54 = vrot.slane %v4951_v34, 4  ;;  %v5554_v7 = vsel %vm13927_vm2, %v5552_v56, %v5553_v62  ;;  %v15935_v39 = vld [vmem:[%s13934_s16 + $0xc4] sm:$0xf]  ;;  %v4962_v62 = vshll.u32 %v12184_v28, 16 }
 0x1ee   : > { %v4947_v25 = vsel %vm13991_vm6, %v4942_v40, %v4946_v17  ;;  %v15940_v52 = vpop.f32.mrf.mxu1  ;;  %v12290_v27 = vcombine.low %v5551_v37, %v5554_v7  ;;  %v5558_v34 = vsel %vm13927_vm2, %v12269_v8, %v5557_v26  ;;  %v4959_v40 = vshrl.u32 %v12184_v28, 16  ;;  %v12187_v53 = vld [vmem:[%s13934_s16 + $0xcc] sm:$0xf]  ;;  %v15947_v56 = vpop.f32.mrf.mxu0  ;;  %v15956_v8 = vld [vmem:[%s13934_s16 + $0xd0] sm:$0xf] }
 0x1ef   : > { %13445 = vmatprep.mubr.msk.bf16.mxu0 %vm1128_vm3, %v12212_v3  ;;  %19615 = vst [vmem:[#allocation143_spill] sm:$0xff] %v15940_v52  ;;  %v4957_v32 = vsel %vm13991_vm6, %v4952_v54, %v4956_v19  ;;  %v5559_v3 = vrot.slane %v5557_v26, 4  ;;  %19616 = vst [vmem:[#allocation144_spill] sm:$0xff] %v15947_v56  ;;  %v19382_v52 = vshll.u32 %v15935_v39, 16  ;;  %v19383_v54 = vshrl.u32 %v15935_v39, 16 }
 0x1f0   : > { %v12213_v17 = vcombine.low %v4947_v25, %v4957_v32  ;;  %13485 = vmatprep.mubr.msk.bf16.mxu1 %vm1128_vm3, %v12290_v27  ;;  %v4978_v19 = vshll.u32 %v15938_v30, 16  ;;  %v4961_v26 = vrot.slane %v4959_v40, 4  ;;  %v4964_v28 = vrot.slane %v4962_v62, 5  ;;  %v12189_v25 = vld [vmem:[%s13934_s16 + $0xd4] sm:$0x1] }
 0x1f1   : > { %v5561_v12 = vsel %vm13927_vm2, %v5559_v3, %v5560_v9  ;;  %v4970_v9 = vrot.slane %v19382_v52, 5  ;;  %v4974_v32 = vrot.slane %v19383_v54, 4  ;;  %v4983_v3 = vshrl.u32 %v12187_v53, 16  ;;  %v15974_v14 = vld [vmem:[%s13934_s16 + $0xc0] sm:$0xe] }
 0x1f2   : > { %13446 = vmatmul.mubr.msk.bf16.gmra.mxu0 %vm1128_vm3, %v12213_v17  ;;  %v12291_v37 = vcombine.low %v5558_v34, %v5561_v12  ;;  %v4965_v27 = vor.u32 %v4964_v28, %v4961_v26  ;;  %v4986_v56 = vshll.u32 %v12187_v53, 16  ;;  %v19384_v17 = vshll.u32 %v15956_v8, 16 }
 0x1f3   : > { %v4975_v40 = vor.u32 %v4974_v32, %v4970_v9  ;;  %v4980_v62 = vrot.slane %v4978_v19, 5  ;;  %v5002_v52 = vshll.u32 %v12189_v25, 16  ;;  %v4985_v18 = vrot.slane %v4983_v3, 4 }
 0x1f4   : > { %v15960_v7 = vpop.f32.mrf.mxu1  ;;  %13486 = vmatmul.mubr.msk.bf16.gmra.mxu1 %vm1128_vm3, %v12291_v37  ;;  %v4966_v54 = vrot.slane %v4965_v27, 4  ;;  %v4988_v37 = vrot.slane %v4986_v56, 5  ;;  %v4994_v53 = vrot.slane %v19384_v17, 5  ;;  %v12270_v1 = vrot.slane %v15974_v14, 9  ;;  %v15989_v27 = vld [vmem:[%s13934_s16 + $0xcc] sm:$0xe] }
 0x1f5   : > { %19617 = vst [vmem:[#allocation145_spill] sm:$0xff] %v15960_v7  ;;  %v19385_v7 = vshrl.u32 %v15956_v8, 16  ;;  %v5564_v56 = vrot.slane %v15935_v39, 5  ;;  %v12271_v46 = vrot.slane %v15989_v27, 9  ;;  %vm7001_vm15 = vsmask.f32 4368 }
 0x1f6   : > { %v15968_v12 = vpop.f32.mrf.mxu1  ;;  %v15970_v34 = vpop.f32.mrf.mxu0  ;;  %v4971_v32 = vsel %vm13991_vm6, %v4966_v54, %v4970_v9  ;;  %vm17070_vm5 = vmor %vm7000_vm14, %vm7001_vm15 }
 0x1f7   : > { %19618 = vst [vmem:[#allocation146_spill] sm:$0xff] %v15968_v12  ;;  %19619 = vst [vmem:[#allocation147_spill] sm:$0xff] %v15970_v34  ;;  %v4976_v12 = vrot.slane %v4975_v40, 4  ;;  %v4998_v19 = vrot.slane %v19385_v7, 4  ;;  %v4989_v34 = vor.u32 %v4988_v37, %v4985_v18  ;;  %v5567_v40 = vrot.slane %v15938_v30, 5 }
 0x1f8   : > { %v15978_v26 = vpop.f32.mrf.mxu1  ;;  %v15980_v28 = vpop.f32.mrf.mxu0  ;;  %v5565_v9 = vsel %vm13927_vm2, %v12270_v1, %v5564_v56  ;;  %v5566_v37 = vrot.slane %v5564_v56, 4  ;;  %v16009_v1 = vld [vmem:[%s13934_s16 + $0xdc] sm:$0xf] }
 0x1f9   : > { %19620 = vst [vmem:[#allocation148_spill] sm:$0xff] %v15978_v26  ;;  %19621 = vst [vmem:[#allocation149_spill] sm:$0xff] %v15980_v28  ;;  %v4981_v3 = vsel %vm13991_vm6, %v4976_v12, %v4980_v62  ;;  %v4999_v17 = vor.u32 %v4998_v19, %v4994_v53  ;;  %v5004_v28 = vrot.slane %v5002_v52, 5  ;;  %v4990_v18 = vrot.slane %v4989_v34, 4  ;;  %v12190_v52 = vld [vmem:[%s13934_s16 + $0xd8] sm:$0xf] }
 0x1fa   : > { %v15994_v7 = vpop.f32.mrf.mxu0  ;;  %v12214_v54 = vcombine.low %v4971_v32, %v4981_v3  ;;  %v15998_v26 = vpop.f32.mrf.mxu1  ;;  %v5571_v12 = vrot.slane %v15956_v8, 5  ;;  %v5568_v34 = vsel %vm13927_vm2, %v5566_v37, %v5567_v40  ;;  %v5574_v62 = vrot.slane %v12189_v25, 5  ;;  %v16012_v19 = vld [vmem:[%s13934_s16 + $0xe0] sm:$0x1]  ;;  %v12193_v25 = vld [vmem:[%s13934_s16 + $0xe4] sm:$0xf] }
 0x1fb   : > { %19622 = vst [vmem:[#allocation150_spill] sm:$0xff] %v15994_v7  ;;  %19623 = vst [vmem:[#allocation151_spill] sm:$0xff] %v15998_v26  ;;  %v5000_v5 = vrot.slane %v4999_v17, 4  ;;  %v4995_v30 = vsel %vm13991_vm6, %v4990_v18, %v4994_v53  ;;  %v12292_v32 = vcombine.low %v5565_v9, %v5568_v34  ;;  %v5007_v18 = vshrl.u32 %v12190_v52, 16  ;;  %v16030_v9 = vld [vmem:[%s13934_s16 + $0xe8] sm:$0xf] }
 0x1fc   : > { %13449 = vmatprep.mubr.msk.bf16.mxu0 %vm1128_vm3, %v12214_v54  ;;  %v5572_v56 = vsel %vm13927_vm2, %v12271_v46, %v5571_v12  ;;  %v5573_v3 = vrot.slane %v5571_v12, 4  ;;  %v16018_v54 = vpop.f32.mrf.mxu0  ;;  %v5010_v40 = vshll.u32 %v12190_v52, 16  ;;  %v5026_v46 = vshll.u32 %v16012_v19, 16  ;;  %v16034_v34 = vld [vmem:[%s13934_s16 + $0xec] sm:$0x1] }
 0x1fd   : > { %v5005_v17 = vsel %vm13991_vm6, %v5000_v5, %v5004_v28  ;;  %19624 = vst [vmem:[#allocation152_spill] sm:$0xff] %v16018_v54  ;;  %13489 = vmatprep.mubr.msk.bf16.mxu1 %vm1128_vm3, %v12292_v32  ;;  %v19386_v5 = vshll.u32 %v16009_v1, 16  ;;  %v19387_v28 = vshrl.u32 %v16009_v1, 16  ;;  %v5009_v52 = vrot.slane %v5007_v18, 4 }
 0x1fe   : > { %v12215_v53 = vcombine.low %v4995_v30, %v5005_v17  ;;  %v5575_v26 = vsel %vm13927_vm2, %v5573_v3, %v5574_v62  ;;  %v5012_v30 = vrot.slane %v5010_v40, 5  ;;  %v19388_v18 = vshll.u32 %v16030_v9, 16 }
 0x1ff   : > { %v12293_v12 = vcombine.low %v5572_v56, %v5575_v26  ;;  %v5018_v62 = vrot.slane %v19386_v5, 5  ;;  %v5022_v32 = vrot.slane %v19387_v28, 4  ;;  %v5031_v26 = vshrl.u32 %v12193_v25, 16  ;;  %v16049_v5 = vld [vmem:[%s13934_s16 + $0xd8] sm:$0xe] }
 0x200   : > { %13450 = vmatmul.mubr.msk.bf16.gmra.mxu0 %vm1128_vm3, %v12215_v53  ;;  %v5013_v53 = vor.u32 %v5012_v30, %v5009_v52  ;;  %v5034_v56 = vshll.u32 %v12193_v25, 16  ;;  %v5050_v54 = vshll.u32 %v16034_v34, 16  ;;  %v5042_v25 = vrot.slane %v19388_v18, 5  ;;  %v13794_v30 = vld [vmem:[%s13934_s16 + $0x24] sm:$0xe] }
 0x201   : > { %v16021_v37 = vpop.f32.mrf.mxu1  ;;  %13490 = vmatmul.mubr.msk.bf16.gmra.mxu1 %vm1128_vm3, %v12293_v12  ;;  %v5023_v40 = vor.u32 %v5022_v32, %v5018_v62  ;;  %v5970_v32 = vshrl.u32 %v13794_v30, 16  ;;  %v5585_v21 = vrot.slane %v16030_v9, 5 }
 0x202   : > { %19625 = vst [vmem:[#allocation153_spill] sm:$0xff] %v16021_v37  ;;  %v5028_v37 = vrot.slane %v5026_v46, 5  ;;  %v5014_v12 = vrot.slane %v5013_v53, 4  ;;  %v5036_v52 = vrot.slane %v5034_v56, 5  ;;  %v5973_v46 = vshll.u32 %v13794_v30, 16 }
 0x203   : > { %v16036_v17 = vpop.f32.mrf.mxu1  ;;  %v5024_v38 = vrot.slane %v5023_v40, 4  ;;  %v12272_v53 = vrot.slane %v16049_v5, 9  ;;  %v16067_v56 = vld [vmem:[%s13934_s16 + $0xe4] sm:$0xe]  ;;  %v5052_v40 = vrot.slane %v5050_v54, 5 }
 0x204   : > { %19626 = vst [vmem:[#allocation154_spill] sm:$0xff] %v16036_v17  ;;  %v16042_v3 = vpop.f32.mrf.mxu0  ;;  %v19389_v17 = vshrl.u32 %v16030_v9, 16  ;;  %v12316_v54 = vld [vmem:[%s13934_s16 + $0x20] sm:$0x3] }
 0x205   : > { %19627 = vst [vmem:[#allocation155_spill] sm:$0xff] %v16042_v3  ;;  %v16051_v7 = vpop.f32.mrf.mxu1  ;;  %v5033_v3 = vrot.slane %v5031_v26, 4  ;;  %v5578_v26 = vrot.slane %v16009_v1, 5  ;;  %v5029_v18 = vsel %vm13991_vm6, %v5024_v38, %v5028_v37 }
 0x206   : > { %19628 = vst [vmem:[#allocation156_spill] sm:$0xff] %v16051_v7  ;;  %v16053_v28 = vpop.f32.mrf.mxu0  ;;  %v5046_v43 = vrot.slane %v19389_v17, 4  ;;  %v5019_v7 = vsel %vm13991_vm6, %v5014_v12, %v5018_v62  ;;  %v5581_v17 = vrot.slane %v16012_v19, 5 }
 0x207   : > { %19629 = vst [vmem:[#allocation157_spill] sm:$0xff] %v16053_v28  ;;  %v5037_v35 = vor.u32 %v5036_v52, %v5033_v3  ;;  %v16072_v28 = vpop.f32.mrf.mxu1  ;;  %v5579_v62 = vsel %vm13927_vm2, %v12272_v53, %v5578_v26  ;;  %v5580_v3 = vrot.slane %v5578_v26, 4  ;;  %v12273_v52 = vrot.slane %v16067_v56, 9 }
 0x208   : > { %v16060_v24 = vpop.f32.mrf.mxu0  ;;  %v5047_v30 = vor.u32 %v5046_v43, %v5042_v25  ;;  %v5972_v43 = vrot.slane %v5970_v32, 5  ;;  %v5587_v26 = vrot.slane %v5585_v21, 4 }
 0x209   : > { %19630 = vst [vmem:[#allocation158_spill] sm:$0xff] %v16060_v24  ;;  %v12216_v24 = vcombine.low %v5019_v7, %v5029_v18  ;;  %v5038_v2 = vrot.slane %v5037_v35, 4  ;;  %v5582_v35 = vsel %vm13927_vm2, %v5580_v3, %v5581_v17  ;;  %v5588_v7 = vrot.slane %v16034_v34, 5 }
 0x20a   : > { %v5048_v12 = vrot.slane %v5047_v30, 4  ;;  %v16078_v38 = vpop.f32.mrf.mxu0  ;;  %v12294_v18 = vcombine.low %v5579_v62, %v5582_v35  ;;  %v5586_v53 = vsel %vm13927_vm2, %v12273_v52, %v5585_v21  ;;  %v19632_v17 = vshrl.u32 %v15434_v16, 16 }
 0x20b   : > { %19631 = vst [vmem:[#allocation159_spill] sm:$0xff] %v16078_v38  ;;  %13453 = vmatprep.mubr.msk.bf16.mxu0 %vm1128_vm3, %v12216_v24  ;;  %v5043_v19 = vsel %vm13991_vm6, %v5038_v2, %v5042_v25  ;;  %v5975_v24 = vrot.slane %v5973_v46, 6  ;;  %v13795_v2 = vld [vmem:[%s13934_s16 + $0x18] sm:$0xe]  ;;  %v5589_v34 = vsel %vm13927_vm2, %v5587_v26, %v5588_v7  ;;  %v19633_v62 = vshll.u32 %v15434_v16, 16 }
 0x20c   : > { %v5053_v37 = vsel %vm13991_vm6, %v5048_v12, %v5052_v40  ;;  %v5947_v25 = vshrl.u32 %v13795_v2, 16  ;;  %v5950_v38 = vshll.u32 %v13795_v2, 16  ;;  %13493 = vmatprep.mubr.msk.bf16.mxu1 %vm1128_vm3, %v12294_v18  ;;  %v5955_v40 = vrot.slane %v19632_v17, 5  ;;  %v12317_v18 = vld [vmem:[%s13934_s16 + $0x2c] sm:$0x3] }
 0x20d   : > { %v12217_v30 = vcombine.low %v5043_v19, %v5053_v37  ;;  %v5956_v3 = vrot.slane %v19633_v62, 6  ;;  %v5961_v21 = vshrl.u32 %v12316_v54, 16  ;;  %v12295_v52 = vcombine.low %v5586_v53, %v5589_v34 }
 0x20e   : > { %v5949_v19 = vrot.slane %v5947_v25, 5  ;;  %v5952_v35 = vrot.slane %v5950_v38, 6  ;;  %v5964_v37 = vshll.u32 %v12316_v54, 16  ;;  %v5976_v58 = vor.u32 %v5975_v24, %v5972_v43 }
 0x20f   : > { %v16091_v32 = vpop.f32.mrf.mxu1  ;;  %13454 = vmatmul.mubr.msk.bf16.gmra.mxu0 %vm1128_vm3, %v12217_v30  ;;  %v5957_v2 = vor.u32 %v5956_v3, %v5955_v40  ;;  %v5963_v7 = vrot.slane %v5961_v21, 5  ;;  %13494 = vmatmul.mubr.msk.bf16.gmra.mxu1 %vm1128_vm3, %v12295_v52  ;;  %v5987_v53 = vshll.u32 %v12317_v18, 16  ;;  %v5982_v34 = vrot.slane %v15490_v13, 4  ;;  %v12318_v21 = vld [vmem:[%s13934_s16 + $0x38] sm:$0x3] }
 0x210   : > { %v5953_v16 = vor.u32 %v5952_v35, %v5949_v19  ;;  %v5966_v62 = vrot.slane %v5964_v37, 6  ;;  %v5977_v54 = vrot.slane %v5976_v58, 4  ;;  %v13796_v35 = vld [vmem:[%s13934_s16 + $0x30] sm:$0xe] }
 0x211   : > { %v16101_v12 = vpop.f32.mrf.mxu1  ;;  %v16103_v46 = vpop.f32.mrf.mxu0  ;;  %v5959_v4 = vrot.slane %v5957_v2, 4  ;;  %v5989_v3 = vrot.slane %v5987_v53, 6  ;;  %v5993_v37 = vshrl.u32 %v13796_v35, 16 }
 0x212   : > { %19634 = vst [vmem:[#allocation160_spill] sm:$0xff] %v16103_v46  ;;  %v5984_v46 = vshrl.u32 %v12317_v18, 16  ;;  %v5954_v30 = vrot.slane %v5953_v16, 4  ;;  %v5967_v38 = vor.u32 %v5966_v62, %v5963_v7  ;;  %v5981_v24 = vsel %vm14415_vm9, %v5977_v54, %v15490_v13 }
 0x213   : > { %v16107_v26 = vpop.f32.mrf.mxu1  ;;  %v16109_v17 = vpop.f32.mrf.mxu0  ;;  %v19637_v18 = vshrl.u32 %v15513_v6, 16  ;;  %v19638_v16 = vshll.u32 %v15513_v6, 16  ;;  %v6007_v62 = vshrl.u32 %v12318_v21, 16  ;;  %v5995_v13 = vrot.slane %v5993_v37, 5  ;;  %v13797_v6 = vld [vmem:[%s13934_s16 + $0x3c] sm:$0xe] }
 0x214   : > { %19635 = vst [vmem:[#allocation161_spill] sm:$0xff] %v16109_v17  ;;  %v5986_v40 = vrot.slane %v5984_v46, 5  ;;  %v5958_v52 = vsel %vm14415_vm9, %v5954_v30, %v5957_v2  ;;  %v5968_v43 = vsel %vm14415_vm9, %v5959_v4, %v5967_v38  ;;  %v5996_v46 = vshll.u32 %v13796_v35, 16 }
 0x215   : > { %v16112_v25 = vpop.f32.mrf.mxu0  ;;  %v16116_v17 = vpop.f32.mrf.mxu1  ;;  %v12338_v58 = vcombine.low %v5958_v52, %v5968_v43  ;;  %v6001_v7 = vrot.slane %v19637_v18, 5  ;;  %v6002_v2 = vrot.slane %v19638_v16, 6  ;;  %v6010_v30 = vshll.u32 %v12318_v21, 16  ;;  %v12319_v43 = vld [vmem:[%s13934_s16 + $0x44] sm:$0x3] }
 0x216   : > { %19636 = vst [vmem:[#allocation162_spill] sm:$0xff] %v16116_v17  ;;  %v5990_v19 = vor.u32 %v5989_v3, %v5986_v40  ;;  %v5998_v40 = vrot.slane %v5996_v46, 6  ;;  %v6009_v52 = vrot.slane %v6007_v62, 5  ;;  %v6016_v18 = vshrl.u32 %v13797_v6, 16 }
 0x217   : > { %v16130_v53 = vpop.f32.mrf.mxu0  ;;  %13501 = vmatprep.mubr.msk.bf16.mxu0 %vm1128_vm3, %v12338_v58  ;;  %v6003_v3 = vor.u32 %v6002_v2, %v6001_v7  ;;  %v6012_v35 = vrot.slane %v6010_v30, 6  ;;  %v6019_v16 = vshll.u32 %v13797_v6, 16  ;;  %v6030_v62 = vshrl.u32 %v12319_v43, 16 }
 0x218   : > { %19639 = vst [vmem:[#allocation163_spill] sm:$0xff] %v16130_v53  ;;  %v5991_v4 = vsel %vm14415_vm9, %v5982_v34, %v5990_v19  ;;  %v5999_v58 = vor.u32 %v5998_v40, %v5995_v13  ;;  %v19642_v34 = vshrl.u32 %v15536_v20, 16  ;;  %v19643_v19 = vshll.u32 %v15536_v20, 16 }
 0x219   : > { %v12339_v54 = vcombine.low %v5981_v24, %v5991_v4  ;;  %v6005_v53 = vrot.slane %v6003_v3, 4  ;;  %v6013_v46 = vor.u32 %v6012_v35, %v6009_v52  ;;  %v6018_v7 = vrot.slane %v6016_v18, 5  ;;  %v12320_v18 = vld [vmem:[%s13934_s16 + $0x50] sm:$0x3] }
 0x21a   : > { %v6024_v21 = vrot.slane %v19642_v34, 5  ;;  %v6025_v24 = vrot.slane %v19643_v19, 6  ;;  %v6021_v2 = vrot.slane %v6019_v16, 6  ;;  %v6000_v4 = vrot.slane %v5999_v58, 4 }
 0x21b   : > { %13502 = vmatmul.mubr.msk.bf16.vlgmr.msra.gmra.mxu0 %vm1128_vm3, %v12339_v54  ;;  %v6033_v6 = vshll.u32 %v12319_v43, 16  ;;  %v6014_v40 = vsel %vm14415_vm9, %v6005_v53, %v6013_v46  ;;  %v6032_v34 = vrot.slane %v6030_v62, 5  ;;  %v6053_v62 = vshrl.u32 %v12320_v18, 16 }
 0x21c   : > { %v16135_v38 = vpop.f32.mrf.mxu1  ;;  %v6026_v30 = vor.u32 %v6025_v24, %v6024_v21  ;;  %v6022_v20 = vor.u32 %v6021_v2, %v6018_v7  ;;  %v6004_v19 = vsel %vm14415_vm9, %v6000_v4, %v6003_v3  ;;  %v13798_v24 = vld [vmem:[%s13934_s16 + $0x48] sm:$0xe]  ;;  %v19649_v3 = vshrl.u32 %v15584_v11, 16 }
 0x21d   : > { %19640 = vst [vmem:[#allocation164_spill] sm:$0xff] %v16135_v38  ;;  %v6035_v35 = vrot.slane %v6033_v6, 6  ;;  %v12340_v58 = vcombine.low %v6004_v19, %v6014_v40  ;;  %v19650_v7 = vshll.u32 %v15584_v11, 16 }
 0x21e   : > { %v16139_v17 = vpop.f32.mrf.mxu1  ;;  %v6028_v52 = vrot.slane %v6026_v30, 4  ;;  %v6023_v21 = vrot.slane %v6022_v20, 4  ;;  %v6047_v46 = vrot.slane %v19649_v3, 5  ;;  %v6056_v20 = vshll.u32 %v12320_v18, 16 }
 0x21f   : > { %19641 = vst [vmem:[#allocation165_spill] sm:$0xff] %v16139_v17  ;;  %v16146_v37 = vpop.f32.mrf.mxu0  ;;  %v6036_v43 = vor.u32 %v6035_v35, %v6032_v34  ;;  %v6042_v17 = vshll.u32 %v13798_v24, 16  ;;  %13505 = vmatprep.mubr.msk.bf16.mxu0 %vm1128_vm3, %v12340_v58  ;;  %v6048_v2 = vrot.slane %v19650_v7, 6  ;;  %v6055_v58 = vrot.slane %v6053_v62, 5 }
 0x220   : > { %19644 = vst [vmem:[#allocation166_spill] sm:$0xff] %v16146_v37  ;;  %v16148_v54 = vpop.f32.mrf.mxu1  ;;  %v6027_v53 = vsel %vm14415_vm9, %v6023_v21, %v6026_v30  ;;  %v6058_v21 = vrot.slane %v6056_v20, 6  ;;  %v6203_v37 = vshll.u32 %v15836_v42, 16 }
 0x221   : > { %19645 = vst [vmem:[#allocation167_spill] sm:$0xff] %v16148_v54  ;;  %v16150_v13 = vpop.f32.mrf.mxu0  ;;  %v6039_v54 = vshrl.u32 %v13798_v24, 16  ;;  %v6037_v4 = vsel %vm14415_vm9, %v6028_v52, %v6036_v43  ;;  %v6044_v40 = vrot.slane %v6042_v17, 6  ;;  %v6049_v35 = vor.u32 %v6048_v2, %v6047_v46  ;;  %v12321_v24 = vld [vmem:[%s13934_s16 + $0x5c] sm:$0x3] }
 0x222   : > { %19646 = vst [vmem:[#allocation168_spill] sm:$0xff] %v16150_v13  ;;  %v16160_v13 = vpop.f32.mrf.mxu1  ;;  %v12341_v19 = vcombine.low %v6027_v53, %v6037_v4  ;;  %v19654_v52 = vshll.u32 %v15604_v41, 16  ;;  %v6059_v53 = vor.u32 %v6058_v21, %v6055_v58  ;;  %v6076_v2 = vshrl.u32 %v12321_v24, 16 }
 0x223   : > { %v16157_v16 = vpop.f32.mrf.mxu0  ;;  %19648 = vst [vmem:[#allocation170_spill] sm:$0xff] %v16160_v13  ;;  %v6041_v6 = vrot.slane %v6039_v54, 5  ;;  %v6051_v11 = vrot.slane %v6049_v35, 4  ;;  %v19653_v54 = vshrl.u32 %v15604_v41, 16  ;;  %v6079_v20 = vshll.u32 %v12321_v24, 16 }
 0x224   : > { %19647 = vst [vmem:[#allocation169_spill] sm:$0xff] %v16157_v16  ;;  %v13799_v16 = vld [vmem:[%s13934_s16 + $0x54] sm:$0xe]  ;;  %13506 = vmatmul.mubr.msk.bf16.gmra.mxu0 %vm1128_vm3, %v12341_v19  ;;  %v6071_v18 = vrot.slane %v19654_v52, 6  ;;  %v6078_v19 = vrot.slane %v6076_v2, 5  ;;  %v19659_v2 = vshll.u32 %v15644_v47, 16 }
 0x225   : > { %v16171_v34 = vpop.f32.mrf.mxu0  ;;  %v6045_v30 = vor.u32 %v6044_v40, %v6041_v6  ;;  %v6062_v3 = vshrl.u32 %v13799_v16, 16  ;;  %v6065_v7 = vshll.u32 %v13799_v16, 16  ;;  %v6070_v17 = vrot.slane %v19653_v54, 5 }
 0x226   : > { %19651 = vst [vmem:[#allocation171_spill] sm:$0xff] %v16171_v34  ;;  %v6060_v41 = vsel %vm14415_vm9, %v6051_v11, %v6059_v53  ;;  %v6081_v52 = vrot.slane %v6079_v20, 6  ;;  %v19658_v11 = vshrl.u32 %v15644_v47, 16  ;;  %v13801_v47 = vld [vmem:[%s13934_s16 + $0x6c] sm:$0xe] }
 0x227   : > { %v6046_v43 = vrot.slane %v6045_v30, 4  ;;  %v6064_v46 = vrot.slane %v6062_v3, 5  ;;  %v6067_v6 = vrot.slane %v6065_v7, 6  ;;  %v6072_v40 = vor.u32 %v6071_v18, %v6070_v17  ;;  %v13800_v17 = vld [vmem:[%s13934_s16 + $0x60] sm:$0xe] }
 0x228   : > { %v6082_v24 = vor.u32 %v6081_v52, %v6078_v19  ;;  %v6085_v18 = vshrl.u32 %v13800_v17, 16  ;;  %v6093_v53 = vrot.slane %v19658_v11, 5  ;;  %v12323_v11 = vld [vmem:[%s13934_s16 + $0x74] sm:$0x3] }
 0x229   : > { %v6050_v16 = vsel %vm14415_vm9, %v6046_v43, %v6049_v35  ;;  %v6068_v3 = vor.u32 %v6067_v6, %v6064_v46  ;;  %v6074_v54 = vrot.slane %v6072_v40, 4  ;;  %v6088_v35 = vshll.u32 %v13800_v17, 16 }
 0x22a   : > { %v16175_v13 = vpop.f32.mrf.mxu1  ;;  %v12342_v21 = vcombine.low %v6050_v16, %v6060_v41  ;;  %v6094_v46 = vrot.slane %v19659_v2, 6  ;;  %v6108_v2 = vshrl.u32 %v13801_v47, 16 }
 0x22b   : > { %19652 = vst [vmem:[#allocation172_spill] sm:$0xff] %v16175_v13  ;;  %v6069_v7 = vrot.slane %v6068_v3, 4  ;;  %v6083_v19 = vsel %vm14415_vm9, %v6074_v54, %v6082_v24  ;;  %v6090_v3 = vrot.slane %v6088_v35, 6 }
 0x22c   : > { %v16182_v62 = vpop.f32.mrf.mxu1  ;;  %v16184_v4 = vpop.f32.mrf.mxu0  ;;  %13509 = vmatprep.mubr.msk.bf16.mxu0 %vm1128_vm3, %v12342_v21  ;;  %v6087_v21 = vrot.slane %v6085_v18, 5  ;;  %v6095_v17 = vor.u32 %v6094_v46, %v6093_v53  ;;  %v6110_v35 = vrot.slane %v6108_v2, 5  ;;  %v19664_v53 = vshll.u32 %v15670_v45, 16 }
 0x22d   : > { %19655 = vst [vmem:[#allocation173_spill] sm:$0xff] %v16182_v62  ;;  %19656 = vst [vmem:[#allocation174_spill] sm:$0xff] %v16184_v4  ;;  %v12322_v4 = vld [vmem:[%s13934_s16 + $0x68] sm:$0x3]  ;;  %v6073_v41 = vsel %vm14415_vm9, %v6069_v7, %v6072_v40  ;;  %v6111_v40 = vshll.u32 %v13801_v47, 16  ;;  %v19662_v7 = vshrl.u32 %v15670_v45, 16 }
 0x22e   : > { %v16190_v30 = vpop.f32.mrf.mxu1  ;;  %v16192_v58 = vpop.f32.mrf.mxu0  ;;  %v6099_v6 = vshrl.u32 %v12322_v4, 16  ;;  %v6102_v20 = vshll.u32 %v12322_v4, 16  ;;  %v12343_v52 = vcombine.low %v6073_v41, %v6083_v19  ;;  %v6091_v34 = vor.u32 %v6090_v3, %v6087_v21  ;;  %v12324_v45 = vld [vmem:[%s13934_s16 + $0x80] sm:$0x3] }
 0x22f   : > { %19657 = vst [vmem:[#allocation175_spill] sm:$0xff] %v16190_v30  ;;  %v6097_v4 = vrot.slane %v6095_v17, 4  ;;  %v6116_v54 = vrot.slane %v19662_v7, 5  ;;  %v6117_v46 = vrot.slane %v19664_v53, 6  ;;  %v6113_v41 = vrot.slane %v6111_v40, 6 }
 0x230   : > { %v16197_v43 = vpop.f32.mrf.mxu0  ;;  %v16203_v16 = vpop.f32.mrf.mxu1  ;;  %v6101_v30 = vrot.slane %v6099_v6, 5  ;;  %v6104_v62 = vrot.slane %v6102_v20, 6  ;;  %13510 = vmatmul.mubr.msk.bf16.gmra.mxu0 %vm1128_vm3, %v12343_v52  ;;  %v6092_v18 = vrot.slane %v6091_v34, 4  ;;  %v6122_v6 = vshrl.u32 %v12323_v11, 16 }
 0x231   : > { %19660 = vst [vmem:[#allocation176_spill] sm:$0xff] %v16203_v16  ;;  %v6125_v19 = vshll.u32 %v12323_v11, 16  ;;  %v6114_v47 = vor.u32 %v6113_v41, %v6110_v35  ;;  %v19666_v35 = vshll.u32 %v15714_v48, 16 }
 0x232   : > { %v16211_v13 = vpop.f32.mrf.mxu0  ;;  %v6105_v16 = vor.u32 %v6104_v62, %v6101_v30  ;;  %v6096_v62 = vsel %vm14415_vm9, %v6092_v18, %v6095_v17  ;;  %v6118_v30 = vor.u32 %v6117_v46, %v6116_v54  ;;  %v6124_v3 = vrot.slane %v6122_v6, 5 }
 0x233   : > { %19661 = vst [vmem:[#allocation177_spill] sm:$0xff] %v16211_v13  ;;  %v6127_v2 = vrot.slane %v6125_v19, 6  ;;  %v6134_v17 = vshll.u32 %v15747_v44, 16  ;;  %v19665_v54 = vshrl.u32 %v15714_v48, 16  ;;  %v6140_v46 = vrot.slane %v19666_v35, 6 }
 0x234   : > { %v6106_v20 = vsel %vm14415_vm9, %v6097_v4, %v6105_v16  ;;  %v6120_v7 = vrot.slane %v6118_v30, 4  ;;  %v6115_v16 = vrot.slane %v6114_v47, 4  ;;  %v6131_v4 = vshrl.u32 %v15747_v44, 16 }
 0x235   : > { %v12344_v34 = vcombine.low %v6096_v62, %v6106_v20  ;;  %v6128_v11 = vor.u32 %v6127_v2, %v6124_v3  ;;  %v6139_v18 = vrot.slane %v19665_v54, 5  ;;  %v6145_v6 = vshrl.u32 %v12324_v45, 16 }
 0x236   : > { %v6148_v20 = vshll.u32 %v12324_v45, 16  ;;  %v6119_v41 = vsel %vm14415_vm9, %v6115_v16, %v6118_v30  ;;  %v6133_v62 = vrot.slane %v6131_v4, 5  ;;  %v6136_v3 = vrot.slane %v6134_v17, 6 }
 0x237   : > { %v16216_v24 = vpop.f32.mrf.mxu1  ;;  %13513 = vmatprep.mubr.msk.bf16.mxu0 %vm1128_vm3, %v12344_v34  ;;  %v6129_v19 = vsel %vm14415_vm9, %v6120_v7, %v6128_v11  ;;  %v6141_v44 = vor.u32 %v6140_v46, %v6139_v18  ;;  %v6147_v47 = vrot.slane %v6145_v6, 5  ;;  %v6154_v48 = vshrl.u32 %v15763_v10, 16 }
 0x238   : > { %19663 = vst [vmem:[#allocation178_spill] sm:$0xff] %v16216_v24  ;;  %v12345_v34 = vcombine.low %v6119_v41, %v6129_v19  ;;  %v6150_v2 = vrot.slane %v6148_v20, 6  ;;  %v12325_v24 = vld [vmem:[%s13934_s16 + $0x8c] sm:$0x3]  ;;  %v6137_v54 = vor.u32 %v6136_v3, %v6133_v62  ;;  %v6157_v7 = vshll.u32 %v15763_v10, 16 }
 0x239   : > { %v16222_v21 = vpop.f32.mrf.mxu1  ;;  %v6143_v30 = vrot.slane %v6141_v44, 4  ;;  %v19668_v16 = vshrl.u32 %v15734_v15, 16  ;;  %v6156_v17 = vrot.slane %v6154_v48, 5  ;;  %v19669_v18 = vshll.u32 %v15734_v15, 16  ;;  %v12326_v15 = vld [vmem:[%s13934_s16 + $0x98] sm:$0x3] }
 0x23a   : > { %v16226_v52 = vpop.f32.mrf.mxu0  ;;  %13514 = vmatmul.mubr.msk.bf16.gmra.mxu0 %vm1128_vm3, %v12345_v34  ;;  %v6151_v45 = vor.u32 %v6150_v2, %v6147_v47  ;;  %v6138_v4 = vrot.slane %v6137_v54, 4  ;;  %v6168_v6 = vshrl.u32 %v12325_v24, 16  ;;  %v6159_v41 = vrot.slane %v6157_v7, 6 }
 0x23b   : > { %v16229_v53 = vpop.f32.mrf.mxu1  ;;  %v6162_v11 = vrot.slane %v19668_v16, 5  ;;  %v6163_v46 = vrot.slane %v19669_v18, 6  ;;  %v6171_v19 = vshll.u32 %v12325_v24, 16  ;;  %v19671_v7 = vshrl.u32 %v15780_v57, 16 }
 0x23c   : > { %v16234_v40 = vpop.f32.mrf.mxu0  ;;  %v6152_v20 = vsel %vm14415_vm9, %v6143_v30, %v6151_v45  ;;  %v6142_v10 = vsel %vm14415_vm9, %v6138_v4, %v6141_v44  ;;  %v6170_v34 = vrot.slane %v6168_v6, 5  ;;  %v6160_v54 = vor.u32 %v6159_v41, %v6156_v17 }
 0x23d   : > { %v16245_v13 = vpop.f32.mrf.mxu1  ;;  %v6164_v3 = vor.u32 %v6163_v46, %v6162_v11  ;;  %v12346_v2 = vcombine.low %v6142_v10, %v6152_v20  ;;  %v6173_v48 = vrot.slane %v6171_v19, 6  ;;  %v6177_v45 = vshrl.u32 %v15822_v22, 16 }
 0x23e   : > { %19667 = vst [vmem:[#allocation179_spill] sm:$0xff] %v16245_v13  ;;  %v16248_v35 = vpop.f32.mrf.mxu0  ;;  %v6161_v30 = vrot.slane %v6160_v54, 4  ;;  %v6180_v44 = vshll.u32 %v15822_v22, 16  ;;  %v6185_v11 = vrot.slane %v19671_v7, 5  ;;  %v19672_v4 = vshll.u32 %v15780_v57, 16 }
 0x23f   : > { %v6166_v18 = vrot.slane %v6164_v3, 4  ;;  %13517 = vmatprep.mubr.msk.bf16.mxu0 %vm1128_vm3, %v12346_v2  ;;  %v6174_v24 = vor.u32 %v6173_v48, %v6170_v34  ;;  %v6191_v46 = vshrl.u32 %v12326_v15, 16  ;;  %v6194_v6 = vshll.u32 %v12326_v15, 16  ;;  %v12327_v57 = vld [vmem:[%s13934_s16 + $0xa4] sm:$0x3] }
 0x240   : > { %v16262_v47 = vpop.f32.mrf.mxu0  ;;  %v6186_v17 = vrot.slane %v19672_v4, 6  ;;  %v6165_v19 = vsel %vm14415_vm9, %v6161_v30, %v6164_v3  ;;  %v6179_v34 = vrot.slane %v6177_v45, 5  ;;  %v6182_v22 = vrot.slane %v6180_v44, 6 }
 0x241   : > { %19670 = vst [vmem:[#allocation180_spill] sm:$0xff] %v16262_v47  ;;  %v6175_v10 = vsel %vm14415_vm9, %v6166_v18, %v6174_v24  ;;  %v6193_v48 = vrot.slane %v6191_v46, 5  ;;  %v6196_v7 = vrot.slane %v6194_v6, 6  ;;  %v6200_v15 = vshrl.u32 %v15836_v42, 16 }
 0x242   : > { %v12347_v2 = vcombine.low %v6165_v19, %v6175_v10  ;;  %v6187_v54 = vor.u32 %v6186_v17, %v6185_v11  ;;  %v6183_v4 = vor.u32 %v6182_v22, %v6179_v34  ;;  %v19673_v3 = vshrl.u32 %v15806_v63, 16 }
 0x243   : > { %v6197_v47 = vor.u32 %v6196_v7, %v6193_v48  ;;  %v6202_v44 = vrot.slane %v6200_v15, 5  ;;  %v19675_v11 = vshll.u32 %v15806_v63, 16  ;;  %v6214_v46 = vshrl.u32 %v12327_v57, 16 }
 0x244   : > { %13518 = vmatmul.mubr.msk.bf16.gmra.mxu0 %vm1128_vm3, %v12347_v2  ;;  %v6189_v13 = vrot.slane %v6187_v54, 4  ;;  %v6208_v30 = vrot.slane %v19673_v3, 5  ;;  %v6184_v45 = vrot.slane %v6183_v4, 4  ;;  %v6205_v19 = vrot.slane %v6203_v37, 6  ;;  %v12328_v3 = vld [vmem:[%s13934_s16 + $0xb0] sm:$0x3] }
 0x245   : > { %v16258_v62 = vpop.f32.mrf.mxu1  ;;  %v6209_v17 = vrot.slane %v19675_v11, 6  ;;  %v6217_v10 = vshll.u32 %v12327_v57, 16  ;;  %v6216_v22 = vrot.slane %v6214_v46, 5  ;;  %v6223_v37 = vshrl.u32 %v15896_v33, 16 }
 0x246   : > { %v6198_v6 = vsel %vm14415_vm9, %v6189_v13, %v6197_v47  ;;  %v6188_v42 = vsel %vm14415_vm9, %v6184_v45, %v6187_v54  ;;  %v6206_v48 = vor.u32 %v6205_v19, %v6202_v44  ;;  %v6226_v47 = vshll.u32 %v15896_v33, 16 }
 0x247   : > { %v16265_v16 = vpop.f32.mrf.mxu1  ;;  %v16274_v20 = vpop.f32.mrf.mxu0  ;;  %v6210_v34 = vor.u32 %v6209_v17, %v6208_v30  ;;  %v12348_v2 = vcombine.low %v6188_v42, %v6198_v6  ;;  %v6219_v7 = vrot.slane %v6217_v10, 6  ;;  %v19676_v57 = vshrl.u32 %v15858_v31, 16 }
 0x248   : > { %v6207_v11 = vrot.slane %v6206_v48, 4  ;;  %v19677_v45 = vshll.u32 %v15858_v31, 16  ;;  %v6237_v17 = vshrl.u32 %v12328_v3, 16  ;;  %v6240_v46 = vshll.u32 %v12328_v3, 16 }
 0x249   : > { %v16276_v41 = vpop.f32.mrf.mxu1  ;;  %v16288_v18 = vpop.f32.mrf.mxu0  ;;  %v6212_v63 = vrot.slane %v6210_v34, 4  ;;  %13521 = vmatprep.mubr.msk.bf16.mxu0 %vm1128_vm3, %v12348_v2  ;;  %v6220_v13 = vor.u32 %v6219_v7, %v6216_v22  ;;  %v6231_v30 = vrot.slane %v19676_v57, 5  ;;  %v6225_v10 = vrot.slane %v6223_v37, 5  ;;  %v12329_v57 = vld [vmem:[%s13934_s16 + $0xbc] sm:$0x3] }
 0x24a   : > { %v6232_v44 = vrot.slane %v19677_v45, 6  ;;  %v6211_v6 = vsel %vm14415_vm9, %v6207_v11, %v6210_v34  ;;  %v6228_v42 = vrot.slane %v6226_v47, 6  ;;  %v6239_v48 = vrot.slane %v6237_v17, 5 }
 0x24b   : > { %v16290_v24 = vpop.f32.mrf.mxu1  ;;  %v16299_v4 = vpop.f32.mrf.mxu0  ;;  %v6221_v19 = vsel %vm14415_vm9, %v6212_v63, %v6220_v13  ;;  %v6242_v7 = vrot.slane %v6240_v46, 6  ;;  %v6246_v31 = vshrl.u32 %v15915_v61, 16  ;;  %v6249_v63 = vshll.u32 %v15915_v61, 16 }
 0x24c   : > { %19674 = vst [vmem:[#allocation181_spill] sm:$0xff] %v16290_v24  ;;  %v12349_v33 = vcombine.low %v6211_v6, %v6221_v19  ;;  %v6233_v2 = vor.u32 %v6232_v44, %v6231_v30  ;;  %v6229_v24 = vor.u32 %v6228_v42, %v6225_v10  ;;  %v19679_v11 = vshrl.u32 %v15878_v23, 16 }
 0x24d   : > { %v16316_v22 = vpop.f32.mrf.mxu0  ;;  %v6243_v3 = vor.u32 %v6242_v7, %v6239_v48  ;;  %v6248_v47 = vrot.slane %v6246_v31, 5  ;;  %v19680_v30 = vshll.u32 %v15878_v23, 16  ;;  %v6260_v17 = vshrl.u32 %v12329_v57, 16  ;;  %v12330_v23 = vld [vmem:[%s13934_s16 + $0xc8] sm:$0x3] }
 0x24e   : > { %19678 = vst [vmem:[#allocation182_spill] sm:$0xff] %v16316_v22  ;;  %13522 = vmatmul.mubr.msk.bf16.gmra.mxu0 %vm1128_vm3, %v12349_v33  ;;  %v6235_v34 = vrot.slane %v6233_v2, 4  ;;  %v6254_v13 = vrot.slane %v19679_v11, 5  ;;  %v6230_v37 = vrot.slane %v6229_v24, 4  ;;  %v6251_v19 = vrot.slane %v6249_v63, 6 }
 0x24f   : > { %v6255_v44 = vrot.slane %v19680_v30, 6  ;;  %v6263_v10 = vshll.u32 %v12329_v57, 16  ;;  %v6262_v33 = vrot.slane %v6260_v17, 5  ;;  %v6269_v57 = vshrl.u32 %v15974_v14, 16 }
 0x250   : > { %v6244_v6 = vsel %vm14415_vm9, %v6235_v34, %v6243_v3  ;;  %v6234_v61 = vsel %vm14415_vm9, %v6230_v37, %v6233_v2  ;;  %v6252_v7 = vor.u32 %v6251_v19, %v6248_v47  ;;  %v6272_v2 = vshll.u32 %v15974_v14, 16 }
 0x251   : > { %v6256_v42 = vor.u32 %v6255_v44, %v6254_v13  ;;  %v12350_v24 = vcombine.low %v6234_v61, %v6244_v6  ;;  %v6265_v31 = vrot.slane %v6263_v10, 6  ;;  %v19682_v3 = vshrl.u32 %v15935_v39, 16 }
 0x252   : > { %v16301_v15 = vpop.f32.mrf.mxu1  ;;  %v6253_v22 = vrot.slane %v6252_v7, 4  ;;  %v19683_v13 = vshll.u32 %v15935_v39, 16  ;;  %v6283_v47 = vshrl.u32 %v12330_v23, 16  ;;  %v6286_v44 = vshll.u32 %v12330_v23, 16 }
 0x253   : > { %v6258_v11 = vrot.slane %v6256_v42, 4  ;;  %13525 = vmatprep.mubr.msk.bf16.mxu0 %vm1128_vm3, %v12350_v24  ;;  %v6266_v34 = vor.u32 %v6265_v31, %v6262_v33  ;;  %v6277_v63 = vrot.slane %v19682_v3, 5  ;;  %v6271_v10 = vrot.slane %v6269_v57, 5  ;;  %v12331_v31 = vld [vmem:[%s13934_s16 + $0xd4] sm:$0x3] }
 0x254   : > { %v16306_v54 = vpop.f32.mrf.mxu1  ;;  %v6278_v37 = vrot.slane %v19683_v13, 6  ;;  %v6257_v6 = vsel %vm14415_vm9, %v6253_v22, %v6256_v42  ;;  %v6274_v61 = vrot.slane %v6272_v2, 6  ;;  %v6285_v24 = vrot.slane %v6283_v47, 5 }
 0x255   : > { %v16328_v46 = vpop.f32.mrf.mxu0  ;;  %v6267_v19 = vsel %vm14415_vm9, %v6258_v11, %v6266_v34  ;;  %v6288_v7 = vrot.slane %v6286_v44, 6  ;;  %v6292_v13 = vshrl.u32 %v15989_v27, 16  ;;  %v6295_v11 = vshll.u32 %v15989_v27, 16 }
 0x256   : > { %v16320_v45 = vpop.f32.mrf.mxu1  ;;  %v12351_v33 = vcombine.low %v6257_v6, %v6267_v19  ;;  %v6279_v14 = vor.u32 %v6278_v37, %v6277_v63  ;;  %v6275_v23 = vor.u32 %v6274_v61, %v6271_v10  ;;  %v19684_v34 = vshrl.u32 %v15956_v8, 16 }
 0x257   : > { %v16337_v30 = vpop.f32.mrf.mxu0  ;;  %v6289_v42 = vor.u32 %v6288_v7, %v6285_v24  ;;  %v6294_v63 = vrot.slane %v6292_v13, 5  ;;  %v19685_v37 = vshll.u32 %v15956_v8, 16  ;;  %v6306_v44 = vshrl.u32 %v12331_v31, 16  ;;  %v12332_v8 = vld [vmem:[%s13934_s16 + $0xe0] sm:$0x3] }
 0x258   : > { %v16334_v48 = vpop.f32.mrf.mxu1  ;;  %13526 = vmatmul.mubr.msk.bf16.gmra.mxu0 %vm1128_vm3, %v12351_v33  ;;  %v6281_v22 = vrot.slane %v6279_v14, 4  ;;  %v6300_v57 = vrot.slane %v19684_v34, 5  ;;  %v6276_v2 = vrot.slane %v6275_v23, 4  ;;  %v6297_v10 = vrot.slane %v6295_v11, 6 }
 0x259   : > { %19681 = vst [vmem:[#allocation183_spill] sm:$0xff] %v16334_v48  ;;  %v16353_v3 = vpop.f32.mrf.mxu0  ;;  %v6301_v47 = vrot.slane %v19685_v37, 6  ;;  %v6309_v61 = vshll.u32 %v12331_v31, 16  ;;  %v6308_v7 = vrot.slane %v6306_v44, 5  ;;  %v6315_v31 = vshrl.u32 %v16049_v5, 16 }
 0x25a   : > { %v6290_v19 = vsel %vm14415_vm9, %v6281_v22, %v6289_v42  ;;  %v6280_v27 = vsel %vm14415_vm9, %v6276_v2, %v6279_v14  ;;  %v6298_v13 = vor.u32 %v6297_v10, %v6294_v63  ;;  %v6318_v42 = vshll.u32 %v16049_v5, 16 }
 0x25b   : > { %v16368_v33 = vpop.f32.mrf.mxu0  ;;  %v6302_v24 = vor.u32 %v6301_v47, %v6300_v57  ;;  %v12352_v23 = vcombine.low %v6280_v27, %v6290_v19  ;;  %v6311_v34 = vrot.slane %v6309_v61, 6  ;;  %v19687_v14 = vshrl.u32 %v16009_v1, 16 }
 0x25c   : > { %v6299_v38 = vrot.slane %v6298_v13, 4  ;;  %v19688_v2 = vshll.u32 %v16009_v1, 16  ;;  %v6329_v47 = vshrl.u32 %v12332_v8, 16  ;;  %v6332_v44 = vshll.u32 %v12332_v8, 16 }
 0x25d   : > { %v6304_v37 = vrot.slane %v6302_v24, 4  ;;  %13529 = vmatprep.mubr.msk.bf16.mxu0 %vm1128_vm3, %v12352_v23  ;;  %v6312_v22 = vor.u32 %v6311_v34, %v6308_v7  ;;  %v6323_v57 = vrot.slane %v19687_v14, 5  ;;  %v6317_v61 = vrot.slane %v6315_v31, 5  ;;  %v12333_v14 = vld [vmem:[%s13934_s16 + $0xec] sm:$0x3] }
 0x25e   : > { %v6324_v63 = vrot.slane %v19688_v2, 6  ;;  %v6303_v19 = vsel %vm14415_vm9, %v6299_v38, %v6302_v24  ;;  %v6320_v27 = vrot.slane %v6318_v42, 6  ;;  %v6331_v13 = vrot.slane %v6329_v47, 5 }
 0x25f   : > { %v6313_v10 = vsel %vm14415_vm9, %v6304_v37, %v6312_v22  ;;  %v6334_v34 = vrot.slane %v6332_v44, 6  ;;  %v6338_v8 = vshrl.u32 %v16067_v56, 16  ;;  %v6341_v37 = vshll.u32 %v16067_v56, 16 }
 0x260   : > { %v16346_v17 = vpop.f32.mrf.mxu1  ;;  %v12353_v5 = vcombine.low %v6303_v19, %v6313_v10  ;;  %v6325_v23 = vor.u32 %v6324_v63, %v6323_v57  ;;  %v6321_v1 = vor.u32 %v6320_v27, %v6317_v61  ;;  %v19690_v22 = vshrl.u32 %v16030_v9, 16 }
 0x261   : > { %v6335_v24 = vor.u32 %v6334_v34, %v6331_v13  ;;  %v6340_v2 = vrot.slane %v6338_v8, 5  ;;  %v19692_v63 = vshll.u32 %v16030_v9, 16  ;;  %v6352_v44 = vshrl.u32 %v12333_v14, 16 }
 0x262   : > { %v16355_v39 = vpop.f32.mrf.mxu1  ;;  %13530 = vmatmul.mubr.msk.bf16.gmra.mxu0 %vm1128_vm3, %v12353_v5  ;;  %v6327_v38 = vrot.slane %v6325_v23, 4  ;;  %v6346_v31 = vrot.slane %v19690_v22, 5  ;;  %v6322_v57 = vrot.slane %v6321_v1, 4  ;;  %v6343_v61 = vrot.slane %v6341_v37, 6 }
 0x263   : > { %v6347_v47 = vrot.slane %v19692_v63, 6  ;;  %v6355_v27 = vshll.u32 %v12333_v14, 16  ;;  %v6354_v13 = vrot.slane %v6352_v44, 5  ;;  %v1635_v37 = vadd.f32 %v15227_v55, %v15202_v0  ;;  %v19697_v44 = vld [vmem:[#allocation60_spill] sm:$0xff]  ;;  %v19702_v0 = vld [vmem:[#allocation117_spill] sm:$0xff] }
 0x264   : > { %v16364_v6 = vpop.f32.mrf.mxu1  ;;  %v6336_v10 = vsel %vm14415_vm9, %v6327_v38, %v6335_v24  ;;  %v6326_v56 = vsel %vm14415_vm9, %v6322_v57, %v6325_v23  ;;  %v6344_v22 = vor.u32 %v6343_v61, %v6340_v2  ;;  %v1611_v23 = vadd.f32 %v15184_v60, %v15161_v29  ;;  %v19695_v57 = vld [vmem:[#allocation58_spill] sm:$0xff] }
 0x265   : > { %v6348_v5 = vor.u32 %v6347_v47, %v6346_v31  ;;  %v12354_v34 = vcombine.low %v6326_v56, %v6336_v10  ;;  %v6357_v1 = vrot.slane %v6355_v27, 6  ;;  %v1622_v24 = vadd.f32 %v15204_v51, %v15169_v49  ;;  %v19694_v31 = vld [vmem:[#allocation54_spill] sm:$0xff]  ;;  %v19696_v47 = vld [vmem:[#allocation56_spill] sm:$0xff]  ;;  %v19700_v49 = vld [vmem:[#allocation59_spill] sm:$0xff] }
 0x266   : > { %v16373_v48 = vpop.f32.mrf.mxu1  ;;  %v6345_v38 = vrot.slane %v6344_v22, 4  ;;  %v1627_v2 = vadd.f32 %v19695_v57, %v19694_v31  ;;  %v1638_v10 = vadd.f32 %v19697_v44, %v19696_v47  ;;  %v19701_v51 = vld [vmem:[#allocation64_spill] sm:$0xff]  ;;  %v2418_v55 = vadd.f32 %v19702_v0, %v1611_v23  ;;  %v19703_v56 = vld [vmem:[#allocation119_spill] sm:$0xff]  ;;  %v19710_v44 = vld [vmem:[#allocation122_spill] sm:$0xff] }
 0x267   : > { %19686 = vst [vmem:[#allocation184_spill] sm:$0xff] %v16373_v48  ;;  %v6350_v9 = vrot.slane %v6348_v5, 4  ;;  %13533 = vmatprep.mubr.msk.bf16.mxu0 %vm1128_vm3, %v12354_v34  ;;  %v6358_v14 = vor.u32 %v6357_v1, %v6354_v13  ;;  %v1651_v27 = vadd.f32 %v19701_v51, %v19700_v49  ;;  %v2421_v13 = vadd.f32 %v19703_v56, %v1622_v24  ;;  %v19704_v1 = vld [vmem:[#allocation61_spill] sm:$0xff]  ;;  %v19706_v57 = vld [vmem:[#allocation63_spill] sm:$0xff]  ;;  %v19711_v49 = vld [vmem:[#allocation124_spill] sm:$0xff] }
 0x268   : > { %v6349_v61 = vsel %vm14415_vm9, %v6345_v38, %v6348_v5  ;;  %v19707_v5 = vld [vmem:[#allocation67_spill] sm:$0xff]  ;;  %v19712_v23 = vld [vmem:[#allocation125_spill] sm:$0xff]  ;;  %v19714_v56 = vld [vmem:[#allocation128_spill] sm:$0xff] }
 0x269   : > { %v16378_v11 = vpop.f32.mrf.mxu0  ;;  %v6359_v29 = vsel %vm14415_vm9, %v6350_v9, %v6358_v14  ;;  %v1654_v38 = vadd.f32 %v19707_v5, %v19706_v57  ;;  %v19709_v14 = vld [vmem:[#allocation123_spill] sm:$0xff]  ;;  %v3249_v51 = vadd.f32 %v19711_v49, %v2421_v13  ;;  %v2422_v0 = vadd.f32 %v19712_v23, %v1627_v2  ;;  %v19716_v5 = vld [vmem:[#allocation133_spill] sm:$0xff] }
 0x26a   : > { %v12355_v34 = vcombine.low %v6349_v61, %v6359_v29  ;;  %v2424_v47 = vadd.f32 %v19709_v14, %v1635_v37  ;;  %v19713_v24 = vld [vmem:[#allocation127_spill] sm:$0xff]  ;;  %v19719_v14 = vld [vmem:[#allocation132_spill] sm:$0xff]  ;;  %v19721_v49 = vld [vmem:[#allocation137_spill] sm:$0xff] }
 0x26b   : > { %v16388_v7 = vpop.f32.mrf.mxu0  ;;  %v16391_v48 = vpop.f32.mrf.mxu1  ;;  %v2425_v61 = vadd.f32 %v19713_v24, %v1638_v10  ;;  %v19722_v24 = vld [vmem:[#allocation139_spill] sm:$0xff] }
 0x26c   : > { %19689 = vst [vmem:[#allocation185_spill] sm:$0xff] %v16391_v48  ;;  %13534 = vmatmul.mubr.msk.bf16.gmra.mxu0 %vm1128_vm3, %v12355_v34  ;;  %v19837_v48 = vld [vmem:[#allocation83_spill] sm:$0xff]  ;;  %vm17058_vm3 = vmand %vm304_vm10, %vm7364_vm12 }
 0x26d   : > { %v16398_v42 = vpop.f32.mrf.mxu1  ;;  %v16402_v19 = vpop.f32.mrf.mxu0  ;;  %v3253_v2 = vadd.f32 %v19719_v14, %v2425_v61  ;;  %v19725_v61 = vld [vmem:[#allocation141_spill] sm:$0xff] }
 0x26e   : > { %19691 = vst [vmem:[#allocation186_spill] sm:$0xff] %v16398_v42  ;;  %v1619_v42 = vadd.f32 %v15171_v50, %v15146_v36  ;;  %v19698_v36 = vld [vmem:[#allocation115_spill] sm:$0xff] }
 0x26f   : > { %v16408_v8 = vpop.f32.mrf.mxu1  ;;  %v16410_v63 = vpop.f32.mrf.mxu0 }
 0x270   : > { %19693 = vst [vmem:[#allocation187_spill] sm:$0xff] %v16408_v8  ;;  %v2420_v50 = vadd.f32 %v19698_v36, %v1619_v42  ;;  %v19705_v42 = vld [vmem:[#allocation66_spill] sm:$0xff]  ;;  %v3246_v36 = vadd.f32 %v19710_v44, %v2418_v55  ;;  %v19833_v8 = vld [vmem:[#allocation79_spill] sm:$0xff] }
 0x271   : > { %v16430_v60 = vpop.f32.mrf.mxu1  ;;  %v1643_v31 = vadd.f32 %v19705_v42, %v19704_v1  ;;  %v3252_v1 = vadd.f32 %v19714_v56, %v2424_v47  ;;  %v19715_v42 = vld [vmem:[#allocation131_spill] sm:$0xff]  ;;  %v19718_v55 = vld [vmem:[#allocation130_spill] sm:$0xff] }
 0x272   : > { %19699 = vst [vmem:[#allocation54_spill] sm:$0xff] %v16430_v60  ;;  %v3248_v9 = vadd.f32 %v19708_v59, %v2420_v50  ;;  %v2428_v57 = vadd.f32 %v19715_v42, %v1651_v27  ;;  %v3250_v13 = vadd.f32 %v19718_v55, %v2422_v0  ;;  %v19720_v44 = vld [vmem:[#allocation134_spill] sm:$0xff]  ;;  %v3782_v34 = vadd.f32 %v16234_v40, %v3246_v36 }
 0x273   : > { %v2426_v50 = vadd.f32 %v19716_v5, %v1643_v31  ;;  %v2429_v10 = vadd.f32 %v19720_v44, %v1654_v38  ;;  %v3785_v27 = vadd.f32 %v16248_v35, %v3249_v51  ;;  %v3788_v0 = vadd.f32 %v16274_v20, %v3252_v1 }
 0x274   : > { %v3784_v37 = vadd.f32 %v16226_v52, %v3248_v9  ;;  %v3256_v23 = vadd.f32 %v19721_v49, %v2428_v57  ;;  %v16470_v9 = vadd.f32 %v16265_v16, %v3782_v34  ;;  %v3786_v38 = vadd.f32 %v16288_v18, %v3250_v13 }
 0x275   : > { %v16436_v22 = vpop.f32.mrf.mxu0  ;;  %v3254_v47 = vadd.f32 %v19722_v24, %v2426_v50  ;;  %v3789_v40 = vadd.f32 %v16299_v4, %v3253_v2  ;;  %v3257_v56 = vadd.f32 %v19725_v61, %v2429_v10  ;;  %v16479_v35 = vadd.f32 %v16276_v41, %v3785_v27  ;;  %v19752_v61 = vld [vmem:[#allocation47_spill] sm:$0xff] }
 0x276   : > { %v16465_v31 = vadd.f32 %v16258_v62, %v3784_v37  ;;  %v3792_v62 = vadd.f32 %v16328_v46, %v3256_v23  ;;  %v16485_v16 = vadd.f32 %v16301_v15, %v3788_v0  ;;  %v16488_v20 = vadd.f32 %v16306_v54, %v3786_v38  ;;  %v19750_v0 = vld [vmem:[#allocation45_spill] sm:$0xff]  ;;  %v19751_v38 = vld [vmem:[#allocation50_spill] sm:$0xff] }
 0x277   : > { %v16449_v29 = vpop.f32.mrf.mxu0  ;;  %v16491_v18 = vadd.f32 %v16320_v45, %v3789_v40  ;;  %v3790_v4 = vadd.f32 %v16337_v30, %v3254_v47  ;;  %v3793_v1 = vadd.f32 %v16353_v3, %v3257_v56  ;;  %v19394_v30 = vmov 0   ;;  %v19753_v56 = vld [vmem:[#allocation51_spill] sm:$0xff] }
 0x278   : > { %v16455_v59 = vpop.f32.mrf.mxu1  ;;  %v16496_v41 = vadd.f32 %v16346_v17, %v3792_v62  ;;  %309 = vst.msk [vmem:[#allocation2 + $0xc] sm:$0xf] %vm304_vm10, %v19394_v30  ;;  %305 = vst.msk [vmem:[#allocation2] sm:$0xf] %vm304_vm10, %v19394_v30  ;;  %13636 = vset.pattern.permute.xlu1 %v19394_v30  ;;  %13635 = vset.pattern.permute.xlu0 %v19394_v30  ;;  %v1595_v40 = vadd.f32 %v19751_v38, %v19750_v0 }
 0x279   : > { %19717 = vst [vmem:[#allocation58_spill] sm:$0xff] %v16455_v59  ;;  %v16475_v36 = vpop.f32.mrf.mxu0  ;;  %v16499_v46 = vadd.f32 %v16355_v39, %v3790_v4  ;;  %v16504_v15 = vadd.f32 %v16364_v6, %v3793_v1  ;;  %306 = vst.msk [vmem:[#allocation2 + $0x4] sm:$0xf] %vm304_vm10, %v19394_v30  ;;  %v1606_v62 = vadd.f32 %v19753_v56, %v19752_v61  ;;  %v19754_v4 = vld [vmem:[#allocation109_spill] sm:$0xff] }
 0x27a   : > { %v16467_v52 = vpop.f32.mrf.mxu1  ;;  %19724 = vst [vmem:[#allocation60_spill] sm:$0xff] %v16475_v36  ;;  %310 = vst.msk [vmem:[#allocation2 + $0x10] sm:$0xf] %vm304_vm10, %v19394_v30  ;;  %v2414_v1 = vadd.f32 %v19754_v4, %v1595_v40 }
 0x27b   : > { %19723 = vst [vmem:[#allocation56_spill] sm:$0xff] %v16467_v52  ;;  %v16501_v42 = vpop.f32.mrf.mxu0  ;;  %312 = vst.msk [vmem:[#allocation2 + $0x18] sm:$0xf] %vm304_vm10, %v19394_v30 }
 0x27c   : > { %v16482_v51 = vpop.f32.mrf.mxu1  ;;  %19727 = vst [vmem:[#allocation59_spill] sm:$0xff] %v16501_v42  ;;  %313 = vst.msk [vmem:[#allocation2 + $0x1c] sm:$0xf] %vm304_vm10, %v19394_v30  ;;  %v19823_v42 = vld [vmem:[#allocation69_spill] sm:$0xff] }
 0x27d   : > { %19726 = vst [vmem:[#allocation115_spill] sm:$0xff] %v16482_v51  ;;  %315 = vst.msk [vmem:[#allocation2 + $0x24] sm:$0xf] %vm304_vm10, %v19394_v30  ;;  %v19813_v51 = vld [vmem:[#allocation49_spill] sm:$0xff] }
 0x27e   : > { %v16506_v54 = vpop.f32.mrf.mxu1  ;;  %316 = vst.msk [vmem:[#allocation2 + $0x28] sm:$0xf] %vm304_vm10, %v19394_v30  ;;  %318 = vst.msk [vmem:[#allocation2 + $0x30] sm:$0xf] %vm304_vm10, %v19394_v30 }
 0x27f   : > { %19728 = vst [vmem:[#allocation64_spill] sm:$0xff] %v16506_v54  ;;  %319 = vst.msk [vmem:[#allocation2 + $0x34] sm:$0xf] %vm304_vm10, %v19394_v30  ;;  %v19809_v54 = vld [vmem:[#allocation41_spill] sm:$0xff] }
 0x280   : > { %321 = vst.msk [vmem:[#allocation2 + $0x3c] sm:$0xf] %vm304_vm10, %v19394_v30  ;;  %322 = vst.msk [vmem:[#allocation2 + $0x40] sm:$0xf] %vm304_vm10, %v19394_v30 }
 0x281   : > { %324 = vst.msk [vmem:[#allocation2 + $0x48] sm:$0xf] %vm304_vm10, %v19394_v30  ;;  %325 = vst.msk [vmem:[#allocation2 + $0x4c] sm:$0xf] %vm304_vm10, %v19394_v30 }
 0x282   : > { %v16508_v57 = vpop.f32.mrf.mxu0  ;;  %327 = vst.msk [vmem:[#allocation2 + $0x54] sm:$0xf] %vm304_vm10, %v19394_v30  ;;  %328 = vst.msk [vmem:[#allocation2 + $0x58] sm:$0xf] %vm304_vm10, %v19394_v30 }
 0x283   : > { %19729 = vst [vmem:[#allocation117_spill] sm:$0xff] %v16508_v57  ;;  %v16510_v45 = vpop.f32.mrf.mxu1  ;;  %330 = vst.msk [vmem:[#allocation2 + $0x60] sm:$0xf] %vm304_vm10, %v19394_v30 }
 0x284   : > { %19730 = vst [vmem:[#allocation119_spill] sm:$0xff] %v16510_v45  ;;  %331 = vst.msk [vmem:[#allocation2 + $0x64] sm:$0xf] %vm304_vm10, %v19394_v30  ;;  %v16586_v17 = vpop.f32.mrf.mxu0 }
 0x285   : > { %333 = vst.msk [vmem:[#allocation2 + $0x6c] sm:$0xf] %vm304_vm10, %v19394_v30  ;;  %334 = vst.msk [vmem:[#allocation2 + $0x70] sm:$0xf] %vm304_vm10, %v19394_v30  ;;  %v16624_v3 = vpop.f32.mrf.mxu1 }
 0x286   : > { %336 = vst.msk [vmem:[#allocation2 + $0x78] sm:$0xf] %vm304_vm10, %v19394_v30  ;;  %337 = vst.msk [vmem:[#allocation2 + $0x7c] sm:$0xf] %vm304_vm10, %v19394_v30  ;;  %v16626_v39 = vpop.f32.mrf.mxu0 }
 0x287   : > { %339 = vst.msk [vmem:[#allocation2 + $0x84] sm:$0xf] %vm304_vm10, %v19394_v30  ;;  %340 = vst.msk [vmem:[#allocation2 + $0x88] sm:$0xf] %vm304_vm10, %v19394_v30  ;;  %v16628_v6 = vpop.f32.mrf.mxu1 }
 0x288   : > { %342 = vst.msk [vmem:[#allocation2 + $0x90] sm:$0xf] %vm304_vm10, %v19394_v30  ;;  %343 = vst.msk [vmem:[#allocation2 + $0x94] sm:$0xf] %vm304_vm10, %v19394_v30  ;;  %v16630_v5 = vpop.f32.mrf.mxu0 }
 0x289   : > { %345 = vst.msk [vmem:[#allocation2 + $0x9c] sm:$0xf] %vm304_vm10, %v19394_v30  ;;  %346 = vst.msk [vmem:[#allocation2 + $0xa0] sm:$0xf] %vm304_vm10, %v19394_v30  ;;  %v16632_v50 = vpop.f32.mrf.mxu1 }
 0x28a   : > { %348 = vst.msk [vmem:[#allocation2 + $0xa8] sm:$0xf] %vm304_vm10, %v19394_v30  ;;  %349 = vst.msk [vmem:[#allocation2 + $0xac] sm:$0xf] %vm304_vm10, %v19394_v30 }
 0x28b   : > { %351 = vst.msk [vmem:[#allocation2 + $0xb4] sm:$0xf] %vm304_vm10, %v19394_v30  ;;  %352 = vst.msk [vmem:[#allocation2 + $0xb8] sm:$0xf] %vm304_vm10, %v19394_v30 }
 0x28c   : > { %354 = vst.msk [vmem:[#allocation2 + $0xc0] sm:$0xf] %vm304_vm10, %v19394_v30  ;;  %355 = vst.msk [vmem:[#allocation2 + $0xc4] sm:$0xf] %vm304_vm10, %v19394_v30 }
 0x28d   : > { %357 = vst.msk [vmem:[#allocation2 + $0xcc] sm:$0xf] %vm304_vm10, %v19394_v30  ;;  %358 = vst.msk [vmem:[#allocation2 + $0xd0] sm:$0xf] %vm304_vm10, %v19394_v30 }
 0x28e   : > { %19731 = vst [vmem:[#allocation61_spill] sm:$0xff] %v16586_v17  ;;  %311 = vst.msk [vmem:[#allocation2 + $0x14] sm:$0x1] %vm307_vm11, %v19394_v30  ;;  %v16634_v37 = vpop.f32.mrf.mxu0 }
 0x28f   : > { %308 = vst.msk [vmem:[#allocation2 + $0x8] sm:$0x1] %vm307_vm11, %v19394_v30  ;;  %314 = vst.msk [vmem:[#allocation2 + $0x20] sm:$0x1] %vm307_vm11, %v19394_v30  ;;  %v16638_v13 = vpop.f32.mrf.mxu1 }
 0x290   : > { %317 = vst.msk [vmem:[#allocation2 + $0x2c] sm:$0x1] %vm307_vm11, %v19394_v30  ;;  %320 = vst.msk [vmem:[#allocation2 + $0x38] sm:$0x1] %vm307_vm11, %v19394_v30  ;;  %v16636_v55 = vpop.f32.mrf.mxu0 }
 0x291   : > { %323 = vst.msk [vmem:[#allocation2 + $0x44] sm:$0x1] %vm307_vm11, %v19394_v30  ;;  %326 = vst.msk [vmem:[#allocation2 + $0x50] sm:$0x1] %vm307_vm11, %v19394_v30  ;;  %v16640_v14 = vpop.f32.mrf.mxu1 }
 0x292   : > { %329 = vst.msk [vmem:[#allocation2 + $0x5c] sm:$0x1] %vm307_vm11, %v19394_v30  ;;  %332 = vst.msk [vmem:[#allocation2 + $0x68] sm:$0x1] %vm307_vm11, %v19394_v30  ;;  %v16642_v2 = vpop.f32.mrf.mxu0 }
 0x293   : > { %335 = vst.msk [vmem:[#allocation2 + $0x74] sm:$0x1] %vm307_vm11, %v19394_v30  ;;  %338 = vst.msk [vmem:[#allocation2 + $0x80] sm:$0x1] %vm307_vm11, %v19394_v30  ;;  %v16644_v44 = vpop.f32.mrf.mxu1 }
 0x294   : > { %341 = vst.msk [vmem:[#allocation2 + $0x8c] sm:$0x1] %vm307_vm11, %v19394_v30  ;;  %344 = vst.msk [vmem:[#allocation2 + $0x98] sm:$0x1] %vm307_vm11, %v19394_v30  ;;  %v16646_v10 = vpop.f32.mrf.mxu0 }
 0x295   : > { %347 = vst.msk [vmem:[#allocation2 + $0xa4] sm:$0x1] %vm307_vm11, %v19394_v30  ;;  %350 = vst.msk [vmem:[#allocation2 + $0xb0] sm:$0x1] %vm307_vm11, %v19394_v30  ;;  %v16648_v34 = vpop.f32.mrf.mxu1 }
 0x296   : > { %353 = vst.msk [vmem:[#allocation2 + $0xbc] sm:$0x1] %vm307_vm11, %v19394_v30  ;;  %356 = vst.msk [vmem:[#allocation2 + $0xc8] sm:$0x1] %vm307_vm11, %v19394_v30 }
 0x297   : > { %359 = vst.msk [vmem:[#allocation2 + $0xd4] sm:$0x1] %vm307_vm11, %v19394_v30  ;;  %19732 = vst [vmem:[#allocation66_spill] sm:$0xff] %v16624_v3 }
 0x298   : > { %19733 = vst [vmem:[#allocation63_spill] sm:$0xff] %v16626_v39  ;;  %19734 = vst [vmem:[#allocation67_spill] sm:$0xff] %v16628_v6  ;;  %v19811_v39 = vld [vmem:[#allocation43_spill] sm:$0xff] }
 0x299   : > { %19735 = vst [vmem:[#allocation120_spill] sm:$0xff] %v16630_v5  ;;  %19736 = vst [vmem:[#allocation123_spill] sm:$0xff] %v16632_v50  ;;  %v19804_v5 = vld [vmem:[#allocation37_spill] sm:$0xff] }
 0x29a   : > { %19737 = vst [vmem:[#allocation122_spill] sm:$0xff] %v16634_v37  ;;  %19738 = vst [vmem:[#allocation124_spill] sm:$0xff] %v16636_v55  ;;  %v16650_v49 = vpop.f32.mrf.mxu0  ;;  %v16652_v23 = vpop.f32.mrf.mxu1  ;;  %v19797_v55 = vld [vmem:[#allocation31_spill] sm:$0xff] }
 0x29b   : > { %19739 = vst [vmem:[#allocation125_spill] sm:$0xff] %v16638_v13  ;;  %19740 = vst [vmem:[#allocation127_spill] sm:$0xff] %v16640_v14  ;;  %v19759_v14 = vld [vmem:[#allocation116_spill] sm:$0xff] }
 0x29c   : > { %19741 = vst [vmem:[#allocation128_spill] sm:$0xff] %v16642_v2  ;;  %19742 = vst [vmem:[#allocation131_spill] sm:$0xff] %v16644_v44  ;;  %v16654_v24 = vpop.f32.mrf.mxu0  ;;  %v16658_v27 = vpop.f32.mrf.mxu1  ;;  %v19757_v44 = vld [vmem:[#allocation111_spill] sm:$0xff] }
 0x29d   : > { %19743 = vst [vmem:[#allocation133_spill] sm:$0xff] %v16646_v10  ;;  %19744 = vst [vmem:[#allocation130_spill] sm:$0xff] %v16648_v34 }
 0x29e   : > { %19745 = vst [vmem:[#allocation132_spill] sm:$0xff] %v16650_v49  ;;  %19746 = vst [vmem:[#allocation134_spill] sm:$0xff] %v16652_v23  ;;  %v16656_v47 = vpop.f32.mrf.mxu0  ;;  %v16667_v34 = vpop.f32.mrf.mxu1  ;;  %v2417_v23 = vadd.f32 %v19757_v44, %v1606_v62  ;;  %v19758_v49 = vld [vmem:[#allocation114_spill] sm:$0xff] }
 0x29f   : > { %19747 = vst [vmem:[#allocation137_spill] sm:$0xff] %v16654_v24  ;;  %19748 = vst [vmem:[#allocation139_spill] sm:$0xff] %v16656_v47  ;;  %v3242_v24 = vadd.f32 %v19758_v49, %v2414_v1 }
 0x2a0   : > { %19749 = vst [vmem:[#allocation141_spill] sm:$0xff] %v16658_v27  ;;  %v16665_v30 = vpop.f32.mrf.mxu0  ;;  %19756 = vst [vmem:[#allocation50_spill] sm:$0xff] %v16667_v34  ;;  %v3245_v47 = vadd.f32 %v19759_v14, %v2417_v23  ;;  %v16675_v0 = vpop.f32.mrf.mxu1  ;;  %v19780_v34 = vld [vmem:[#allocation15_spill] sm:$0xff] }
 0x2a1   : > { %19755 = vst [vmem:[#allocation45_spill] sm:$0xff] %v16665_v30  ;;  %v3778_v27 = vadd.f32 %v16192_v58, %v3242_v24  ;;  %19761 = vst [vmem:[#allocation51_spill] sm:$0xff] %v16675_v0  ;;  %v19768_v24 = vld [vmem:[#allocation5_spill] sm:$0xff]  ;;  %v19779_v0 = vld [vmem:[#allocation18_spill] sm:$0xff] }
 0x2a2   : > { %v3781_v38 = vadd.f32 %v16197_v43, %v3245_v47  ;;  %v19769_v43 = vld [vmem:[#allocation8_spill] sm:$0xff]  ;;  %v19782_v30 = vld [vmem:[#allocation17_spill] sm:$0xff] }
 0x2a3   : > { %v4548_v40 = vadd.f32 %v16222_v21, %v3778_v27  ;;  %v1523_v47 = vadd.f32 %v19769_v43, %v19768_v24  ;;  %v19770_v21 = vld [vmem:[#allocation6_spill] sm:$0xff] }
 0x2a4   : > { %v4551_v56 = vadd.f32 %v16229_v53, %v3781_v38  ;;  %v19771_v27 = vld [vmem:[#allocation10_spill] sm:$0xff]  ;;  %v19772_v53 = vld [vmem:[#allocation7_spill] sm:$0xff]  ;;  %v19773_v38 = vld [vmem:[#allocation12_spill] sm:$0xff] }
 0x2a5   : > { %v16673_v10 = vpop.f32.mrf.mxu0  ;;  %v1515_v1 = vadd.f32 %v19771_v27, %v19770_v21  ;;  %v19783_v24 = vld [vmem:[#allocation22_spill] sm:$0xff]  ;;  %v19784_v21 = vld [vmem:[#allocation19_spill] sm:$0xff]  ;;  %v19785_v27 = vld [vmem:[#allocation24_spill] sm:$0xff] }
 0x2a6   : > { %19760 = vst [vmem:[#allocation47_spill] sm:$0xff] %v16673_v10  ;;  %v1534_v43 = vadd.f32 %v19783_v24, %v19782_v30  ;;  %v1555_v50 = vadd.f32 %v19785_v27, %v19784_v21  ;;  %v19795_v30 = vld [vmem:[#allocation29_spill] sm:$0xff]  ;;  %v19796_v24 = vld [vmem:[#allocation34_spill] sm:$0xff]  ;;  %v19798_v21 = vld [vmem:[#allocation36_spill] sm:$0xff] }
 0x2a7   : > { %v5293_v61 = vpop.f32.mrf.mxu0  ;;  %v1563_v45 = vadd.f32 %v19796_v24, %v19795_v30  ;;  %v1574_v27 = vadd.f32 %v19798_v21, %v19797_v55  ;;  %v19808_v30 = vld [vmem:[#allocation44_spill] sm:$0xff]  ;;  %v19810_v55 = vld [vmem:[#allocation46_spill] sm:$0xff] }
 0x2a8   : > { %v16680_v4 = vadd.f32 %v5293_v61, %v4548_v40  ;;  %v16682_v62 = vpop.f32.mrf.mxu1  ;;  %v1526_v40 = vadd.f32 %v19773_v38, %v19772_v53  ;;  %v19774_v61 = vld [vmem:[#allocation9_spill] sm:$0xff]  ;;  %v19787_v38 = vld [vmem:[#allocation26_spill] sm:$0xff]  ;;  %v1582_v21 = vadd.f32 %v19810_v55, %v19809_v54 }
 0x2a9   : > { %v13444_v44 = vpop.f32.mrf.mxu0  ;;  %19763 = vst [vmem:[#allocation111_spill] sm:$0xff] %v16682_v62  ;;  %v19786_v53 = vld [vmem:[#allocation21_spill] sm:$0xff] }
 0x2aa   : > { %19762 = vst [vmem:[#allocation109_spill] sm:$0xff] %v16680_v4  ;;  %v16684_v49 = vadd.f32 %v13444_v44, %v4551_v56  ;;  %v16686_v14 = vpop.f32.mrf.mxu1  ;;  %v19775_v4 = vld [vmem:[#allocation14_spill] sm:$0xff]  ;;  %v19776_v56 = vld [vmem:[#allocation11_spill] sm:$0xff]  ;;  %v19777_v44 = vld [vmem:[#allocation16_spill] sm:$0xff]  ;;  %v1547_v2 = vadd.f32 %v19787_v38, %v19786_v53 }
 0x2ab   : > { %19765 = vst [vmem:[#allocation116_spill] sm:$0xff] %v16686_v14  ;;  %v16688_v58 = vpop.f32.mrf.mxu0  ;;  %v1518_v62 = vadd.f32 %v19775_v4, %v19774_v61  ;;  %v19778_v14 = vld [vmem:[#allocation13_spill] sm:$0xff]  ;;  %v19788_v4 = vld [vmem:[#allocation23_spill] sm:$0xff]  ;;  %v19789_v61 = vld [vmem:[#allocation28_spill] sm:$0xff] }
 0x2ac   : > { %19764 = vst [vmem:[#allocation114_spill] sm:$0xff] %v16684_v49  ;;  %19766 = vst [vmem:[#allocation188_spill] sm:$0xff] %v16688_v58  ;;  %v16690_v23 = vpop.f32.mrf.mxu1  ;;  %v1539_v49 = vadd.f32 %v19777_v44, %v19776_v56  ;;  %v1531_v58 = vadd.f32 %v19779_v0, %v19778_v14  ;;  %v1558_v6 = vadd.f32 %v19789_v61, %v19788_v4  ;;  %v19791_v0 = vld [vmem:[#allocation25_spill] sm:$0xff]  ;;  %v19792_v14 = vld [vmem:[#allocation30_spill] sm:$0xff] }
 0x2ad   : > { %19767 = vst [vmem:[#allocation189_spill] sm:$0xff] %v16690_v23  ;;  %v19781_v23 = vld [vmem:[#allocation20_spill] sm:$0xff]  ;;  %v1550_v44 = vadd.f32 %v19792_v14, %v19791_v0  ;;  %v19800_v38 = vld [vmem:[#allocation33_spill] sm:$0xff]  ;;  %v19801_v4 = vld [vmem:[#allocation38_spill] sm:$0xff] }
 0x2ae   : > { %v1542_v10 = vadd.f32 %v19781_v23, %v19780_v34  ;;  %v19793_v34 = vld [vmem:[#allocation27_spill] sm:$0xff]  ;;  %v19794_v23 = vld [vmem:[#allocation32_spill] sm:$0xff]  ;;  %v16725_v53 = vpop.f32.mrf.mxu1  ;;  %v1566_v61 = vadd.f32 %v19801_v4, %v19800_v38  ;;  %v19805_v0 = vld [vmem:[#allocation42_spill] sm:$0xff] }
 0x2af   : > { %v1571_v3 = vadd.f32 %v19794_v23, %v19793_v34  ;;  %19799 = vst [vmem:[#allocation8_spill] sm:$0xff] %v16725_v53  ;;  %v1579_v14 = vadd.f32 %v19805_v0, %v19804_v5  ;;  %v19807_v23 = vld [vmem:[#allocation39_spill] sm:$0xff]  ;;  %v19812_v53 = vld [vmem:[#allocation48_spill] sm:$0xff]  ;;  %v19822_v55 = vld [vmem:[#allocation65_spill] sm:$0xff] }
 0x2b0   : > { %v1590_v24 = vadd.f32 %v19808_v30, %v19807_v23  ;;  %v1603_v17 = vadd.f32 %v19812_v53, %v19811_v39  ;;  %v19814_v38 = vld [vmem:[#allocation52_spill] sm:$0xff]  ;;  %v19820_v23 = vld [vmem:[#allocation57_spill] sm:$0xff]  ;;  %v19821_v30 = vld [vmem:[#allocation62_spill] sm:$0xff]  ;;  %v1646_v39 = vadd.f32 %v19823_v42, %v19822_v55  ;;  %v2401_v42 = vadd.f32 %v19833_v8, %v1542_v10 }
 0x2b1   : > { %v1598_v4 = vadd.f32 %v19814_v38, %v19813_v51  ;;  %v19817_v5 = vld [vmem:[#allocation68_spill] sm:$0xff]  ;;  %v1630_v54 = vadd.f32 %v19821_v30, %v19820_v23  ;;  %v19824_v53 = vld [vmem:[#allocation71_spill] sm:$0xff]  ;;  %v19825_v51 = vld [vmem:[#allocation73_spill] sm:$0xff] }
 0x2b2   : > { %v13447_v13 = vpop.f32.mrf.mxu0  ;;  %v2396_v0 = vadd.f32 %v19817_v5, %v1523_v47  ;;  %v2397_v59 = vadd.f32 %v19824_v53, %v1526_v40  ;;  %v2395_v38 = vadd.f32 %v19825_v51, %v1518_v62  ;;  %v19828_v47 = vld [vmem:[#allocation74_spill] sm:$0xff]  ;;  %v19834_v55 = vld [vmem:[#allocation81_spill] sm:$0xff]  ;;  %v19835_v53 = vld [vmem:[#allocation80_spill] sm:$0xff] }
 0x2b3   : > { %v16715_v56 = vadd.f32 %v13447_v13, %v16465_v31  ;;  %v19802_v31 = vld [vmem:[#allocation35_spill] sm:$0xff]  ;;  %v19803_v13 = vld [vmem:[#allocation40_spill] sm:$0xff]  ;;  %v19832_v23 = vld [vmem:[#allocation78_spill] sm:$0xff]  ;;  %v2399_v40 = vadd.f32 %v19834_v55, %v1534_v43 }
 0x2b4   : > { %v5309_v37 = vpop.f32.mrf.mxu0  ;;  %v16757_v60 = vpop.f32.mrf.mxu1  ;;  %v3223_v30 = vadd.f32 %v19832_v23, %v2395_v38  ;;  %v19836_v51 = vld [vmem:[#allocation82_spill] sm:$0xff]  ;;  %v19845_v10 = vld [vmem:[#allocation88_spill] sm:$0xff]  ;;  %v19847_v55 = vld [vmem:[#allocation91_spill] sm:$0xff] }
 0x2b5   : > { %19790 = vst [vmem:[#allocation5_spill] sm:$0xff] %v16715_v56  ;;  %v1587_v56 = vadd.f32 %v19803_v13, %v19802_v31  ;;  %v16734_v34 = vadd.f32 %v5309_v37, %v16470_v9  ;;  %v19815_v31 = vld [vmem:[#allocation53_spill] sm:$0xff]  ;;  %v19816_v13 = vld [vmem:[#allocation55_spill] sm:$0xff]  ;;  %v19818_v9 = vld [vmem:[#allocation70_spill] sm:$0xff] }
 0x2b6   : > { %v13448_v57 = vpop.f32.mrf.mxu0  ;;  %v1614_v52 = vadd.f32 %v19816_v13, %v19815_v31  ;;  %v2394_v37 = vadd.f32 %v19818_v9, %v1515_v1  ;;  %19826 = vst [vmem:[#allocation7_spill] sm:$0xff] %v16757_v60  ;;  %v19827_v31 = vld [vmem:[#allocation72_spill] sm:$0xff]  ;;  %v19829_v1 = vld [vmem:[#allocation75_spill] sm:$0xff]  ;;  %v16777_v8 = vpop.f32.mrf.mxu1 }
 0x2b7   : > { %19806 = vst [vmem:[#allocation6_spill] sm:$0xff] %v16734_v34  ;;  %v16749_v34 = vadd.f32 %v13448_v57, %v16479_v35  ;;  %v3224_v13 = vadd.f32 %v19827_v31, %v2396_v0  ;;  %v2400_v9 = vadd.f32 %v19829_v1, %v1539_v49  ;;  %v19830_v35 = vld [vmem:[#allocation77_spill] sm:$0xff]  ;;  %v2404_v0 = vadd.f32 %v19837_v48, %v1555_v50  ;;  %v19840_v1 = vld [vmem:[#allocation86_spill] sm:$0xff] }
 0x2b8   : > { %v3222_v5 = vadd.f32 %v19828_v47, %v2394_v37  ;;  %v2398_v57 = vadd.f32 %v19830_v35, %v1531_v58  ;;  %v19838_v31 = vld [vmem:[#allocation85_spill] sm:$0xff]  ;;  %v19839_v47 = vld [vmem:[#allocation84_spill] sm:$0xff]  ;;  %v3227_v58 = vadd.f32 %v19840_v1, %v2399_v40  ;;  %v19841_v35 = vld [vmem:[#allocation87_spill] sm:$0xff]  ;;  %v16775_v23 = vpop.f32.mrf.mxu0  ;;  %19844 = vst [vmem:[#allocation9_spill] sm:$0xff] %v16777_v8  ;;  %v2408_v48 = vadd.f32 %v19847_v55, %v1571_v3 }
 0x2b9   : > { %19819 = vst [vmem:[#allocation10_spill] sm:$0xff] %v16749_v34  ;;  %v19831_v34 = vld [vmem:[#allocation76_spill] sm:$0xff]  ;;  %v3228_v62 = vadd.f32 %v19835_v53, %v2400_v9  ;;  %v2402_v37 = vadd.f32 %v19838_v31, %v1547_v2  ;;  %v3229_v49 = vadd.f32 %v19839_v47, %v2401_v42  ;;  %19843 = vst [vmem:[#allocation12_spill] sm:$0xff] %v16775_v23  ;;  %v19846_v9 = vld [vmem:[#allocation90_spill] sm:$0xff] }
 0x2ba   : > { %v3225_v36 = vadd.f32 %v19831_v34, %v2397_v59  ;;  %v3226_v60 = vadd.f32 %v19836_v51, %v2398_v57  ;;  %v2405_v59 = vadd.f32 %v19841_v35, %v1558_v6  ;;  %v19842_v34 = vld [vmem:[#allocation89_spill] sm:$0xff]  ;;  %v3232_v43 = vadd.f32 %v19845_v10, %v2404_v0  ;;  %v19849_v53 = vld [vmem:[#allocation92_spill] sm:$0xff]  ;;  %v19850_v51 = vld [vmem:[#allocation94_spill] sm:$0xff] }
 0x2bb   : > { %v2403_v38 = vadd.f32 %v19842_v34, %v1550_v44  ;;  %v3230_v57 = vadd.f32 %v19846_v9, %v2402_v37  ;;  %v19848_v50 = vld [vmem:[#allocation93_spill] sm:$0xff]  ;;  %v19851_v31 = vld [vmem:[#allocation95_spill] sm:$0xff]  ;;  %v19853_v1 = vld [vmem:[#allocation96_spill] sm:$0xff] }
 0x2bc   : > { %v2406_v2 = vadd.f32 %v19848_v50, %v1563_v45  ;;  %v3233_v42 = vadd.f32 %v19849_v53, %v2405_v59  ;;  %v2409_v6 = vadd.f32 %v19851_v31, %v1574_v27  ;;  %v19852_v47 = vld [vmem:[#allocation97_spill] sm:$0xff]  ;;  %v3236_v35 = vadd.f32 %v19853_v1, %v2408_v48  ;;  %v19854_v34 = vld [vmem:[#allocation98_spill] sm:$0xff]  ;;  %v19855_v23 = vld [vmem:[#allocation99_spill] sm:$0xff]  ;;  %v16795_v27 = vpop.f32.mrf.mxu1 }
 0x2bd   : > { %v3231_v40 = vadd.f32 %v19850_v51, %v2403_v38  ;;  %v2407_v44 = vadd.f32 %v19852_v47, %v1566_v61  ;;  %v2412_v0 = vadd.f32 %v19855_v23, %v1587_v56  ;;  %v19856_v10 = vld [vmem:[#allocation101_spill] sm:$0xff]  ;;  %v19857_v9 = vld [vmem:[#allocation100_spill] sm:$0xff]  ;;  %v19858_v55 = vld [vmem:[#allocation102_spill] sm:$0xff] }
 0x2be   : > { %v3234_v8 = vadd.f32 %v19854_v34, %v2406_v2  ;;  %v2410_v37 = vadd.f32 %v19856_v10, %v1579_v14  ;;  %v3237_v3 = vadd.f32 %v19857_v9, %v2409_v6  ;;  %v19859_v50 = vld [vmem:[#allocation103_spill] sm:$0xff]  ;;  %v19860_v53 = vld [vmem:[#allocation105_spill] sm:$0xff]  ;;  %v19861_v61 = vld [vmem:[#allocation104_spill] sm:$0xff] }
 0x2bf   : > { %v3235_v45 = vadd.f32 %v19858_v55, %v2407_v44  ;;  %v2413_v59 = vadd.f32 %v19859_v50, %v1590_v24  ;;  %v2411_v38 = vadd.f32 %v19860_v53, %v1582_v21  ;;  %v3240_v31 = vadd.f32 %v19861_v61, %v2412_v0  ;;  %v19862_v48 = vld [vmem:[#allocation106_spill] sm:$0xff]  ;;  %v19863_v2 = vld [vmem:[#allocation107_spill] sm:$0xff]  ;;  %v19864_v14 = vld [vmem:[#allocation108_spill] sm:$0xff] }
 0x2c0   : > { %v13451_v51 = vpop.f32.mrf.mxu0  ;;  %v3238_v47 = vadd.f32 %v19862_v48, %v2410_v37  ;;  %v2416_v1 = vadd.f32 %v19863_v2, %v1603_v17  ;;  %v19865_v6 = vld [vmem:[#allocation110_spill] sm:$0xff]  ;;  %v19866_v34 = vld [vmem:[#allocation113_spill] sm:$0xff]  ;;  %v19868_v55 = vld [vmem:[#allocation112_spill] sm:$0xff] }
 0x2c1   : > { %v16801_v56 = vadd.f32 %v13451_v51, %v16485_v16  ;;  %v3241_v23 = vadd.f32 %v19864_v14, %v2413_v59  ;;  %v3239_v44 = vadd.f32 %v19865_v6, %v2411_v38  ;;  %v2415_v24 = vadd.f32 %v19866_v34, %v1598_v4  ;;  %v19867_v10 = vld [vmem:[#allocation121_spill] sm:$0xff]  ;;  %v19870_v61 = vld [vmem:[#allocation136_spill] sm:$0xff]  ;;  %v19872_v16 = vld [vmem:[#allocation118_spill] sm:$0xff]  ;;  %v16817_v6 = vpop.f32.mrf.mxu1 }
 0x2c2   : > { %v2419_v21 = vadd.f32 %v19867_v10, %v1614_v52  ;;  %v5325_v9 = vpop.f32.mrf.mxu0  ;;  %v3244_v50 = vadd.f32 %v19868_v55, %v2416_v1  ;;  %v19869_v53 = vld [vmem:[#allocation129_spill] sm:$0xff]  ;;  %v2427_v37 = vadd.f32 %v19870_v61, %v1646_v39  ;;  %v19873_v48 = vld [vmem:[#allocation126_spill] sm:$0xff]  ;;  %v19875_v14 = vld [vmem:[#allocation140_spill] sm:$0xff] }
 0x2c3   : > { %v2423_v0 = vadd.f32 %v19869_v53, %v1630_v54  ;;  %v16811_v17 = vadd.f32 %v5325_v9, %v16488_v20  ;;  %v3243_v51 = vadd.f32 %v19872_v16, %v2415_v24  ;;  %v19874_v2 = vld [vmem:[#allocation138_spill] sm:$0xff]  ;;  %v3758_v4 = vadd.f32 %v19875_v14, %v3222_v5  ;;  %v19876_v34 = vld [vmem:[#allocation135_spill] sm:$0xff]  ;;  %v19880_v9 = vld [vmem:[#allocation145_spill] sm:$0xff] }
 0x2c4   : > { %v3247_v59 = vadd.f32 %v19873_v48, %v2419_v21  ;;  %v3760_v38 = vadd.f32 %v19874_v2, %v3224_v13  ;;  %v13452_v52 = vpop.f32.mrf.mxu0  ;;  %v19877_v10 = vld [vmem:[#allocation143_spill] sm:$0xff]  ;;  %v19878_v55 = vld [vmem:[#allocation142_spill] sm:$0xff]  ;;  %v19881_v53 = vld [vmem:[#allocation144_spill] sm:$0xff] }
 0x2c5   : > { %19871 = vst [vmem:[#allocation14_spill] sm:$0xff] %v16811_v17  ;;  %v3251_v1 = vadd.f32 %v19876_v34, %v2423_v0  ;;  %v3255_v54 = vadd.f32 %v19877_v10, %v2427_v37  ;;  %v3761_v39 = vadd.f32 %v19878_v55, %v3225_v36  ;;  %v16823_v20 = vadd.f32 %v13452_v52, %v16491_v18  ;;  %v19882_v61 = vld [vmem:[#allocation146_spill] sm:$0xff]  ;;  %v19883_v16 = vld [vmem:[#allocation147_spill] sm:$0xff]  ;;  %v19884_v48 = vld [vmem:[#allocation148_spill] sm:$0xff] }
 0x2c6   : > { %v4530_v24 = vadd.f32 %v19880_v9, %v3760_v38  ;;  %v3759_v21 = vadd.f32 %v19881_v53, %v3223_v30  ;;  %v4528_v13 = vadd.f32 %v19882_v61, %v3758_v4  ;;  %v3764_v5 = vadd.f32 %v19883_v16, %v3228_v62  ;;  %v19885_v14 = vld [vmem:[#allocation149_spill] sm:$0xff]  ;;  %v19886_v0 = vld [vmem:[#allocation150_spill] sm:$0xff]  ;;  %v19887_v37 = vld [vmem:[#allocation152_spill] sm:$0xff]  ;;  %v16837_v53 = vpop.f32.mrf.mxu1 }
 0x2c7   : > { %19879 = vst [vmem:[#allocation11_spill] sm:$0xff] %v16823_v20  ;;  %v4531_v2 = vadd.f32 %v19884_v48, %v3761_v39  ;;  %v3762_v17 = vadd.f32 %v19885_v14, %v3226_v60  ;;  %v3765_v34 = vadd.f32 %v19886_v0, %v3229_v49  ;;  %v3763_v10 = vadd.f32 %v19887_v37, %v3227_v58  ;;  %v19888_v36 = vld [vmem:[#allocation151_spill] sm:$0xff]  ;;  %v19889_v18 = vld [vmem:[#allocation153_spill] sm:$0xff]  ;;  %v19892_v4 = vld [vmem:[#allocation154_spill] sm:$0xff] }
 0x2c8   : > { %v4529_v55 = vadd.f32 %v19888_v36, %v3759_v21  ;;  %v4534_v52 = vadd.f32 %v19889_v18, %v3764_v5  ;;  %v19890_v20 = vld [vmem:[#allocation155_spill] sm:$0xff]  ;;  %v19891_v9 = vld [vmem:[#allocation157_spill] sm:$0xff]  ;;  %v19893_v61 = vld [vmem:[#allocation156_spill] sm:$0xff] }
 0x2c9   : > { %v3768_v38 = vadd.f32 %v19890_v20, %v3232_v43  ;;  %v3766_v30 = vadd.f32 %v19891_v9, %v3230_v57  ;;  %v4532_v62 = vadd.f32 %v19892_v4, %v3762_v17  ;;  %v4535_v39 = vadd.f32 %v19893_v61, %v3765_v34  ;;  %v19894_v16 = vld [vmem:[#allocation158_spill] sm:$0xff]  ;;  %v19895_v48 = vld [vmem:[#allocation159_spill] sm:$0xff]  ;;  %v19896_v14 = vld [vmem:[#allocation160_spill] sm:$0xff]  ;;  %v16847_v20 = vpop.f32.mrf.mxu0  ;;  %v16857_v9 = vpop.f32.mrf.mxu1 }
 0x2ca   : > { %v4533_v60 = vadd.f32 %v16072_v28, %v3763_v10  ;;  %v3769_v49 = vadd.f32 %v19894_v16, %v3233_v42  ;;  %v3767_v21 = vadd.f32 %v19895_v48, %v3231_v40  ;;  %v3772_v43 = vadd.f32 %v19896_v14, %v3236_v35  ;;  %v19897_v0 = vld [vmem:[#allocation161_spill] sm:$0xff]  ;;  %v19898_v37 = vld [vmem:[#allocation163_spill] sm:$0xff]  ;;  %v19899_v10 = vld [vmem:[#allocation162_spill] sm:$0xff] }
 0x2cb   : > { %v4538_v58 = vadd.f32 %v16091_v32, %v3768_v38  ;;  %v4536_v5 = vadd.f32 %v16101_v12, %v3766_v30  ;;  %v3770_v17 = vadd.f32 %v19897_v0, %v3234_v8  ;;  %v3773_v34 = vadd.f32 %v16112_v25, %v3237_v3  ;;  %v19900_v36 = vld [vmem:[#allocation164_spill] sm:$0xff]  ;;  %v19901_v18 = vld [vmem:[#allocation166_spill] sm:$0xff]  ;;  %v19903_v35 = vld [vmem:[#allocation165_spill] sm:$0xff] }
 0x2cc   : > { %v4539_v57 = vadd.f32 %v16107_v26, %v3769_v49  ;;  %v3771_v28 = vadd.f32 %v19898_v37, %v3235_v45  ;;  %v4537_v42 = vadd.f32 %v19899_v10, %v3767_v21  ;;  %v4542_v32 = vadd.f32 %v19900_v36, %v3772_v43  ;;  %v19902_v38 = vld [vmem:[#allocation168_spill] sm:$0xff]  ;;  %v19904_v4 = vld [vmem:[#allocation167_spill] sm:$0xff]  ;;  %v19905_v61 = vld [vmem:[#allocation170_spill] sm:$0xff] }
 0x2cd   : > { %v3776_v40 = vadd.f32 %v19901_v18, %v3240_v31  ;;  %v3774_v12 = vadd.f32 %v19902_v38, %v3238_v47  ;;  %v4540_v30 = vadd.f32 %v19903_v35, %v3770_v17  ;;  %v4543_v26 = vadd.f32 %v19904_v4, %v3773_v34  ;;  %v19906_v16 = vld [vmem:[#allocation169_spill] sm:$0xff]  ;;  %v19907_v3 = vld [vmem:[#allocation172_spill] sm:$0xff]  ;;  %v19908_v49 = vld [vmem:[#allocation171_spill] sm:$0xff]  ;;  %v16877_v4 = vpop.f32.mrf.mxu1 }
 0x2ce   : > { %v4541_v8 = vadd.f32 %v19905_v61, %v3771_v28  ;;  %v3777_v25 = vadd.f32 %v19906_v16, %v3241_v23  ;;  %v3775_v48 = vadd.f32 %v19908_v49, %v3239_v44  ;;  %v19909_v21 = vld [vmem:[#allocation173_spill] sm:$0xff]  ;;  %v19910_v43 = vld [vmem:[#allocation174_spill] sm:$0xff]  ;;  %v19912_v10 = vld [vmem:[#allocation180_spill] sm:$0xff] }
 0x2cf   : > { %v4546_v45 = vadd.f32 %v19907_v3, %v3776_v40  ;;  %v4544_v14 = vadd.f32 %v19909_v21, %v3774_v12  ;;  %v3780_v31 = vadd.f32 %v19910_v43, %v3244_v50  ;;  %v13455_v0 = vpop.f32.mrf.mxu0  ;;  %v19911_v47 = vld [vmem:[#allocation177_spill] sm:$0xff]  ;;  %v3783_v36 = vadd.f32 %v19912_v10, %v3247_v59  ;;  %v19913_v17 = vld [vmem:[#allocation182_spill] sm:$0xff]  ;;  %v19914_v28 = vld [vmem:[#allocation175_spill] sm:$0xff] }
 0x2d0   : > { %v3779_v37 = vadd.f32 %v19911_v47, %v3243_v51  ;;  %v3787_v18 = vadd.f32 %v19913_v17, %v3251_v1  ;;  %v16871_v34 = vadd.f32 %v13455_v0, %v16496_v41  ;;  %v4547_v23 = vadd.f32 %v19914_v28, %v3777_v25  ;;  %v19915_v38 = vld [vmem:[#allocation176_spill] sm:$0xff]  ;;  %v19916_v35 = vld [vmem:[#allocation178_spill] sm:$0xff]  ;;  %v19917_v61 = vld [vmem:[#allocation179_spill] sm:$0xff] }
 0x2d1   : > { %v4545_v40 = vadd.f32 %v19915_v38, %v3775_v48  ;;  %v4550_v44 = vadd.f32 %v19916_v35, %v3780_v31  ;;  %v3791_v12 = vadd.f32 %v16368_v33, %v3255_v54  ;;  %v5341_v50 = vpop.f32.mrf.mxu0  ;;  %v19918_v16 = vld [vmem:[#allocation181_spill] sm:$0xff]  ;;  %v19919_v1 = vld [vmem:[#allocation183_spill] sm:$0xff]  ;;  %v5358_v25 = vadd.f32 %v16378_v11, %v4530_v24  ;;  %v19920_v49 = vld [vmem:[#allocation184_spill] sm:$0xff] }
 0x2d2   : > { %v4549_v51 = vadd.f32 %v19917_v61, %v3779_v37  ;;  %v16881_v59 = vadd.f32 %v19918_v16, %v3783_v36  ;;  %v16884_v3 = vadd.f32 %v19919_v1, %v3787_v18  ;;  %v16887_v41 = vadd.f32 %v5341_v50, %v16499_v46  ;;  %v19921_v46 = vld [vmem:[#allocation185_spill] sm:$0xff]  ;;  %v19922_v11 = vld [vmem:[#allocation186_spill] sm:$0xff]  ;;  %v19923_v10 = vld [vmem:[#allocation187_spill] sm:$0xff] }
 0x2d3   : > { %v16891_v48 = vadd.f32 %v19920_v49, %v3791_v12  ;;  %v5356_v33 = vadd.f32 %v16388_v7, %v4528_v13  ;;  %v5359_v54 = vadd.f32 %v16402_v19, %v4531_v2  ;;  %v13456_v21 = vpop.f32.mrf.mxu0  ;;  %v5357_v43 = vadd.f32 %v16410_v63, %v4529_v55  ;;  %v19924_v17 = vld [vmem:[#allocation60_spill] sm:$0xff]  ;;  %v16905_v13 = vpop.f32.mrf.mxu1  ;;  %v19925_v19 = vld [vmem:[#allocation54_spill] sm:$0xff]  ;;  %v19930_v28 = vld [vmem:[#allocation115_spill] sm:$0xff] }
 0x2d4   : > { %v5362_v31 = vadd.f32 %v16436_v22, %v4534_v52  ;;  %v5360_v0 = vadd.f32 %v16449_v29, %v4532_v62  ;;  %v16899_v47 = vadd.f32 %v13456_v21, %v16504_v15  ;;  %v5894_v37 = vadd.f32 %v19921_v46, %v5358_v25  ;;  %v19926_v63 = vld [vmem:[#allocation58_spill] sm:$0xff]  ;;  %v19927_v29 = vld [vmem:[#allocation59_spill] sm:$0xff]  ;;  %v19928_v15 = vld [vmem:[#allocation56_spill] sm:$0xff] }
 0x2d5   : > { %v5892_v24 = vadd.f32 %v19922_v11, %v5356_v33  ;;  %v5895_v36 = vadd.f32 %v19923_v10, %v5359_v54  ;;  %v5363_v7 = vadd.f32 %v19924_v17, %v4535_v39  ;;  %v16908_v2 = vadd.f32 %v19925_v19, %v5357_v43  ;;  %v19929_v62 = vld [vmem:[#allocation117_spill] sm:$0xff]  ;;  %v19932_v12 = vld [vmem:[#allocation63_spill] sm:$0xff]  ;;  %v16923_v61 = vpop.f32.mrf.mxu0  ;;  %v19933_v16 = vld [vmem:[#allocation64_spill] sm:$0xff]  ;;  %v13495_v10 = vpop.f32.mrf.mxu1 }
 0x2d6   : > { %v16911_v22 = vadd.f32 %v19926_v63, %v5362_v31  ;;  %v5361_v55 = vadd.f32 %v19927_v29, %v4533_v60  ;;  %v16915_v52 = vadd.f32 %v19928_v15, %v5360_v0  ;;  %v5366_v18 = vadd.f32 %v19929_v62, %v4538_v58  ;;  %v19931_v35 = vld [vmem:[#allocation61_spill] sm:$0xff]  ;;  %v19934_v25 = vld [vmem:[#allocation120_spill] sm:$0xff]  ;;  %v19935_v60 = vld [vmem:[#allocation122_spill] sm:$0xff] }
 0x2d7   : > { %v16919_v38 = vadd.f32 %v19930_v28, %v5363_v7  ;;  %v5364_v39 = vadd.f32 %v19931_v35, %v4536_v5  ;;  %v5367_v50 = vadd.f32 %v19932_v12, %v4539_v57  ;;  %v5365_v49 = vadd.f32 %v19934_v25, %v4537_v42  ;;  %v19936_v54 = vld [vmem:[#allocation124_spill] sm:$0xff]  ;;  %v19937_v43 = vld [vmem:[#allocation119_spill] sm:$0xff]  ;;  %v19938_v31 = vld [vmem:[#allocation66_spill] sm:$0xff] }
 0x2d8   : > { %v16926_v1 = vadd.f32 %v19933_v16, %v5361_v55  ;;  %v5370_v33 = vadd.f32 %v19935_v60, %v4542_v32  ;;  %v5368_v21 = vadd.f32 %v19936_v54, %v4540_v30  ;;  %v16932_v58 = vadd.f32 %v19937_v43, %v5366_v18  ;;  %v19939_v5 = vld [vmem:[#allocation67_spill] sm:$0xff]  ;;  %v19940_v57 = vld [vmem:[#allocation128_spill] sm:$0xff]  ;;  %v19942_v42 = vld [vmem:[#allocation125_spill] sm:$0xff] }
 0x2d9   : > { %v16935_v0 = vadd.f32 %v19938_v31, %v5364_v39  ;;  %v16938_v46 = vadd.f32 %v19939_v5, %v5367_v50  ;;  %v5371_v11 = vadd.f32 %v19940_v57, %v4543_v26  ;;  %v19941_v17 = vld [vmem:[#allocation123_spill] sm:$0xff]  ;;  %v19943_v32 = vld [vmem:[#allocation133_spill] sm:$0xff]  ;;  %v19945_v55 = vld [vmem:[#allocation132_spill] sm:$0xff] }
 0x2da   : > { %v16942_v7 = vadd.f32 %v19941_v17, %v5365_v49  ;;  %v16945_v19 = vadd.f32 %v19942_v42, %v5370_v33  ;;  %v5369_v30 = vadd.f32 %v19943_v32, %v4541_v8  ;;  %v19944_v63 = vld [vmem:[#allocation127_spill] sm:$0xff]  ;;  %v5374_v15 = vadd.f32 %v19945_v55, %v4546_v45  ;;  %v19947_v28 = vld [vmem:[#allocation137_spill] sm:$0xff]  ;;  %v16960_v50 = vld [vmem:[%s19298_s2] ss:$0 sm:$0xff] }
 0x2db   : > { %v16949_v29 = vadd.f32 %v19944_v63, %v5368_v21  ;;  %v19946_v62 = vld [vmem:[#allocation131_spill] sm:$0xff]  ;;  %v5372_v35 = vadd.f32 %v19947_v28, %v4544_v14  ;;  %v13503_v12 = vpop.f32.mrf.mxu0  ;;  %v19949_v16 = vld [vmem:[#allocation130_spill] sm:$0xff]  ;;  %v19950_v25 = vld [vmem:[#allocation45_spill] sm:$0xff] }
 0x2dc   : > { %v16953_v18 = vadd.f32 %v19946_v62, %v5371_v11  ;;  %v19948_v26 = vld [vmem:[#allocation139_spill] sm:$0xff]  ;;  %v16963_v8 = vadd.f32 %v19949_v16, %v5369_v30  ;;  %v5373_v49 = vadd.f32 %v19950_v25, %v4545_v40  ;;  %v6664_v33 = vadd.f32 %v13503_v12, %v5894_v37  ;;  %v19952_v54 = vld [vmem:[#allocation134_spill] sm:$0xff]  ;;  %v19953_v14 = vld [vmem:[#allocation141_spill] sm:$0xff]  ;;  %v5877_v11 = vpop.f32.mrf.mxu1 }
 0x2dd   : > { %v5375_v39 = vadd.f32 %v19948_v26, %v4547_v23  ;;  %v19951_v60 = vld [vmem:[#allocation47_spill] sm:$0xff]  ;;  %v16968_v21 = vadd.f32 %v19952_v54, %v5374_v15  ;;  %v16971_v43 = vadd.f32 %v19953_v14, %v5372_v35  ;;  %v19954_v23 = vld [vmem:[#allocation50_spill] sm:$0xff]  ;;  %v19955_v5 = vld [vmem:[#allocation188_spill] sm:$0xff]  ;;  %v6519_v40 = vpop.f32.mrf.mxu0 }
 0x2de   : > { %v5378_v45 = vadd.f32 %v19951_v60, %v4550_v44  ;;  %v5377_v57 = vadd.f32 %v19955_v5, %v4549_v51  ;;  %v16980_v17 = vld [vmem:[%s19299_s3] ss:$0 sm:$0xff]  ;;  %v19956_v44 = vld [vmem:[#allocation51_spill] sm:$0xff]  ;;  %v6707_v30 = vmul.f32 %v16960_v50, %v6664_v33  ;;  %v6662_v63 = vadd.f32 %v6519_v40, %v5892_v24  ;;  %v19958_v55 = vld [vmem:[#allocation109_spill] sm:$0xff] }
 0x2df   : > { %v16974_v31 = vadd.f32 %v19954_v23, %v5375_v39  ;;  %v16983_v37 = vadd.f32 %v19956_v44, %v5373_v49  ;;  %v19957_v42 = vld [vmem:[#allocation111_spill] sm:$0xff]  ;;  %v19959_v15 = vld [vmem:[#allocation116_spill] sm:$0xff]  ;;  %v19960_v51 = vld [vmem:[#allocation114_spill] sm:$0xff]  ;;  %v13504_v25 = vpop.f32.mrf.mxu0  ;;  %v17021_v44 = vadd.f32 %v16837_v53, %v16801_v56 }
 0x2e0   : > { %v16986_v32 = vadd.f32 %v19957_v42, %v5378_v45  ;;  %v16991_v62 = vadd.f32 %v19959_v15, %v19958_v55  ;;  %v19961_v28 = vld [vmem:[#allocation189_spill] sm:$0xff]  ;;  %v19962_v26 = vld [vmem:[#allocation8_spill] sm:$0xff]  ;;  %v19965_v60 = vld [vmem:[#allocation7_spill] sm:$0xff]  ;;  %v6750_v24 = vadd.f32 %v16980_v17, %v6707_v30  ;;  %v6705_v33 = vmul.f32 %v16960_v50, %v6662_v63  ;;  %v13496_v42 = vpop.f32.mrf.mxu1 }
 0x2e1   : > { %v16995_v35 = vadd.f32 %v19961_v28, %v19960_v51  ;;  %v16998_v39 = vadd.f32 %v19962_v26, %v5377_v57  ;;  %v19963_v12 = vld [vmem:[#allocation12_spill] sm:$0xff]  ;;  %v19964_v49 = vld [vmem:[#allocation5_spill] sm:$0xff]  ;;  %v6665_v54 = vadd.f32 %v13504_v25, %v5895_v36  ;;  %v19966_v14 = vld [vmem:[#allocation6_spill] sm:$0xff]  ;;  %v6522_v30 = vpop.f32.mrf.mxu0 }
 0x2e2   : > { %v5381_v16 = vadd.f32 %v19963_v12, %v16881_v59  ;;  %v17004_v45 = vadd.f32 %v19965_v60, %v19964_v49  ;;  %v19967_v23 = vld [vmem:[#allocation9_spill] sm:$0xff]  ;;  %v19968_v57 = vld [vmem:[#allocation10_spill] sm:$0xff]  ;;  %vm6786_vm13 = vcmp.ge.f32.partialorder %v6750_v24, 0.0  ;;  %v6822_v63 = vmul.f32 0.01, %v6750_v24  ;;  %v19970_v51 = vld [vmem:[#allocation11_spill] sm:$0xff] }
 0x2e3   : > { %v17010_v5 = vadd.f32 %v19967_v23, %v19966_v14  ;;  %v17014_v40 = vadd.f32 %v16795_v27, %v19968_v57  ;;  %v6748_v36 = vadd.f32 %v16980_v17, %v6705_v33  ;;  %v6708_v55 = vmul.f32 %v16960_v50, %v6665_v54  ;;  %v19969_v15 = vld [vmem:[#allocation14_spill] sm:$0xff] }
 0x2e4   : > { %v17017_v59 = vadd.f32 %v16817_v6, %v5381_v16  ;;  %v5385_v27 = vadd.f32 %v16847_v20, %v16884_v3  ;;  %v17029_v6 = vadd.f32 %v16857_v9, %v19969_v15  ;;  %v17033_v56 = vadd.f32 %v16877_v4, %v19970_v51  ;;  %v5880_v9 = vpop.f32.mrf.mxu1  ;;  %v13507_v60 = vpop.f32.mrf.mxu0 }
 0x2e5   : > { %v6663_v53 = vadd.f32 %v6522_v30, %v16908_v2  ;;  %v6858_v28 = vsel %vm6786_vm13, %v6750_v24, %v6822_v63  ;;  %vm6784_vm0 = vcmp.ge.f32.partialorder %v6748_v36, 0.0  ;;  %v6820_v26 = vmul.f32 0.01, %v6748_v36 }
 0x2e6   : > { %v6751_v12 = vadd.f32 %v16980_v17, %v6708_v55  ;;  %v17038_v16 = vadd.f32 %v16905_v13, %v5385_v27  ;;  %v17041_v20 = vadd.f32 %v13495_v10, %v16871_v34  ;;  %v12747_v3 = vpack.c.bf16 %v6858_v28, %v6858_v28  ;;  %v7366_v28 = vld [vmem:[#allocation2] sm:$0xf] }
 0x2e7   : > { %v6706_v25 = vmul.f32 %v16960_v50, %v6663_v53  ;;  %v5389_v4 = vadd.f32 %v16923_v61, %v16891_v48  ;;  %v6856_v49 = vsel %vm6784_vm0, %v6748_v36, %v6820_v26  ;;  %v17047_v24 = vadd.f32 %v5877_v11, %v16887_v41  ;;  %v6535_v48 = vpop.f32.mrf.mxu0  ;;  %v7375_v11 = vld [vmem:[#allocation2 + $0xc] sm:$0xf] }
 0x2e8   : > { %vm6787_vm1 = vcmp.ge.f32.partialorder %v6751_v12, 0.0  ;;  %v6823_v2 = vmul.f32 0.01, %v6751_v12  ;;  %v7021_v33 = vshrl.u32 %v12747_v3, 16  ;;  %v12745_v13 = vpack.c.bf16 %v6856_v49, %v6856_v49 }
 0x2e9   : > { %v6749_v54 = vadd.f32 %v16980_v17, %v6706_v25  ;;  %v17051_v34 = vadd.f32 %v13496_v42, %v16899_v47  ;;  %v17053_v10 = vadd.f32 %v5880_v9, %v5389_v4  ;;  %v6668_v23 = vadd.f32 %v13507_v60, %v16911_v22  ;;  %v13508_v55 = vpop.f32.mrf.mxu0 }
 0x2ea   : > { %v6859_v14 = vsel %vm6787_vm1, %v6751_v12, %v6823_v2  ;;  %v7023_v61 = vrot.slane %v7021_v33, 7  ;;  %v7024_v57 = vshll.u32 %v12747_v3, 16  ;;  %v7004_v30 = vshrl.u32 %v12745_v13, 16  ;;  %v7379_v33 = vld [vmem:[#allocation2 + $0x14] sm:$0x1] }
 0x2eb   : > { %v12748_v63 = vpack.c.bf16 %v6859_v14, %v6859_v14  ;;  %vm6785_vm4 = vcmp.ge.f32.partialorder %v6749_v54, 0.0  ;;  %v6821_v47 = vmul.f32 0.01, %v6749_v54  ;;  %v6711_v42 = vmul.f32 %v16960_v50, %v6668_v23  ;;  %v6538_v2 = vpop.f32.mrf.mxu0 }
 0x2ec   : > { %v6666_v36 = vadd.f32 %v6535_v48, %v16915_v52  ;;  %v7026_v22 = vor.u32 %v7024_v57, %v7023_v61  ;;  %v7006_v27 = vrot.slane %v7004_v30, 7  ;;  %v7007_v15 = vshll.u32 %v12745_v13, 16 }
 0x2ed   : > { %v7029_v51 = vshrl.u32 %v12748_v63, 16  ;;  %v7027_v53 = vrot.slane %v7023_v61, 4  ;;  %v6857_v26 = vsel %vm6785_vm4, %v6749_v54, %v6821_v47  ;;  %v6754_v12 = vadd.f32 %v16980_v17, %v6711_v42 }
 0x2ee   : > { %v6709_v3 = vmul.f32 %v16960_v50, %v6666_v36  ;;  %v7376_v9 = vsel %vm17058_vm3, %v7026_v22, %v7375_v11  ;;  %v7009_v25 = vor.u32 %v7007_v15, %v7006_v27  ;;  %v7032_v49 = vshll.u32 %v12748_v63, 16 }
 0x2ef   : > { %v7031_v4 = vrot.slane %v7029_v51, 7  ;;  %7377 = vst [vmem:[#allocation2 + $0xc] sm:$0xf] %v7376_v9  ;;  %v12746_v13 = vpack.c.bf16 %v6857_v26, %v6857_v26  ;;  %vm6790_vm8 = vcmp.ge.f32.partialorder %v6754_v12, 0.0  ;;  %v6826_v54 = vmul.f32 0.01, %v6754_v12 }
 0x2f0   : > { %v6752_v14 = vadd.f32 %v16980_v17, %v6709_v3  ;;  %v7367_v23 = vsel %vm17058_vm3, %v7009_v25, %v7366_v28  ;;  %v6669_v57 = vadd.f32 %v13508_v55, %v16919_v38  ;;  %v19977_v47 = vmov 0   ;;  %v13511_v51 = vpop.f32.mrf.mxu0  ;;  %v7372_v3 = vld [vmem:[#allocation2 + $0x8] sm:$0x1] }
 0x2f1   : > { %v7034_v48 = vor.u32 %v7032_v49, %v7031_v4  ;;  %v7036_v61 = vrot.slane %v7031_v4, 4  ;;  %7368 = vst [vmem:[#allocation2] sm:$0xf] %v7367_v23  ;;  %v7012_v30 = vshrl.u32 %v12746_v13, 16  ;;  %v7015_v63 = vshll.u32 %v12746_v13, 16 }
 0x2f2   : > { %v6862_v11 = vsel %vm6790_vm8, %v6754_v12, %v6826_v54  ;;  %vm6788_vm9 = vcmp.ge.f32.partialorder %v6752_v14, 0.0  ;;  %7498 = vst.msk [vmem:[#allocation2] sm:$0xf] %vm304_vm10, %v19977_v47  ;;  %v6824_v15 = vmul.f32 0.01, %v6752_v14  ;;  %v6712_v55 = vmul.f32 %v16960_v50, %v6669_v57  ;;  %v6551_v4 = vpop.f32.mrf.mxu0 }
 0x2f3   : > { %v7035_v42 = vsel %vm17070_vm5, %v7027_v53, %v7034_v48  ;;  %v7380_v36 = vsel %vm17076_vm7, %v7036_v61, %v7379_v33  ;;  %v12751_v22 = vpack.c.bf16 %v6862_v11, %v6862_v11  ;;  %v7014_v38 = vrot.slane %v7012_v30, 7  ;;  %v7389_v61 = vld [vmem:[#allocation2 + $0x24] sm:$0xf] }
 0x2f4   : > { %7378 = vst.msk [vmem:[#allocation2 + $0x10] sm:$0xf] %vm304_vm10, %v7035_v42  ;;  %7381 = vst [vmem:[#allocation2 + $0x14] sm:$0x1] %v7380_v36  ;;  %v6667_v28 = vadd.f32 %v6538_v2, %v16926_v1  ;;  %v6672_v26 = vadd.f32 %v13511_v51, %v16932_v58  ;;  %v7010_v12 = vrot.slane %v7006_v27, 4  ;;  %v6860_v25 = vsel %vm6788_vm9, %v6752_v14, %v6824_v15  ;;  %v13512_v27 = vpop.f32.mrf.mxu0 }
 0x2f5   : > { %v7055_v9 = vshrl.u32 %v12751_v22, 16  ;;  %v7058_v53 = vshll.u32 %v12751_v22, 16  ;;  %v7017_v49 = vor.u32 %v7015_v63, %v7014_v38  ;;  %v7019_v33 = vrot.slane %v7014_v38, 4 }
 0x2f6   : > { %v12749_v13 = vpack.c.bf16 %v6860_v25, %v6860_v25  ;;  %v6755_v54 = vadd.f32 %v16980_v17, %v6712_v55  ;;  %v6710_v48 = vmul.f32 %v16960_v50, %v6667_v28  ;;  %v6715_v1 = vmul.f32 %v16960_v50, %v6672_v26  ;;  %v7382_v55 = vld [vmem:[#allocation2 + $0x18] sm:$0xf] }
 0x2f7   : > { %v17096_v23 = vrot.slane %v7055_v9, 7  ;;  %v6670_v58 = vadd.f32 %v6551_v4, %v16935_v0  ;;  %v7018_v2 = vsel %vm17070_vm5, %v7010_v12, %v7017_v49  ;;  %v7373_v14 = vsel %vm17076_vm7, %v7019_v33, %v7372_v3  ;;  %v6554_v0 = vpop.f32.mrf.mxu0 }
 0x2f8   : > { %v7038_v57 = vshrl.u32 %v12749_v13, 16  ;;  %v7041_v30 = vshll.u32 %v12749_v13, 16  ;;  %7369 = vst.msk [vmem:[#allocation2 + $0x4] sm:$0xf] %vm304_vm10, %v7018_v2  ;;  %7374 = vst [vmem:[#allocation2 + $0x8] sm:$0x1] %v7373_v14  ;;  %v6753_v22 = vadd.f32 %v16980_v17, %v6710_v48  ;;  %v6758_v15 = vadd.f32 %v16980_v17, %v6715_v1 }
 0x2f9   : > { %v7060_v63 = vor.u32 %v7058_v53, %v17096_v23  ;;  %v7061_v11 = vrot.slane %v17096_v23, 4  ;;  %vm6791_vm12 = vcmp.ge.f32.partialorder %v6755_v54, 0.0  ;;  %v6827_v42 = vmul.f32 0.01, %v6755_v54  ;;  %7499 = vst.msk [vmem:[#allocation2 + $0x4] sm:$0xf] %vm304_vm10, %v19977_v47 }
 0x2fa   : > { %7500 = vst.msk [vmem:[#allocation2 + $0x8] sm:$0x1] %vm307_vm11, %v19977_v47  ;;  %v17112_v36 = vrot.slane %v7038_v57, 7  ;;  %v6713_v51 = vmul.f32 %v16960_v50, %v6670_v58  ;;  %v6673_v26 = vadd.f32 %v13512_v27, %v16938_v46  ;;  %v6671_v12 = vadd.f32 %v6554_v0, %v16942_v7  ;;  %v13515_v7 = vpop.f32.mrf.mxu0  ;;  %v7393_v57 = vld [vmem:[#allocation2 + $0x2c] sm:$0x1] }
 0x2fb   : > { %v7390_v38 = vsel %vm17058_vm3, %v7060_v63, %v7389_v61  ;;  %v6863_v28 = vsel %vm6791_vm12, %v6755_v54, %v6827_v42  ;;  %vm6789_vm13 = vcmp.ge.f32.partialorder %v6753_v22, 0.0  ;;  %v6825_v25 = vmul.f32 0.01, %v6753_v22 }
 0x2fc   : > { %7391 = vst [vmem:[#allocation2 + $0x24] sm:$0xf] %v7390_v38  ;;  %v7043_v3 = vor.u32 %v7041_v30, %v17112_v36  ;;  %v7044_v9 = vrot.slane %v17112_v36, 4  ;;  %v12752_v53 = vpack.c.bf16 %v6863_v28, %v6863_v28  ;;  %vm6794_vm14 = vcmp.ge.f32.partialorder %v6758_v15, 0.0  ;;  %v6567_v61 = vpop.f32.mrf.mxu0 }
 0x2fd   : > { %v6830_v4 = vmul.f32 0.01, %v6758_v15  ;;  %v6756_v49 = vadd.f32 %v16980_v17, %v6713_v51  ;;  %v6716_v46 = vmul.f32 %v16960_v50, %v6673_v26  ;;  %v6861_v23 = vsel %vm6789_vm13, %v6753_v22, %v6825_v25 }
 0x2fe   : > { %v7383_v33 = vsel %vm17058_vm3, %v7043_v3, %v7382_v55  ;;  %v7063_v13 = vshrl.u32 %v12752_v53, 16  ;;  %v7066_v54 = vshll.u32 %v12752_v53, 16  ;;  %v12750_v27 = vpack.c.bf16 %v6861_v23, %v6861_v23  ;;  %v13516_v38 = vpop.f32.mrf.mxu0  ;;  %v7386_v55 = vld [vmem:[#allocation2 + $0x20] sm:$0x1] }
 0x2ff   : > { %7384 = vst [vmem:[#allocation2 + $0x18] sm:$0xf] %v7383_v33  ;;  %v6866_v48 = vsel %vm6794_vm14, %v6758_v15, %v6830_v4  ;;  %vm6792_vm15 = vcmp.ge.f32.partialorder %v6756_v49, 0.0  ;;  %v6828_v1 = vmul.f32 0.01, %v6756_v49  ;;  %v6759_v14 = vadd.f32 %v16980_v17, %v6716_v46 }
 0x300   : > { %v7065_v58 = vrot.slane %v7063_v13, 7  ;;  %v12755_v2 = vpack.c.bf16 %v6866_v48, %v6866_v48  ;;  %v6714_v63 = vmul.f32 %v16960_v50, %v6671_v12  ;;  %v6676_v42 = vadd.f32 %v13515_v7, %v16945_v19  ;;  %v7403_v19 = vld [vmem:[#allocation2 + $0x3c] sm:$0xf] }
 0x301   : > { %v6864_v30 = vsel %vm6792_vm15, %v6756_v49, %v6828_v1  ;;  %v6674_v0 = vadd.f32 %v6567_v61, %v16949_v29  ;;  %v7046_v22 = vshrl.u32 %v12750_v27, 16  ;;  %v7049_v15 = vshll.u32 %v12750_v27, 16 }
 0x302   : > { %v7068_v36 = vor.u32 %v7066_v54, %v7065_v58  ;;  %v7070_v51 = vrot.slane %v7065_v58, 4  ;;  %v7089_v28 = vshrl.u32 %v12755_v2, 16  ;;  %v7092_v26 = vshll.u32 %v12755_v2, 16  ;;  %v6570_v54 = vpop.f32.mrf.mxu0 }
 0x303   : > { %v12753_v3 = vpack.c.bf16 %v6864_v30, %v6864_v30  ;;  %vm6795_vm0 = vcmp.ge.f32.partialorder %v6759_v14, 0.0  ;;  %v7048_v25 = vrot.slane %v7046_v22, 7  ;;  %v6831_v4 = vmul.f32 0.01, %v6759_v14 }
 0x304   : > { %v7069_v53 = vsel %vm17070_vm5, %v7061_v11, %v7068_v36  ;;  %v7394_v12 = vsel %vm17076_vm7, %v7070_v51, %v7393_v57  ;;  %v7091_v29 = vrot.slane %v7089_v28, 7  ;;  %v6757_v13 = vadd.f32 %v16980_v17, %v6714_v63  ;;  %v7396_v57 = vld [vmem:[#allocation2 + $0x30] sm:$0xf]  ;;  %v13519_v51 = vpop.f32.mrf.mxu0 }
 0x305   : > { %7392 = vst.msk [vmem:[#allocation2 + $0x28] sm:$0xf] %vm304_vm10, %v7069_v53  ;;  %7395 = vst [vmem:[#allocation2 + $0x2c] sm:$0x1] %v7394_v12  ;;  %v7072_v49 = vshrl.u32 %v12753_v3, 16  ;;  %v7075_v33 = vshll.u32 %v12753_v3, 16  ;;  %v7051_v46 = vor.u32 %v7049_v15, %v7048_v25  ;;  %v6867_v23 = vsel %vm6795_vm0, %v6759_v14, %v6831_v4 }
 0x306   : > { %v7053_v7 = vrot.slane %v7048_v25, 4  ;;  %v6719_v11 = vmul.f32 %v16960_v50, %v6676_v42  ;;  %v7094_v48 = vor.u32 %v7092_v26, %v7091_v29  ;;  %v7095_v1 = vrot.slane %v7091_v29, 4  ;;  %v6583_v12 = vpop.f32.mrf.mxu0  ;;  %v7407_v25 = vld [vmem:[#allocation2 + $0x44] sm:$0x1] }
 0x307   : > { %v7074_v58 = vrot.slane %v7072_v49, 7  ;;  %v12756_v27 = vpack.c.bf16 %v6867_v23, %v6867_v23  ;;  %v7052_v2 = vsel %vm17070_vm5, %v7044_v9, %v7051_v46  ;;  %vm6793_vm1 = vcmp.ge.f32.partialorder %v6757_v13, 0.0 }
 0x308   : > { %v7387_v61 = vsel %vm17076_vm7, %v7053_v7, %v7386_v55  ;;  %v6829_v30 = vmul.f32 0.01, %v6757_v13  ;;  %7385 = vst.msk [vmem:[#allocation2 + $0x1c] sm:$0xf] %vm304_vm10, %v7052_v2  ;;  %v7404_v14 = vsel %vm17058_vm3, %v7094_v48, %v7403_v19  ;;  %v6762_v9 = vadd.f32 %v16980_v17, %v6719_v11  ;;  %v13520_v46 = vpop.f32.mrf.mxu0 }
 0x309   : > { %7388 = vst [vmem:[#allocation2 + $0x20] sm:$0x1] %v7387_v61  ;;  %v7077_v63 = vor.u32 %v7075_v33, %v7074_v58  ;;  %v7078_v42 = vrot.slane %v7074_v58, 4  ;;  %v7097_v36 = vshrl.u32 %v12756_v27, 16  ;;  %7405 = vst [vmem:[#allocation2 + $0x3c] sm:$0xf] %v7404_v14  ;;  %v6717_v55 = vmul.f32 %v16960_v50, %v6674_v0 }
 0x30a   : > { %v7100_v22 = vshll.u32 %v12756_v27, 16  ;;  %v6865_v15 = vsel %vm6793_vm1, %v6757_v13, %v6829_v30  ;;  %v6677_v53 = vadd.f32 %v13516_v38, %v16953_v18  ;;  %vm6798_vm4 = vcmp.ge.f32.partialorder %v6762_v9, 0.0 }
 0x30b   : > { %v7397_v28 = vsel %vm17058_vm3, %v7077_v63, %v7396_v57  ;;  %v7099_v26 = vrot.slane %v7097_v36, 7  ;;  %v12754_v3 = vpack.c.bf16 %v6865_v15, %v6865_v15  ;;  %v6834_v19 = vmul.f32 0.01, %v6762_v9  ;;  %v6586_v57 = vpop.f32.mrf.mxu0 }
 0x30c   : > { %7398 = vst [vmem:[#allocation2 + $0x30] sm:$0xf] %v7397_v28  ;;  %v6760_v4 = vadd.f32 %v16980_v17, %v6717_v55  ;;  %v6675_v29 = vadd.f32 %v6570_v54, %v16963_v8  ;;  %v6720_v11 = vmul.f32 %v16960_v50, %v6677_v53  ;;  %v7400_v8 = vld [vmem:[#allocation2 + $0x38] sm:$0x1]  ;;  %v6680_v61 = vadd.f32 %v13519_v51, %v16968_v21  ;;  %v7417_v21 = vld [vmem:[#allocation2 + $0x54] sm:$0xf] }
 0x30d   : > { %v7102_v49 = vor.u32 %v7100_v22, %v7099_v26  ;;  %v7104_v33 = vrot.slane %v7099_v26, 4  ;;  %v7080_v13 = vshrl.u32 %v12754_v3, 16  ;;  %v7083_v0 = vshll.u32 %v12754_v3, 16 }
 0x30e   : > { %v6870_v7 = vsel %vm6798_vm4, %v6762_v9, %v6834_v19  ;;  %vm6796_vm8 = vcmp.ge.f32.partialorder %v6760_v4, 0.0  ;;  %v6832_v23 = vmul.f32 0.01, %v6760_v4  ;;  %v6763_v27 = vadd.f32 %v16980_v17, %v6720_v11  ;;  %v7410_v11 = vld [vmem:[#allocation2 + $0x48] sm:$0xf] }
 0x30f   : > { %v7103_v18 = vsel %vm17070_vm5, %v7095_v1, %v7102_v49  ;;  %v7408_v38 = vsel %vm17076_vm7, %v7104_v33, %v7407_v25  ;;  %v7082_v48 = vrot.slane %v7080_v13, 7  ;;  %v12759_v58 = vpack.c.bf16 %v6870_v7, %v6870_v7  ;;  %v17168_v25 = vpop.f32.mrf.mxu0 }
 0x310   : > { %7406 = vst.msk [vmem:[#allocation2 + $0x40] sm:$0xf] %vm304_vm10, %v7103_v18  ;;  %7409 = vst [vmem:[#allocation2 + $0x44] sm:$0x1] %v7408_v38  ;;  %v6868_v54 = vsel %vm6796_vm8, %v6760_v4, %v6832_v23  ;;  %v6718_v2 = vmul.f32 %v16960_v50, %v6675_v29  ;;  %vm6799_vm9 = vcmp.ge.f32.partialorder %v6763_v27, 0.0  ;;  %v6723_v26 = vmul.f32 %v16960_v50, %v6680_v61 }
 0x311   : > { %v7085_v30 = vor.u32 %v7083_v0, %v7082_v48  ;;  %v7087_v14 = vrot.slane %v7082_v48, 4  ;;  %v7123_v1 = vshrl.u32 %v12759_v58, 16  ;;  %v7126_v63 = vshll.u32 %v12759_v58, 16  ;;  %v17173_v7 = vpop.f32.mrf.mxu0 }
 0x312   : > { %v12757_v36 = vpack.c.bf16 %v6868_v54, %v6868_v54  ;;  %v6835_v22 = vmul.f32 0.01, %v6763_v27  ;;  %v6761_v15 = vadd.f32 %v16980_v17, %v6718_v2  ;;  %v6766_v33 = vadd.f32 %v16980_v17, %v6723_v26 }
 0x313   : > { %v7086_v9 = vsel %vm17070_vm5, %v7078_v42, %v7085_v30  ;;  %v7401_v55 = vsel %vm17076_vm7, %v7087_v14, %v7400_v8  ;;  %v7125_v28 = vrot.slane %v7123_v1, 7  ;;  %v6678_v13 = vadd.f32 %v6583_v12, %v16971_v43 }
 0x314   : > { %7399 = vst.msk [vmem:[#allocation2 + $0x34] sm:$0xf] %vm304_vm10, %v7086_v9  ;;  %7402 = vst [vmem:[#allocation2 + $0x38] sm:$0x1] %v7401_v55  ;;  %v7106_v51 = vshrl.u32 %v12757_v36, 16  ;;  %v7109_v3 = vshll.u32 %v12757_v36, 16  ;;  %v6871_v53 = vsel %vm6799_vm9, %v6763_v27, %v6835_v22  ;;  %v6681_v0 = vadd.f32 %v13520_v46, %v16974_v31  ;;  %v13524_v27 = vpop.f32.mrf.mxu0 }
 0x315   : > { %vm6797_vm12 = vcmp.ge.f32.partialorder %v6761_v15, 0.0  ;;  %v7128_v19 = vor.u32 %v7126_v63, %v7125_v28  ;;  %v7129_v4 = vrot.slane %v7125_v28, 4  ;;  %v12760_v29 = vpack.c.bf16 %v6871_v53, %v6871_v53  ;;  %v7421_v46 = vld [vmem:[#allocation2 + $0x5c] sm:$0x1] }
 0x316   : > { %v6833_v42 = vmul.f32 0.01, %v6761_v15  ;;  %v7108_v49 = vrot.slane %v7106_v51, 7  ;;  %vm6802_vm13 = vcmp.ge.f32.partialorder %v6766_v33, 0.0  ;;  %v6838_v61 = vmul.f32 0.01, %v6766_v33  ;;  %v17183_v9 = vpop.f32.mrf.mxu0 }
 0x317   : > { %v7418_v23 = vsel %vm17058_vm3, %v7128_v19, %v7417_v21  ;;  %v7131_v18 = vshrl.u32 %v12760_v29, 16  ;;  %v7134_v38 = vshll.u32 %v12760_v29, 16  ;;  %v6721_v43 = vmul.f32 %v16960_v50, %v6678_v13 }
 0x318   : > { %v6869_v48 = vsel %vm6797_vm12, %v6761_v15, %v6833_v42  ;;  %7419 = vst [vmem:[#allocation2 + $0x54] sm:$0xf] %v7418_v23  ;;  %v7111_v58 = vor.u32 %v7109_v3, %v7108_v49  ;;  %v7112_v8 = vrot.slane %v7108_v49, 4  ;;  %v6724_v31 = vmul.f32 %v16960_v50, %v6681_v0  ;;  %v17193_v0 = vpop.f32.mrf.mxu0 }
 0x319   : > { %v12758_v54 = vpack.c.bf16 %v6869_v48, %v6869_v48  ;;  %v7133_v2 = vrot.slane %v7131_v18, 7  ;;  %v6679_v1 = vadd.f32 %v6586_v57, %v16983_v37  ;;  %v6874_v22 = vsel %vm6802_vm13, %v6766_v33, %v6838_v61  ;;  %v7414_v57 = vld [vmem:[#allocation2 + $0x50] sm:$0x1] }
 0x31a   : > { %v7411_v12 = vsel %vm17058_vm3, %v7111_v58, %v7410_v11  ;;  %v6764_v15 = vadd.f32 %v16980_v17, %v6721_v43  ;;  %v12763_v28 = vpack.c.bf16 %v6874_v22, %v6874_v22  ;;  %v6767_v26 = vadd.f32 %v16980_v17, %v6724_v31 }
 0x31b   : > { %v7114_v30 = vshrl.u32 %v12758_v54, 16  ;;  %v7117_v14 = vshll.u32 %v12758_v54, 16  ;;  %7412 = vst [vmem:[#allocation2 + $0x48] sm:$0xf] %v7411_v12  ;;  %v7136_v63 = vor.u32 %v7134_v38, %v7133_v2  ;;  %v7138_v36 = vrot.slane %v7133_v2, 4 }
 0x31c   : > { %v6722_v21 = vmul.f32 %v16960_v50, %v6679_v1  ;;  %vm6800_vm14 = vcmp.ge.f32.partialorder %v6764_v15, 0.0  ;;  %v6836_v3 = vmul.f32 0.01, %v6764_v15  ;;  %v7157_v29 = vshrl.u32 %v12763_v28, 16  ;;  %v7431_v38 = vld [vmem:[#allocation2 + $0x6c] sm:$0xf] }
 0x31d   : > { %v7116_v55 = vrot.slane %v7114_v30, 7  ;;  %v7137_v51 = vsel %vm17070_vm5, %v7129_v4, %v7136_v63  ;;  %v7422_v37 = vsel %vm17076_vm7, %v7138_v36, %v7421_v46  ;;  %v7160_v42 = vshll.u32 %v12763_v28, 16 }
 0x31e   : > { %7420 = vst.msk [vmem:[#allocation2 + $0x58] sm:$0xf] %vm304_vm10, %v7137_v51  ;;  %7423 = vst [vmem:[#allocation2 + $0x5c] sm:$0x1] %v7422_v37  ;;  %v6872_v49 = vsel %vm6800_vm14, %v6764_v15, %v6836_v3  ;;  %vm6803_vm15 = vcmp.ge.f32.partialorder %v6767_v26, 0.0  ;;  %v6765_v13 = vadd.f32 %v16980_v17, %v6722_v21  ;;  %v7159_v11 = vrot.slane %v7157_v29, 7 }
 0x31f   : > { %v7119_v53 = vor.u32 %v7117_v14, %v7116_v55  ;;  %v7121_v19 = vrot.slane %v7116_v55, 4  ;;  %v6839_v33 = vmul.f32 0.01, %v6767_v26  ;;  %v12761_v18 = vpack.c.bf16 %v6872_v49, %v6872_v49 }
 0x320   : > { %vm6801_vm0 = vcmp.ge.f32.partialorder %v6765_v13, 0.0  ;;  %v6837_v58 = vmul.f32 0.01, %v6765_v13  ;;  %v6684_v54 = vadd.f32 %v17168_v25, %v16986_v32  ;;  %v7162_v2 = vor.u32 %v7160_v42, %v7159_v11  ;;  %v7424_v32 = vld [vmem:[#allocation2 + $0x60] sm:$0xf] }
 0x321   : > { %v7120_v4 = vsel %vm17070_vm5, %v7112_v8, %v7119_v53  ;;  %v7415_v23 = vsel %vm17076_vm7, %v7121_v19, %v7414_v57  ;;  %v6875_v48 = vsel %vm6803_vm15, %v6767_v26, %v6839_v33  ;;  %v7163_v61 = vrot.slane %v7159_v11, 4  ;;  %v6615_v8 = vpop.f32.mrf.mxu0  ;;  %v7428_v19 = vld [vmem:[#allocation2 + $0x68] sm:$0x1] }
 0x322   : > { %7413 = vst.msk [vmem:[#allocation2 + $0x4c] sm:$0xf] %vm304_vm10, %v7120_v4  ;;  %7416 = vst [vmem:[#allocation2 + $0x50] sm:$0x1] %v7415_v23  ;;  %v7140_v43 = vshrl.u32 %v12761_v18, 16  ;;  %v7143_v31 = vshll.u32 %v12761_v18, 16  ;;  %v12764_v12 = vpack.c.bf16 %v6875_v48, %v6875_v48  ;;  %v6873_v46 = vsel %vm6801_vm0, %v6765_v13, %v6837_v58 }
 0x323   : > { %v6727_v30 = vmul.f32 %v16960_v50, %v6684_v54  ;;  %v6682_v14 = vadd.f32 %v17173_v7, %v16991_v62  ;;  %v7432_v1 = vsel %vm17058_vm3, %v7162_v2, %v7431_v38  ;;  %v12762_v36 = vpack.c.bf16 %v6873_v46, %v6873_v46  ;;  %v13528_v62 = vpop.f32.mrf.mxu0 }
 0x324   : > { %v7142_v63 = vrot.slane %v7140_v43, 7  ;;  %v6685_v22 = vadd.f32 %v13524_v27, %v16995_v35  ;;  %7433 = vst [vmem:[#allocation2 + $0x6c] sm:$0xf] %v7432_v1  ;;  %v7165_v25 = vshrl.u32 %v12764_v12, 16  ;;  %v7168_v15 = vshll.u32 %v12764_v12, 16 }
 0x325   : > { %v6770_v55 = vadd.f32 %v16980_v17, %v6727_v30  ;;  %v6725_v28 = vmul.f32 %v16960_v50, %v6682_v14  ;;  %v7148_v51 = vshrl.u32 %v12762_v36, 16  ;;  %v7151_v37 = vshll.u32 %v12762_v36, 16  ;;  %v7435_v27 = vld [vmem:[#allocation2 + $0x74] sm:$0x1]  ;;  %v17216_v38 = vpop.f32.mrf.mxu0 }
 0x326   : > { %v7145_v26 = vor.u32 %v7143_v31, %v7142_v63  ;;  %v7146_v21 = vrot.slane %v7142_v63, 4  ;;  %v7167_v7 = vrot.slane %v7165_v25, 7  ;;  %v6728_v29 = vmul.f32 %v16960_v50, %v6685_v22  ;;  %v7445_v22 = vld [vmem:[#allocation2 + $0x84] sm:$0xf] }
 0x327   : > { %vm6806_vm1 = vcmp.ge.f32.partialorder %v6770_v55, 0.0  ;;  %v6842_v57 = vmul.f32 0.01, %v6770_v55  ;;  %v6768_v3 = vadd.f32 %v16980_v17, %v6725_v28  ;;  %v7150_v53 = vrot.slane %v7148_v51, 7  ;;  %v17235_v36 = vpop.f32.mrf.mxu0 }
 0x328   : > { %v7425_v35 = vsel %vm17058_vm3, %v7145_v26, %v7424_v32  ;;  %v6683_v42 = vadd.f32 %v17183_v9, %v16998_v39  ;;  %v7170_v49 = vor.u32 %v7168_v15, %v7167_v7  ;;  %v7172_v33 = vrot.slane %v7167_v7, 4 }
 0x329   : > { %7426 = vst [vmem:[#allocation2 + $0x60] sm:$0xf] %v7425_v35  ;;  %v6878_v13 = vsel %vm6806_vm1, %v6770_v55, %v6842_v57  ;;  %vm6804_vm4 = vcmp.ge.f32.partialorder %v6768_v3, 0.0  ;;  %v7153_v4 = vor.u32 %v7151_v37, %v7150_v53  ;;  %v7155_v23 = vrot.slane %v7150_v53, 4 }
 0x32a   : > { %v12767_v11 = vpack.c.bf16 %v6878_v13, %v6878_v13  ;;  %v6840_v18 = vmul.f32 0.01, %v6768_v3  ;;  %v7171_v48 = vsel %vm17070_vm5, %v7163_v61, %v7170_v49  ;;  %v7436_v58 = vsel %vm17076_vm7, %v7172_v33, %v7435_v27 }
 0x32b   : > { %v6771_v54 = vadd.f32 %v16980_v17, %v6728_v29  ;;  %v6726_v39 = vmul.f32 %v16960_v50, %v6683_v42  ;;  %7434 = vst.msk [vmem:[#allocation2 + $0x70] sm:$0xf] %vm304_vm10, %v7171_v48  ;;  %7437 = vst [vmem:[#allocation2 + $0x74] sm:$0x1] %v7436_v58  ;;  %v7154_v9 = vsel %vm17070_vm5, %v7146_v21, %v7153_v4  ;;  %v7449_v4 = vld [vmem:[#allocation2 + $0x8c] sm:$0x1] }
 0x32c   : > { %v7429_v2 = vsel %vm17076_vm7, %v7155_v23, %v7428_v19  ;;  %v7191_v43 = vshrl.u32 %v12767_v11, 16  ;;  %v7194_v31 = vshll.u32 %v12767_v11, 16  ;;  %7427 = vst.msk [vmem:[#allocation2 + $0x64] sm:$0xf] %vm304_vm10, %v7154_v9  ;;  %v6876_v61 = vsel %vm6804_vm4, %v6768_v3, %v6840_v18  ;;  %v6631_v3 = vpop.f32.mrf.mxu0 }
 0x32d   : > { %7430 = vst [vmem:[#allocation2 + $0x68] sm:$0x1] %v7429_v2  ;;  %vm6807_vm8 = vcmp.ge.f32.partialorder %v6771_v54, 0.0  ;;  %v6843_v12 = vmul.f32 0.01, %v6771_v54  ;;  %v6769_v46 = vadd.f32 %v16980_v17, %v6726_v39  ;;  %v12765_v14 = vpack.c.bf16 %v6876_v61, %v6876_v61 }
 0x32e   : > { %v7193_v30 = vrot.slane %v7191_v43, 7  ;;  %v6688_v1 = vadd.f32 %v17193_v0, %v17004_v45  ;;  %v6686_v63 = vadd.f32 %v6615_v8, %v17010_v5  ;;  %v6689_v15 = vadd.f32 %v13528_v62, %v17014_v40  ;;  %v7438_v40 = vld [vmem:[#allocation2 + $0x78] sm:$0xf]  ;;  %v13532_v48 = vpop.f32.mrf.mxu0  ;;  %v7442_v39 = vld [vmem:[#allocation2 + $0x80] sm:$0x1] }
 0x32f   : > { %v6879_v32 = vsel %vm6807_vm8, %v6771_v54, %v6843_v12  ;;  %vm6805_vm9 = vcmp.ge.f32.partialorder %v6769_v46, 0.0  ;;  %v6841_v25 = vmul.f32 0.01, %v6769_v46  ;;  %v7174_v26 = vshrl.u32 %v12765_v14, 16 }
 0x330   : > { %v7196_v55 = vor.u32 %v7194_v31, %v7193_v30  ;;  %v7197_v28 = vrot.slane %v7193_v30, 4  ;;  %v7177_v21 = vshll.u32 %v12765_v14, 16  ;;  %v12768_v51 = vpack.c.bf16 %v6879_v32, %v6879_v32 }
 0x331   : > { %v6877_v37 = vsel %vm6805_vm9, %v6769_v46, %v6841_v25  ;;  %v6731_v7 = vmul.f32 %v16960_v50, %v6688_v1  ;;  %v6729_v45 = vmul.f32 %v16960_v50, %v6686_v63  ;;  %v7176_v0 = vrot.slane %v7174_v26, 7  ;;  %v6634_v63 = vpop.f32.mrf.mxu0 }
 0x332   : > { %v7446_v5 = vsel %vm17058_vm3, %v7196_v55, %v7445_v22  ;;  %v12766_v8 = vpack.c.bf16 %v6877_v37, %v6877_v37  ;;  %v6732_v57 = vmul.f32 %v16960_v50, %v6689_v15  ;;  %v7199_v62 = vshrl.u32 %v12768_v51, 16  ;;  %v17264_v15 = vld [vmem:[%s19298_s2] ss:$0 sm:$0xff]  ;;  %v7459_v37 = vld [vmem:[#allocation2 + $0x9c] sm:$0xf] }
 0x333   : > { %7447 = vst [vmem:[#allocation2 + $0x84] sm:$0xf] %v7446_v5  ;;  %v7202_v35 = vshll.u32 %v12768_v51, 16  ;;  %v6774_v27 = vadd.f32 %v16980_v17, %v6731_v7  ;;  %v6772_v53 = vadd.f32 %v16980_v17, %v6729_v45  ;;  %v7179_v19 = vor.u32 %v7177_v21, %v7176_v0  ;;  %v17277_v5 = vld [vmem:[%s19299_s3] ss:$0 sm:$0xff] }
 0x334   : > { %v7180_v29 = vrot.slane %v7176_v0, 4  ;;  %v7182_v42 = vshrl.u32 %v12766_v8, 16  ;;  %v7185_v49 = vshll.u32 %v12766_v8, 16  ;;  %v7201_v33 = vrot.slane %v7199_v62, 7 }
 0x335   : > { %vm6810_vm12 = vcmp.ge.f32.partialorder %v6774_v27, 0.0  ;;  %v6846_v13 = vmul.f32 0.01, %v6774_v27  ;;  %vm6808_vm13 = vcmp.ge.f32.partialorder %v6772_v53, 0.0  ;;  %v7439_v50 = vsel %vm17058_vm3, %v7179_v19, %v7438_v40 }
 0x336   : > { %v7184_v23 = vrot.slane %v7182_v42, 7  ;;  %v6844_v11 = vmul.f32 0.01, %v6772_v53  ;;  %v6775_v18 = vadd.f32 %v16980_v17, %v6732_v57  ;;  %7440 = vst [vmem:[#allocation2 + $0x78] sm:$0xf] %v7439_v50  ;;  %v7204_v58 = vor.u32 %v7202_v35, %v7201_v33 }
 0x337   : > { %v7206_v54 = vrot.slane %v7201_v33, 4  ;;  %v6882_v9 = vsel %vm6810_vm12, %v6774_v27, %v6846_v13  ;;  %v6687_v2 = vadd.f32 %v17216_v38, %v17017_v59  ;;  %v6692_v26 = vadd.f32 %v17235_v36, %v17021_v44  ;;  %v7452_v36 = vld [vmem:[#allocation2 + $0x90] sm:$0xf] }
 0x338   : > { %v7187_v43 = vor.u32 %v7185_v49, %v7184_v23  ;;  %v7189_v31 = vrot.slane %v7184_v23, 4  ;;  %v12771_v61 = vpack.c.bf16 %v6882_v9, %v6882_v9  ;;  %v6880_v12 = vsel %vm6808_vm13, %v6772_v53, %v6844_v11  ;;  %v7463_v23 = vld [vmem:[#allocation2 + $0xa4] sm:$0x1] }
 0x339   : > { %v7205_v46 = vsel %vm17070_vm5, %v7197_v28, %v7204_v58  ;;  %v7450_v17 = vsel %vm17076_vm7, %v7206_v54, %v7449_v4  ;;  %v12769_v30 = vpack.c.bf16 %v6880_v12, %v6880_v12  ;;  %vm6811_vm14 = vcmp.ge.f32.partialorder %v6775_v18, 0.0 }
 0x33a   : > { %7448 = vst.msk [vmem:[#allocation2 + $0x88] sm:$0xf] %vm304_vm10, %v7205_v46  ;;  %7451 = vst [vmem:[#allocation2 + $0x8c] sm:$0x1] %v7450_v17  ;;  %v7188_v14 = vsel %vm17070_vm5, %v7180_v29, %v7187_v43  ;;  %v7443_v59 = vsel %vm17076_vm7, %v7189_v31, %v7442_v39  ;;  %v7225_v38 = vshrl.u32 %v12771_v61, 16  ;;  %v7228_v1 = vshll.u32 %v12771_v61, 16 }
 0x33b   : > { %7441 = vst.msk [vmem:[#allocation2 + $0x7c] sm:$0xf] %vm304_vm10, %v7188_v14  ;;  %7444 = vst [vmem:[#allocation2 + $0x80] sm:$0x1] %v7443_v59  ;;  %v7208_v22 = vshrl.u32 %v12769_v30, 16  ;;  %v7211_v32 = vshll.u32 %v12769_v30, 16  ;;  %v6730_v55 = vmul.f32 %v17264_v15, %v6687_v2  ;;  %v6690_v21 = vadd.f32 %v6631_v3, %v17029_v6 }
 0x33c   : > { %v6847_v25 = vmul.f32 0.01, %v6775_v18  ;;  %v7227_v28 = vrot.slane %v7225_v38, 7  ;;  %v6693_v51 = vadd.f32 %v13532_v48, %v17033_v56  ;;  %v6691_v8 = vadd.f32 %v6634_v63, %v17038_v16  ;;  %v13535_v16 = vpop.f32.mrf.mxu0 }
 0x33d   : > { %v17271_v7 = vrot.slane %v7208_v22, 7  ;;  %v6773_v0 = vadd.f32 %v17277_v5, %v6730_v55  ;;  %v6735_v56 = vmul.f32 %v17264_v15, %v6692_v26  ;;  %v6733_v49 = vmul.f32 %v17264_v15, %v6690_v21 }
 0x33e   : > { %v6883_v45 = vsel %vm6811_vm14, %v6775_v18, %v6847_v25  ;;  %v7230_v57 = vor.u32 %v7228_v1, %v7227_v28  ;;  %v7231_v44 = vrot.slane %v7227_v28, 4  ;;  %v6736_v33 = vmul.f32 %v17264_v15, %v6693_v51  ;;  %v6647_v1 = vpop.f32.mrf.mxu0 }
 0x33f   : > { %v12772_v6 = vpack.c.bf16 %v6883_v45, %v6883_v45  ;;  %v7213_v3 = vor.u32 %v7211_v32, %v17271_v7  ;;  %v7214_v40 = vrot.slane %v17271_v7, 4  ;;  %vm6809_vm15 = vcmp.ge.f32.partialorder %v6773_v0, 0.0  ;;  %v7473_v45 = vld [vmem:[#allocation2 + $0xb4] sm:$0xf] }
 0x340   : > { %v6845_v62 = vmul.f32 0.01, %v6773_v0  ;;  %v7460_v35 = vsel %vm17058_vm3, %v7230_v57, %v7459_v37  ;;  %v6778_v19 = vadd.f32 %v17277_v5, %v6735_v56  ;;  %v6776_v11 = vadd.f32 %v17277_v5, %v6733_v49  ;;  %v13656_v49 = vld [vmem:[%s19300_s4 + $0x40] sm:$0xff]  }
 0x341   : > { %v7233_v27 = vshrl.u32 %v12772_v6, 16  ;;  %v7236_v53 = vshll.u32 %v12772_v6, 16  ;;  %7461 = vst [vmem:[#allocation2 + $0x9c] sm:$0xf] %v7460_v35  ;;  %v7453_v29 = vsel %vm17058_vm3, %v7213_v3, %v7452_v36  ;;  %v6779_v18 = vadd.f32 %v17277_v5, %v6736_v33  ;;  %v13536_v36 = vpop.f32.mrf.mxu0 }
 0x342   : > { %v6881_v42 = vsel %vm6809_vm15, %v6773_v0, %v6845_v62  ;;  %7454 = vst [vmem:[#allocation2 + $0x90] sm:$0xf] %v7453_v29  ;;  %vm6814_vm0 = vcmp.ge.f32.partialorder %v6778_v19, 0.0  ;;  %v6850_v4 = vmul.f32 0.01, %v6778_v19  ;;  %v6734_v48 = vmul.f32 %v17264_v15, %v6691_v8 }
 0x343   : > { %v7235_v13 = vrot.slane %v7233_v27, 7  ;;  %v12770_v50 = vpack.c.bf16 %v6881_v42, %v6881_v42  ;;  %v6696_v58 = vadd.f32 %v13535_v16, %v17041_v20  ;;  %vm6812_vm1 = vcmp.ge.f32.partialorder %v6776_v11, 0.0  ;;  %v7456_v20 = vld [vmem:[#allocation2 + $0x98] sm:$0x1] }
 0x344   : > { %v6886_v43 = vsel %vm6814_vm0, %v6778_v19, %v6850_v4  ;;  %v6848_v31 = vmul.f32 0.01, %v6776_v11  ;;  %vm6815_vm4 = vcmp.ge.f32.partialorder %v6779_v18, 0.0  ;;  %v6851_v14 = vmul.f32 0.01, %v6779_v18 }
 0x345   : > { %v7238_v54 = vor.u32 %v7236_v53, %v7235_v13  ;;  %v7240_v39 = vrot.slane %v7235_v13, 4  ;;  %v7216_v9 = vshrl.u32 %v12770_v50, 16  ;;  %v7219_v2 = vshll.u32 %v12770_v50, 16  ;;  %v7466_v19 = vld [vmem:[#allocation2 + $0xa8] sm:$0xf] }
 0x346   : > { %v12775_v17 = vpack.c.bf16 %v6886_v43, %v6886_v43  ;;  %v6884_v30 = vsel %vm6812_vm1, %v6776_v11, %v6848_v31  ;;  %v6777_v59 = vadd.f32 %v17277_v5, %v6734_v48  ;;  %v6739_v38 = vmul.f32 %v17264_v15, %v6696_v58  ;;  %v7477_v50 = vld [vmem:[#allocation2 + $0xbc] sm:$0x1]  ;;  %v6650_v11 = vpop.f32.mrf.mxu0  ;;  %v7470_v31 = vld [vmem:[#allocation2 + $0xb0] sm:$0x1] }
 0x347   : > { %v7239_v61 = vsel %vm17070_vm5, %v7231_v44, %v7238_v54  ;;  %v7464_v12 = vsel %vm17076_vm7, %v7240_v39, %v7463_v23  ;;  %v7218_v46 = vrot.slane %v7216_v9, 7  ;;  %vm8022_vm8 = vcmask 523264  }
 0x348   : > { %7462 = vst.msk [vmem:[#allocation2 + $0xa0] sm:$0xf] %vm304_vm10, %v7239_v61  ;;  %7465 = vst [vmem:[#allocation2 + $0xa4] sm:$0x1] %v7464_v12  ;;  %v7259_v32 = vshrl.u32 %v12775_v17, 16  ;;  %v7262_v25 = vshll.u32 %v12775_v17, 16  ;;  %v12773_v55 = vpack.c.bf16 %v6884_v30, %v6884_v30  ;;  %v6887_v28 = vsel %vm6815_vm4, %v6779_v18, %v6851_v14  ;;  %13025 = vmatprep.mubr.msk.bf16.mxu0 %vm8022_vm8, %v13656_v49 }
 0x349   : > { %v7221_v63 = vor.u32 %v7219_v2, %v7218_v46  ;;  %v7223_v22 = vrot.slane %v7218_v46, 4  ;;  %vm6813_vm9 = vcmp.ge.f32.partialorder %v6777_v59, 0.0  ;;  %v6849_v26 = vmul.f32 0.01, %v6777_v59  ;;  %v8396_v46 = vld [vmem:[#allocation2 + $0x54] sm:$0xe] }
 0x34a   : > { %v7261_v37 = vrot.slane %v7259_v32, 7  ;;  %v12776_v7 = vpack.c.bf16 %v6887_v28, %v6887_v28  ;;  %v7242_v0 = vshrl.u32 %v12773_v55, 16  ;;  %v7245_v8 = vshll.u32 %v12773_v55, 16  ;;  %v13657_v28 = vld [vmem:[%s19300_s4 + $0x20] sm:$0xff]  }
 0x34b   : > { %v7222_v21 = vsel %vm17070_vm5, %v7214_v40, %v7221_v63  ;;  %v7457_v51 = vsel %vm17076_vm7, %v7223_v22, %v7456_v20  ;;  %v6885_v57 = vsel %vm6813_vm9, %v6777_v59, %v6849_v26  ;;  %v6782_v44 = vadd.f32 %v17277_v5, %v6739_v38  ;;  %v7487_v59 = vld [vmem:[#allocation2 + $0xcc] sm:$0xf]  ;;  %12977 = vmatprep.mubr.msk.bf16.mxu1 %vm8022_vm8, %v13657_v28 }
 0x34c   : > { %7455 = vst.msk [vmem:[#allocation2 + $0x94] sm:$0xf] %vm304_vm10, %v7222_v21  ;;  %7458 = vst [vmem:[#allocation2 + $0x98] sm:$0x1] %v7457_v51  ;;  %v7264_v6 = vor.u32 %v7262_v25, %v7261_v37  ;;  %v7265_v56 = vrot.slane %v7261_v37, 4  ;;  %v7267_v3 = vshrl.u32 %v12776_v7, 16  ;;  %v12774_v35 = vpack.c.bf16 %v6885_v57, %v6885_v57 }
 0x34d   : > { %v7270_v62 = vshll.u32 %v12776_v7, 16  ;;  %v7244_v40 = vrot.slane %v7242_v0, 7  ;;  %vm6818_vm12 = vcmp.ge.f32.partialorder %v6782_v44, 0.0  ;;  %v6854_v27 = vmul.f32 0.01, %v6782_v44 }
 0x34e   : > { %v7474_v53 = vsel %vm17058_vm3, %v7264_v6, %v7473_v45  ;;  %v7269_v16 = vrot.slane %v7267_v3, 7  ;;  %v6694_v29 = vadd.f32 %v6647_v1, %v17047_v24  ;;  %v6697_v42 = vadd.f32 %v13536_v36, %v17051_v34  ;;  %v17337_v25 = vld [vmem:[#allocation2 + $0x58] sm:$0xf] }
 0x34f   : > { %7475 = vst [vmem:[#allocation2 + $0xb4] sm:$0xf] %v7474_v53  ;;  %v7247_v33 = vor.u32 %v7245_v8, %v7244_v40  ;;  %v7248_v13 = vrot.slane %v7244_v40, 4  ;;  %v7250_v4 = vshrl.u32 %v12774_v35, 16  ;;  %v7253_v23 = vshll.u32 %v12774_v35, 16 }
 0x350   : > { %v7272_v18 = vor.u32 %v7270_v62, %v7269_v16  ;;  %v7274_v48 = vrot.slane %v7269_v16, 4  ;;  %v6890_v58 = vsel %vm6818_vm12, %v6782_v44, %v6854_v27  ;;  %v6737_v54 = vmul.f32 %v17264_v15, %v6694_v29  ;;  %v17346_v8 = vld [vmem:[#allocation2 + $0x5c] sm:$0x1] }
 0x351   : > { %v7467_v24 = vsel %vm17058_vm3, %v7247_v33, %v7466_v19  ;;  %v7252_v34 = vrot.slane %v7250_v4, 7  ;;  %v12779_v39 = vpack.c.bf16 %v6890_v58, %v6890_v58  ;;  %v6740_v9 = vmul.f32 %v17264_v15, %v6697_v42 }
 0x352   : > { %7468 = vst [vmem:[#allocation2 + $0xa8] sm:$0xf] %v7467_v24  ;;  %v7273_v2 = vsel %vm17070_vm5, %v7265_v56, %v7272_v18  ;;  %v7478_v43 = vsel %vm17076_vm7, %v7274_v48, %v7477_v50  ;;  %v6780_v61 = vadd.f32 %v17277_v5, %v6737_v54  ;;  %v6695_v12 = vadd.f32 %v6650_v11, %v17053_v10  ;;  %v7480_v50 = vld [vmem:[#allocation2 + $0xc0] sm:$0xf] }
 0x353   : > { %7476 = vst.msk [vmem:[#allocation2 + $0xb8] sm:$0xf] %vm304_vm10, %v7273_v2  ;;  %7479 = vst [vmem:[#allocation2 + $0xbc] sm:$0x1] %v7478_v43  ;;  %v7255_v17 = vor.u32 %v7253_v23, %v7252_v34  ;;  %v7257_v20 = vrot.slane %v7252_v34, 4  ;;  %v7293_v30 = vshrl.u32 %v12779_v39, 16  ;;  %v6783_v1 = vadd.f32 %v17277_v5, %v6740_v9 }
 0x354   : > { %v7296_v14 = vshll.u32 %v12779_v39, 16  ;;  %vm6816_vm13 = vcmp.ge.f32.partialorder %v6780_v61, 0.0  ;;  %v6852_v38 = vmul.f32 0.01, %v6780_v61  ;;  %v6738_v63 = vmul.f32 %v17264_v15, %v6695_v12  ;;  %v7491_v39 = vld [vmem:[#allocation2 + $0xd4] sm:$0x1] }
 0x355   : > { %v7256_v22 = vsel %vm17070_vm5, %v7248_v13, %v7255_v17  ;;  %v7471_v10 = vsel %vm17076_vm7, %v7257_v20, %v7470_v31  ;;  %v17335_v32 = vrot.slane %v7293_v30, 7  ;;  %v12485_v55 = vrot.slane %v8396_v46, 9 }
 0x356   : > { %7469 = vst.msk [vmem:[#allocation2 + $0xac] sm:$0xf] %vm304_vm10, %v7256_v22  ;;  %7472 = vst [vmem:[#allocation2 + $0xb0] sm:$0x1] %v7471_v10  ;;  %v6888_v26 = vsel %vm6816_vm13, %v6780_v61, %v6852_v38  ;;  %vm6819_vm14 = vcmp.ge.f32.partialorder %v6783_v1, 0.0  ;;  %v6781_v21 = vadd.f32 %v17277_v5, %v6738_v63  ;;  %v8497_v36 = vrot.slane %v17337_v25, 5 }
 0x357   : > { %v6855_v15 = vmul.f32 0.01, %v6783_v1  ;;  %v8404_v51 = vld [vmem:[#allocation2 + $0xb4] sm:$0xe]  ;;  %v7298_v37 = vor.u32 %v7296_v14, %v17335_v32  ;;  %v7299_v7 = vrot.slane %v17335_v32, 4  ;;  %v12777_v45 = vpack.c.bf16 %v6888_v26, %v6888_v26 }
 0x358   : > { %v12493_v0 = vrot.slane %v8404_v51, 9  ;;  %vm6817_vm15 = vcmp.ge.f32.partialorder %v6781_v21, 0.0  ;;  %v6853_v44 = vmul.f32 0.01, %v6781_v21  ;;  %v8498_v19 = vsel %vm13927_vm2, %v12485_v55, %v8497_v36  ;;  %v7535_v30 = vld [vmem:[#allocation2 + $0xb4] sm:$0xf] }
 0x359   : > { %v6891_v57 = vsel %vm6819_vm14, %v6783_v1, %v6855_v15  ;;  %v7488_v6 = vsel %vm17058_vm3, %v7298_v37, %v7487_v59  ;;  %v7276_v5 = vshrl.u32 %v12777_v45, 16  ;;  %v7279_v56 = vshll.u32 %v12777_v45, 16  ;;  %v8403_v62 = vld [vmem:[#allocation2 + $0xa8] sm:$0xe]  ;;  %v7484_v14 = vld [vmem:[#allocation2 + $0xc8] sm:$0x1] }
 0x35a   : > { %v12780_v3 = vpack.c.bf16 %v6891_v57, %v6891_v57  ;;  %7489 = vst [vmem:[#allocation2 + $0xcc] sm:$0xf] %v7488_v6  ;;  %v6889_v40 = vsel %vm6817_vm15, %v6781_v21, %v6853_v44  ;;  %v17352_v35 = vld [vmem:[#allocation2 + $0xb8] sm:$0xf]  ;;  %v17354_v27 = vld [vmem:[#allocation2 + $0xbc] sm:$0x1] }
 0x35b   : > { %v8499_v16 = vrot.slane %v8497_v36, 4  ;;  %v8500_v29 = vrot.slane %v17346_v8, 5  ;;  %7502 = vst.msk [vmem:[#allocation2 + $0xcc] sm:$0xf] %vm304_vm10, %v19977_v47  ;;  %v7278_v42 = vrot.slane %v7276_v5, 7  ;;  %v12778_v13 = vpack.c.bf16 %v6889_v40, %v6889_v40 }
 0x35c   : > { %v7301_v49 = vshrl.u32 %v12780_v3, 16  ;;  %v7304_v33 = vshll.u32 %v12780_v3, 16  ;;  %v8553_v4 = vrot.slane %v17352_v35, 5  ;;  %v8556_v23 = vrot.slane %v17354_v27, 5  ;;  %v7519_v55 = vld [vmem:[#allocation2 + $0x54] sm:$0xf] }
 0x35d   : > { %v8501_v11 = vsel %vm13927_vm2, %v8499_v16, %v8500_v29  ;;  %v12492_v18 = vrot.slane %v8403_v62, 9  ;;  %v7281_v48 = vor.u32 %v7279_v56, %v7278_v42  ;;  %v7282_v58 = vrot.slane %v7278_v42, 4  ;;  %v17365_v34 = vld [vmem:[#allocation2 + $0xac] sm:$0xf]  ;;  %v17369_v61 = vld [vmem:[#allocation2 + $0xb0] sm:$0x1] }
 0x35e   : > { %v7303_v54 = vrot.slane %v7301_v49, 7  ;;  %v7284_v24 = vshrl.u32 %v12778_v13, 16  ;;  %v7287_v9 = vshll.u32 %v12778_v13, 16  ;;  %v8554_v2 = vsel %vm13927_vm2, %v12493_v0, %v8553_v4  ;;  %v7533_v5 = vld [vmem:[#allocation2 + $0xa8] sm:$0xf] }
 0x35f   : > { %v8555_v43 = vrot.slane %v8553_v4, 4  ;;  %v12505_v31 = vcombine.low %v8498_v19, %v8501_v11  ;;  %v7481_v12 = vsel %vm17058_vm3, %v7281_v48, %v7480_v50  ;;  %v8546_v1 = vrot.slane %v17365_v34, 5  ;;  %v8395_v11 = vld [vmem:[#allocation2 + $0x48] sm:$0xe] }
 0x360   : > { %v7306_v46 = vor.u32 %v7304_v33, %v7303_v54  ;;  %v7308_v17 = vrot.slane %v7303_v54, 4  ;;  %v7286_v20 = vrot.slane %v7284_v24, 7  ;;  %7482 = vst [vmem:[#allocation2 + $0xc0] sm:$0xf] %v7481_v12  ;;  %v8549_v63 = vrot.slane %v17369_v61, 5 }
 0x361   : > { %v8557_v59 = vsel %vm13927_vm2, %v8555_v43, %v8556_v23  ;;  %v8660_v38 = vsel %vm8022_vm8, %v12505_v31, 0  ;;  %v8547_v26 = vsel %vm13927_vm2, %v12492_v18, %v8546_v1  ;;  %v8548_v15 = vrot.slane %v8546_v1, 4  ;;  %v7518_v24 = vld [vmem:[#allocation2 + $0x4c] sm:$0xf]  ;;  %v7551_v43 = vld [vmem:[#allocation2 + $0x50] sm:$0x1] }
 0x362   : > { %v7307_v22 = vsel %vm17070_vm5, %v7299_v7, %v7306_v46  ;;  %v7492_v41 = vsel %vm17076_vm7, %v7308_v17, %v7491_v39  ;;  %v7289_v10 = vor.u32 %v7287_v9, %v7286_v20  ;;  %v7291_v32 = vrot.slane %v7286_v20, 4  ;;  %v8402_v31 = vld [vmem:[#allocation2 + $0x9c] sm:$0xe]  ;;  %v9731_v39 = vld [vmem:[#allocation2 + $0x60] sm:$0xe] }
 0x363   : > { %7490 = vst.msk [vmem:[#allocation2 + $0xd0] sm:$0xf] %vm304_vm10, %v7307_v22  ;;  %7493 = vst [vmem:[#allocation2 + $0xd4] sm:$0x1] %v7492_v41  ;;  %v12513_v28 = vcombine.low %v8554_v2, %v8557_v59  ;;  %v7931_v21 = vshrl.u32 %v7535_v30, 16  ;;  %v7934_v7 = vshll.u32 %v7535_v30, 16  ;;  %v8550_v0 = vsel %vm13927_vm2, %v8548_v15, %v8549_v63 }
 0x364   : > { %7503 = vst.msk [vmem:[#allocation2 + $0xd0] sm:$0xf] %vm304_vm10, %v19977_v47  ;;  %v7290_v51 = vsel %vm17070_vm5, %v7282_v58, %v7289_v10  ;;  %v7485_v37 = vsel %vm17076_vm7, %v7291_v32, %v7484_v14  ;;  %v7940_v45 = vshll.u32 %v17352_v35, 16  ;;  %v7950_v52 = vshll.u32 %v17354_v27, 16  ;;  %v17411_v30 = vld [vmem:[#allocation2 + $0xa0] sm:$0xf] }
 0x365   : > { %7504 = vst.msk [vmem:[#allocation2 + $0xd4] sm:$0x1] %vm307_vm11, %v19977_v47  ;;  %7486 = vst [vmem:[#allocation2 + $0xc8] sm:$0x1] %v7485_v37  ;;  %13553 = vmatprep.subr.msk.bf16.mxu0 %vm8022_vm8, %v12513_v28  ;;  %v7933_v57 = vrot.slane %v7931_v21, 4  ;;  %v7944_v47 = vshrl.u32 %v17352_v35, 16  ;;  %v12512_v44 = vcombine.low %v8547_v26, %v8550_v0 }
 0x366   : > { %7483 = vst.msk [vmem:[#allocation2 + $0xc4] sm:$0xf] %vm304_vm10, %v7290_v51  ;;  %13010 = vmatpush3.bf16.xpose.msra.mxu0 %v8660_v38  ;;  %v7936_v60 = vrot.slane %v7934_v7, 5  ;;  %v7942_v36 = vrot.slane %v7940_v45, 5  ;;  %v7739_v6 = vshrl.u32 %v7519_v55, 16  ;;  %v7952_v3 = vrot.slane %v7950_v52, 5 }
 0x367   : > { %v7946_v56 = vrot.slane %v7944_v47, 4  ;;  %v7742_v62 = vshll.u32 %v7519_v55, 16  ;;  %v7748_v40 = vshll.u32 %v17337_v25, 16  ;;  %13554 = vmatprep.subr.msk.bf16.mxu0 %vm8022_vm8, %v12512_v44  ;;  %v7752_v29 = vshrl.u32 %v17337_v25, 16  ;;  %v17413_v63 = vld [vmem:[#allocation2 + $0xa4] sm:$0x1] }
 0x368   : > { %v7937_v19 = vor.u32 %v7936_v60, %v7933_v57  ;;  %v7741_v16 = vrot.slane %v7739_v6, 4  ;;  %v7758_v35 = vshll.u32 %v17346_v8, 16  ;;  %v7907_v33 = vshrl.u32 %v7533_v5, 16  ;;  %v7517_v26 = vld [vmem:[#allocation2 + $0x48] sm:$0xf] }
 0x369   : > { %v7947_v27 = vor.u32 %v7946_v56, %v7942_v36  ;;  %v7744_v42 = vrot.slane %v7742_v62, 5  ;;  %v7750_v49 = vrot.slane %v7748_v40, 5  ;;  %v7754_v50 = vrot.slane %v7752_v29, 4  ;;  %v8394_v29 = vld [vmem:[#allocation2 + $0x3c] sm:$0xe] }
 0x36a   : > { %v7938_v13 = vrot.slane %v7937_v19, 4  ;;  %v7760_v4 = vrot.slane %v7758_v35, 5  ;;  %v7910_v23 = vshll.u32 %v7533_v5, 16  ;;  %v7909_v58 = vrot.slane %v7907_v33, 4  ;;  %v17436_v33 = vld [vmem:[#allocation2 + $0x40] sm:$0xf] }
 0x36b   : > { %v7948_v18 = vrot.slane %v7947_v27, 4  ;;  %v7745_v48 = vor.u32 %v7744_v42, %v7741_v16  ;;  %v7916_v54 = vshll.u32 %v17365_v34, 16  ;;  %v7755_v9 = vor.u32 %v7754_v50, %v7750_v49 }
 0x36c   : > { %v7943_v25 = vsel %vm13991_vm6, %v7938_v13, %v7942_v36  ;;  %v7912_v8 = vrot.slane %v7910_v23, 5  ;;  %v7920_v2 = vshrl.u32 %v17365_v34, 16  ;;  %v7926_v20 = vshll.u32 %v17369_v61, 16  ;;  %v7531_v36 = vld [vmem:[#allocation2 + $0x9c] sm:$0xf] }
 0x36d   : > { %v7953_v12 = vsel %vm13991_vm6, %v7948_v18, %v7952_v3  ;;  %v7746_v46 = vrot.slane %v7745_v48, 4  ;;  %v7918_v17 = vrot.slane %v7916_v54, 5  ;;  %v7756_v59 = vrot.slane %v7755_v9, 4  ;;  %v17440_v54 = vld [vmem:[#allocation2 + $0x44] sm:$0x1] }
 0x36e   : > { %v12441_v14 = vcombine.low %v7943_v25, %v7953_v12  ;;  %v7913_v38 = vor.u32 %v7912_v8, %v7909_v58  ;;  %v7922_v1 = vrot.slane %v7920_v2, 4  ;;  %v7928_v22 = vrot.slane %v7926_v20, 5  ;;  %v8401_v2 = vld [vmem:[#allocation2 + $0x90] sm:$0xe]  ;;  %v7530_v20 = vld [vmem:[#allocation2 + $0x94] sm:$0xf] }
 0x36f   : > { %v7751_v34 = vsel %vm13991_vm6, %v7746_v46, %v7750_v49  ;;  %v12484_v41 = vrot.slane %v8395_v11, 9  ;;  %v8490_v10 = vrot.slane %v7518_v24, 5  ;;  %v7761_v32 = vsel %vm13991_vm6, %v7756_v59, %v7760_v4 }
 0x370   : > { %13537 = vmatprep.subr.msk.bf16.mxu1 %vm8022_vm8, %v12441_v14  ;;  %v7914_v61 = vrot.slane %v7913_v38, 4  ;;  %v7923_v55 = vor.u32 %v7922_v1, %v7918_v17  ;;  %v8493_v28 = vrot.slane %v7551_v43, 5  ;;  %v12433_v15 = vcombine.low %v7751_v34, %v7761_v32  ;;  %v7557_v34 = vld [vmem:[#allocation2 + $0x98] sm:$0x1] }
 0x371   : > { %v8491_v21 = vsel %vm13927_vm2, %v12484_v41, %v8490_v10  ;;  %v8492_v51 = vrot.slane %v8490_v10, 4  ;;  %v12491_v37 = vrot.slane %v8402_v31, 9  ;;  %v8539_v0 = vrot.slane %v17411_v30, 5 }
 0x372   : > { %v7919_v7 = vsel %vm13991_vm6, %v7914_v61, %v7918_v17  ;;  %v7924_v45 = vrot.slane %v7923_v55, 4  ;;  %v8542_v57 = vrot.slane %v17413_v63, 5  ;;  %v8057_v47 = vsel %vm8022_vm8, %v12433_v15, 0 }
 0x373   : > { %v8494_v52 = vsel %vm13927_vm2, %v8492_v51, %v8493_v28  ;;  %v7715_v44 = vshrl.u32 %v7517_v26, 16  ;;  %v7718_v60 = vshll.u32 %v7517_v26, 16  ;;  %12962 = vmatpush3.bf16.xpose.msra.mxu1 %v8057_v47  ;;  %v8540_v56 = vsel %vm13927_vm2, %v12491_v37, %v8539_v0 }
 0x374   : > { %v7929_v6 = vsel %vm13991_vm6, %v7924_v45, %v7928_v22  ;;  %v12504_v5 = vcombine.low %v8491_v21, %v8494_v52  ;;  %v8541_v3 = vrot.slane %v8539_v0, 4  ;;  %v7724_v16 = vshll.u32 %v7518_v24, 16 }
 0x375   : > { %v12440_v62 = vcombine.low %v7919_v7, %v7929_v6  ;;  %v7717_v40 = vrot.slane %v7715_v44, 4  ;;  %v7720_v19 = vrot.slane %v7718_v60, 5  ;;  %v7728_v42 = vshrl.u32 %v7518_v24, 16 }
 0x376   : > { %v8657_v35 = vsel %vm8022_vm8, %v12504_v5, 0  ;;  %v8543_v27 = vsel %vm13927_vm2, %v8541_v3, %v8542_v57  ;;  %v7734_v49 = vshll.u32 %v7551_v43, 16  ;;  %v7726_v4 = vrot.slane %v7724_v16, 5  ;;  %v7515_v43 = vld [vmem:[#allocation2 + $0x3c] sm:$0xf] }
 0x377   : > { %13538 = vmatprep.subr.msk.bf16.mxu1 %vm8022_vm8, %v12440_v62  ;;  %13012 = vmatpush3.bf16.xpose.msra.mxu0 %v8657_v35  ;;  %v12511_v13 = vcombine.low %v8540_v56, %v8543_v27  ;;  %v7721_v50 = vor.u32 %v7720_v19, %v7717_v40  ;;  %v7883_v23 = vshrl.u32 %v7531_v36, 16  ;;  %v7730_v11 = vrot.slane %v7728_v42, 4  ;;  %v17463_v5 = vld [vmem:[#allocation2 + $0x90] sm:$0xf]  ;;  %v17470_v42 = vld [vmem:[#allocation2 + $0x34] sm:$0xf] }
 0x378   : > { %v7736_v18 = vrot.slane %v7734_v49, 5  ;;  %v7886_v48 = vshll.u32 %v7531_v36, 16  ;;  %v7892_v58 = vshll.u32 %v17411_v30, 16  ;;  %v7896_v9 = vshrl.u32 %v17411_v30, 16  ;;  %v8393_v19 = vld [vmem:[#allocation2 + $0x30] sm:$0xe] }
 0x379   : > { %13555 = vmatprep.subr.msk.bf16.mxu0 %vm8022_vm8, %v12511_v13  ;;  %v7722_v24 = vrot.slane %v7721_v50, 4  ;;  %v7885_v25 = vrot.slane %v7883_v23, 4  ;;  %v7902_v8 = vshll.u32 %v17413_v63, 16  ;;  %v7731_v31 = vor.u32 %v7730_v11, %v7726_v4  ;;  %v17475_v23 = vld [vmem:[#allocation2 + $0x38] sm:$0x1] }
 0x37a   : > { %v7888_v12 = vrot.slane %v7886_v48, 5  ;;  %v7894_v46 = vrot.slane %v7892_v58, 5  ;;  %v12483_v17 = vrot.slane %v8394_v29, 9  ;;  %v7898_v59 = vrot.slane %v7896_v9, 4  ;;  %v8400_v58 = vld [vmem:[#allocation2 + $0x84] sm:$0xe] }
 0x37b   : > { %v7727_v14 = vsel %vm13991_vm6, %v7722_v24, %v7726_v4  ;;  %v7904_v38 = vrot.slane %v7902_v8, 5  ;;  %v8483_v1 = vrot.slane %v17436_v33, 5  ;;  %v7732_v22 = vrot.slane %v7731_v31, 4  ;;  %v17478_v8 = vld [vmem:[#allocation2 + $0x88] sm:$0xf] }
 0x37c   : > { %v7889_v41 = vor.u32 %v7888_v12, %v7885_v25  ;;  %v8486_v30 = vrot.slane %v17440_v54, 5  ;;  %v12490_v63 = vrot.slane %v8401_v2, 9  ;;  %v7899_v10 = vor.u32 %v7898_v59, %v7894_v46 }
 0x37d   : > { %v8484_v32 = vsel %vm13927_vm2, %v12483_v17, %v8483_v1  ;;  %v8485_v61 = vrot.slane %v8483_v1, 4  ;;  %v8532_v55 = vrot.slane %v7530_v20, 5  ;;  %v7737_v28 = vsel %vm13991_vm6, %v7732_v22, %v7736_v18  ;;  %v7556_v1 = vld [vmem:[#allocation2 + $0x8c] sm:$0x1] }
 0x37e   : > { %v7890_v26 = vrot.slane %v7889_v41, 4  ;;  %v8535_v15 = vrot.slane %v7557_v34, 5  ;;  %v7691_v21 = vshrl.u32 %v7515_v43, 16  ;;  %v12432_v51 = vcombine.low %v7727_v14, %v7737_v28  ;;  %v17485_v41 = vld [vmem:[#allocation2 + $0x30] sm:$0xf] }
 0x37f   : > { %v7900_v37 = vrot.slane %v7899_v10, 4  ;;  %v8487_v7 = vsel %vm13927_vm2, %v8485_v61, %v8486_v30  ;;  %v8533_v45 = vsel %vm13927_vm2, %v12490_v63, %v8532_v55  ;;  %v8534_v47 = vrot.slane %v8532_v55, 4 }
 0x380   : > { %v7895_v0 = vsel %vm13991_vm6, %v7890_v26, %v7894_v46  ;;  %v12503_v57 = vcombine.low %v8484_v32, %v8487_v7  ;;  %v7693_v52 = vrot.slane %v7691_v21, 4  ;;  %v8054_v44 = vsel %vm8022_vm8, %v12432_v51, 0 }
 0x381   : > { %v7905_v60 = vsel %vm13991_vm6, %v7900_v37, %v7904_v38  ;;  %v7694_v36 = vshll.u32 %v7515_v43, 16  ;;  %v7700_v6 = vshll.u32 %v17436_v33, 16  ;;  %12964 = vmatpush3.bf16.xpose.msra.mxu1 %v8054_v44  ;;  %v8536_v62 = vsel %vm13927_vm2, %v8534_v47, %v8535_v15  ;;  %v17502_v47 = vld [vmem:[#allocation2 + $0x84] sm:$0xf] }
 0x382   : > { %v12439_v56 = vcombine.low %v7895_v0, %v7905_v60  ;;  %v8654_v3 = vsel %vm8022_vm8, %v12503_v57, 0  ;;  %v7704_v40 = vshrl.u32 %v17436_v33, 16  ;;  %v12510_v16 = vcombine.low %v8533_v45, %v8536_v62 }
 0x383   : > { %13014 = vmatpush3.bf16.xpose.msra.mxu0 %v8654_v3  ;;  %v7696_v29 = vrot.slane %v7694_v36, 5  ;;  %v7702_v35 = vrot.slane %v7700_v6, 5  ;;  %v7710_v27 = vshll.u32 %v17440_v54, 16  ;;  %v7859_v13 = vshrl.u32 %v17463_v5, 16 }
 0x384   : > { %13539 = vmatprep.subr.msk.bf16.mxu1 %vm8022_vm8, %v12439_v56  ;;  %v7706_v49 = vrot.slane %v7704_v40, 4  ;;  %v7862_v50 = vshll.u32 %v17463_v5, 16  ;;  %v7868_v4 = vshll.u32 %v7530_v20, 16  ;;  %13556 = vmatprep.subr.msk.bf16.mxu0 %vm8022_vm8, %v12510_v16  ;;  %v7872_v18 = vshrl.u32 %v7530_v20, 16  ;;  %v8392_v40 = vld [vmem:[#allocation2 + $0x24] sm:$0xe] }
 0x385   : > { %v7697_v33 = vor.u32 %v7696_v29, %v7693_v52  ;;  %v7712_v11 = vrot.slane %v7710_v27, 5  ;;  %v7878_v48 = vshll.u32 %v7557_v34, 16  ;;  %v7861_v24 = vrot.slane %v7859_v13, 4  ;;  %v7512_v27 = vld [vmem:[#allocation2 + $0x28] sm:$0xf] }
 0x386   : > { %v7707_v54 = vor.u32 %v7706_v49, %v7702_v35  ;;  %v7864_v25 = vrot.slane %v7862_v50, 5  ;;  %v7870_v9 = vrot.slane %v7868_v4, 5  ;;  %v7874_v43 = vrot.slane %v7872_v18, 4  ;;  %v7548_v4 = vld [vmem:[#allocation2 + $0x2c] sm:$0x1] }
 0x387   : > { %v7698_v2 = vrot.slane %v7697_v33, 4  ;;  %v7880_v31 = vrot.slane %v7878_v48, 5  ;;  %v12482_v12 = vrot.slane %v8393_v19, 9  ;;  %v8476_v14 = vrot.slane %v17470_v42, 5 }
 0x388   : > { %v7708_v46 = vrot.slane %v7707_v54, 4  ;;  %v7865_v17 = vor.u32 %v7864_v25, %v7861_v24  ;;  %v8479_v59 = vrot.slane %v17475_v23, 5  ;;  %v7875_v38 = vor.u32 %v7874_v43, %v7870_v9 }
 0x389   : > { %v7703_v20 = vsel %vm13991_vm6, %v7698_v2, %v7702_v35  ;;  %v12489_v34 = vrot.slane %v8400_v58, 9  ;;  %v8525_v22 = vrot.slane %v17478_v8, 5  ;;  %v8477_v10 = vsel %vm13927_vm2, %v12482_v12, %v8476_v14  ;;  %v8399_v58 = vld [vmem:[#allocation2 + $0x78] sm:$0xe] }
 0x38a   : > { %v7713_v30 = vsel %vm13991_vm6, %v7708_v46, %v7712_v11  ;;  %v7866_v63 = vrot.slane %v7865_v17, 4  ;;  %v8478_v32 = vrot.slane %v8476_v14, 4  ;;  %v7876_v55 = vrot.slane %v7875_v38, 4  ;;  %v7555_v46 = vld [vmem:[#allocation2 + $0x80] sm:$0x1] }
 0x38b   : > { %v12431_v61 = vcombine.low %v7703_v20, %v7713_v30  ;;  %v8526_v28 = vsel %vm13927_vm2, %v12489_v34, %v8525_v22  ;;  %v8527_v26 = vrot.slane %v8525_v22, 4  ;;  %v8528_v51 = vrot.slane %v7556_v1, 5  ;;  %v17520_v38 = vld [vmem:[#allocation2 + $0x24] sm:$0xf] }
 0x38c   : > { %v7871_v15 = vsel %vm13991_vm6, %v7866_v63, %v7870_v9  ;;  %v8480_v21 = vsel %vm13927_vm2, %v8478_v32, %v8479_v59  ;;  %v7667_v37 = vshrl.u32 %v17485_v41, 16  ;;  %v7881_v45 = vsel %vm13991_vm6, %v7876_v55, %v7880_v31  ;;  %v17516_v9 = vld [vmem:[#allocation2 + $0x7c] sm:$0xf] }
 0x38d   : > { %v8051_v7 = vsel %vm8022_vm8, %v12431_v61, 0  ;;  %v12502_v0 = vcombine.low %v8477_v10, %v8480_v21  ;;  %v7670_v57 = vshll.u32 %v17485_v41, 16  ;;  %v12438_v52 = vcombine.low %v7871_v15, %v7881_v45  ;;  %v17536_v45 = vld [vmem:[#allocation2 + $0x78] sm:$0xf] }
 0x38e   : > { %12966 = vmatpush3.bf16.xpose.msra.mxu1 %v8051_v7  ;;  %v8529_v44 = vsel %vm13927_vm2, %v8527_v26, %v8528_v51  ;;  %v7669_v60 = vrot.slane %v7667_v37, 4  ;;  %v7676_v36 = vshll.u32 %v17470_v42, 16  ;;  %v7680_v62 = vshrl.u32 %v17470_v42, 16 }
 0x38f   : > { %v8651_v6 = vsel %vm8022_vm8, %v12502_v0, 0  ;;  %v12509_v56 = vcombine.low %v8526_v28, %v8529_v44  ;;  %v7672_v3 = vrot.slane %v7670_v57, 5  ;;  %13540 = vmatprep.subr.msk.bf16.mxu1 %vm8022_vm8, %v12438_v52  ;;  %v7686_v16 = vshll.u32 %v17475_v23, 16 }
 0x390   : > { %13016 = vmatpush3.bf16.xpose.msra.mxu0 %v8651_v6  ;;  %v7678_v19 = vrot.slane %v7676_v36, 5  ;;  %v7835_v29 = vshrl.u32 %v17502_v47, 16  ;;  %v7838_v35 = vshll.u32 %v17502_v47, 16  ;;  %v7682_v13 = vrot.slane %v7680_v62, 4 }
 0x391   : > { %13557 = vmatprep.subr.msk.bf16.mxu0 %vm8022_vm8, %v12509_v56  ;;  %v7673_v49 = vor.u32 %v7672_v3, %v7669_v60  ;;  %v7844_v50 = vshll.u32 %v17478_v8, 16  ;;  %v7848_v42 = vshrl.u32 %v17478_v8, 16  ;;  %v7688_v33 = vrot.slane %v7686_v16, 5  ;;  %v8391_v16 = vld [vmem:[#allocation2 + $0x18] sm:$0xe] }
 0x392   : > { %v7837_v11 = vrot.slane %v7835_v29, 4  ;;  %v7840_v18 = vrot.slane %v7838_v35, 5  ;;  %v7854_v48 = vshll.u32 %v7556_v1, 16  ;;  %v7683_v54 = vor.u32 %v7682_v13, %v7678_v19 }
 0x393   : > { %v7674_v23 = vrot.slane %v7673_v49, 4  ;;  %v7846_v24 = vrot.slane %v7844_v50, 5  ;;  %v7850_v25 = vrot.slane %v7848_v42, 4  ;;  %v12481_v31 = vrot.slane %v8392_v40, 9  ;;  %v17547_v50 = vld [vmem:[#allocation2 + $0x1c] sm:$0xf] }
 0x394   : > { %v7841_v2 = vor.u32 %v7840_v18, %v7837_v11  ;;  %v7856_v43 = vrot.slane %v7854_v48, 5  ;;  %v8469_v12 = vrot.slane %v7512_v27, 5  ;;  %v7684_v14 = vrot.slane %v7683_v54, 4  ;;  %v7547_v18 = vld [vmem:[#allocation2 + $0x20] sm:$0x1] }
 0x395   : > { %v7679_v17 = vsel %vm13991_vm6, %v7674_v23, %v7678_v19  ;;  %v7851_v59 = vor.u32 %v7850_v25, %v7846_v24  ;;  %v8472_v20 = vrot.slane %v7548_v4, 5  ;;  %v12488_v30 = vrot.slane %v8399_v58, 9  ;;  %v8398_v54 = vld [vmem:[#allocation2 + $0x6c] sm:$0xe] }
 0x396   : > { %v7842_v1 = vrot.slane %v7841_v2, 4  ;;  %v8470_v34 = vsel %vm13927_vm2, %v12481_v31, %v8469_v12  ;;  %v8471_v22 = vrot.slane %v8469_v12, 4  ;;  %v7689_v63 = vsel %vm13991_vm6, %v7684_v14, %v7688_v33  ;;  %v17552_v31 = vld [vmem:[#allocation2 + $0x70] sm:$0xf] }
 0x397   : > { %v7852_v10 = vrot.slane %v7851_v59, 4  ;;  %v8518_v32 = vrot.slane %v17516_v9, 5  ;;  %v8521_v61 = vrot.slane %v7555_v46, 5  ;;  %v12430_v55 = vcombine.low %v7679_v17, %v7689_v63 }
 0x398   : > { %v7847_v28 = vsel %vm13991_vm6, %v7842_v1, %v7846_v24  ;;  %v8473_v26 = vsel %vm13927_vm2, %v8471_v22, %v8472_v20  ;;  %v7643_v15 = vshrl.u32 %v17520_v38, 16  ;;  %v7646_v44 = vshll.u32 %v17520_v38, 16  ;;  %v7554_v20 = vld [vmem:[#allocation2 + $0x74] sm:$0x1] }
 0x399   : > { %v7857_v21 = vsel %vm13991_vm6, %v7852_v10, %v7856_v43  ;;  %v12501_v51 = vcombine.low %v8470_v34, %v8473_v26  ;;  %v8519_v37 = vsel %vm13927_vm2, %v12488_v30, %v8518_v32  ;;  %v8520_v7 = vrot.slane %v8518_v32, 4 }
 0x39a   : > { %v8048_v0 = vsel %vm8022_vm8, %v12430_v55, 0  ;;  %v12437_v57 = vcombine.low %v7847_v28, %v7857_v21  ;;  %v7645_v52 = vrot.slane %v7643_v15, 4  ;;  %v7652_v6 = vshll.u32 %v7512_v27, 16 }
 0x39b   : > { %12968 = vmatpush3.bf16.xpose.msra.mxu1 %v8048_v0  ;;  %v8648_v60 = vsel %vm8022_vm8, %v12501_v51, 0  ;;  %v8522_v36 = vsel %vm13927_vm2, %v8520_v7, %v8521_v61  ;;  %v7656_v56 = vshrl.u32 %v7512_v27, 16  ;;  %v7648_v62 = vrot.slane %v7646_v44, 5  ;;  %v17561_v61 = vld [vmem:[#allocation2 + $0x18] sm:$0xf] }
 0x39c   : > { %13541 = vmatprep.subr.msk.bf16.mxu1 %vm8022_vm8, %v12437_v57  ;;  %13018 = vmatpush3.bf16.xpose.msra.mxu0 %v8648_v60  ;;  %v12508_v3 = vcombine.low %v8519_v37, %v8522_v36  ;;  %v7662_v40 = vshll.u32 %v7548_v4, 16  ;;  %v7811_v19 = vshrl.u32 %v17536_v45, 16  ;;  %v7654_v29 = vrot.slane %v7652_v6, 5  ;;  %v17574_v60 = vld [vmem:[#allocation2 + $0x6c] sm:$0xf] }
 0x39d   : > { %v7658_v35 = vrot.slane %v7656_v56, 4  ;;  %v7814_v49 = vshll.u32 %v17536_v45, 16  ;;  %v7820_v13 = vshll.u32 %v17516_v9, 16  ;;  %v7649_v27 = vor.u32 %v7648_v62, %v7645_v52 }
 0x39e   : > { %13558 = vmatprep.subr.msk.bf16.mxu0 %vm8022_vm8, %v12508_v3  ;;  %v7664_v42 = vrot.slane %v7662_v40, 5  ;;  %v7813_v33 = vrot.slane %v7811_v19, 4  ;;  %v7824_v11 = vshrl.u32 %v17516_v9, 16  ;;  %v7830_v23 = vshll.u32 %v7555_v46, 16 }
 0x39f   : > { %v7659_v4 = vor.u32 %v7658_v35, %v7654_v29  ;;  %v7816_v48 = vrot.slane %v7814_v49, 5  ;;  %v7822_v58 = vrot.slane %v7820_v13, 5  ;;  %v7650_v24 = vrot.slane %v7649_v27, 4 }
 0x3a0   : > { %v7826_v25 = vrot.slane %v7824_v11, 4  ;;  %v12480_v2 = vrot.slane %v8391_v16, 9  ;;  %v8462_v43 = vrot.slane %v17547_v50, 5  ;;  %v7832_v14 = vrot.slane %v7830_v23, 5 }
 0x3a1   : > { %v7660_v12 = vrot.slane %v7659_v4, 4  ;;  %v7817_v17 = vor.u32 %v7816_v48, %v7813_v33  ;;  %v8465_v59 = vrot.slane %v7547_v18, 5  ;;  %v7655_v1 = vsel %vm13991_vm6, %v7650_v24, %v7654_v29  ;;  %v8390_v29 = vld [vmem:[#allocation2 + $0xc] sm:$0xe] }
 0x3a2   : > { %v7827_v34 = vor.u32 %v7826_v25, %v7822_v58  ;;  %v8463_v46 = vsel %vm13927_vm2, %v12480_v2, %v8462_v43  ;;  %v8464_v22 = vrot.slane %v8462_v43, 4  ;;  %v12487_v10 = vrot.slane %v8398_v54, 9 }
 0x3a3   : > { %v7665_v30 = vsel %vm13991_vm6, %v7660_v12, %v7664_v42  ;;  %v7818_v63 = vrot.slane %v7817_v17, 4  ;;  %v8511_v32 = vrot.slane %v17552_v31, 5  ;;  %v8514_v15 = vrot.slane %v7554_v20, 5  ;;  %v17584_v42 = vld [vmem:[#allocation2 + $0x10] sm:$0xf] }
 0x3a4   : > { %v12429_v55 = vcombine.low %v7655_v1, %v7665_v30  ;;  %v7828_v28 = vrot.slane %v7827_v34, 4  ;;  %v8466_v26 = vsel %vm13927_vm2, %v8464_v22, %v8465_v59  ;;  %v7619_v52 = vshrl.u32 %v17561_v61, 16  ;;  %v7553_v22 = vld [vmem:[#allocation2 + $0x68] sm:$0x1] }
 0x3a5   : > { %v7823_v21 = vsel %vm13991_vm6, %v7818_v63, %v7822_v58  ;;  %v12500_v51 = vcombine.low %v8463_v46, %v8466_v26  ;;  %v8512_v37 = vsel %vm13927_vm2, %v12487_v10, %v8511_v32  ;;  %v8513_v7 = vrot.slane %v8511_v32, 4  ;;  %v7546_v58 = vld [vmem:[#allocation2 + $0x14] sm:$0x1] }
 0x3a6   : > { %v8045_v0 = vsel %vm8022_vm8, %v12429_v55, 0  ;;  %v7833_v57 = vsel %vm13991_vm6, %v7828_v28, %v7832_v14  ;;  %v7622_v44 = vshll.u32 %v17561_v61, 16  ;;  %v7628_v3 = vshll.u32 %v17547_v50, 16  ;;  %v8397_v14 = vld [vmem:[#allocation2 + $0x60] sm:$0xe] }
 0x3a7   : > { %12970 = vmatpush3.bf16.xpose.msra.mxu1 %v8045_v0  ;;  %v12436_v36 = vcombine.low %v7823_v21, %v7833_v57  ;;  %v8645_v6 = vsel %vm8022_vm8, %v12500_v51, 0  ;;  %v8515_v56 = vsel %vm13927_vm2, %v8513_v7, %v8514_v15  ;;  %v7621_v40 = vrot.slane %v7619_v52, 4 }
 0x3a8   : > { %13020 = vmatpush3.bf16.xpose.msra.mxu0 %v8645_v6  ;;  %v12507_v62 = vcombine.low %v8512_v37, %v8515_v56  ;;  %v7624_v19 = vrot.slane %v7622_v44, 5  ;;  %v7632_v16 = vshrl.u32 %v17547_v50, 16  ;;  %v7630_v35 = vrot.slane %v7628_v3, 5 }
 0x3a9   : > { %13542 = vmatprep.subr.msk.bf16.mxu1 %vm8022_vm8, %v12436_v36  ;;  %v7638_v49 = vshll.u32 %v7547_v18, 16  ;;  %v7787_v13 = vshrl.u32 %v17574_v60, 16  ;;  %v7790_v27 = vshll.u32 %v17574_v60, 16  ;;  %v7796_v4 = vshll.u32 %v17552_v31, 16  ;;  %v17589_v18 = vld [vmem:[#allocation2 + $0x64] sm:$0xf] }
 0x3aa   : > { %13559 = vmatprep.subr.msk.bf16.mxu0 %vm8022_vm8, %v12507_v62  ;;  %v7625_v33 = vor.u32 %v7624_v19, %v7621_v40  ;;  %v7634_v11 = vrot.slane %v7632_v16, 4  ;;  %v7800_v48 = vshrl.u32 %v17552_v31, 16  ;;  %v7806_v25 = vshll.u32 %v7554_v20, 16  ;;  %v17594_v20 = vld [vmem:[#allocation2 + $0xc] sm:$0xf] }
 0x3ab   : > { %v7640_v23 = vrot.slane %v7638_v49, 5  ;;  %v7789_v54 = vrot.slane %v7787_v13, 4  ;;  %v7792_v24 = vrot.slane %v7790_v27, 5  ;;  %v7798_v12 = vrot.slane %v7796_v4, 5  ;;  %v17610_v62 = vld [vmem:[#allocation2 + $0x60] sm:$0xf] }
 0x3ac   : > { %v7626_v2 = vrot.slane %v7625_v33, 4  ;;  %v7635_v43 = vor.u32 %v7634_v11, %v7630_v35  ;;  %v7802_v17 = vrot.slane %v7800_v48, 4  ;;  %v7808_v1 = vrot.slane %v7806_v25, 5 }
 0x3ad   : > { %v7793_v59 = vor.u32 %v7792_v24, %v7789_v54  ;;  %v12479_v34 = vrot.slane %v8390_v29, 9  ;;  %v8455_v46 = vrot.slane %v17584_v42, 5  ;;  %v8458_v32 = vrot.slane %v7546_v58, 5 }
 0x3ae   : > { %v7631_v30 = vsel %vm13991_vm6, %v7626_v2, %v7630_v35  ;;  %v7636_v63 = vrot.slane %v7635_v43, 4  ;;  %v7803_v10 = vor.u32 %v7802_v17, %v7798_v12  ;;  %v12486_v15 = vrot.slane %v8397_v14, 9  ;;  %v8389_v43 = vld [vmem:[#allocation2] sm:$0xe] }
 0x3af   : > { %v7794_v55 = vrot.slane %v7793_v59, 4  ;;  %v8456_v28 = vsel %vm13927_vm2, %v12479_v34, %v8455_v46  ;;  %v8457_v26 = vrot.slane %v8455_v46, 4  ;;  %v8504_v37 = vrot.slane %v17589_v18, 5 }
 0x3b0   : > { %v7641_v21 = vsel %vm13991_vm6, %v7636_v63, %v7640_v23  ;;  %v7804_v51 = vrot.slane %v7803_v10, 4  ;;  %v8507_v7 = vrot.slane %v7553_v22, 5  ;;  %v7595_v44 = vshrl.u32 %v17594_v20, 16  ;;  %v17621_v23 = vld [vmem:[#allocation2 + $0x4] sm:$0xf] }
 0x3b1   : > { %v12428_v0 = vcombine.low %v7631_v30, %v7641_v21  ;;  %v7799_v57 = vsel %vm13991_vm6, %v7794_v55, %v7798_v12  ;;  %v8459_v52 = vsel %vm13927_vm2, %v8457_v26, %v8458_v32  ;;  %v8505_v56 = vsel %vm13927_vm2, %v12486_v15, %v8504_v37 }
 0x3b2   : > { %v7809_v36 = vsel %vm13991_vm6, %v7804_v51, %v7808_v1  ;;  %v12499_v6 = vcombine.low %v8456_v28, %v8459_v52  ;;  %v8506_v3 = vrot.slane %v8504_v37, 4  ;;  %v7597_v16 = vrot.slane %v7595_v44, 4  ;;  %v7545_v1 = vld [vmem:[#allocation2 + $0x8] sm:$0x1]  ;;  %v9111_v28 = vld [vmem:[#allocation2 + $0xc0] sm:$0xf] }
 0x3b3   : > { %v8042_v40 = vsel %vm8022_vm8, %v12428_v0, 0  ;;  %v12435_v19 = vcombine.low %v7799_v57, %v7809_v36  ;;  %v7598_v29 = vshll.u32 %v17594_v20, 16  ;;  %v7604_v13 = vshll.u32 %v17584_v42, 16  ;;  %v9112_v37 = vld [vmem:[#allocation2 + $0xc4] sm:$0xf] }
 0x3b4   : > { %12972 = vmatpush3.bf16.xpose.msra.mxu1 %v8042_v40  ;;  %v8642_v35 = vsel %vm8022_vm8, %v12499_v6, 0  ;;  %v8508_v49 = vsel %vm13927_vm2, %v8506_v3, %v8507_v7  ;;  %v7608_v27 = vshrl.u32 %v17584_v42, 16  ;;  %v7614_v4 = vshll.u32 %v7546_v58, 16 }
 0x3b5   : > { %13543 = vmatprep.subr.msk.bf16.mxu1 %vm8022_vm8, %v12435_v19  ;;  %13022 = vmatpush3.bf16.xpose.msra.mxu0 %v8642_v35  ;;  %v12506_v33 = vcombine.low %v8505_v56, %v8508_v49  ;;  %v7600_v11 = vrot.slane %v7598_v29, 5  ;;  %v7763_v48 = vshrl.u32 %v17610_v62, 16  ;;  %v7606_v54 = vrot.slane %v7604_v13, 5  ;;  %v9113_v19 = vld [vmem:[#allocation2 + $0xc8] sm:$0x1] }
 0x3b6   : > { %v7610_v24 = vrot.slane %v7608_v27, 4  ;;  %v7766_v25 = vshll.u32 %v17610_v62, 16  ;;  %v7772_v2 = vshll.u32 %v17589_v18, 16  ;;  %v7616_v17 = vrot.slane %v7614_v4, 5  ;;  %v17638_v27 = vld [vmem:[#allocation2] sm:$0xf] }
 0x3b7   : > { %13560 = vmatprep.subr.msk.bf16.mxu0 %vm8022_vm8, %v12506_v33  ;;  %v7601_v12 = vor.u32 %v7600_v11, %v7597_v16  ;;  %v7765_v14 = vrot.slane %v7763_v48, 4  ;;  %v7776_v59 = vshrl.u32 %v17589_v18, 16  ;;  %v7782_v30 = vshll.u32 %v7553_v22, 16 }
 0x3b8   : > { %v7611_v58 = vor.u32 %v7610_v24, %v7606_v54  ;;  %v7768_v34 = vrot.slane %v7766_v25, 5  ;;  %v7774_v46 = vrot.slane %v7772_v2, 5  ;;  %v12478_v32 = vrot.slane %v8389_v43, 9 }
 0x3b9   : > { %v7602_v63 = vrot.slane %v7601_v12, 4  ;;  %v7778_v10 = vrot.slane %v7776_v59, 4  ;;  %v8448_v55 = vrot.slane %v17621_v23, 5  ;;  %v7784_v21 = vrot.slane %v7782_v30, 5  ;;  %v9087_v59 = vld [vmem:[#allocation2 + $0x60] sm:$0xf] }
 0x3ba   : > { %v7612_v26 = vrot.slane %v7611_v58, 4  ;;  %v7769_v15 = vor.u32 %v7768_v34, %v7765_v14  ;;  %v8451_v51 = vrot.slane %v7545_v1, 5  ;;  %v9484_v36 = vshrl.u32 %v9111_v28, 16 }
 0x3bb   : > { %v7607_v7 = vsel %vm13991_vm6, %v7602_v63, %v7606_v54  ;;  %v7779_v0 = vor.u32 %v7778_v10, %v7774_v46  ;;  %v8449_v57 = vsel %vm13927_vm2, %v12478_v32, %v8448_v55  ;;  %v8450_v52 = vrot.slane %v8448_v55, 4  ;;  %v9088_v63 = vld [vmem:[#allocation2 + $0x64] sm:$0xf] }
 0x3bc   : > { %v7617_v22 = vsel %vm13991_vm6, %v7612_v26, %v7616_v17  ;;  %v7770_v44 = vrot.slane %v7769_v15, 4  ;;  %v9487_v6 = vshll.u32 %v9111_v28, 16  ;;  %v9493_v16 = vshll.u32 %v9112_v37, 16  ;;  %v9089_v26 = vld [vmem:[#allocation2 + $0x68] sm:$0x1] }
 0x3bd   : > { %v12427_v56 = vcombine.low %v7607_v7, %v7617_v22  ;;  %v7780_v3 = vrot.slane %v7779_v0, 4  ;;  %v8452_v40 = vsel %vm13927_vm2, %v8450_v52, %v8451_v51  ;;  %v9486_v49 = vrot.slane %v9484_v36, 4  ;;  %v13805_v7 = vld [vmem:[#allocation2 + $0xb4] sm:$0xf] }
 0x3be   : > { %v7775_v29 = vsel %vm13991_vm6, %v7770_v44, %v7774_v46  ;;  %v12498_v35 = vcombine.low %v8449_v57, %v8452_v40  ;;  %v9489_v13 = vrot.slane %v9487_v6, 5  ;;  %v9495_v4 = vrot.slane %v9493_v16, 5  ;;  %v9108_v40 = vld [vmem:[#allocation2 + $0xb4] sm:$0xf] }
 0x3bf   : > { %v8039_v33 = vsel %vm8022_vm8, %v12427_v56, 0  ;;  %v7785_v11 = vsel %vm13991_vm6, %v7780_v3, %v7784_v21  ;;  %v9497_v48 = vshrl.u32 %v9112_v37, 16  ;;  %v9503_v2 = vshll.u32 %v9113_v19, 16  ;;  %v13804_v37 = vld [vmem:[#allocation2 + $0xb8] sm:$0xf] }
 0x3c0   : > { %12974 = vmatpush3.bf16.xpose.msra.mxu1 %v8039_v33  ;;  %v12434_v54 = vcombine.low %v7775_v29, %v7785_v11  ;;  %v8639_v24 = vsel %vm8022_vm8, %v12498_v35, 0  ;;  %v9490_v25 = vor.u32 %v9489_v13, %v9486_v49  ;;  %v7571_v12 = vshrl.u32 %v17638_v27, 16  ;;  %v9109_v49 = vld [vmem:[#allocation2 + $0xb8] sm:$0xf]  ;;  %v13806_v11 = vld [vmem:[%s19300_s4 + $0x40] sm:$0xff]  }
 0x3c1   : > { %13024 = vmatpush3.bf16.xpose.msra.mxu0 %v8639_v24  ;;  %v9499_v43 = vrot.slane %v9497_v48, 4  ;;  %v7574_v17 = vshll.u32 %v17638_v27, 16  ;;  %v7580_v14 = vshll.u32 %v17621_v23, 16  ;;  %v9505_v34 = vrot.slane %v9503_v2, 5  ;;  %v9110_v2 = vld [vmem:[#allocation2 + $0xbc] sm:$0x1] }
 0x3c2   : > { %13544 = vmatprep.subr.msk.bf16.mxu1 %vm8022_vm8, %v12434_v54  ;;  %v9491_v58 = vrot.slane %v9490_v25, 4  ;;  %v7584_v46 = vshrl.u32 %v17621_v23, 16  ;;  %v7590_v30 = vshll.u32 %v7545_v1, 16  ;;  %v7573_v32 = vrot.slane %v7571_v12, 4  ;;  %v17654_v1 = vld [vmem:[%s19300_s4 + $0x48] sm:$0xff]  }
 0x3c3   : > { %v9500_v10 = vor.u32 %v9499_v43, %v9495_v4  ;;  %v7576_v55 = vrot.slane %v7574_v17, 5  ;;  %v7582_v28 = vrot.slane %v7580_v14, 5  ;;  %v12465_v0 = vcombine.low %v13805_v7, %v13804_v37  ;;  %v13807_v37 = vld [vmem:[#allocation2 + $0x58] sm:$0xf] }
 0x3c4   : > { %v9496_v15 = vsel %vm13991_vm6, %v9491_v58, %v9495_v4  ;;  %v7586_v21 = vrot.slane %v7584_v46, 4  ;;  %v7592_v51 = vrot.slane %v7590_v30, 5  ;;  %v9292_v22 = vshrl.u32 %v9087_v59, 16 }
 0x3c5   : > { %v9501_v57 = vrot.slane %v9500_v10, 4  ;;  %v7577_v52 = vor.u32 %v7576_v55, %v7573_v32  ;;  %v9295_v44 = vshll.u32 %v9087_v59, 16  ;;  %v9301_v6 = vshll.u32 %v9088_v63, 16 }
 0x3c6   : > { %v7587_v36 = vor.u32 %v7586_v21, %v7582_v28  ;;  %v9305_v56 = vshrl.u32 %v9088_v63, 16  ;;  %v9311_v3 = vshll.u32 %v9089_v26, 16  ;;  %v9294_v29 = vrot.slane %v9292_v22, 4 }
 0x3c7   : > { %v9506_v19 = vsel %vm13991_vm6, %v9501_v57, %v9505_v34  ;;  %v7578_v16 = vrot.slane %v7577_v52, 4  ;;  %v9297_v35 = vrot.slane %v9295_v44, 5  ;;  %v9303_v4 = vrot.slane %v9301_v6, 5  ;;  %v17672_v57 = vld [vmem:[#allocation2 + $0x58] sm:$0xf]  ;;  %v17677_v52 = vld [vmem:[%s19300_s4 + $0x50] sm:$0xff]  }
 0x3c8   : > { %v12577_v13 = vcombine.low %v9496_v15, %v9506_v19  ;;  %v7588_v33 = vrot.slane %v7587_v36, 4  ;;  %13026 = vmatmul.mubr.msk.bf16.vlgmr.msra.gmra.mxu0 %vm8022_vm8, %v13806_v11  ;;  %v9307_v48 = vrot.slane %v9305_v56, 4  ;;  %v9313_v25 = vrot.slane %v9311_v3, 5  ;;  %v13809_v6 = vld [vmem:[#allocation2 + $0xac] sm:$0xf] }
 0x3c9   : > { %v7583_v54 = vsel %vm13991_vm6, %v7578_v16, %v7582_v28  ;;  %v9298_v24 = vor.u32 %v9297_v35, %v9294_v29  ;;  %v9460_v43 = vshrl.u32 %v9108_v40, 16  ;;  %13027 = vmatprep.mubr.msk.bf16.mxu0 %vm8022_vm8, %v17654_v1  ;;  %v9463_v14 = vshll.u32 %v9108_v40, 16  ;;  %v9084_v28 = vld [vmem:[#allocation2 + $0x54] sm:$0xf]  ;;  %v13810_v56 = vld [vmem:[#allocation2 + $0xa8] sm:$0xf] }
 0x3ca   : > { %13569 = vmatprep.subr.msk.bf16.mxu0 %vm8022_vm8, %v12577_v13  ;;  %v7593_v12 = vsel %vm13991_vm6, %v7588_v33, %v7592_v51  ;;  %v9308_v17 = vor.u32 %v9307_v48, %v9303_v4  ;;  %v9469_v59 = vshll.u32 %v9109_v49, 16  ;;  %v9473_v30 = vshrl.u32 %v9109_v49, 16  ;;  %v13808_v51 = vld [vmem:[#allocation2 + $0x54] sm:$0xf]  ;;  %v9086_v40 = vld [vmem:[#allocation2 + $0x5c] sm:$0x1] }
 0x3cb   : > { %v12426_v58 = vcombine.low %v7583_v54, %v7593_v12  ;;  %v9299_v34 = vrot.slane %v9298_v24, 4  ;;  %v9462_v46 = vrot.slane %v9460_v43, 4  ;;  %v9465_v10 = vrot.slane %v9463_v14, 5  ;;  %v9107_v14 = vld [vmem:[#allocation2 + $0xb0] sm:$0x1] }
 0x3cc   : > { %v9309_v63 = vrot.slane %v9308_v17, 4  ;;  %v9471_v32 = vrot.slane %v9469_v59, 5  ;;  %v9479_v55 = vshll.u32 %v9110_v2, 16  ;;  %v9475_v21 = vrot.slane %v9473_v30, 4 }
 0x3cd   : > { %v8036_v26 = vsel %vm8022_vm8, %v12426_v58, 0  ;;  %v9304_v15 = vsel %vm13991_vm6, %v9299_v34, %v9303_v4  ;;  %v12457_v7 = vcombine.low %v13808_v51, %v13807_v37  ;;  %v9466_v44 = vor.u32 %v9465_v10, %v9462_v46  ;;  %v9105_v4 = vld [vmem:[#allocation2 + $0xa8] sm:$0xf]  ;;  %v17708_v51 = vld [vmem:[%s19300_s4 + $0x58] sm:$0xff]  }
 0x3ce   : > { %12976 = vmatpush3.bf16.xpose.msra.mxu1 %v8036_v26  ;;  %v9314_v22 = vsel %vm13991_vm6, %v9309_v63, %v9313_v25  ;;  %v9481_v36 = vrot.slane %v9479_v55, 5  ;;  %v12464_v3 = vcombine.low %v13810_v56, %v13809_v6  ;;  %v9476_v16 = vor.u32 %v9475_v21, %v9471_v32  ;;  %v17688_v25 = vld [vmem:[#allocation2 + $0xac] sm:$0xf]  ;;  %v13813_v6 = vld [vmem:[#allocation2 + $0x48] sm:$0xf] }
 0x3cf   : > { %13545 = vmatprep.subr.msk.bf16.mxu1 %vm8022_vm8, %v12465_v0  ;;  %v12569_v19 = vcombine.low %v9304_v15, %v9314_v22  ;;  %v8290_v29 = vsel %vm8022_vm8, %v12457_v7, 0  ;;  %v9268_v35 = vshrl.u32 %v9084_v28, 16  ;;  %v9467_v49 = vrot.slane %v9466_v44, 4  ;;  %v13669_v46 = vld [vmem:[%s19300_s4 + $0x28] sm:$0xff]  }
 0x3d0   : > { %v9271_v13 = vshll.u32 %v9084_v28, 16  ;;  %v9277_v33 = vshll.u32 %v17672_v57, 16  ;;  %v9281_v11 = vshrl.u32 %v17672_v57, 16  ;;  %13028 = vmatmul.mubr.msk.bf16.gmra.mxu0 %vm8022_vm8, %v17654_v1  ;;  %v9477_v54 = vrot.slane %v9476_v16, 4  ;;  %v13811_v28 = vld [vmem:[%s19300_s4 + $0x20] sm:$0xff]  }
 0x3d1   : > { %v9609_v48 = vsel %vm8022_vm8, %v12569_v19, 0  ;;  %v9270_v24 = vrot.slane %v9268_v35, 4  ;;  %v9287_v0 = vshll.u32 %v9086_v40, 16  ;;  %13029 = vmatprep.mubr.msk.bf16.mxu0 %vm8022_vm8, %v17677_v52  ;;  %v9472_v2 = vsel %vm13991_vm6, %v9467_v49, %v9471_v32  ;;  %v9081_v32 = vld [vmem:[#allocation2 + $0x48] sm:$0xf] }
 0x3d2   : > { %13058 = vmatpush3.bf16.xpose.msra.mxu0 %v9609_v48  ;;  %v9273_v43 = vrot.slane %v9271_v13, 5  ;;  %v9279_v12 = vrot.slane %v9277_v33, 5  ;;  %v9283_v17 = vrot.slane %v9281_v11, 4  ;;  %v9482_v1 = vsel %vm13991_vm6, %v9477_v54, %v9481_v36  ;;  %v13812_v36 = vld [vmem:[#allocation2 + $0x4c] sm:$0xf] }
 0x3d3   : > { %v9289_v59 = vrot.slane %v9287_v0, 5  ;;  %v9436_v58 = vshrl.u32 %v9105_v4, 16  ;;  %v9439_v34 = vshll.u32 %v9105_v4, 16  ;;  %v12576_v30 = vcombine.low %v9472_v2, %v9482_v1  ;;  %v13814_v35 = vld [vmem:[#allocation2 + $0xa0] sm:$0xf] }
 0x3d4   : > { %v9274_v63 = vor.u32 %v9273_v43, %v9270_v24  ;;  %v9284_v10 = vor.u32 %v9283_v17, %v9279_v12  ;;  %v9445_v55 = vshll.u32 %v17688_v25, 16  ;;  %v9449_v21 = vshrl.u32 %v17688_v25, 16  ;;  %v13815_v49 = vld [vmem:[#allocation2 + $0x9c] sm:$0xf]  ;;  %v17712_v33 = vld [vmem:[#allocation2 + $0x4c] sm:$0xf] }
 0x3d5   : > { %12978 = vmatmul.mubr.msk.bf16.vlgmr.msra.gmra.mxu1 %vm8022_vm8, %v13811_v28  ;;  %v9438_v26 = vrot.slane %v9436_v58, 4  ;;  %v9441_v15 = vrot.slane %v9439_v34, 5  ;;  %v9455_v37 = vshll.u32 %v9107_v14, 16  ;;  %13570 = vmatprep.subr.msk.bf16.mxu0 %vm8022_vm8, %v12576_v30  ;;  %v12456_v56 = vcombine.low %v13813_v6, %v13812_v36  ;;  %v17714_v11 = vld [vmem:[#allocation2 + $0x50] sm:$0x1] }
 0x3d6   : > { %12986 = vmatpush3.bf16.xpose.msra.mxu1 %v8290_v29  ;;  %v9275_v7 = vrot.slane %v9274_v63, 4  ;;  %v9285_v22 = vrot.slane %v9284_v10, 4  ;;  %v9447_v44 = vrot.slane %v9445_v55, 5  ;;  %v9451_v19 = vrot.slane %v9449_v21, 4  ;;  %12979 = vmatprep.mubr.msk.bf16.mxu1 %vm8022_vm8, %v13669_v46  ;;  %v9102_v43 = vld [vmem:[#allocation2 + $0x9c] sm:$0xf] }
 0x3d7   : > { %13546 = vmatprep.subr.msk.bf16.mxu1 %vm8022_vm8, %v12464_v3  ;;  %v9442_v40 = vor.u32 %v9441_v15, %v9438_v26  ;;  %v9457_v16 = vrot.slane %v9455_v37, 5  ;;  %v12463_v13 = vcombine.low %v13815_v49, %v13814_v35  ;;  %v8287_v3 = vsel %vm8022_vm8, %v12456_v56, 0  ;;  %v17724_v17 = vld [vmem:[#allocation2 + $0xa0] sm:$0xf]  ;;  %v17739_v28 = vld [vmem:[#allocation2 + $0xa4] sm:$0x1] }
 0x3d8   : > { %v9280_v29 = vsel %vm13991_vm6, %v9275_v7, %v9279_v12  ;;  %v9290_v4 = vsel %vm13991_vm6, %v9285_v22, %v9289_v59  ;;  %v9244_v48 = vshrl.u32 %v9081_v32, 16  ;;  %13030 = vmatmul.mubr.msk.bf16.gmra.mxu0 %vm8022_vm8, %v17677_v52  ;;  %v9452_v0 = vor.u32 %v9451_v19, %v9447_v44  ;;  %v17734_v52 = vld [vmem:[%s19300_s4 + $0x30] sm:$0xff]   ;;  %v17748_v22 = vld [vmem:[%s19300_s4 + $0x80] sm:$0xff]  }
 0x3d9   : > { %v12568_v54 = vcombine.low %v9280_v29, %v9290_v4  ;;  %v9443_v24 = vrot.slane %v9442_v40, 4  ;;  %v9247_v2 = vshll.u32 %v9081_v32, 16  ;;  %13031 = vmatprep.mubr.msk.bf16.mxu0 %vm8022_vm8, %v17708_v51  ;;  %v9253_v14 = vshll.u32 %v17712_v33, 16  ;;  %v9078_v40 = vld [vmem:[#allocation2 + $0x3c] sm:$0xf] }
 0x3da   : > { %v9246_v12 = vrot.slane %v9244_v48, 4  ;;  %v9257_v1 = vshrl.u32 %v17712_v33, 16  ;;  %v9263_v59 = vshll.u32 %v17714_v11, 16  ;;  %v9453_v30 = vrot.slane %v9452_v0, 4  ;;  %v13816_v4 = vld [vmem:[#allocation2 + $0x40] sm:$0xf] }
 0x3db   : > { %v9606_v58 = vsel %vm8022_vm8, %v12568_v54, 0  ;;  %v9448_v34 = vsel %vm13991_vm6, %v9443_v24, %v9447_v44  ;;  %v9249_v63 = vrot.slane %v9247_v2, 5  ;;  %v9255_v10 = vrot.slane %v9253_v14, 5  ;;  %v13818_v54 = vld [vmem:[#allocation2 + $0x94] sm:$0xf] }
 0x3dc   : > { %13060 = vmatpush3.bf16.xpose.msra.mxu0 %v9606_v58  ;;  %v9259_v55 = vrot.slane %v9257_v1, 4  ;;  %v9265_v32 = vrot.slane %v9263_v59, 5  ;;  %v9412_v26 = vshrl.u32 %v9102_v43, 16  ;;  %v9458_v15 = vsel %vm13991_vm6, %v9453_v30, %v9457_v16  ;;  %v17757_v0 = vld [vmem:[#allocation2 + $0x40] sm:$0xf] }
 0x3dd   : > { %v9250_v21 = vor.u32 %v9249_v63, %v9246_v12  ;;  %v9415_v37 = vshll.u32 %v9102_v43, 16  ;;  %v9421_v7 = vshll.u32 %v17724_v17, 16  ;;  %12980 = vmatmul.mubr.msk.bf16.gmra.mxu1 %vm8022_vm8, %v13669_v46  ;;  %v12575_v44 = vcombine.low %v9448_v34, %v9458_v15  ;;  %v17763_v12 = vld [vmem:[#allocation2 + $0x44] sm:$0x1]  ;;  %v9099_v34 = vld [vmem:[#allocation2 + $0x90] sm:$0xf] }
 0x3de   : > { %12988 = vmatpush3.bf16.xpose.msra.mxu1 %v8287_v3  ;;  %v9260_v36 = vor.u32 %v9259_v55, %v9255_v10  ;;  %v9414_v6 = vrot.slane %v9412_v26, 4  ;;  %v9425_v56 = vshrl.u32 %v17724_v17, 16  ;;  %12981 = vmatprep.mubr.msk.bf16.mxu1 %vm8022_vm8, %v17734_v52  ;;  %v9431_v35 = vshll.u32 %v17739_v28, 16  ;;  %v13817_v3 = vld [vmem:[#allocation2 + $0x3c] sm:$0xf] }
 0x3df   : > { %13547 = vmatprep.subr.msk.bf16.mxu1 %vm8022_vm8, %v12463_v13  ;;  %v9251_v19 = vrot.slane %v9250_v21, 4  ;;  %v9417_v16 = vrot.slane %v9415_v37, 5  ;;  %v9423_v46 = vrot.slane %v9421_v7, 5  ;;  %13571 = vmatprep.subr.msk.bf16.mxu0 %vm8022_vm8, %v12575_v44  ;;  %v12455_v48 = vcombine.low %v13817_v3, %v13816_v4  ;;  %v13677_v55 = vld [vmem:[%s19300_s4 + $0x38] sm:$0xff]   ;;  %v17776_v37 = vld [vmem:[#allocation2 + $0x94] sm:$0xf] }
 0x3e0   : > { %v9261_v49 = vrot.slane %v9260_v36, 4  ;;  %v9427_v29 = vrot.slane %v9425_v56, 4  ;;  %v12462_v24 = vcombine.low %v17463_v5, %v13818_v54  ;;  %13032 = vmatmul.mubr.msk.bf16.gmra.mxu0 %vm8022_vm8, %v17708_v51  ;;  %v9433_v43 = vrot.slane %v9431_v35, 5 }
 0x3e1   : > { %v9256_v13 = vsel %vm13991_vm6, %v9251_v19, %v9255_v10  ;;  %v9418_v2 = vor.u32 %v9417_v16, %v9414_v6  ;;  %v9220_v14 = vshrl.u32 %v9078_v40, 16  ;;  %13073 = vmatprep.mubr.msk.bf16.mxu0 %vm8022_vm8, %v17748_v22  ;;  %v8284_v59 = vsel %vm8022_vm8, %v12455_v48, 0  ;;  %v17781_v6 = vld [vmem:[#allocation2 + $0x98] sm:$0x1] }
 0x3e2   : > { %v9266_v1 = vsel %vm13991_vm6, %v9261_v49, %v9265_v32  ;;  %v9428_v5 = vor.u32 %v9427_v29, %v9423_v46  ;;  %v9223_v58 = vshll.u32 %v9078_v40, 16  ;;  %v9229_v10 = vshll.u32 %v17757_v0, 16 }
 0x3e3   : > { %v12567_v51 = vcombine.low %v9256_v13, %v9266_v1  ;;  %v9419_v30 = vrot.slane %v9418_v2, 4  ;;  %v9222_v63 = vrot.slane %v9220_v14, 4  ;;  %v9233_v21 = vshrl.u32 %v17757_v0, 16  ;;  %v9075_v13 = vld [vmem:[#allocation2 + $0x30] sm:$0xf] }
 0x3e4   : > { %v9429_v26 = vrot.slane %v9428_v5, 4  ;;  %v9225_v15 = vrot.slane %v9223_v58, 5  ;;  %v9239_v32 = vshll.u32 %v17763_v12, 16  ;;  %v9231_v36 = vrot.slane %v9229_v10, 5  ;;  %v13819_v14 = vld [vmem:[#allocation2 + $0x34] sm:$0xf] }
 0x3e5   : > { %v9603_v7 = vsel %vm8022_vm8, %v12567_v51, 0  ;;  %v9424_v44 = vsel %vm13991_vm6, %v9419_v30, %v9423_v46  ;;  %v9388_v56 = vshrl.u32 %v9099_v34, 16  ;;  %12982 = vmatmul.mubr.msk.bf16.gmra.mxu1 %vm8022_vm8, %v17734_v52  ;;  %v9235_v16 = vrot.slane %v9233_v21, 4  ;;  %v17796_v5 = vld [vmem:[#allocation2 + $0x34] sm:$0xf]  ;;  %v17803_v30 = vld [vmem:[%s19300_s4] sm:$0xff]  }
 0x3e6   : > { %13062 = vmatpush3.bf16.xpose.msra.mxu0 %v9603_v7  ;;  %v9434_v40 = vsel %vm13991_vm6, %v9429_v26, %v9433_v43  ;;  %12990 = vmatpush3.bf16.xpose.msra.mxu1 %v8284_v59  ;;  %v9226_v19 = vor.u32 %v9225_v15, %v9222_v63  ;;  %v9241_v35 = vrot.slane %v9239_v32, 5  ;;  %v9391_v46 = vshll.u32 %v9099_v34, 16  ;;  %v9096_v7 = vld [vmem:[#allocation2 + $0x84] sm:$0xf] }
 0x3e7   : > { %v12574_v49 = vcombine.low %v9424_v44, %v9434_v40  ;;  %13548 = vmatprep.subr.msk.bf16.mxu1 %vm8022_vm8, %v12462_v24  ;;  %v9390_v29 = vrot.slane %v9388_v56, 4  ;;  %v9397_v4 = vshll.u32 %v17776_v37, 16  ;;  %12983 = vmatprep.mubr.msk.bf16.mxu1 %vm8022_vm8, %v13677_v55  ;;  %v9236_v48 = vor.u32 %v9235_v16, %v9231_v36 }
 0x3e8   : > { %v9227_v3 = vrot.slane %v9226_v19, 4  ;;  %v9401_v52 = vshrl.u32 %v17776_v37, 16  ;;  %v9407_v54 = vshll.u32 %v17781_v6, 16  ;;  %v9393_v2 = vrot.slane %v9391_v46, 5  ;;  %v17814_v46 = vld [vmem:[#allocation2 + $0x88] sm:$0xf] }
 0x3e9   : > { %13572 = vmatprep.subr.msk.bf16.mxu0 %vm8022_vm8, %v12574_v49  ;;  %v9399_v43 = vrot.slane %v9397_v4, 5  ;;  %v12454_v24 = vcombine.low %v17485_v41, %v13819_v14  ;;  %v12461_v1 = vcombine.low %v17502_v47, %v17478_v8  ;;  %v9237_v58 = vrot.slane %v9236_v48, 4  ;;  %v17806_v41 = vld [vmem:[#allocation2 + $0x38] sm:$0x1] }
 0x3ea   : > { %v9232_v59 = vsel %vm13991_vm6, %v9227_v3, %v9231_v36  ;;  %v9403_v34 = vrot.slane %v9401_v52, 4  ;;  %v9409_v51 = vrot.slane %v9407_v54, 5  ;;  %v9394_v63 = vor.u32 %v9393_v2, %v9390_v29 }
 0x3eb   : > { %v8281_v10 = vsel %vm8022_vm8, %v12454_v24, 0  ;;  %v9196_v26 = vshrl.u32 %v9075_v13, 16  ;;  %v9199_v8 = vshll.u32 %v9075_v13, 16  ;;  %v9242_v47 = vsel %vm13991_vm6, %v9237_v58, %v9241_v35 }
 0x3ec   : > { %v9404_v15 = vor.u32 %v9403_v34, %v9399_v43  ;;  %v9205_v21 = vshll.u32 %v17796_v5, 16  ;;  %v9209_v32 = vshrl.u32 %v17796_v5, 16  ;;  %v12566_v44 = vcombine.low %v9232_v59, %v9242_v47 }
 0x3ed   : > { %v9395_v36 = vrot.slane %v9394_v63, 4  ;;  %v9198_v56 = vrot.slane %v9196_v26, 4  ;;  %v9201_v40 = vrot.slane %v9199_v8, 5  ;;  %12984 = vmatmul.mubr.msk.bf16.gmra.mxu1 %vm8022_vm8, %v13677_v55  ;;  %v9215_v29 = vshll.u32 %v17806_v41, 16  ;;  %v17822_v55 = vld [vmem:[#allocation2 + $0x8c] sm:$0x1] }
 0x3ee   : > { %v9405_v19 = vrot.slane %v9404_v15, 4  ;;  %12992 = vmatpush3.bf16.xpose.msra.mxu1 %v8281_v10  ;;  %v9207_v16 = vrot.slane %v9205_v21, 5  ;;  %v9211_v49 = vrot.slane %v9209_v32, 4  ;;  %13001 = vmatprep.mubr.msk.bf16.mxu1 %vm8022_vm8, %v17803_v30  ;;  %v9600_v35 = vsel %vm8022_vm8, %v12566_v44, 0  ;;  %v9072_v10 = vld [vmem:[#allocation2 + $0x24] sm:$0xf] }
 0x3ef   : > { %v9400_v4 = vsel %vm13991_vm6, %v9395_v36, %v9399_v43  ;;  %13549 = vmatprep.subr.msk.bf16.mxu1 %vm8022_vm8, %v12461_v1  ;;  %v9202_v3 = vor.u32 %v9201_v40, %v9198_v56  ;;  %v9364_v48 = vshrl.u32 %v9096_v7, 16  ;;  %13064 = vmatpush3.bf16.xpose.msra.mxu0 %v9600_v35  ;;  %v9217_v13 = vrot.slane %v9215_v29, 5  ;;  %v13820_v8 = vld [vmem:[#allocation2 + $0x28] sm:$0xf]  ;;  %v17839_v56 = vld [vmem:[#allocation2 + $0x2c] sm:$0x1] }
 0x3f0   : > { %v9410_v52 = vsel %vm13991_vm6, %v9405_v19, %v9409_v51  ;;  %v9212_v54 = vor.u32 %v9211_v49, %v9207_v16  ;;  %v9367_v2 = vshll.u32 %v9096_v7, 16  ;;  %v9373_v58 = vshll.u32 %v17814_v46, 16  ;;  %v17835_v21 = vld [vmem:[#allocation2 + $0x28] sm:$0xf]  ;;  %v9093_v35 = vld [vmem:[#allocation2 + $0x78] sm:$0xf] }
 0x3f1   : > { %v12573_v14 = vcombine.low %v9400_v4, %v9410_v52  ;;  %v9203_v24 = vrot.slane %v9202_v3, 4  ;;  %v9366_v59 = vrot.slane %v9364_v48, 4  ;;  %v9377_v1 = vshrl.u32 %v17814_v46, 16 }
 0x3f2   : > { %v9213_v34 = vrot.slane %v9212_v54, 4  ;;  %v9369_v43 = vrot.slane %v9367_v2, 5  ;;  %v9383_v63 = vshll.u32 %v17822_v55, 16  ;;  %v9375_v26 = vrot.slane %v9373_v58, 5  ;;  %v17847_v54 = vld [vmem:[#allocation2 + $0x7c] sm:$0xf] }
 0x3f3   : > { %13573 = vmatprep.subr.msk.bf16.mxu0 %vm8022_vm8, %v12573_v14  ;;  %v9208_v51 = vsel %vm13991_vm6, %v9203_v24, %v9207_v16  ;;  %v12453_v47 = vcombine.low %v17520_v38, %v13820_v8  ;;  %v12460_v15 = vcombine.low %v17536_v45, %v17516_v9  ;;  %v9379_v44 = vrot.slane %v9377_v1, 4 }
 0x3f4   : > { %v9218_v32 = vsel %vm13991_vm6, %v9213_v34, %v9217_v13  ;;  %v9370_v7 = vor.u32 %v9369_v43, %v9366_v59  ;;  %v9385_v36 = vrot.slane %v9383_v63, 5  ;;  %v9172_v16 = vshrl.u32 %v9072_v10, 16  ;;  %v17851_v34 = vld [vmem:[#allocation2 + $0x80] sm:$0x1] }
 0x3f5   : > { %v12565_v40 = vcombine.low %v9208_v51, %v9218_v32  ;;  %v8278_v19 = vsel %vm8022_vm8, %v12453_v47, 0  ;;  %v9175_v49 = vshll.u32 %v9072_v10, 16  ;;  %v9380_v38 = vor.u32 %v9379_v44, %v9375_v26 }
 0x3f6   : > { %v9371_v29 = vrot.slane %v9370_v7, 4  ;;  %12994 = vmatpush3.bf16.xpose.msra.mxu1 %v8278_v19  ;;  %v9181_v9 = vshll.u32 %v17835_v21, 16  ;;  %v9185_v45 = vshrl.u32 %v17835_v21, 16  ;;  %v9174_v3 = vrot.slane %v9172_v16, 4  ;;  %v9069_v7 = vld [vmem:[#allocation2 + $0x18] sm:$0xf] }
 0x3f7   : > { %v9597_v4 = vsel %vm8022_vm8, %v12565_v40, 0  ;;  %13550 = vmatprep.subr.msk.bf16.mxu1 %vm8022_vm8, %v12460_v15  ;;  %v9177_v48 = vrot.slane %v9175_v49, 5  ;;  %v9191_v52 = vshll.u32 %v17839_v56, 16  ;;  %v9381_v2 = vrot.slane %v9380_v38, 4 }
 0x3f8   : > { %13066 = vmatpush3.bf16.xpose.msra.mxu0 %v9597_v4  ;;  %v9376_v13 = vsel %vm13991_vm6, %v9371_v29, %v9375_v26  ;;  %v9183_v14 = vrot.slane %v9181_v9, 5  ;;  %v9187_v24 = vrot.slane %v9185_v45, 4  ;;  %v9340_v43 = vshrl.u32 %v9093_v35, 16  ;;  %v17865_v9 = vld [vmem:[#allocation2 + $0x1c] sm:$0xf] }
 0x3f9   : > { %v9178_v59 = vor.u32 %v9177_v48, %v9174_v3  ;;  %v9193_v58 = vrot.slane %v9191_v52, 5  ;;  %v9343_v1 = vshll.u32 %v9093_v35, 16  ;;  %v9386_v63 = vsel %vm13991_vm6, %v9381_v2, %v9385_v36  ;;  %v17869_v3 = vld [vmem:[#allocation2 + $0x20] sm:$0x1] }
 0x3fa   : > { %v9188_v10 = vor.u32 %v9187_v24, %v9183_v14  ;;  %v9349_v51 = vshll.u32 %v17847_v54, 16  ;;  %v9353_v8 = vshrl.u32 %v17847_v54, 16  ;;  %v12572_v47 = vcombine.low %v9376_v13, %v9386_v63  ;;  %v9090_v24 = vld [vmem:[#allocation2 + $0x6c] sm:$0xf]  ;;  %v17879_v63 = vld [vmem:[#allocation2 + $0x70] sm:$0xf] }
 0x3fb   : > { %v9179_v15 = vrot.slane %v9178_v59, 4  ;;  %v9342_v26 = vrot.slane %v9340_v43, 4  ;;  %v9345_v32 = vrot.slane %v9343_v1, 5  ;;  %v9359_v16 = vshll.u32 %v17851_v34, 16 }
 0x3fc   : > { %v9189_v44 = vrot.slane %v9188_v10, 4  ;;  %v9351_v40 = vrot.slane %v9349_v51, 5  ;;  %v9355_v19 = vrot.slane %v9353_v8, 4  ;;  %13574 = vmatprep.subr.msk.bf16.mxu0 %vm8022_vm8, %v12572_v47  ;;  %v12452_v29 = vcombine.low %v17561_v61, %v17547_v50 }
 0x3fd   : > { %v9184_v36 = vsel %vm13991_vm6, %v9179_v15, %v9183_v14  ;;  %v9346_v49 = vor.u32 %v9345_v32, %v9342_v26  ;;  %v12459_v38 = vcombine.low %v17574_v60, %v17552_v31  ;;  %v9361_v4 = vrot.slane %v9359_v16, 5  ;;  %v17883_v32 = vld [vmem:[#allocation2 + $0x74] sm:$0x1] }
 0x3fe   : > { %v9194_v45 = vsel %vm13991_vm6, %v9189_v44, %v9193_v58  ;;  %v9356_v35 = vor.u32 %v9355_v19, %v9351_v40  ;;  %v9148_v48 = vshrl.u32 %v9069_v7, 16  ;;  %v8275_v2 = vsel %vm8022_vm8, %v12452_v29, 0 }
 0x3ff   : > { %v12564_v52 = vcombine.low %v9184_v36, %v9194_v45  ;;  %v9347_v13 = vrot.slane %v9346_v49, 4  ;;  %v9151_v14 = vshll.u32 %v9069_v7, 16  ;;  %12996 = vmatpush3.bf16.xpose.msra.mxu1 %v8275_v2  ;;  %v9157_v31 = vshll.u32 %v17865_v9, 16  ;;  %v9066_v45 = vld [vmem:[#allocation2 + $0xc] sm:$0xf] }
 0x400   : > { %v9357_v50 = vrot.slane %v9356_v35, 4  ;;  %v9150_v61 = vrot.slane %v9148_v48, 4  ;;  %v9161_v60 = vshrl.u32 %v17865_v9, 16  ;;  %13551 = vmatprep.subr.msk.bf16.mxu1 %vm8022_vm8, %v12459_v38  ;;  %v9167_v1 = vshll.u32 %v17869_v3, 16 }
 0x401   : > { %v9594_v59 = vsel %vm8022_vm8, %v12564_v52, 0  ;;  %v9352_v58 = vsel %vm13991_vm6, %v9347_v13, %v9351_v40  ;;  %v9153_v43 = vrot.slane %v9151_v14, 5  ;;  %v9159_v51 = vrot.slane %v9157_v31, 5  ;;  %v17891_v13 = vld [vmem:[#allocation2 + $0x10] sm:$0xf] }
 0x402   : > { %13068 = vmatpush3.bf16.xpose.msra.mxu0 %v9594_v59  ;;  %v9362_v10 = vsel %vm13991_vm6, %v9357_v50, %v9361_v4  ;;  %v9163_v8 = vrot.slane %v9161_v60, 4  ;;  %v9316_v47 = vshrl.u32 %v9090_v24, 16  ;;  %v9319_v7 = vshll.u32 %v9090_v24, 16 }
 0x403   : > { %v12571_v15 = vcombine.low %v9352_v58, %v9362_v10  ;;  %v9154_v26 = vor.u32 %v9153_v43, %v9150_v61  ;;  %v9325_v19 = vshll.u32 %v17879_v63, 16  ;;  %v9329_v16 = vshrl.u32 %v17879_v63, 16  ;;  %v17900_v61 = vld [vmem:[#allocation2 + $0x14] sm:$0x1] }
 0x404   : > { %v9164_v44 = vor.u32 %v9163_v8, %v9159_v51  ;;  %v9318_v40 = vrot.slane %v9316_v47, 4  ;;  %v9169_v49 = vrot.slane %v9167_v1, 5  ;;  %v9321_v29 = vrot.slane %v9319_v7, 5 }
 0x405   : > { %13575 = vmatprep.subr.msk.bf16.mxu0 %vm8022_vm8, %v12571_v15  ;;  %v9155_v36 = vrot.slane %v9154_v26, 4  ;;  %v12451_v38 = vcombine.low %v17594_v20, %v17584_v42  ;;  %v9327_v4 = vrot.slane %v9325_v19, 5  ;;  %v9331_v48 = vrot.slane %v9329_v16, 4 }
 0x406   : > { %v9165_v35 = vrot.slane %v9164_v44, 4  ;;  %v9335_v52 = vshll.u32 %v17883_v32, 16  ;;  %v9322_v14 = vor.u32 %v9321_v29, %v9318_v40  ;;  %v12458_v50 = vcombine.low %v17610_v62, %v17589_v18 }
 0x407   : > { %v9160_v2 = vsel %vm13991_vm6, %v9155_v36, %v9159_v51  ;;  %v8272_v24 = vsel %vm8022_vm8, %v12451_v38, 0  ;;  %v9332_v20 = vor.u32 %v9331_v48, %v9327_v4  ;;  %v9124_v31 = vshrl.u32 %v9066_v45, 16 }
 0x408   : > { %v9170_v42 = vsel %vm13991_vm6, %v9165_v35, %v9169_v49  ;;  %12998 = vmatpush3.bf16.xpose.msra.mxu1 %v8272_v24  ;;  %v9127_v60 = vshll.u32 %v9066_v45, 16  ;;  %v9323_v58 = vrot.slane %v9322_v14, 4  ;;  %v9133_v43 = vshll.u32 %v17891_v13, 16  ;;  %v13679_v35 = vld [vmem:[#allocation2 + $0xc0] sm:$0xff]   ;;  %v13689_v14 = vld [vmem:[%s19300_s4 + $0x8] sm:$0xff]  }
 0x409   : > { %v12563_v59 = vcombine.low %v9160_v2, %v9170_v42  ;;  %13552 = vmatprep.subr.msk.bf16.mxu1 %vm8022_vm8, %v12458_v50  ;;  %v9137_v1 = vshrl.u32 %v17891_v13, 16  ;;  %v9333_v10 = vrot.slane %v9332_v20, 4  ;;  %v9337_v51 = vrot.slane %v9335_v52, 5  ;;  %v13685_v52 = vld [vmem:[#allocation2 + $0x60] sm:$0xff]   ;;  %v13686_v50 = vld [vmem:[#allocation2 + $0xb4] sm:$0xff]   ;;  %v13682_v42 = vld [vmem:[#allocation2 + $0x6c] sm:$0xff]  }
 0x40a   : > { %v9126_v18 = vrot.slane %v9124_v31, 4  ;;  %v9129_v62 = vrot.slane %v9127_v60, 5  ;;  %v9135_v47 = vrot.slane %v9133_v43, 5  ;;  %v9143_v26 = vshll.u32 %v17900_v61, 16  ;;  %v13706_v20 = vld [vmem:[%s19300_s4 + $0x88] sm:$0xff]   ;;  %v13690_v31 = vld [vmem:[#allocation2 + $0x54] sm:$0xff]  }
 0x40b   : > { %v9591_v8 = vsel %vm8022_vm8, %v12563_v59, 0  ;;  %v9139_v15 = vrot.slane %v9137_v1, 4  ;;  %v9328_v7 = vsel %vm13991_vm6, %v9323_v58, %v9327_v4  ;;  %v9338_v44 = vsel %vm13991_vm6, %v9333_v10, %v9337_v51  ;;  %v13694_v59 = vld [vmem:[%s19300_s4 + $0x10] sm:$0xff]   ;;  %v13691_v43 = vld [vmem:[#allocation2 + $0xa8] sm:$0xff]   ;;  %v13687_v1 = vld [vmem:[#allocation2 + $0x60] sm:$0xff]  }
 0x40c   : > { %13070 = vmatpush3.bf16.xpose.msra.mxu0 %v9591_v8  ;;  %v9130_v40 = vor.u32 %v9129_v62, %v9126_v18  ;;  %v12450_v19 = vcombine.low %v17638_v27, %v17621_v23  ;;  %v12570_v16 = vcombine.low %v9328_v7, %v9338_v44  ;;  %v9145_v45 = vrot.slane %v9143_v26, 5  ;;  %v13681_v27 = vld [vmem:[#allocation2 + $0xcc] sm:$0xff]   ;;  %v13688_v18 = vld [vmem:[#allocation2 + $0xb4] sm:$0xff]   ;;  %v13700_v7 = vld [vmem:[#allocation2 + $0x3c] sm:$0xff]  }
 0x40d   : > { %v9140_v36 = vor.u32 %v9139_v15, %v9135_v47  ;;  %v8951_v24 = vsel %vm8022_vm8, %v13685_v52, 0  ;;  %v10302_v60 = vsel %vm8022_vm8, %v13682_v42, 0  ;;  %v8948_v58 = vsel %vm8022_vm8, %v13690_v31, 0  ;;  %v13695_v10 = vld [vmem:[#allocation2 + $0x48] sm:$0xff]   ;;  %v13699_v62 = vld [vmem:[%s19300_s4 + $0x18] sm:$0xff]  }
 0x40e   : > { %v9131_v49 = vrot.slane %v9130_v40, 4  ;;  %v8269_v29 = vsel %vm8022_vm8, %v12450_v19, 0  ;;  %13576 = vmatprep.subr.msk.bf16.mxu0 %vm8022_vm8, %v12570_v16  ;;  %v10299_v51 = vsel %vm8022_vm8, %v13687_v1, 0  ;;  %v8945_v8 = vsel %vm8022_vm8, %v13695_v10, 0  ;;  %v13692_v15 = vld [vmem:[#allocation2 + $0x54] sm:$0xff]   ;;  %v13693_v40 = vld [vmem:[#allocation2 + $0xa8] sm:$0xff]  }
 0x40f   : > { %v9141_v38 = vrot.slane %v9140_v36, 4  ;;  %v13716_v26 = vld [vmem:[%s19300_s4 + $0x98] sm:$0xff]   ;;  %v10296_v44 = vsel %vm8022_vm8, %v13692_v15, 0  ;;  %v17967_v19 = vld [vmem:[%s19300_s4 + $0x60] sm:$0xff]   ;;  %v8942_v16 = vsel %vm8022_vm8, %v13700_v7, 0  ;;  %v13701_v36 = vld [vmem:[#allocation2 + $0x90] sm:$0xff]  }
 0x410   : > { %13000 = vmatpush3.bf16.xpose.msra.mxu1 %v8269_v29  ;;  %v9136_v4 = vsel %vm13991_vm6, %v9131_v49, %v9135_v47  ;;  %v13696_v47 = vld [vmem:[#allocation2 + $0x9c] sm:$0xff]   ;;  %v13697_v49 = vld [vmem:[#allocation2 + $0x48] sm:$0xff]   ;;  %v17988_v52 = vld [vmem:[#allocation2 + $0xd0] sm:$0xf] }
 0x411   : > { %v9146_v48 = vsel %vm13991_vm6, %v9141_v38, %v9145_v45  ;;  %13561 = vmatprep.subr.msk.bf16.mxu1 %vm8022_vm8, %v13679_v35  ;;  %v17979_v29 = vld [vmem:[%s19300_s4 + $0xc0] sm:$0xff]   ;;  %v13704_v38 = vld [vmem:[#allocation2 + $0x30] sm:$0xff]   ;;  %v10293_v45 = vsel %vm8022_vm8, %v13697_v49, 0  ;;  %v13710_v10 = vld [vmem:[#allocation2 + $0x78] sm:$0xff]  }
 0x412   : > { %v12562_v23 = vcombine.low %v9136_v4, %v9146_v48  ;;  %v13698_v35 = vld [vmem:[#allocation2 + $0x9c] sm:$0xff]   ;;  %v8939_v4 = vsel %vm8022_vm8, %v13704_v38, 0  ;;  %v13705_v48 = vld [vmem:[#allocation2 + $0x84] sm:$0xff]   ;;  %v11082_v15 = vld [vmem:[#allocation2 + $0x6c] sm:$0xe] }
 0x413   : > { %v13712_v31 = vld [vmem:[#allocation2 + $0x24] sm:$0xff]  }
 0x414   : > { %v9588_v2 = vsel %vm8022_vm8, %v12562_v23, 0  ;;  %v13702_v23 = vld [vmem:[#allocation2 + $0x3c] sm:$0xff]   ;;  %v18009_v49 = vld [vmem:[#allocation2 + $0x64] sm:$0xf] }
 0x415   : > { %13072 = vmatpush3.bf16.xpose.msra.mxu0 %v9588_v2  ;;  %v17990_v2 = vld [vmem:[#allocation2 + $0x70] sm:$0xf]  ;;  %19982 = vst [vmem:[#allocation18_spill] sm:$0xff] %v18009_v49 }
 0x416   : > { %13585 = vmatprep.subr.msk.bf16.mxu0 %vm8022_vm8, %v13681_v27  ;;  %v13709_v27 = vld [vmem:[#allocation2 + $0x24] sm:$0xff]   ;;  %v11199_v1 = vrot.slane %v17990_v2, 5 }
 0x417   : > { %13002 = vmatmul.mubr.msk.bf16.vlgmr.msra.gmra.mxu1 %vm8022_vm8, %v17803_v30  ;;  %v13683_v30 = vld [vmem:[#allocation2 + $0xc0] sm:$0xff]  }
 0x418   : > { %13034 = vmatpush3.bf16.xpose.msra.mxu1 %v8951_v24  ;;  %13003 = vmatprep.mubr.msk.bf16.mxu1 %vm8022_vm8, %v13689_v14  ;;  %v13703_v24 = vld [vmem:[#allocation2 + $0x90] sm:$0xff]  }
 0x419   : > { %13562 = vmatprep.subr.msk.bf16.mxu1 %vm8022_vm8, %v13686_v50  ;;  %v13821_v50 = vld [vmem:[#allocation2 + $0xc4] sm:$0xf] }
 0x41a   : > { %v9904_v42 = vrot.slane %v13821_v50, 5 }
 0x41c   : > { %13074 = vmatmul.mubr.msk.bf16.vlgmr.msra.gmra.mxu0 %vm8022_vm8, %v17748_v22  ;;  %v13711_v22 = vld [vmem:[%s19300_s4 + $0x90] sm:$0xff]  }
 0x41d   : > { %13106 = vmatpush3.bf16.xpose.msra.mxu0 %v10302_v60  ;;  %13075 = vmatprep.mubr.msk.bf16.mxu0 %vm8022_vm8, %v13706_v20  ;;  %v17993_v60 = vld [vmem:[#allocation2 + $0xc4] sm:$0xf] }
 0x41e   : > { %13586 = vmatprep.subr.msk.bf16.mxu0 %vm8022_vm8, %v13683_v30  ;;  %19980 = vst [vmem:[#allocation16_spill] sm:$0xff] %v17993_v60  ;;  %v13714_v30 = vld [vmem:[#allocation2 + $0x18] sm:$0xff]  }
 0x41f   : > { %13004 = vmatmul.mubr.msk.bf16.gmra.mxu1 %vm8022_vm8, %v13689_v14  ;;  %v10290_v14 = vsel %vm8022_vm8, %v13702_v23, 0 }
 0x420   : > { %13036 = vmatpush3.bf16.xpose.msra.mxu1 %v8948_v58  ;;  %13005 = vmatprep.mubr.msk.bf16.mxu1 %vm8022_vm8, %v13694_v59  ;;  %v11090_v58 = vld [vmem:[#allocation2 + $0xcc] sm:$0xe] }
 0x421   : > { %13563 = vmatprep.subr.msk.bf16.mxu1 %vm8022_vm8, %v13691_v43  ;;  %v11255_v43 = vrot.slane %v17988_v52, 5 }
 0x423   : > { %v11257_v38 = vrot.slane %v11255_v43, 4 }
 0x424   : > { %13076 = vmatmul.mubr.msk.bf16.gmra.mxu0 %vm8022_vm8, %v13706_v20  ;;  %v13707_v20 = vld [vmem:[#allocation2 + $0x30] sm:$0xff]  }
 0x425   : > { %13108 = vmatpush3.bf16.xpose.msra.mxu0 %v10299_v51  ;;  %13077 = vmatprep.mubr.msk.bf16.mxu0 %vm8022_vm8, %v13711_v22  ;;  %v13717_v51 = vld [vmem:[#allocation2 + $0x18] sm:$0xff]   ;;  %v10287_v7 = vsel %vm8022_vm8, %v13707_v20, 0 }
 0x426   : > { %13587 = vmatprep.subr.msk.bf16.mxu0 %vm8022_vm8, %v13688_v18  ;;  %v17999_v18 = vld [vmem:[#allocation2 + $0xd4] sm:$0x1]  ;;  %v18021_v20 = vld [vmem:[#allocation2 + $0xb8] sm:$0xf] }
 0x427   : > { %13006 = vmatmul.mubr.msk.bf16.gmra.mxu1 %vm8022_vm8, %v13694_v59  ;;  %v13718_v59 = vld [vmem:[#allocation2 + $0xc] sm:$0xff]   ;;  %19984 = vst [vmem:[#allocation20_spill] sm:$0xff] %v18021_v20 }
 0x428   : > { %13038 = vmatpush3.bf16.xpose.msra.mxu1 %v8945_v8  ;;  %13007 = vmatprep.mubr.msk.bf16.mxu1 %vm8022_vm8, %v13699_v62  ;;  %v9906_v8 = vrot.slane %v9904_v42, 4 }
 0x429   : > { %13564 = vmatprep.subr.msk.bf16.mxu1 %vm8022_vm8, %v13696_v47  ;;  %v18001_v47 = vld [vmem:[#allocation2 + $0x74] sm:$0x1] }
 0x42a   : > { %19981 = vst [vmem:[#allocation13_spill] sm:$0xff] %v18001_v47 }
 0x42c   : > { %13078 = vmatmul.mubr.msk.bf16.gmra.mxu0 %vm8022_vm8, %v13711_v22  ;;  %v8936_v22 = vsel %vm8022_vm8, %v13709_v27, 0  ;;  %v8933_v27 = vsel %vm8022_vm8, %v13714_v30, 0  ;;  %v11192_v30 = vrot.slane %v18009_v49, 5  ;;  %v9841_v49 = vrot.slane %v17672_v57, 5  ;;  %v18067_v57 = vld [vmem:[#allocation2 + $0xbc] sm:$0x1] }
 0x42d   : > { %13110 = vmatpush3.bf16.xpose.msra.mxu0 %v10296_v44  ;;  %13079 = vmatprep.mubr.msk.bf16.mxu0 %vm8022_vm8, %v13716_v26  ;;  %v18007_v44 = vsel %vm8022_vm8, %v13712_v31, 0  ;;  %v13708_v31 = vld [vmem:[#allocation2 + $0x84] sm:$0xff]   ;;  %19986 = vst [vmem:[#allocation22_spill] sm:$0xff] %v18067_v57 }
 0x42e   : > { %13588 = vmatprep.subr.msk.bf16.mxu0 %vm8022_vm8, %v13693_v40  ;;  %v13822_v40 = vld [vmem:[#allocation2 + $0xc8] sm:$0x1] }
 0x42f   : > { %13008 = vmatmul.mubr.msk.bf16.gmra.mxu1 %vm8022_vm8, %v13699_v62  ;;  %v9739_v62 = vld [vmem:[#allocation2 + $0xc0] sm:$0xe] }
 0x430   : > { %13040 = vmatpush3.bf16.xpose.msra.mxu1 %v8942_v16  ;;  %13049 = vmatprep.mubr.msk.bf16.mxu1 %vm8022_vm8, %v17967_v19  ;;  %v9907_v16 = vrot.slane %v13822_v40, 5  ;;  %v12605_v50 = vrot.slane %v9739_v62, 9  ;;  %v12709_v62 = vrot.slane %v11082_v15, 9 }
 0x431   : > { %13565 = vmatprep.subr.msk.bf16.mxu1 %vm8022_vm8, %v13701_v36  ;;  %v12717_v36 = vrot.slane %v11090_v58, 9 }
 0x432   : > { %v18025_v58 = vsel %vm13927_vm2, %v9906_v8, %v9907_v16  ;;  %v13715_v8 = vld [vmem:[#allocation2 + $0x6c] sm:$0xff]   ;;  %v11200_v15 = vsel %vm13927_vm2, %v12709_v62, %v11199_v1 }
 0x434   : > { %13080 = vmatmul.mubr.msk.bf16.gmra.mxu0 %vm8022_vm8, %v13716_v26  ;;  %v11248_v26 = vrot.slane %v17993_v60, 5  ;;  %v9890_v60 = vrot.slane %v17688_v25, 5 }
 0x435   : > { %13112 = vmatpush3.bf16.xpose.msra.mxu0 %v10293_v45  ;;  %13121 = vmatprep.mubr.msk.bf16.mxu0 %vm8022_vm8, %v17979_v29  ;;  %v11258_v45 = vrot.slane %v17999_v18, 5 }
 0x436   : > { %13589 = vmatprep.subr.msk.bf16.mxu0 %vm8022_vm8, %v13698_v35  ;;  %v11201_v35 = vrot.slane %v11199_v1, 4  ;;  %v11250_v40 = vrot.slane %v11248_v26, 4  ;;  %v18073_v1 = vld [vmem:[#allocation2 + $0x58] sm:$0xf] }
 0x437   : > { %v18041_v16 = vsel %vm13927_vm2, %v11257_v38, %v11258_v45  ;;  %v11241_v38 = vrot.slane %v18021_v20, 5  ;;  %19987 = vst [vmem:[#allocation19_spill] sm:$0xff] %v18073_v1  ;;  %v13713_v20 = vld [vmem:[#allocation2 + $0x78] sm:$0xff]  }
 0x438   : > { %13042 = vmatpush3.bf16.xpose.msra.mxu1 %v8939_v4  ;;  %v18012_v4 = vld [vmem:[#allocation2 + $0xc8] sm:$0x1] }
 0x439   : > { %13566 = vmatprep.subr.msk.bf16.mxu1 %vm8022_vm8, %v13705_v48  ;;  %19983 = vst [vmem:[#allocation15_spill] sm:$0xff] %v18012_v4  ;;  %v13823_v48 = vld [vmem:[#allocation2 + $0x64] sm:$0xf] }
 0x43a   : > { %v9848_v23 = vrot.slane %v13823_v48, 5  ;;  %v11251_v48 = vrot.slane %v18012_v4, 5  ;;  %v18049_v4 = vld [vmem:[#allocation2 + $0x68] sm:$0x1] }
 0x43b   : > { %19985 = vst [vmem:[#allocation17_spill] sm:$0xff] %v18049_v4 }
 0x43c   : > { %v18054_v45 = vsel %vm13927_vm2, %v11250_v40, %v11251_v48 }
 0x43d   : > { %13114 = vmatpush3.bf16.xpose.msra.mxu0 %v10290_v14  ;;  %v18016_v14 = vsel %vm8022_vm8, %v13717_v51, 0  ;;  %v18031_v51 = vsel %vm13927_vm2, %v12605_v50, %v9904_v42  ;;  %v9850_v42 = vrot.slane %v9848_v23, 4  ;;  %v13824_v50 = vld [vmem:[#allocation2 + $0xb8] sm:$0xf] }
 0x43e   : > { %13590 = vmatprep.subr.msk.bf16.mxu0 %vm8022_vm8, %v13703_v24  ;;  %v18019_v24 = vsel %vm8022_vm8, %v13718_v59, 0  ;;  %v18035_v59 = vsel %vm13927_vm2, %v12717_v36, %v11255_v43  ;;  %v12625_v43 = vcombine.low %v18031_v51, %v18025_v58  ;;  %v11081_v51 = vld [vmem:[#allocation2 + $0x60] sm:$0xe] }
 0x440   : > { %13044 = vmatpush3.bf16.xpose.msra.mxu1 %v8936_v22  ;;  %v11202_v22 = vrot.slane %v18001_v47, 5  ;;  %v9897_v47 = vrot.slane %v13824_v50, 5  ;;  %v11194_v50 = vrot.slane %v11192_v30, 4 }
 0x441   : > { %13567 = vmatprep.subr.msk.bf16.mxu1 %vm8022_vm8, %v13710_v10  ;;  %v11089_v10 = vld [vmem:[#allocation2 + $0xc0] sm:$0xe] }
 0x442   : > { %v12716_v36 = vrot.slane %v11089_v10, 9  ;;  %v9899_v48 = vrot.slane %v9897_v47, 4 }
 0x444   : > { %v18062_v10 = vsel %vm13927_vm2, %v12716_v36, %v11248_v26  ;;  %v11243_v36 = vrot.slane %v11241_v38, 4 }
 0x445   : > { %13116 = vmatpush3.bf16.xpose.msra.mxu0 %v10287_v7  ;;  %v11203_v7 = vsel %vm13927_vm2, %v11201_v35, %v11202_v22  ;;  %v13825_v35 = vld [vmem:[#allocation2 + $0x68] sm:$0x1] }
 0x446   : > { %13591 = vmatprep.subr.msk.bf16.mxu0 %vm8022_vm8, %v13708_v31  ;;  %v9738_v31 = vld [vmem:[#allocation2 + $0xb4] sm:$0xe]  ;;  %v9851_v22 = vrot.slane %v13825_v35, 5  ;;  %v12729_v58 = vcombine.low %v11200_v15, %v11203_v7  ;;  %v11195_v35 = vrot.slane %v18049_v4, 5  ;;  %v13826_v15 = vld [vmem:[#allocation2 + $0xbc] sm:$0x1] }
 0x447   : > { %v12604_v62 = vrot.slane %v9738_v31, 9  ;;  %v9900_v26 = vrot.slane %v13826_v15, 5  ;;  %v9843_v4 = vrot.slane %v9841_v49, 4  ;;  %v11244_v15 = vrot.slane %v18067_v57, 5  ;;  %v9737_v57 = vld [vmem:[#allocation2 + $0xa8] sm:$0xe] }
 0x448   : > { %13046 = vmatpush3.bf16.xpose.msra.mxu1 %v8933_v27  ;;  %v12597_v27 = vrot.slane %v9731_v39, 9  ;;  %v9852_v40 = vsel %vm13927_vm2, %v9850_v42, %v9851_v22  ;;  %v9730_v39 = vld [vmem:[#allocation2 + $0x54] sm:$0xe]  ;;  %v12708_v42 = vrot.slane %v11081_v51, 9  ;;  %v11196_v31 = vsel %vm13927_vm2, %v11194_v50, %v11195_v35  ;;  %v18087_v51 = vld [vmem:[#allocation2 + $0xac] sm:$0xf] }
 0x449   : > { %13568 = vmatprep.subr.msk.bf16.mxu1 %vm8022_vm8, %v13715_v8  ;;  %v11088_v22 = vld [vmem:[#allocation2 + $0xb4] sm:$0xe]  ;;  %v18080_v8 = vsel %vm8022_vm8, %v12729_v58, 0  ;;  %19988 = vst [vmem:[#allocation24_spill] sm:$0xff] %v18087_v51  ;;  %v18092_v50 = vsel %vm13927_vm2, %v9899_v48, %v9900_v26  ;;  %v9892_v48 = vrot.slane %v9890_v60, 4 }
 0x44a   : > { %v9849_v7 = vsel %vm13927_vm2, %v12597_v27, %v9848_v23  ;;  %v18084_v27 = vsel %vm13927_vm2, %v12604_v62, %v9897_v47  ;;  %v11193_v25 = vsel %vm13927_vm2, %v12708_v42, %v11192_v30  ;;  %v12715_v47 = vrot.slane %v11088_v22, 9  ;;  %v11080_v26 = vld [vmem:[#allocation2 + $0x54] sm:$0xe]  ;;  %v11087_v22 = vld [vmem:[#allocation2 + $0xa8] sm:$0xe] }
 0x44b   : > { %v12617_v23 = vcombine.low %v9849_v7, %v9852_v40  ;;  %v11185_v40 = vrot.slane %v18073_v1, 5  ;;  %v12728_v35 = vcombine.low %v11193_v25, %v11196_v31  ;;  %v18099_v62 = vsel %vm13927_vm2, %v11243_v36, %v11244_v15  ;;  %v13828_v25 = vld [vmem:[#allocation2 + $0xb0] sm:$0x1] }
 0x44c   : > { %v12596_v7 = vrot.slane %v9730_v39, 9  ;;  %v11234_v30 = vrot.slane %v18087_v51, 5  ;;  %v9834_v42 = vrot.slane %v17712_v33, 5  ;;  %v12624_v36 = vcombine.low %v18084_v27, %v18092_v50 }
 0x44d   : > { %13118 = vmatpush3.bf16.xpose.msra.mxu0 %v18007_v44  ;;  %v13827_v44 = vld [vmem:[#allocation2 + $0x5c] sm:$0x1]  ;;  %v10011_v31 = vsel %vm8022_vm8, %v12617_v23, 0  ;;  %v18112_v39 = vsel %vm13927_vm2, %v12715_v47, %v11241_v38  ;;  %v12603_v15 = vrot.slane %v9737_v57, 9  ;;  %v9893_v33 = vrot.slane %v13828_v25, 5  ;;  %v18133_v57 = vld [vmem:[%s19300_s4 + $0x68] sm:$0xff]  }
 0x44e   : > { %13592 = vmatprep.subr.msk.bf16.mxu0 %vm8022_vm8, %v13713_v20  ;;  %v9844_v58 = vrot.slane %v13827_v44, 5  ;;  %v11187_v44 = vrot.slane %v11185_v40, 4  ;;  %v9883_v23 = vrot.slane %v17724_v17, 5  ;;  %v18122_v27 = vsel %vm8022_vm8, %v12728_v35, 0  ;;  %v18128_v47 = vld [vmem:[#allocation2 + $0xa0] sm:$0xf] }
 0x44f   : > { %v18137_v17 = vsel %vm13927_vm2, %v9892_v48, %v9893_v33  ;;  %v9729_v25 = vld [vmem:[#allocation2 + $0x48] sm:$0xe]  ;;  %v9836_v38 = vrot.slane %v9834_v42, 4  ;;  %v9837_v51 = vrot.slane %v17714_v11, 5  ;;  %v19990_v48 = vcombine.low %v18035_v59, %v18041_v16  ;;  %v18236_v11 = vld [vmem:[#allocation2 + $0x44] sm:$0x1] }
 0x450   : > { %13048 = vmatpush3.bf16.xpose.msra.mxu1 %v18019_v24  ;;  %v9845_v20 = vsel %vm13927_vm2, %v9843_v4, %v9844_v58  ;;  %v9842_v4 = vsel %vm13927_vm2, %v12596_v7, %v9841_v49  ;;  %v18116_v24 = vld [vmem:[#allocation2 + $0x5c] sm:$0x1]  ;;  %v12707_v58 = vrot.slane %v11080_v26, 9  ;;  %v18126_v49 = vld [vmem:[#allocation2 + $0x4c] sm:$0xf]  ;;  %v11236_v7 = vrot.slane %v11234_v30, 4 }
 0x451   : > { %13577 = vmatprep.subr.msk.bf16.mxu1 %vm8022_vm8, %v12625_v43  ;;  %19989 = vst [vmem:[#allocation21_spill] sm:$0xff] %v18116_v24  ;;  %v18118_v43 = vld [vmem:[#allocation2 + $0xb0] sm:$0x1]  ;;  %v12616_v50 = vcombine.low %v9842_v4, %v9845_v20  ;;  %v11188_v35 = vrot.slane %v18116_v24, 5  ;;  %v18143_v20 = vsel %vm13927_vm2, %v12603_v15, %v9890_v60  ;;  %v12714_v26 = vrot.slane %v11087_v22, 9 }
 0x452   : > { %v11237_v4 = vrot.slane %v18118_v43, 5  ;;  %v9736_v24 = vld [vmem:[#allocation2 + $0x9c] sm:$0xe]  ;;  %v9885_v1 = vrot.slane %v9883_v23, 4  ;;  %v11227_v60 = vrot.slane %v18128_v47, 5  ;;  %v12595_v59 = vrot.slane %v9729_v25, 9 }
 0x453   : > { %v11189_v33 = vsel %vm13927_vm2, %v11187_v44, %v11188_v35  ;;  %v10008_v22 = vsel %vm8022_vm8, %v12616_v50, 0  ;;  %v19412_v16 = vrot.slane %v17757_v0, 5  ;;  %v11186_v15 = vsel %vm13927_vm2, %v12707_v58, %v11185_v40  ;;  %v18172_v35 = vld [vmem:[#allocation2 + $0x50] sm:$0x1]  ;;  %v11079_v25 = vld [vmem:[#allocation2 + $0x48] sm:$0xe] }
 0x454   : > { %v18167_v44 = vsel %vm13927_vm2, %v11236_v7, %v11237_v4  ;;  %v9886_v50 = vrot.slane %v17739_v28, 5  ;;  %v9835_v40 = vsel %vm13927_vm2, %v12595_v59, %v9834_v42  ;;  %v12602_v58 = vrot.slane %v9736_v24, 9  ;;  %v18181_v7 = vld [vmem:[#allocation2 + $0xa4] sm:$0x1]  ;;  %v18183_v4 = vld [vmem:[#allocation2 + $0x40] sm:$0xf] }
 0x455   : > { %13120 = vmatpush3.bf16.xpose.msra.mxu0 %v18016_v14  ;;  %v11178_v14 = vrot.slane %v18126_v49, 5  ;;  %19991 = vst [vmem:[#allocation26_spill] sm:$0xff] %v18181_v7  ;;  %v18188_v28 = vld [vmem:[%s19300_s4 + $0xc8] sm:$0xff]   ;;  %v9728_v59 = vld [vmem:[#allocation2 + $0x3c] sm:$0xe]  ;;  %v9830_v42 = vrot.slane %v17763_v12, 5 }
 0x456   : > { %13601 = vmatprep.subr.msk.bf16.mxu0 %vm8022_vm8, %v19990_v48  ;;  %v18177_v48 = vsel %vm13927_vm2, %v12714_v26, %v11234_v30  ;;  %v11086_v30 = vld [vmem:[#allocation2 + $0x9c] sm:$0xe]  ;;  %v9876_v26 = vrot.slane %v17776_v37, 5  ;;  %v12706_v37 = vrot.slane %v11079_v25, 9  ;;  %v19992_v25 = vcombine.low %v18062_v10, %v18054_v45  ;;  %v9735_v12 = vld [vmem:[#allocation2 + $0x90] sm:$0xe] }
 0x457   : > { %13050 = vmatmul.mubr.msk.bf16.vlgmr.msra.gmra.mxu1 %vm8022_vm8, %v17967_v19  ;;  %v9838_v19 = vsel %vm13927_vm2, %v9836_v38, %v9837_v51  ;;  %v18192_v51 = vsel %vm13927_vm2, %v9885_v1, %v9886_v50  ;;  %v11229_v38 = vrot.slane %v11227_v60, 4  ;;  %v18208_v1 = vld [vmem:[%s19300_s4 + $0x70] sm:$0xff]   ;;  %v11181_v50 = vrot.slane %v18172_v35, 5 }
 0x458   : > { %13082 = vmatpush3.bf16.xpose.msra.mxu1 %v10011_v31  ;;  %13051 = vmatprep.mubr.msk.bf16.mxu1 %vm8022_vm8, %v18133_v57  ;;  %v12727_v31 = vcombine.low %v11186_v15, %v11189_v33  ;;  %v12615_v24 = vcombine.low %v9835_v40, %v9838_v19  ;;  %v18199_v33 = vsel %vm13927_vm2, %v12602_v58, %v9883_v23  ;;  %v9829_v15 = vrot.slane %v19412_v16, 4  ;;  %v18220_v16 = vld [vmem:[#allocation2 + $0x94] sm:$0xf] }
 0x459   : > { %13578 = vmatprep.subr.msk.bf16.mxu1 %vm8022_vm8, %v12624_v36  ;;  %v11180_v36 = vrot.slane %v11178_v14, 4  ;;  %v11230_v19 = vrot.slane %v18181_v7, 5  ;;  %v11171_v23 = vrot.slane %v18183_v4, 5  ;;  %v12713_v58 = vrot.slane %v11086_v30, 9  ;;  %v11078_v7 = vld [vmem:[#allocation2 + $0x3c] sm:$0xe] }
 0x45a   : > { %v18215_v40 = vsel %vm8022_vm8, %v12727_v31, 0  ;;  %v10005_v45 = vsel %vm8022_vm8, %v12615_v24, 0  ;;  %v12594_v10 = vrot.slane %v9728_v59, 9  ;;  %v11085_v24 = vld [vmem:[#allocation2 + $0x90] sm:$0xe]  ;;  %v11220_v59 = vrot.slane %v18220_v16, 5 }
 0x45b   : > { %v11182_v31 = vsel %vm13927_vm2, %v11180_v36, %v11181_v50  ;;  %v18234_v30 = vsel %vm13927_vm2, %v11229_v38, %v11230_v19  ;;  %v9820_v36 = vrot.slane %v17796_v5, 5  ;;  %v18250_v38 = vsel %vm13927_vm2, %v12713_v58, %v11227_v60 }
 0x45c   : > { %13122 = vmatmul.mubr.msk.bf16.vlgmr.msra.gmra.mxu0 %vm8022_vm8, %v17979_v29  ;;  %v9878_v29 = vrot.slane %v9876_v26, 4  ;;  %v11173_v50 = vrot.slane %v11171_v23, 4  ;;  %v12601_v19 = vrot.slane %v9735_v12, 9  ;;  %v18279_v12 = vld [vmem:[#allocation2 + $0x98] sm:$0x1] }
 0x45d   : > { %13154 = vmatpush3.bf16.xpose.msra.mxu0 %v18080_v8  ;;  %13123 = vmatprep.mubr.msk.bf16.mxu0 %vm8022_vm8, %v18188_v28  ;;  %v11179_v8 = vsel %vm13927_vm2, %v12706_v37, %v11178_v14  ;;  %v9831_v14 = vsel %vm13927_vm2, %v9829_v15, %v9830_v42  ;;  %v18244_v37 = vld [vmem:[#allocation2 + $0x34] sm:$0xf]  ;;  %v19993_v42 = vcombine.low %v18143_v20, %v18137_v17  ;;  %v19994_v15 = vrot.slane %v17757_v0, 5 }
 0x45e   : > { %13602 = vmatprep.subr.msk.bf16.mxu0 %vm8022_vm8, %v19992_v25  ;;  %v12726_v5 = vcombine.low %v11179_v8, %v11182_v31  ;;  %v11174_v20 = vrot.slane %v18236_v11, 5  ;;  %v9727_v25 = vld [vmem:[#allocation2 + $0x30] sm:$0xe]  ;;  %v11164_v8 = vrot.slane %v18244_v37, 5  ;;  %v18277_v0 = vsel %vm13927_vm2, %v12601_v19, %v9876_v26 }
 0x45f   : > { %13052 = vmatmul.mubr.msk.bf16.gmra.mxu1 %vm8022_vm8, %v18133_v57  ;;  %v9879_v57 = vrot.slane %v17781_v6, 5  ;;  %v9828_v60 = vsel %vm13927_vm2, %v12594_v10, %v19994_v15  ;;  %v18267_v6 = vld [vmem:[%s19300_s4 + $0xd0] sm:$0xff]   ;;  %v12705_v31 = vrot.slane %v11078_v7, 9  ;;  %v12712_v10 = vrot.slane %v11085_v24, 9 }
 0x460   : > { %13084 = vmatpush3.bf16.xpose.msra.mxu1 %v10008_v22  ;;  %13053 = vmatprep.mubr.msk.bf16.mxu1 %vm8022_vm8, %v18208_v1  ;;  %v12614_v58 = vcombine.low %v9828_v60, %v9831_v14  ;;  %v18284_v14 = vld [vmem:[%s19300_s4 + $0x78] sm:$0xff]   ;;  %v19414_v15 = vrot.slane %v17814_v46, 5  ;;  %v18289_v60 = vld [vmem:[#allocation2 + $0x88] sm:$0xf]  ;;  %v18296_v7 = vsel %vm8022_vm8, %v12726_v5, 0  ;;  %v9823_v19 = vrot.slane %v17806_v41, 5 }
 0x461   : > { %13579 = vmatprep.subr.msk.bf16.mxu1 %vm8022_vm8, %v19993_v42  ;;  %v18271_v17 = vsel %vm13927_vm2, %v9878_v29, %v9879_v57  ;;  %v9822_v42 = vrot.slane %v9820_v36, 4  ;;  %v11175_v29 = vsel %vm13927_vm2, %v11173_v50, %v11174_v20  ;;  %v11222_v57 = vrot.slane %v11220_v59, 4  ;;  %v18303_v20 = vld [vmem:[#allocation2 + $0x38] sm:$0x1]  ;;  %v11077_v22 = vld [vmem:[#allocation2 + $0x30] sm:$0xe] }
 0x462   : > { %v11172_v50 = vsel %vm13927_vm2, %v12705_v31, %v11171_v23  ;;  %v18314_v5 = vsel %vm13927_vm2, %v12712_v10, %v11220_v59  ;;  %v11223_v23 = vrot.slane %v18279_v12, 5  ;;  %v9734_v41 = vld [vmem:[#allocation2 + $0x84] sm:$0xe]  ;;  %v11166_v31 = vrot.slane %v11164_v8, 4 }
 0x463   : > { %v12725_v24 = vcombine.low %v11172_v50, %v11175_v29  ;;  %v12593_v26 = vrot.slane %v9727_v25, 9  ;;  %v9726_v10 = vld [vmem:[#allocation2 + $0x24] sm:$0xe]  ;;  %v19996_v25 = vrot.slane %v17835_v21, 5  ;;  %v12600_v50 = vrot.slane %v9734_v41, 9 }
 0x464   : > { %13124 = vmatmul.mubr.msk.bf16.gmra.mxu0 %vm8022_vm8, %v18188_v28  ;;  %v10002_v28 = vsel %vm8022_vm8, %v12614_v58, 0  ;;  %v18326_v59 = vsel %vm13927_vm2, %v11222_v57, %v11223_v23  ;;  %v9871_v58 = vrot.slane %v19414_v15, 4  ;;  %v12704_v57 = vrot.slane %v11077_v22, 9  ;;  %v18345_v23 = vld [vmem:[%s19300_s4 + $0xd8] sm:$0xff]  }
 0x465   : > { %13156 = vmatpush3.bf16.xpose.msra.mxu0 %v18122_v27  ;;  %13125 = vmatprep.mubr.msk.bf16.mxu0 %vm8022_vm8, %v18267_v6  ;;  %v19995_v27 = vcombine.low %v18112_v39, %v18099_v62  ;;  %v9824_v62 = vsel %vm13927_vm2, %v9822_v42, %v9823_v19  ;;  %v11213_v39 = vrot.slane %v18289_v60, 5  ;;  %v9815_v29 = vrot.slane %v19996_v25, 4  ;;  %v18353_v22 = vld [vmem:[#allocation2 + $0x7c] sm:$0xf] }
 0x466   : > { %v19997_v42 = vcombine.low %v18199_v33, %v18192_v51  ;;  %v9862_v19 = vrot.slane %v17847_v54, 5  ;;  %v9872_v15 = vrot.slane %v17822_v55, 5  ;;  %v18350_v33 = vld [vmem:[#allocation2 + $0x8c] sm:$0x1]  ;;  %v18356_v54 = vsel %vm8022_vm8, %v12725_v24, 0  ;;  %v18372_v24 = vld [vmem:[%s19300_s4 + $0xa0] sm:$0xff]  }
 0x467   : > { %13603 = vmatprep.subr.msk.bf16.mxu0 %vm8022_vm8, %v19995_v27  ;;  %13054 = vmatmul.mubr.msk.bf16.gmra.mxu1 %vm8022_vm8, %v18208_v1  ;;  %v11167_v1 = vrot.slane %v18303_v20, 5  ;;  %v18340_v27 = vld [vmem:[#allocation2 + $0x28] sm:$0xf]  ;;  %19998 = vst [vmem:[#allocation23_spill] sm:$0xff] %v18350_v33  ;;  %v11165_v41 = vsel %vm13927_vm2, %v12704_v57, %v11164_v8  ;;  %v11215_v55 = vrot.slane %v11213_v39, 4 }
 0x468   : > { %13086 = vmatpush3.bf16.xpose.msra.mxu1 %v10005_v45  ;;  %13055 = vmatprep.mubr.msk.bf16.mxu1 %vm8022_vm8, %v18284_v14  ;;  %v9821_v45 = vsel %vm13927_vm2, %v12593_v26, %v9820_v36  ;;  %v9816_v36 = vrot.slane %v17839_v56, 5  ;;  %v18396_v26 = vld [vmem:[#allocation2 + $0x2c] sm:$0x1] }
 0x469   : > { %13580 = vmatprep.subr.msk.bf16.mxu1 %vm8022_vm8, %v19997_v42  ;;  %v12613_v25 = vcombine.low %v9821_v45, %v9824_v62  ;;  %v11168_v51 = vsel %vm13927_vm2, %v11166_v31, %v11167_v1  ;;  %v11084_v62 = vld [vmem:[#allocation2 + $0x84] sm:$0xe]  ;;  %v18364_v31 = vsel %vm13927_vm2, %v9871_v58, %v9872_v15  ;;  %v12592_v1 = vrot.slane %v9726_v10, 9  ;;  %v9733_v58 = vld [vmem:[#allocation2 + $0x78] sm:$0xe] }
 0x46a   : > { %v9817_v56 = vsel %vm13927_vm2, %v9815_v29, %v9816_v36  ;;  %v11157_v42 = vrot.slane %v18340_v27, 5  ;;  %v12724_v8 = vcombine.low %v11165_v41, %v11168_v51  ;;  %v11216_v15 = vrot.slane %v18350_v33, 5  ;;  %v11076_v33 = vld [vmem:[#allocation2 + $0x24] sm:$0xe] }
 0x46b   : > { %v9864_v10 = vrot.slane %v9862_v19, 4  ;;  %v11206_v45 = vrot.slane %v18353_v22, 5  ;;  %v19999_v29 = vcombine.low %v18177_v48, %v18167_v44  ;;  %v9999_v57 = vsel %vm8022_vm8, %v12613_v25, 0  ;;  %v9725_v25 = vld [vmem:[#allocation2 + $0x18] sm:$0xe] }
 0x46c   : > { %13126 = vmatmul.mubr.msk.bf16.gmra.mxu0 %vm8022_vm8, %v18267_v6  ;;  %v20000_v6 = vrot.slane %v17814_v46, 5  ;;  %v12711_v51 = vrot.slane %v11084_v62, 9  ;;  %v20001_v36 = vrot.slane %v17835_v21, 5  ;;  %v18404_v46 = vsel %vm13927_vm2, %v11215_v55, %v11216_v15  ;;  %v11083_v21 = vld [vmem:[#allocation2 + $0x78] sm:$0xe] }
 0x46d   : > { %13158 = vmatpush3.bf16.xpose.msra.mxu0 %v18215_v40  ;;  %13127 = vmatprep.mubr.msk.bf16.mxu0 %vm8022_vm8, %v18345_v23  ;;  %v20002_v55 = vcombine.low %v18277_v0, %v18271_v17  ;;  %v11160_v15 = vrot.slane %v18396_v26, 5 }
 0x46e   : > { %13604 = vmatprep.subr.msk.bf16.mxu0 %vm8022_vm8, %v19999_v29  ;;  %v18390_v40 = vsel %vm13927_vm2, %v12600_v50, %v20000_v6  ;;  %v9814_v41 = vsel %vm13927_vm2, %v12592_v1, %v20001_v36  ;;  %v9865_v50 = vrot.slane %v17851_v34, 5  ;;  %v18409_v62 = vsel %vm13927_vm2, %v12711_v51, %v11213_v39  ;;  %v9732_v51 = vld [vmem:[#allocation2 + $0x6c] sm:$0xe] }
 0x46f   : > { %13056 = vmatmul.mubr.msk.bf16.gmra.mxu1 %vm8022_vm8, %v18284_v14  ;;  %v12620_v44 = vcombine.low %v18390_v40, %v18364_v31  ;;  %v12612_v48 = vcombine.low %v9814_v41, %v9817_v56  ;;  %v12599_v1 = vrot.slane %v9733_v58, 9  ;;  %v11159_v29 = vrot.slane %v11157_v42, 4  ;;  %v18411_v14 = vld [vmem:[#allocation2 + $0x80] sm:$0x1]  ;;  %v10462_v58 = vld [vmem:[#allocation2 + $0xcc] sm:$0xf] }
 0x470   : > { %13088 = vmatpush3.bf16.xpose.msra.mxu1 %v10002_v28  ;;  %v9806_v31 = vrot.slane %v17865_v9, 5  ;;  %13097 = vmatprep.mubr.msk.bf16.mxu1 %vm8022_vm8, %v18372_v24  ;;  %v18421_v34 = vsel %vm8022_vm8, %v12724_v8, 0  ;;  %v18425_v28 = vsel %vm13927_vm2, %v9864_v10, %v9865_v50  ;;  %v11208_v39 = vrot.slane %v11206_v45, 4  ;;  %v18431_v9 = vld [vmem:[%s19300_s4 + $0x100] sm:$0xff]  }
 0x471   : > { %13581 = vmatprep.subr.msk.bf16.mxu1 %vm8022_vm8, %v20002_v55  ;;  %v9855_v56 = vrot.slane %v17879_v63, 5  ;;  %v18437_v0 = vsel %vm13927_vm2, %v12599_v1, %v9862_v19  ;;  %v12703_v8 = vrot.slane %v11076_v33, 9  ;;  %v18441_v10 = vsel %vm8022_vm8, %v12612_v48, 0 }
 0x472   : > { %v12710_v63 = vrot.slane %v11083_v21, 9  ;;  %v11209_v6 = vrot.slane %v18411_v14, 5  ;;  %v12591_v40 = vrot.slane %v9725_v25, 9  ;;  %v12619_v36 = vcombine.low %v18437_v0, %v18425_v28  ;;  %v18457_v21 = vld [vmem:[#allocation2 + $0x1c] sm:$0xf] }
 0x473   : > { %v11158_v41 = vsel %vm13927_vm2, %v12703_v8, %v11157_v42  ;;  %v11161_v19 = vsel %vm13927_vm2, %v11159_v29, %v11160_v15  ;;  %v9808_v33 = vrot.slane %v9806_v31, 4  ;;  %v9857_v50 = vrot.slane %v9855_v56, 4 }
 0x474   : > { %13128 = vmatmul.mubr.msk.bf16.gmra.mxu0 %vm8022_vm8, %v18345_v23  ;;  %v18455_v48 = vsel %vm13927_vm2, %v11208_v39, %v11209_v6  ;;  %v10835_v25 = vshrl.u32 %v10462_v58, 16  ;;  %v10838_v1 = vshll.u32 %v10462_v58, 16  ;;  %v20003_v42 = vcombine.low %v18250_v38, %v18234_v30  ;;  %v11075_v38 = vld [vmem:[#allocation2 + $0x18] sm:$0xe]  ;;  %v18477_v58 = vld [vmem:[#allocation2 + $0xc] sm:$0xe] }
 0x475   : > { %13160 = vmatpush3.bf16.xpose.msra.mxu0 %v18296_v7  ;;  %13169 = vmatprep.mubr.msk.bf16.mxu0 %vm8022_vm8, %v18431_v9  ;;  %v9809_v23 = vrot.slane %v17869_v3, 5  ;;  %v12598_v7 = vrot.slane %v9732_v51, 9  ;;  %v10844_v29 = vshll.u32 %v17988_v52, 16  ;;  %v10848_v55 = vshrl.u32 %v17988_v52, 16  ;;  %v10438_v3 = vld [vmem:[#allocation2 + $0x6c] sm:$0xf] }
 0x476   : > { %13605 = vmatprep.subr.msk.bf16.mxu0 %vm8022_vm8, %v20003_v42  ;;  %v12723_v39 = vcombine.low %v11158_v41, %v11161_v19  ;;  %v18470_v8 = vsel %vm13927_vm2, %v12710_v63, %v11206_v45  ;;  %v18474_v15 = vsel %vm13927_vm2, %v12591_v40, %v9806_v31  ;;  %v9858_v30 = vrot.slane %v17883_v32, 5  ;;  %v18489_v31 = vld [vmem:[#allocation2 + $0x20] sm:$0x1]  ;;  %v11479_v63 = vld [vmem:[%s19301_s5 + $0x10] sm:$0xff] }
 0x477   : > { %v18483_v52 = vsel %vm13927_vm2, %v9808_v33, %v9809_v23  ;;  %v18487_v45 = vsel %vm13927_vm2, %v12598_v7, %v9855_v56  ;;  %v11150_v32 = vrot.slane %v18457_v21, 5  ;;  %v19416_v56 = vrot.slane %v17891_v13, 5  ;;  %v10459_v19 = vld [vmem:[#allocation2 + $0xc0] sm:$0xf]  ;;  %11497 = vperm.xlu1 %13636, %v11479_v63  }
 0x478   : > { %13090 = vmatpush3.bf16.xpose.msra.mxu1 %v9999_v57  ;;  %v11477_v57 = vld [vmem:[%s19301_s5] sm:$0xff]  ;;  %v18501_v40 = vsel %vm13927_vm2, %v9857_v50, %v9858_v30  ;;  %v10837_v51 = vrot.slane %v10835_v25, 4  ;;  %v10840_v41 = vrot.slane %v10838_v1, 5  ;;  %v18504_v33 = vrot.slane %v10844_v29, 5  ;;  %v11478_v1 = vld [vmem:[%s19301_s5 + $0x8] sm:$0xff] }
 0x479   : > { %13582 = vmatprep.subr.msk.bf16.mxu1 %vm8022_vm8, %v12620_v44  ;;  %v10850_v42 = vrot.slane %v10848_v55, 4  ;;  %v10643_v23 = vshrl.u32 %v10438_v3, 16  ;;  %v10646_v7 = vshll.u32 %v10438_v3, 16  ;;  %11487 = vperm.xlu0 %13635, %v11477_v57   ;;  %v11480_v44 = vld [vmem:[%s19301_s5 + $0x18] sm:$0xff]  ;;  %v18510_v6 = vsel %vm8022_vm8, %v12723_v39, 0 }
 0x47a   : > { %v12702_v50 = vrot.slane %v11075_v38, 9  ;;  %v10652_v30 = vshll.u32 %v17990_v2, 16  ;;  %v10656_v25 = vshrl.u32 %v17990_v2, 16  ;;  %v12611_v29 = vcombine.low %v18474_v15, %v18483_v52 }
 0x47b   : > { %v12618_v55 = vcombine.low %v18487_v45, %v18501_v40  ;;  %v11153_v3 = vrot.slane %v18489_v31, 5  ;;  %v12590_v39 = vrot.slane %v18477_v58, 9  ;;  %v11152_v38 = vrot.slane %v11150_v32, 4  ;;  %11502 = vperm.xlu1 %13636, %v11480_v44   ;;  %v20006_v44 = vld [vmem:[#allocation18_spill] sm:$0xff] }
 0x47c   : > { %v9801_v2 = vrot.slane %v19416_v56, 4  ;;  %v10841_v63 = vor.u32 %v10840_v41, %v10837_v51  ;;  %v10854_v57 = vshll.u32 %v17999_v18, 16  ;;  %v20004_v15 = vcombine.low %v18314_v5, %v18326_v59  ;;  %v20005_v18 = vld [vmem:[#allocation16_spill] sm:$0xff] }
 0x47d   : > { %13162 = vmatpush3.bf16.xpose.msra.mxu0 %v18356_v54  ;;  %v10851_v52 = vor.u32 %v10850_v42, %v18504_v33  ;;  %v10645_v45 = vrot.slane %v10643_v23, 4  ;;  %v10648_v40 = vrot.slane %v10646_v7, 5  ;;  %v10811_v58 = vshrl.u32 %v10459_v19, 16  ;;  %11492 = vperm.xlu0 %13635, %v11478_v1   ;;  %v10435_v59 = vld [vmem:[#allocation2 + $0x60] sm:$0xf] }
 0x47e   : > { %13606 = vmatprep.subr.msk.bf16.mxu0 %vm8022_vm8, %v20004_v15  ;;  %v9802_v54 = vrot.slane %v17900_v61, 5  ;;  %v18533_v17 = vrot.slane %v10652_v30, 5  ;;  %v10658_v56 = vrot.slane %v10656_v25, 4  ;;  %v10814_v51 = vshll.u32 %v10459_v19, 16 }
 0x47f   : > { %v10820_v41 = vshll.u32 %v20005_v18, 16  ;;  %v10824_v5 = vshrl.u32 %v20005_v18, 16  ;;  %v10628_v15 = vshll.u32 %v20006_v44, 16  ;;  %v10632_v42 = vshrl.u32 %v20006_v44, 16 }
 0x480   : > { %13092 = vmatpush3.bf16.xpose.msra.mxu1 %v18441_v10  ;;  %v18546_v61 = vsel %vm13927_vm2, %v12702_v50, %v11150_v32  ;;  %v18550_v10 = vsel %vm13927_vm2, %v11152_v38, %v11153_v3  ;;  %v18554_v19 = vsel %vm13927_vm2, %v9801_v2, %v9802_v54  ;;  %v10856_v23 = vrot.slane %v10854_v57, 5  ;;  %v20008_v57 = vld [vmem:[#allocation13_spill] sm:$0xff] }
 0x481   : > { %13583 = vmatprep.subr.msk.bf16.mxu1 %vm8022_vm8, %v12619_v36  ;;  %v10842_v7 = vrot.slane %v10841_v63, 4  ;;  %v10852_v30 = vrot.slane %v10851_v52, 4  ;;  %v10649_v25 = vor.u32 %v10648_v40, %v10645_v45  ;;  %v10813_v1 = vrot.slane %v10811_v58, 4  ;;  %v10456_v45 = vld [vmem:[#allocation2 + $0xb4] sm:$0xf] }
 0x482   : > { %v10659_v28 = vor.u32 %v10658_v56, %v18533_v17  ;;  %v10816_v0 = vrot.slane %v10814_v51, 5  ;;  %v10619_v36 = vshrl.u32 %v10435_v59, 16  ;;  %v10622_v18 = vshll.u32 %v10435_v59, 16 }
 0x483   : > { %v18557_v32 = vrot.slane %v10820_v41, 5  ;;  %v10826_v50 = vrot.slane %v10824_v5, 4  ;;  %v18559_v44 = vrot.slane %v10628_v15, 5  ;;  %v10634_v3 = vrot.slane %v10632_v42, 4 }
 0x484   : > { %v9993_v38 = vsel %vm8022_vm8, %v12611_v29, 0  ;;  %v12722_v2 = vcombine.low %v18546_v61, %v18550_v10  ;;  %v20007_v63 = vrot.slane %v17891_v13, 5  ;;  %v10662_v52 = vshll.u32 %v20008_v57, 16 }
 0x485   : > { %13164 = vmatpush3.bf16.xpose.msra.mxu0 %v18421_v34  ;;  %v20009_v40 = vcombine.low %v18409_v62, %v18404_v46  ;;  %v10847_v58 = vsel %vm13991_vm6, %v10842_v7, %v18504_v33  ;;  %v10857_v13 = vsel %vm13991_vm6, %v10852_v30, %v10856_v23  ;;  %v10650_v54 = vrot.slane %v10649_v25, 4  ;;  %v20011_v33 = vld [vmem:[#allocation20_spill] sm:$0xff]  ;;  %v20013_v7 = vld [vmem:[#allocation17_spill] sm:$0xff]  ;;  %v10432_v25 = vld [vmem:[#allocation2 + $0x54] sm:$0xf] }
 0x486   : > { %v9800_v56 = vsel %vm13927_vm2, %v12590_v39, %v20007_v63  ;;  %v10660_v53 = vrot.slane %v10659_v28, 4  ;;  %v10817_v39 = vor.u32 %v10816_v0, %v10813_v1  ;;  %v10621_v51 = vrot.slane %v10619_v36, 4  ;;  %v20014_v1 = vld [vmem:[#allocation19_spill] sm:$0xff] }
 0x487   : > { %13607 = vmatprep.subr.msk.bf16.mxu0 %vm8022_vm8, %v20009_v40  ;;  %v12610_v34 = vcombine.low %v9800_v56, %v18554_v19  ;;  %v10624_v41 = vrot.slane %v10622_v18, 5  ;;  %v10827_v5 = vor.u32 %v10826_v50, %v18557_v32  ;;  %v10635_v46 = vor.u32 %v10634_v3, %v18559_v44  ;;  %v20012_v19 = vld [vmem:[#allocation15_spill] sm:$0xff] }
 0x488   : > { %13094 = vmatpush3.bf16.xpose.msra.mxu1 %v9993_v38  ;;  %v10787_v62 = vshrl.u32 %v10456_v45, 16  ;;  %v10790_v59 = vshll.u32 %v10456_v45, 16  ;;  %v12689_v15 = vcombine.low %v10847_v58, %v10857_v13  ;;  %v10664_v42 = vrot.slane %v10662_v52, 5 }
 0x489   : > { %13584 = vmatprep.subr.msk.bf16.mxu1 %vm8022_vm8, %v12618_v55  ;;  %v10796_v61 = vshll.u32 %v20011_v33, 16  ;;  %v10800_v10 = vshrl.u32 %v20011_v33, 16  ;;  %v10830_v23 = vshll.u32 %v20012_v19, 16  ;;  %v10638_v30 = vshll.u32 %v20013_v7, 16 }
 0x48a   : > { %v10604_v28 = vshll.u32 %v20014_v1, 16  ;;  %v10608_v0 = vshrl.u32 %v20014_v1, 16  ;;  %v10655_v36 = vsel %vm13991_vm6, %v10650_v54, %v18533_v17  ;;  %v10665_v55 = vsel %vm13991_vm6, %v10660_v53, %v10664_v42 }
 0x48b   : > { %v10818_v18 = vrot.slane %v10817_v39, 4  ;;  %v10625_v50 = vor.u32 %v10624_v41, %v10621_v51  ;;  %v10828_v3 = vrot.slane %v10827_v5, 4  ;;  %v10636_v38 = vrot.slane %v10635_v46, 4  ;;  %v10453_v39 = vld [vmem:[#allocation2 + $0xa8] sm:$0xf] }
 0x48c   : > { %v10789_v63 = vrot.slane %v10787_v62, 4  ;;  %v10792_v56 = vrot.slane %v10790_v59, 5  ;;  %v18595_v57 = vrot.slane %v10796_v61, 5  ;;  %v10802_v52 = vrot.slane %v10800_v10, 4  ;;  %v20016_v10 = vld [vmem:[#allocation24_spill] sm:$0xff] }
 0x48d   : > { %13166 = vmatpush3.bf16.xpose.msra.mxu0 %v18510_v6  ;;  %v10595_v45 = vshrl.u32 %v10432_v25, 16  ;;  %v10598_v40 = vshll.u32 %v10432_v25, 16  ;;  %v20015_v58 = vcombine.low %v18470_v8, %v18455_v48  ;;  %v10832_v17 = vrot.slane %v10830_v23, 5  ;;  %v20018_v25 = vld [vmem:[#allocation21_spill] sm:$0xff] }
 0x48e   : > { %v10640_v13 = vrot.slane %v10638_v30, 5  ;;  %v18601_v54 = vrot.slane %v10604_v28, 5  ;;  %v10610_v53 = vrot.slane %v10608_v0, 4  ;;  %v11341_v51 = vsel %vm8022_vm8, %v12722_v2, 0  ;;  %v20017_v30 = vld [vmem:[#allocation22_spill] sm:$0xff]  ;;  %v18626_v0 = vld [vmem:[%s19300_s4 + $0xa8] sm:$0xff]  }
 0x48f   : > { %13608 = vmatprep.subr.msk.bf16.mxu0 %vm8022_vm8, %v20015_v58  ;;  %v9990_v6 = vsel %vm8022_vm8, %v12610_v34, 0  ;;  %v12681_v41 = vcombine.low %v10655_v36, %v10665_v55  ;;  %v10626_v5 = vrot.slane %v10625_v50, 4  ;;  %v10823_v46 = vsel %vm13991_vm6, %v10818_v18, %v18557_v32  ;;  %v10429_v55 = vld [vmem:[#allocation2 + $0x48] sm:$0xf] }
 0x490   : > { %13096 = vmatpush3.bf16.xpose.msra.mxu1 %v9990_v6  ;;  %v10833_v48 = vsel %vm13991_vm6, %v10828_v3, %v10832_v17  ;;  %v10641_v8 = vsel %vm13991_vm6, %v10636_v38, %v10640_v13  ;;  %v10793_v62 = vor.u32 %v10792_v56, %v10789_v63  ;;  %v10803_v2 = vor.u32 %v10802_v52, %v18595_v57 }
 0x491   : > { %13593 = vmatprep.subr.msk.bf16.mxu1 %vm8022_vm8, %v12689_v15  ;;  %v10597_v59 = vrot.slane %v10595_v45, 4  ;;  %v10600_v34 = vrot.slane %v10598_v40, 5  ;;  %v10763_v42 = vshrl.u32 %v10453_v39, 16  ;;  %v10611_v33 = vor.u32 %v10610_v53, %v18601_v54 }
 0x492   : > { %v10766_v61 = vshll.u32 %v10453_v39, 16  ;;  %v10772_v19 = vshll.u32 %v20016_v10, 16  ;;  %v10776_v32 = vshrl.u32 %v20016_v10, 16  ;;  %v10960_v23 = vsel %vm8022_vm8, %v12681_v41, 0  ;;  %v10450_v39 = vld [vmem:[#allocation2 + $0x9c] sm:$0xf] }
 0x493   : > { %v10631_v7 = vsel %vm13991_vm6, %v10626_v5, %v18559_v44  ;;  %v10806_v15 = vshll.u32 %v20017_v30, 16  ;;  %v10614_v1 = vshll.u32 %v20018_v25, 16  ;;  %v12688_v28 = vcombine.low %v10823_v46, %v10833_v48  ;;  %v11481_v5 = vld [vmem:[%s19301_s5 + $0x20] sm:$0xff]  ;;  %v11484_v25 = vld [vmem:[%s19301_s5 + $0x38] sm:$0xff] }
 0x494   : > { %v12680_v36 = vcombine.low %v10631_v7, %v10641_v8  ;;  %v10580_v18 = vshll.u32 %v18126_v49, 16  ;;  %v10584_v50 = vshrl.u32 %v18126_v49, 16  ;;  %v10794_v3 = vrot.slane %v10793_v62, 4  ;;  %11507 = vperm.xlu0 %13635, %v11481_v5  }
 0x495   : > { %13168 = vmatpush3.bf16.xpose.msra.mxu0 %v11341_v51  ;;  %v10804_v38 = vrot.slane %v10803_v2, 4  ;;  %v10601_v44 = vor.u32 %v10600_v34, %v10597_v59  ;;  %v10765_v63 = vrot.slane %v10763_v42, 4  ;;  %v10612_v56 = vrot.slane %v10611_v33, 4  ;;  %v18661_v42 = vpop.f32.mrf.mxu1 }
 0x496   : > { %v10768_v52 = vrot.slane %v10766_v61, 5  ;;  %v18630_v45 = vrot.slane %v10772_v19, 5  ;;  %v10778_v40 = vrot.slane %v10776_v32, 4  ;;  %v10808_v58 = vrot.slane %v10806_v15, 5  ;;  %v10426_v19 = vld [vmem:[#allocation2 + $0x3c] sm:$0xf] }
 0x497   : > { %13098 = vmatmul.mubr.msk.bf16.vlgmr.msra.gmra.mxu1 %vm8022_vm8, %v18372_v24  ;;  %v10616_v17 = vrot.slane %v10614_v1, 5  ;;  %v10571_v13 = vshrl.u32 %v10429_v55, 16  ;;  %v10574_v53 = vshll.u32 %v10429_v55, 16  ;;  %v18636_v49 = vrot.slane %v10580_v18, 5  ;;  %v11482_v24 = vld [vmem:[%s19301_s5 + $0x28] sm:$0xff]  ;;  %v18666_v32 = vld [vmem:[%s19300_s4 + $0xb0] sm:$0xff]  }
 0x498   : > { %13130 = vmatpush3.bf16.xpose.msra.mxu1 %v10960_v23  ;;  %13099 = vmatprep.mubr.msk.bf16.mxu1 %vm8022_vm8, %v18626_v0  ;;  %v10586_v51 = vrot.slane %v10584_v50, 4  ;;  %v10748_v6 = vshll.u32 %v18128_v47, 16  ;;  %v10752_v41 = vshrl.u32 %v18128_v47, 16  ;;  %v10957_v46 = vsel %vm8022_vm8, %v12680_v36, 0  ;;  %v18654_v47 = vld [vmem:[%s19300_s4 + $0x108] sm:$0xff]   ;;  %v11483_v1 = vld [vmem:[%s19301_s5 + $0x30] sm:$0xff] }
 0x499   : > { %13594 = vmatprep.subr.msk.bf16.mxu1 %vm8022_vm8, %v12688_v28  ;;  %v10799_v48 = vsel %vm13991_vm6, %v10794_v3, %v18595_v57  ;;  %v10602_v8 = vrot.slane %v10601_v44, 4  ;;  %11512 = vperm.xlu1 %13636, %v11482_v24   ;;  %v10809_v62 = vsel %vm13991_vm6, %v10804_v38, %v10808_v58  ;;  %v10617_v2 = vsel %vm13991_vm6, %v10612_v56, %v10616_v17  ;;  %v18688_v38 = vpop.f32.mrf.mxu1  ;;  %v11542_v17 = vld [vmem:[%s19302_s6 + $0x8] sm:$0xff] }
 0x49a   : > { %v10769_v59 = vor.u32 %v10768_v52, %v10765_v63  ;;  %v10779_v34 = vor.u32 %v10778_v40, %v18630_v45  ;;  %v10573_v57 = vrot.slane %v10571_v13, 4  ;;  %v10576_v33 = vrot.slane %v10574_v53, 5  ;;  %11517 = vperm.xlu0 %13635, %v11483_v1  }
 0x49b   : > { %v10739_v61 = vshrl.u32 %v10450_v39, 16  ;;  %v10742_v10 = vshll.u32 %v10450_v39, 16  ;;  %v10782_v23 = vshll.u32 %v18118_v43, 16  ;;  %v10587_v7 = vor.u32 %v10586_v51, %v18636_v49 }
 0x49c   : > { %v18670_v30 = vrot.slane %v10748_v6, 5  ;;  %v10754_v15 = vrot.slane %v10752_v41, 4  ;;  %13170 = vmatmul.mubr.msk.bf16.vlgmr.msra.gmra.mxu0 %vm8022_vm8, %v18431_v9  ;;  %v12687_v28 = vcombine.low %v10799_v48, %v10809_v62  ;;  %v10607_v43 = vsel %vm13991_vm6, %v10602_v8, %v18601_v54  ;;  %v18709_v6 = vld [vmem:[%s19300_s4 + $0x110] sm:$0xff]   ;;  %v18717_v48 = vpop.f32.mrf.mxu1 }
 0x49d   : > { %v10556_v36 = vshll.u32 %v18183_v4, 16  ;;  %v10560_v55 = vshrl.u32 %v18183_v4, 16  ;;  %13171 = vmatprep.mubr.msk.bf16.mxu0 %vm8022_vm8, %v18654_v47  ;;  %11522 = vperm.xlu1 %13636, %v11484_v25   ;;  %v12679_v9 = vcombine.low %v10607_v43, %v10617_v2  ;;  %v10770_v18 = vrot.slane %v10769_v59, 4  ;;  %v10447_v4 = vld [vmem:[#allocation2 + $0x90] sm:$0xf] }
 0x49e   : > { %v10780_v50 = vrot.slane %v10779_v34, 4  ;;  %v10590_v3 = vshll.u32 %v18172_v35, 16  ;;  %v10577_v54 = vor.u32 %v10576_v33, %v10573_v57  ;;  %v10741_v44 = vrot.slane %v10739_v61, 4  ;;  %v20019_v62 = vld [vmem:[#allocation26_spill] sm:$0xff]  ;;  %v18723_v57 = vld [vmem:[%s19300_s4 + $0xb8] sm:$0xff]  }
 0x49f   : > { %13100 = vmatmul.mubr.msk.bf16.gmra.mxu1 %vm8022_vm8, %v18626_v0  ;;  %v10744_v63 = vrot.slane %v10742_v10, 5  ;;  %v10547_v56 = vshrl.u32 %v10426_v19, 16  ;;  %v10784_v52 = vrot.slane %v10782_v23, 5  ;;  %v10588_v40 = vrot.slane %v10587_v7, 4  ;;  %v11541_v0 = vld [vmem:[%s19302_s6] sm:$0xff]  ;;  %v11543_v23 = vld [vmem:[%s19302_s6 + $0x10] sm:$0xff] }
 0x4a0   : > { %13132 = vmatpush3.bf16.xpose.msra.mxu1 %v10957_v46  ;;  %13101 = vmatprep.mubr.msk.bf16.mxu1 %vm8022_vm8, %v18666_v32  ;;  %v10755_v58 = vor.u32 %v10754_v15, %v18670_v30  ;;  %v10550_v35 = vshll.u32 %v10426_v19, 16  ;;  %v18702_v13 = vrot.slane %v10556_v36, 5  ;;  %v10562_v53 = vrot.slane %v10560_v55, 4  ;;  %v10423_v34 = vld [vmem:[#allocation2 + $0x30] sm:$0xf]  ;;  %v11544_v19 = vld [vmem:[%s19302_s6 + $0x18] sm:$0xff]  ;;  %v18742_v55 = vpop.f32.mrf.mxu1 }
 0x4a1   : > { %13595 = vmatprep.subr.msk.bf16.mxu1 %vm8022_vm8, %v12687_v28  ;;  %v10724_v39 = vshll.u32 %v18220_v16, 16  ;;  %v10728_v51 = vshrl.u32 %v18220_v16, 16  ;;  %11556 = vperm.xlu1 %13636, %v11542_v17   ;;  %v10954_v41 = vsel %vm8022_vm8, %v12679_v9, 0  ;;  %v10775_v24 = vsel %vm13991_vm6, %v10770_v18, %v18630_v45 }
 0x4a2   : > { %v10785_v5 = vsel %vm13991_vm6, %v10780_v50, %v10784_v52  ;;  %v10592_v46 = vrot.slane %v10590_v3, 5  ;;  %11551 = vperm.xlu0 %13635, %v11541_v0   ;;  %v10578_v16 = vrot.slane %v10577_v54, 4  ;;  %v10745_v8 = vor.u32 %v10744_v63, %v10741_v44 }
 0x4a3   : > { %v10758_v2 = vshll.u32 %v20019_v62, 16  ;;  %v10549_v59 = vrot.slane %v10547_v56, 4  ;;  %v10552_v33 = vrot.slane %v10550_v35, 5  ;;  %v10715_v61 = vshrl.u32 %v10447_v4, 16  ;;  %v11545_v56 = vld [vmem:[%s19302_s6 + $0x20] sm:$0xff] }
 0x4a4   : > { %v10593_v45 = vsel %vm13991_vm6, %v10588_v40, %v10592_v46  ;;  %v10718_v10 = vshll.u32 %v10447_v4, 16  ;;  %13172 = vmatmul.mubr.msk.bf16.gmra.mxu0 %vm8022_vm8, %v18654_v47  ;;  %v10756_v7 = vrot.slane %v10755_v58, 4  ;;  %v10563_v15 = vor.u32 %v10562_v53, %v18702_v13  ;;  %v13738_v58 = vld [vmem:[%s19300_s4 + $0x118] sm:$0xff]   ;;  %v18778_v62 = vld [vmem:[%s19300_s4 + $0xe0] sm:$0xff]  }
 0x4a5   : > { %v18736_v25 = vrot.slane %v10724_v39, 5  ;;  %v10730_v1 = vrot.slane %v10728_v51, 4  ;;  %13173 = vmatprep.mubr.msk.bf16.mxu0 %vm8022_vm8, %v18709_v6  ;;  %11566 = vperm.xlu1 %13636, %v11544_v19   ;;  %v10523_v28 = vshrl.u32 %v10423_v34, 16  ;;  %v10526_v47 = vshll.u32 %v10423_v34, 16  ;;  %v10444_v39 = vld [vmem:[#allocation2 + $0x84] sm:$0xf] }
 0x4a6   : > { %v10532_v43 = vshll.u32 %v18244_v37, 16  ;;  %v10536_v36 = vshrl.u32 %v18244_v37, 16  ;;  %11561 = vperm.xlu0 %13635, %v11543_v23   ;;  %v12686_v9 = vcombine.low %v10775_v24, %v10785_v5  ;;  %v10583_v18 = vsel %vm13991_vm6, %v10578_v16, %v18636_v49  ;;  %v10420_v19 = vld [vmem:[#allocation2 + $0x24] sm:$0xf] }
 0x4a7   : > { %13102 = vmatmul.mubr.msk.bf16.gmra.mxu1 %vm8022_vm8, %v18666_v32  ;;  %v10746_v50 = vrot.slane %v10745_v8, 4  ;;  %v10760_v3 = vrot.slane %v10758_v2, 5  ;;  %v10553_v54 = vor.u32 %v10552_v33, %v10549_v59  ;;  %v10566_v37 = vshll.u32 %v18236_v11, 16  ;;  %v11546_v32 = vld [vmem:[%s19302_s6 + $0x28] sm:$0xff]  ;;  %v18762_v11 = vpop.f32.mrf.mxu1 }
 0x4a8   : > { %13134 = vmatpush3.bf16.xpose.msra.mxu1 %v10954_v41  ;;  %13103 = vmatprep.mubr.msk.bf16.mxu1 %vm8022_vm8, %v18723_v57  ;;  %v10717_v44 = vrot.slane %v10715_v61, 4  ;;  %v10720_v63 = vrot.slane %v10718_v10, 5  ;;  %v12678_v49 = vcombine.low %v10583_v18, %v10593_v45  ;;  %v10564_v52 = vrot.slane %v10563_v15, 4 }
 0x4a9   : > { %13596 = vmatprep.subr.msk.bf16.mxu1 %vm8022_vm8, %v12686_v9  ;;  %v10761_v4 = vsel %vm13991_vm6, %v10756_v7, %v10760_v3  ;;  %v10731_v40 = vor.u32 %v10730_v1, %v18736_v25  ;;  %11576 = vperm.xlu1 %13636, %v11546_v32   ;;  %v10525_v35 = vrot.slane %v10523_v28, 4  ;;  %v10528_v17 = vrot.slane %v10526_v47, 5  ;;  %v10441_v32 = vld [vmem:[#allocation2 + $0x78] sm:$0xf] }
 0x4aa   : > { %v18767_v0 = vrot.slane %v10532_v43, 5  ;;  %v10538_v53 = vrot.slane %v10536_v36, 4  ;;  %11571 = vperm.xlu0 %13635, %v11545_v56   ;;  %v10751_v51 = vsel %vm13991_vm6, %v10746_v50, %v18670_v30  ;;  %v10700_v41 = vshll.u32 %v18289_v60, 16  ;;  %v11548_v30 = vld [vmem:[%s19302_s6 + $0x38] sm:$0xff] }
 0x4ab   : > { %v10704_v24 = vshrl.u32 %v18289_v60, 16  ;;  %v10554_v5 = vrot.slane %v10553_v54, 4  ;;  %v10568_v46 = vrot.slane %v10566_v37, 5  ;;  %v10721_v16 = vor.u32 %v10720_v63, %v10717_v44  ;;  %v11547_v60 = vld [vmem:[%s19302_s6 + $0x30] sm:$0xff] }
 0x4ac   : > { %v10734_v8 = vshll.u32 %v18279_v12, 16  ;;  %13174 = vmatmul.mubr.msk.bf16.gmra.mxu0 %vm8022_vm8, %v18709_v6  ;;  %v10951_v2 = vsel %vm8022_vm8, %v12678_v49, 0  ;;  %v12685_v59 = vcombine.low %v10751_v51, %v10761_v4  ;;  %v18789_v12 = vpop.f32.mrf.mxu1  ;;  %v10691_v34 = vshrl.u32 %v10444_v39, 16 }
 0x4ad   : > { %v10694_v45 = vshll.u32 %v10444_v39, 16  ;;  %13175 = vmatprep.mubr.msk.bf16.mxu0 %vm8022_vm8, %v13738_v58  ;;  %11586 = vperm.xlu1 %13636, %v11548_v30   ;;  %v10569_v6 = vsel %vm13991_vm6, %v10564_v52, %v10568_v46  ;;  %v10732_v33 = vrot.slane %v10731_v40, 4  ;;  %v10529_v61 = vor.u32 %v10528_v17, %v10525_v35  ;;  %v20020_v35 = vld [vmem:[#allocation23_spill] sm:$0xff] }
 0x4ae   : > { %v10539_v10 = vor.u32 %v10538_v53, %v18767_v0  ;;  %11581 = vperm.xlu0 %13635, %v11547_v60   ;;  %v18797_v23 = vrot.slane %v10700_v41, 5  ;;  %v10706_v7 = vrot.slane %v10704_v24, 4  ;;  %v10508_v15 = vshll.u32 %v18340_v27, 16  ;;  %v18808_v18 = vpop.f32.mrf.mxu1 }
 0x4af   : > { %13104 = vmatmul.mubr.msk.bf16.gmra.mxu1 %vm8022_vm8, %v18723_v57  ;;  %v10512_v1 = vshrl.u32 %v18340_v27, 16  ;;  %v10559_v28 = vsel %vm13991_vm6, %v10554_v5, %v18702_v13  ;;  %v10722_v47 = vrot.slane %v10721_v16, 4  ;;  %v10736_v43 = vrot.slane %v10734_v8, 5  ;;  %v10417_v8 = vld [vmem:[#allocation2 + $0x18] sm:$0xf] }
 0x4b0   : > { %13136 = vmatpush3.bf16.xpose.msra.mxu1 %v10951_v2  ;;  %v10542_v36 = vshll.u32 %v18303_v20, 16  ;;  %13145 = vmatprep.mubr.msk.bf16.mxu1 %vm8022_vm8, %v18778_v62  ;;  %v10693_v57 = vrot.slane %v10691_v34, 4  ;;  %v10696_v9 = vrot.slane %v10694_v45, 5  ;;  %v10499_v50 = vshrl.u32 %v10420_v19, 16  ;;  %v18822_v53 = vpop.f32.mrf.mxu1 }
 0x4b1   : > { %13597 = vmatprep.subr.msk.bf16.mxu1 %vm8022_vm8, %v12685_v59  ;;  %v10502_v27 = vshll.u32 %v10420_v19, 16  ;;  %v12677_v3 = vcombine.low %v10559_v28, %v10569_v6  ;;  %v10737_v54 = vsel %vm13991_vm6, %v10732_v33, %v10736_v43  ;;  %v10530_v13 = vrot.slane %v10529_v61, 4  ;;  %v18839_v28 = vpop.f32.mrf.mxu0 }
 0x4b2   : > { %v10540_v37 = vrot.slane %v10539_v10, 4  ;;  %v10707_v44 = vor.u32 %v10706_v7, %v18797_v23  ;;  %v18813_v20 = vrot.slane %v10508_v15, 5  ;;  %v10514_v63 = vrot.slane %v10512_v1, 4  ;;  %v18834_v6 = vpop.f32.mrf.mxu1 }
 0x4b3   : > { %v10727_v56 = vsel %vm13991_vm6, %v10722_v47, %v18736_v25  ;;  %v10544_v49 = vrot.slane %v10542_v36, 5  ;;  %v10676_v4 = vshll.u32 %v18353_v22, 16  ;;  %v10680_v52 = vshrl.u32 %v18353_v22, 16 }
 0x4b4   : > { %13176 = vmatmul.mubr.msk.bf16.gmra.mxu0 %vm8022_vm8, %v13738_v58  ;;  %v10697_v40 = vor.u32 %v10696_v9, %v10693_v57  ;;  %v10710_v17 = vshll.u32 %v20020_v35, 16  ;;  %v10501_v39 = vrot.slane %v10499_v50, 4  ;;  %v10504_v51 = vrot.slane %v10502_v27, 5  ;;  %v18844_v50 = vpop.f32.mrf.mxu1 }
 0x4b5   : > { %v10948_v41 = vsel %vm8022_vm8, %v12677_v3, 0  ;;  %v12684_v24 = vcombine.low %v10727_v56, %v10737_v54  ;;  %v10667_v5 = vshrl.u32 %v10441_v32, 16  ;;  %v10670_v46 = vshll.u32 %v10441_v32, 16 }
 0x4b6   : > { %v10535_v25 = vsel %vm13991_vm6, %v10530_v13, %v18767_v0  ;;  %v10545_v22 = vsel %vm13991_vm6, %v10540_v37, %v10544_v49  ;;  %v10708_v58 = vrot.slane %v10707_v44, 4  ;;  %v10515_v16 = vor.u32 %v10514_v63, %v18813_v20  ;;  %v18848_v63 = vpop.f32.mrf.mxu0 }
 0x4b7   : > { %v10678_v30 = vrot.slane %v10676_v4, 5  ;;  %v10682_v60 = vrot.slane %v10680_v52, 4  ;;  %v10484_v2 = vshll.u32 %v18457_v21, 16  ;;  %v10488_v59 = vshrl.u32 %v18457_v21, 16 }
 0x4b8   : > { %13138 = vmatpush3.bf16.xpose.msra.mxu1 %v10948_v41  ;;  %v10698_v34 = vrot.slane %v10697_v40, 4  ;;  %v10712_v45 = vrot.slane %v10710_v17, 5  ;;  %v10505_v0 = vor.u32 %v10504_v51, %v10501_v39  ;;  %v10518_v33 = vshll.u32 %v18396_v26, 16  ;;  %v18859_v39 = vpop.f32.mrf.mxu0 }
 0x4b9   : > { %13598 = vmatprep.subr.msk.bf16.mxu1 %vm8022_vm8, %v12684_v24  ;;  %v10669_v61 = vrot.slane %v10667_v5, 4  ;;  %v10672_v10 = vrot.slane %v10670_v46, 5  ;;  %v10475_v19 = vshrl.u32 %v10417_v8, 16  ;;  %v10478_v7 = vshll.u32 %v10417_v8, 16 }
 0x4ba   : > { %v12676_v15 = vcombine.low %v10535_v25, %v10545_v22  ;;  %v10713_v1 = vsel %vm13991_vm6, %v10708_v58, %v10712_v45  ;;  %v10516_v21 = vrot.slane %v10515_v16, 4  ;;  %v10683_v47 = vor.u32 %v10682_v60, %v10678_v30  ;;  %v18868_v58 = vpop.f32.mrf.mxu0 }
 0x4bb   : > { %v10486_v43 = vrot.slane %v10484_v2, 5  ;;  %v10490_v36 = vrot.slane %v10488_v59, 4  ;;  %v10703_v57 = vsel %vm13991_vm6, %v10698_v34, %v18797_v23  ;;  %v10506_v9 = vrot.slane %v10505_v0, 4 }
 0x4bc   : > { %v10520_v26 = vrot.slane %v10518_v33, 5  ;;  %v10673_v27 = vor.u32 %v10672_v10, %v10669_v61  ;;  %v10686_v3 = vshll.u32 %v18411_v14, 16  ;;  %v10477_v54 = vrot.slane %v10475_v19, 4  ;;  %v18856_v14 = vpop.f32.mrf.mxu1  ;;  %v18875_v8 = vpop.f32.mrf.mxu0  ;;  %v13733_v33 = vld [vmem:[%s19300_s4 + $0xe8] sm:$0xff]  }
 0x4bd   : > { %v10480_v13 = vrot.slane %v10478_v7, 5  ;;  %v10945_v37 = vsel %vm8022_vm8, %v12676_v15, 0  ;;  %v12683_v44 = vcombine.low %v10703_v57, %v10713_v1  ;;  %v10684_v56 = vrot.slane %v10683_v47, 4  ;;  %v13735_v1 = vld [vmem:[%s19300_s4 + $0xf0] sm:$0xff]  }
 0x4be   : > { %v10521_v32 = vsel %vm13991_vm6, %v10516_v21, %v10520_v26  ;;  %v10491_v23 = vor.u32 %v10490_v36, %v10486_v43  ;;  %v10511_v49 = vsel %vm13991_vm6, %v10506_v9, %v18813_v20  ;;  %v10674_v4 = vrot.slane %v10673_v27, 4  ;;  %v18863_v24 = vpop.f32.mrf.mxu1  ;;  %v18881_v59 = vpop.f32.mrf.mxu0  ;;  %v13737_v9 = vld [vmem:[%s19300_s4 + $0xf8] sm:$0xff]  }
 0x4bf   : > { %v10688_v52 = vrot.slane %v10686_v3, 5  ;;  %v10481_v40 = vor.u32 %v10480_v13, %v10477_v54  ;;  %v10494_v35 = vshll.u32 %v18489_v31, 16  ;;  %v12675_v17 = vcombine.low %v10511_v49, %v10521_v32 }
 0x4c0   : > { %13140 = vmatpush3.bf16.xpose.msra.mxu1 %v10945_v37  ;;  %v10492_v41 = vrot.slane %v10491_v23, 4  ;;  %v10679_v5 = vsel %vm13991_vm6, %v10674_v4, %v10678_v30  ;;  %v18873_v16 = vpop.f32.mrf.mxu1  ;;  %v18886_v0 = vpop.f32.mrf.mxu0 }
 0x4c1   : > { %13599 = vmatprep.subr.msk.bf16.mxu1 %vm8022_vm8, %v12683_v44  ;;  %v10689_v51 = vsel %vm13991_vm6, %v10684_v56, %v10688_v52  ;;  %v10482_v20 = vrot.slane %v10481_v40, 4  ;;  %v10496_v46 = vrot.slane %v10494_v35, 5  ;;  %v10942_v25 = vsel %vm8022_vm8, %v12675_v17, 0 }
 0x4c2   : > { %v12682_v22 = vcombine.low %v10679_v5, %v10689_v51  ;;  %v18879_v2 = vpop.f32.mrf.mxu1  ;;  %v18891_v10 = vpop.f32.mrf.mxu0 }
 0x4c3   : > { %v10497_v31 = vsel %vm13991_vm6, %v10492_v41, %v10496_v46  ;;  %v10487_v30 = vsel %vm13991_vm6, %v10482_v20, %v10486_v43 }
 0x4c4   : > { %v12674_v60 = vcombine.low %v10487_v30, %v10497_v31  ;;  %v18884_v45 = vpop.f32.mrf.mxu1  ;;  %v18900_v7 = vpop.f32.mrf.mxu0 }
 0x4c6   : > { %v10939_v34 = vsel %vm8022_vm8, %v12674_v60, 0  ;;  %v8153_v61 = vpop.f32.mrf.mxu1  ;;  %v18909_v47 = vpop.f32.mrf.mxu0 }
 0x4c8   : > { %13142 = vmatpush3.bf16.xpose.msra.mxu1 %v10942_v25  ;;  %v18917_v36 = vpop.f32.mrf.mxu0 }
 0x4c9   : > { %13600 = vmatprep.subr.msk.bf16.mxu1 %vm8022_vm8, %v12682_v22 }
 0x4ca   : > { %v18926_v27 = vpop.f32.mrf.mxu0 }
 0x4cc   : > { %v18934_v13 = vpop.f32.mrf.mxu0 }
 0x4ce   : > { %v18940_v32 = vpop.f32.mrf.mxu0 }
 0x4d0   : > { %13144 = vmatpush3.bf16.xpose.msra.mxu1 %v10939_v34  ;;  %v18947_v49 = vpop.f32.mrf.mxu0 }
 0x4d2   : > { %v8756_v40 = vpop.f32.mrf.mxu0 }
 0x4d7   : > { %v18893_v29 = vpop.f32.mrf.mxu1  ;;  %13146 = vmatmul.mubr.msk.bf16.vlgmr.msra.gmra.mxu1 %vm8022_vm8, %v18778_v62 }
 0x4d8   : > { %13147 = vmatprep.mubr.msk.bf16.mxu1 %vm8022_vm8, %v13733_v33 }
 0x4d9   : > { %v18898_v19 = vpop.f32.mrf.mxu1 }
 0x4db   : > { %v18902_v15 = vpop.f32.mrf.mxu1 }
 0x4dc   : > { %v18953_v51 = vpop.f32.mrf.mxu0 }
 0x4dd   : > { %v18907_v21 = vpop.f32.mrf.mxu1 }
 0x4de   : > { %v18955_v41 = vpop.f32.mrf.mxu0 }
 0x4df   : > { %v18911_v43 = vpop.f32.mrf.mxu1  ;;  %13148 = vmatmul.mubr.msk.bf16.gmra.mxu1 %vm8022_vm8, %v13733_v33  ;;  %20022 = vst [vmem:[#allocation25_spill] sm:$0xff] %v18955_v41 }
 0x4e0   : > { %13149 = vmatprep.mubr.msk.bf16.mxu1 %vm8022_vm8, %v13735_v1  ;;  %v18957_v5 = vpop.f32.mrf.mxu0 }
 0x4e1   : > { %v18915_v62 = vpop.f32.mrf.mxu1  ;;  %20023 = vst [vmem:[#allocation30_spill] sm:$0xff] %v18957_v5 }
 0x4e2   : > { %v18959_v20 = vpop.f32.mrf.mxu0 }
 0x4e3   : > { %v18919_v57 = vpop.f32.mrf.mxu1  ;;  %20024 = vst [vmem:[#allocation27_spill] sm:$0xff] %v18959_v20 }
 0x4e4   : > { %v18961_v46 = vpop.f32.mrf.mxu0 }
 0x4e5   : > { %v18924_v26 = vpop.f32.mrf.mxu1  ;;  %20025 = vst [vmem:[#allocation32_spill] sm:$0xff] %v18961_v46 }
 0x4e6   : > { %v18963_v25 = vpop.f32.mrf.mxu0 }
 0x4e7   : > { %v18928_v3 = vpop.f32.mrf.mxu1  ;;  %13150 = vmatmul.mubr.msk.bf16.gmra.mxu1 %vm8022_vm8, %v13735_v1  ;;  %20026 = vst [vmem:[#allocation29_spill] sm:$0xff] %v18963_v25 }
 0x4e8   : > { %13151 = vmatprep.mubr.msk.bf16.mxu1 %vm8022_vm8, %v13737_v9  ;;  %v18965_v22 = vpop.f32.mrf.mxu0 }
 0x4e9   : > { %v18932_v54 = vpop.f32.mrf.mxu1  ;;  %20027 = vst [vmem:[#allocation34_spill] sm:$0xff] %v18965_v22 }
 0x4ea   : > { %v18969_v30 = vpop.f32.mrf.mxu0 }
 0x4eb   : > { %v18936_v37 = vpop.f32.mrf.mxu1  ;;  %20028 = vst [vmem:[#allocation31_spill] sm:$0xff] %v18969_v30 }
 0x4ec   : > { %v18973_v34 = vpop.f32.mrf.mxu0 }
 0x4ed   : > { %v18938_v44 = vpop.f32.mrf.mxu1  ;;  %20029 = vst [vmem:[#allocation36_spill] sm:$0xff] %v18973_v34 }
 0x4ef   : > { %v18942_v56 = vpop.f32.mrf.mxu1  ;;  %13152 = vmatmul.mubr.msk.bf16.gmra.mxu1 %vm8022_vm8, %v13737_v9 }
 0x4f1   : > { %v18945_v23 = vpop.f32.mrf.mxu1 }
 0x4f3   : > { %v18949_v4 = vpop.f32.mrf.mxu1 }
 0x4f5   : > { %v8386_v52 = vpop.f32.mrf.mxu1 }
 0x4f6   : > { %v8387_v35 = vadd.f32 %v8386_v52, %v8153_v61  ;;  %v18977_v61 = vpop.f32.mrf.mxu0 }
 0x4f7   : > { %20030 = vst [vmem:[#allocation33_spill] sm:$0xff] %v18977_v61 }
 0x4f8   : > { %v18951_v17 = vadd.f32 %v8756_v40, %v8387_v35  ;;  %v18981_v9 = vpop.f32.mrf.mxu0 }
 0x4f9   : > { %20031 = vst [vmem:[#allocation38_spill] sm:$0xff] %v18981_v9 }
 0x4fa   : > { %20021 = vst [vmem:[#allocation28_spill] sm:$0xff] %v18951_v17  ;;  %v18985_v40 = vpop.f32.mrf.mxu0 }
 0x4fb   : > { %20032 = vst [vmem:[#allocation35_spill] sm:$0xff] %v18985_v40 }
 0x4fc   : > { %v18989_v17 = vpop.f32.mrf.mxu0 }
 0x4fd   : > { %20033 = vst [vmem:[#allocation40_spill] sm:$0xff] %v18989_v17 }
 0x4fe   : > { %v18993_v22 = vpop.f32.mrf.mxu0 }
 0x4ff   : > { %20034 = vst [vmem:[#allocation37_spill] sm:$0xff] %v18993_v22 }
 0x500   : > { %v18997_v25 = vpop.f32.mrf.mxu0 }
 0x501   : > { %20036 = vst [vmem:[#allocation39_spill] sm:$0xff] %v18997_v25 }
 0x502   : > { %v19001_v46 = vpop.f32.mrf.mxu0 }
 0x503   : > { %20038 = vst [vmem:[#allocation41_spill] sm:$0xff] %v19001_v46 }
 0x517   : > { %v18967_v31 = vpop.f32.mrf.mxu1 }
 0x519   : > { %v18971_v60 = vpop.f32.mrf.mxu1 }
 0x51b   : > { %v18975_v33 = vpop.f32.mrf.mxu1 }
 0x51c   : > { %v19005_v20 = vpop.f32.mrf.mxu0 }
 0x51d   : > { %v18979_v1 = vpop.f32.mrf.mxu1  ;;  %20040 = vst [vmem:[#allocation43_spill] sm:$0xff] %v19005_v20 }
 0x51e   : > { %v19009_v5 = vpop.f32.mrf.mxu0 }
 0x51f   : > { %v18983_v52 = vpop.f32.mrf.mxu1  ;;  %20042 = vst [vmem:[#allocation49_spill] sm:$0xff] %v19009_v5 }
 0x520   : > { %v19013_v41 = vpop.f32.mrf.mxu0 }
 0x521   : > { %v18987_v35 = vpop.f32.mrf.mxu1  ;;  %20044 = vst [vmem:[#allocation53_spill] sm:$0xff] %v19013_v41 }
 0x523   : > { %v18991_v30 = vpop.f32.mrf.mxu1 }
 0x525   : > { %v18995_v34 = vpop.f32.mrf.mxu1 }
 0x526   : > { %20035 = vst [vmem:[#allocation42_spill] sm:$0xff] %v18995_v34  ;;  %v19017_v34 = vpop.f32.mrf.mxu0 }
 0x527   : > { %v18999_v61 = vpop.f32.mrf.mxu1  ;;  %20046 = vst [vmem:[#allocation68_spill] sm:$0xff] %v19017_v34 }
 0x528   : > { %20037 = vst [vmem:[#allocation44_spill] sm:$0xff] %v18999_v61  ;;  %v19019_v25 = vpop.f32.mrf.mxu0 }
 0x529   : > { %v19003_v9 = vpop.f32.mrf.mxu1  ;;  %20047 = vst [vmem:[#allocation70_spill] sm:$0xff] %v19019_v25 }
 0x52a   : > { %20039 = vst [vmem:[#allocation46_spill] sm:$0xff] %v19003_v9  ;;  %v19023_v46 = vpop.f32.mrf.mxu0 }
 0x52b   : > { %v19007_v40 = vpop.f32.mrf.mxu1  ;;  %20049 = vst [vmem:[#allocation62_spill] sm:$0xff] %v19023_v46 }
 0x52c   : > { %20041 = vst [vmem:[#allocation48_spill] sm:$0xff] %v19007_v40  ;;  %v19027_v20 = vpop.f32.mrf.mxu0 }
 0x52d   : > { %v19011_v17 = vpop.f32.mrf.mxu1  ;;  %20051 = vst [vmem:[#allocation69_spill] sm:$0xff] %v19027_v20 }
 0x52e   : > { %20043 = vst [vmem:[#allocation52_spill] sm:$0xff] %v19011_v17  ;;  %v19033_v17 = vpop.f32.mrf.mxu0 }
 0x52f   : > { %v19015_v22 = vpop.f32.mrf.mxu1  ;;  %20054 = vst [vmem:[#allocation72_spill] sm:$0xff] %v19033_v17 }
 0x530   : > { %20045 = vst [vmem:[#allocation55_spill] sm:$0xff] %v19015_v22  ;;  %v19037_v22 = vpop.f32.mrf.mxu0 }
 0x531   : > { %v19021_v61 = vpop.f32.mrf.mxu1  ;;  %20056 = vst [vmem:[#allocation75_spill] sm:$0xff] %v19037_v22 }
 0x532   : > { %20048 = vst [vmem:[#allocation57_spill] sm:$0xff] %v19021_v61  ;;  %v19041_v25 = vpop.f32.mrf.mxu0 }
 0x533   : > { %v19025_v9 = vpop.f32.mrf.mxu1  ;;  %20058 = vst [vmem:[#allocation76_spill] sm:$0xff] %v19041_v25 }
 0x534   : > { %20050 = vst [vmem:[#allocation65_spill] sm:$0xff] %v19025_v9  ;;  %v19045_v46 = vpop.f32.mrf.mxu0 }
 0x535   : > { %v19029_v40 = vpop.f32.mrf.mxu1  ;;  %20060 = vst [vmem:[#allocation79_spill] sm:$0xff] %v19045_v46 }
 0x536   : > { %20052 = vst [vmem:[#allocation71_spill] sm:$0xff] %v19029_v40  ;;  %v19049_v20 = vpop.f32.mrf.mxu0 }
 0x537   : > { %20062 = vst [vmem:[#allocation80_spill] sm:$0xff] %v19049_v20 }
 0x557   : > { %v19031_v5 = vpop.f32.mrf.mxu1 }
 0x558   : > { %20053 = vst [vmem:[#allocation73_spill] sm:$0xff] %v19031_v5  ;;  %v19053_v5 = vpop.f32.mrf.mxu0 }
 0x559   : > { %v19035_v41 = vpop.f32.mrf.mxu1  ;;  %20064 = vst [vmem:[#allocation83_spill] sm:$0xff] %v19053_v5 }
 0x55a   : > { %20055 = vst [vmem:[#allocation74_spill] sm:$0xff] %v19035_v41  ;;  %v19057_v41 = vpop.f32.mrf.mxu0 }
 0x55b   : > { %v19039_v34 = vpop.f32.mrf.mxu1  ;;  %20066 = vst [vmem:[#allocation84_spill] sm:$0xff] %v19057_v41  ;;  %v19079_v41 = vpop.permute.xlu0 %11487 }
 0x55c   : > { %20057 = vst [vmem:[#allocation77_spill] sm:$0xff] %v19039_v34  ;;  %v19061_v34 = vpop.f32.mrf.mxu0 }
 0x55d   : > { %v19043_v61 = vpop.f32.mrf.mxu1  ;;  %20067 = vst [vmem:[#allocation86_spill] sm:$0xff] %v19061_v34  ;;  %v8351_v34 = vadd.f32 %v18893_v29, %v18661_v42  ;;  %v19097_v42 = vpop.permute.xlu1 %11497  ;;  %v8367_v29 = vadd.f32 %v18924_v26, %v18822_v53  ;;  %v8381_v53 = vadd.f32 %v18942_v56, %v18873_v16  ;;  %v8385_v16 = vadd.f32 %v18949_v4, %v18884_v45  ;;  %v20075_v56 = vld [vmem:[#allocation25_spill] sm:$0xff]  ;;  %v20076_v4 = vld [vmem:[#allocation42_spill] sm:$0xff] }
 0x55e   : > { %20059 = vst [vmem:[#allocation78_spill] sm:$0xff] %v19043_v61  ;;  %v19065_v61 = vpop.f32.mrf.mxu0 }
 0x55f   : > { %v19047_v9 = vpop.f32.mrf.mxu1  ;;  %20069 = vst [vmem:[#allocation89_spill] sm:$0xff] %v19065_v61  ;;  %v8353_v61 = vadd.f32 %v18898_v19, %v18688_v38  ;;  %v8759_v38 = vadd.f32 %v18839_v28, %v8351_v34  ;;  %v8377_v19 = vadd.f32 %v18938_v44, %v18863_v24  ;;  %v8383_v24 = vadd.f32 %v18945_v23, %v18879_v2  ;;  %v20080_v34 = vld [vmem:[#allocation48_spill] sm:$0xff] }
 0x560   : > { %20061 = vst [vmem:[#allocation81_spill] sm:$0xff] %v19047_v9  ;;  %v19067_v46 = vpop.f32.mrf.mxu0 }
 0x561   : > { %v19051_v40 = vpop.f32.mrf.mxu1  ;;  %v8760_v28 = vadd.f32 %v18848_v63, %v8353_v61  ;;  %v8770_v26 = vadd.f32 %v18926_v27, %v8377_v19  ;;  %v19137_v2 = vpop.permute.xlu1 %11502  ;;  %v20081_v61 = vld [vmem:[#allocation52_spill] sm:$0xff]  ;;  %v20087_v19 = vld [vmem:[#allocation29_spill] sm:$0xff] }
 0x562   : > { %20063 = vst [vmem:[#allocation82_spill] sm:$0xff] %v19051_v40  ;;  %v19071_v20 = vpop.f32.mrf.mxu0 }
 0x563   : > { %v19055_v17 = vpop.f32.mrf.mxu1  ;;  %20071 = vst [vmem:[#allocation90_spill] sm:$0xff] %v19071_v20 }
 0x564   : > { %20065 = vst [vmem:[#allocation85_spill] sm:$0xff] %v19055_v17  ;;  %v19075_v5 = vpop.f32.mrf.mxu0 }
 0x565   : > { %v19059_v22 = vpop.f32.mrf.mxu1  ;;  %20073 = vst [vmem:[#allocation93_spill] sm:$0xff] %v19075_v5  ;;  %v8361_v5 = vadd.f32 %v18911_v43, %v18762_v11  ;;  %v8373_v11 = vadd.f32 %v18932_v54, %v18844_v50 }
 0x567   : > { %v19063_v25 = vpop.f32.mrf.mxu1 }
 0x568   : > { %20068 = vst [vmem:[#allocation87_spill] sm:$0xff] %v19063_v25  ;;  %v8355_v25 = vadd.f32 %v18902_v15, %v18717_v48  ;;  %v8365_v48 = vadd.f32 %v18919_v57, %v18808_v18  ;;  %v19112_v15 = vpop.permute.xlu0 %11492  ;;  %v9051_v57 = vadd.f32 %v18971_v60, %v8760_v28 }
 0x569   : > { %v19069_v9 = vpop.f32.mrf.mxu1 }
 0x56a   : > { %20070 = vst [vmem:[#allocation88_spill] sm:$0xff] %v19069_v9  ;;  %v19087_v9 = vpop.f32.mrf.mxu0  ;;  %v8761_v18 = vadd.f32 %v18859_v39, %v8355_v25  ;;  %v8765_v63 = vadd.f32 %v18886_v0, %v8365_v48  ;;  %v8766_v39 = vadd.f32 %v18891_v10, %v8367_v29  ;;  %v9709_v23 = vadd.f32 %v20075_v56, %v9051_v57  ;;  %v20078_v25 = vld [vmem:[#allocation44_spill] sm:$0xff]  ;;  %v20085_v48 = vld [vmem:[#allocation74_spill] sm:$0xff]  ;;  %v20092_v57 = vld [vmem:[#allocation43_spill] sm:$0xff] }
 0x56b   : > { %v19073_v40 = vpop.f32.mrf.mxu1 }
 0x56c   : > { %20072 = vst [vmem:[#allocation91_spill] sm:$0xff] %v19073_v40  ;;  %v8357_v40 = vadd.f32 %v18907_v21, %v18742_v55  ;;  %v8371_v55 = vadd.f32 %v18928_v3, %v18834_v6  ;;  %v9050_v6 = vadd.f32 %v18967_v31, %v8759_v38  ;;  %v19119_v21 = vpop.f32.mrf.mxu0  ;;  %v8771_v3 = vadd.f32 %v18934_v13, %v8381_v53  ;;  %v19151_v44 = vpop.permute.xlu0 %11507  ;;  %v20079_v31 = vld [vmem:[#allocation46_spill] sm:$0xff]  ;;  %v20084_v38 = vld [vmem:[#allocation55_spill] sm:$0xff] }
 0x56d   : > { %v19077_v17 = vpop.f32.mrf.mxu1  ;;  %v9052_v10 = vadd.f32 %v18975_v33, %v8761_v18  ;;  %v9056_v27 = vadd.f32 %v18991_v30, %v8765_v63  ;;  %v8773_v13 = vadd.f32 %v18947_v49, %v8385_v16  ;;  %v9061_v30 = vadd.f32 %v20081_v61, %v8770_v26  ;;  %v20088_v18 = vld [vmem:[#allocation34_spill] sm:$0xff]  ;;  %v20094_v26 = vld [vmem:[#allocation36_spill] sm:$0xff]  ;;  %v20103_v61 = vld [vmem:[#allocation71_spill] sm:$0xff] }
 0x56e   : > { %20074 = vst [vmem:[#allocation92_spill] sm:$0xff] %v19077_v17  ;;  %v8363_v17 = vadd.f32 %v18915_v62, %v18789_v12  ;;  %v8375_v12 = vadd.f32 %v18936_v37, %v18856_v14  ;;  %v8762_v50 = vadd.f32 %v18868_v58, %v8357_v40  ;;  %v8763_v14 = vadd.f32 %v18875_v8, %v8361_v5  ;;  %v19143_v54 = vpop.f32.mrf.mxu0  ;;  %v20083_v40 = vld [vmem:[#allocation27_spill] sm:$0xff] }
 0x56f   : > { %v19095_v20 = vpop.f32.mrf.mxu1  ;;  %v8767_v58 = vadd.f32 %v18900_v7, %v8371_v55  ;;  %v8768_v8 = vadd.f32 %v18909_v47, %v8373_v11  ;;  %v9708_v0 = vadd.f32 %v18953_v51, %v9050_v6  ;;  %v8772_v7 = vadd.f32 %v18940_v32, %v8383_v24  ;;  %v20077_v51 = vld [vmem:[#allocation73_spill] sm:$0xff]  ;;  %v20086_v11 = vld [vmem:[#allocation32_spill] sm:$0xff]  ;;  %v20090_v24 = vld [vmem:[#allocation31_spill] sm:$0xff] }
 0x570   : > { %v8764_v43 = vadd.f32 %v18881_v59, %v8363_v17  ;;  %v8769_v59 = vadd.f32 %v18917_v36, %v8375_v12  ;;  %v9053_v45 = vadd.f32 %v18979_v1, %v8762_v50  ;;  %v9054_v47 = vadd.f32 %v18983_v52, %v8763_v14  ;;  %v20082_v1 = vld [vmem:[#allocation30_spill] sm:$0xff]  ;;  %v19165_v55 = vpop.f32.mrf.mxu0  ;;  %v20089_v6 = vld [vmem:[#allocation57_spill] sm:$0xff] }
 0x571   : > { %v19126_v62 = vpop.f32.mrf.mxu1  ;;  %v9057_v17 = vadd.f32 %v20076_v4, %v8766_v39  ;;  %v10110_v5 = vadd.f32 %v20077_v51, %v9708_v0  ;;  %v9058_v32 = vadd.f32 %v20078_v25, %v8767_v58  ;;  %v9059_v60 = vadd.f32 %v20079_v31, %v8768_v8  ;;  %v20091_v39 = vld [vmem:[#allocation65_spill] sm:$0xff] }
 0x572   : > { %v9055_v36 = vadd.f32 %v18987_v35, %v8764_v43  ;;  %v9060_v33 = vadd.f32 %v20080_v34, %v8769_v59  ;;  %v9710_v52 = vadd.f32 %v20082_v1, %v9052_v10  ;;  %v9711_v35 = vadd.f32 %v20083_v40, %v9053_v45  ;;  %v19173_v43 = vpop.permute.xlu1 %11512  ;;  %v20093_v8 = vld [vmem:[#allocation77_spill] sm:$0xff]  ;;  %v20096_v45 = vld [vmem:[#allocation38_spill] sm:$0xff]  ;;  %v19188_v31 = vpop.f32.mrf.mxu0 }
 0x573   : > { %v19149_v37 = vpop.f32.mrf.mxu1  ;;  %v9062_v49 = vadd.f32 %v20084_v38, %v8771_v3  ;;  %v10111_v29 = vadd.f32 %v20085_v48, %v9709_v23  ;;  %v9712_v12 = vadd.f32 %v20086_v11, %v9054_v47  ;;  %v9714_v53 = vadd.f32 %v20088_v18, %v9056_v27  ;;  %v20095_v0 = vld [vmem:[#allocation33_spill] sm:$0xff]  ;;  %v19183_v27 = vpop.permute.xlu0 %11517  ;;  %v20098_v23 = vld [vmem:[#allocation40_spill] sm:$0xff]  ;;  %v20106_v48 = vld [vmem:[#allocation39_spill] sm:$0xff] }
 0x574   : > { %v9713_v28 = vadd.f32 %v20087_v19, %v9055_v36  ;;  %v9063_v50 = vadd.f32 %v20089_v6, %v8772_v7  ;;  %v9715_v63 = vadd.f32 %v20090_v24, %v9057_v17  ;;  %v9064_v16 = vadd.f32 %v20091_v39, %v8773_v13  ;;  %v20097_v36 = vld [vmem:[#allocation35_spill] sm:$0xff]  ;;  %v20099_v17 = vld [vmem:[#allocation49_spill] sm:$0xff]  ;;  %v20100_v13 = vld [vmem:[#allocation78_spill] sm:$0xff] }
 0x575   : > { %v19171_v14 = vpop.f32.mrf.mxu1  ;;  %v10401_v58 = vadd.f32 %v20092_v57, %v10110_v5  ;;  %v10112_v59 = vadd.f32 %v20093_v8, %v9710_v52  ;;  %v9716_v3 = vadd.f32 %v20094_v26, %v9058_v32  ;;  %v9717_v10 = vadd.f32 %v20095_v0, %v9059_v60  ;;  %v20101_v34 = vld [vmem:[#allocation37_spill] sm:$0xff]  ;;  %v20102_v60 = vld [vmem:[#allocation28_spill] sm:$0xff]  ;;  %v20105_v52 = vld [vmem:[#allocation82_spill] sm:$0xff] }
 0x576   : > { %v9718_v47 = vadd.f32 %v20096_v45, %v9060_v33  ;;  %v9719_v7 = vadd.f32 %v20097_v36, %v9061_v30  ;;  %v9720_v4 = vadd.f32 %v20098_v23, %v9062_v49  ;;  %v10402_v51 = vadd.f32 %v20099_v17, %v10111_v29  ;;  %v20104_v1 = vld [vmem:[#allocation81_spill] sm:$0xff]  ;;  %v20109_v24 = vld [vmem:[#allocation87_spill] sm:$0xff]  ;;  %v20110_v57 = vld [vmem:[#allocation88_spill] sm:$0xff] }
 0x577   : > { %v10113_v25 = vadd.f32 %v20100_v13, %v9711_v35  ;;  %v19191_v32 = vadd.f32 %v20101_v34, %v9063_v50  ;;  %v9065_v33 = vadd.f32 %v20103_v61, %v20102_v60  ;;  %v10114_v30 = vadd.f32 %v20104_v1, %v9712_v12  ;;  %v20107_v29 = vld [vmem:[#allocation53_spill] sm:$0xff]  ;;  %v20111_v8 = vld [vmem:[#allocation68_spill] sm:$0xff]  ;;  %v20112_v0 = vld [vmem:[#allocation90_spill] sm:$0xff]  ;;  %v11552_v17 = vpop.permute.xlu0 %11551 }
 0x578   : > { %v10115_v40 = vadd.f32 %v20105_v52, %v9713_v28  ;;  %v19198_v49 = vadd.f32 %v20106_v48, %v9064_v16  ;;  %v10403_v11 = vadd.f32 %v20107_v29, %v10112_v59  ;;  %v20108_v18 = vld [vmem:[#allocation85_spill] sm:$0xff]  ;;  %v10117_v50 = vadd.f32 %v19059_v22, %v9715_v63  ;;  %v20114_v22 = vld [vmem:[#allocation70_spill] sm:$0xff]  ;;  %v20119_v52 = vld [vmem:[#allocation72_spill] sm:$0xff] }
 0x579   : > { %v10116_v6 = vadd.f32 %v20108_v18, %v9714_v53  ;;  %v10118_v39 = vadd.f32 %v20109_v24, %v9716_v3  ;;  %v10119_v12 = vadd.f32 %v20110_v57, %v9717_v10  ;;  %v10404_v16 = vadd.f32 %v20111_v8, %v10113_v25  ;;  %v20113_v53 = vld [vmem:[#allocation41_spill] sm:$0xff]  ;;  %v20115_v3 = vld [vmem:[#allocation62_spill] sm:$0xff]  ;;  %v20116_v10 = vld [vmem:[#allocation91_spill] sm:$0xff] }
 0x57a   : > { %v19214_v36 = vadd.f32 %v20113_v53, %v9065_v33  ;;  %v10405_v63 = vadd.f32 %v20114_v22, %v10114_v30  ;;  %v10120_v23 = vadd.f32 %v20116_v10, %v9718_v47  ;;  %v20117_v34 = vld [vmem:[#allocation93_spill] sm:$0xff]  ;;  %v10408_v33 = vadd.f32 %v20119_v52, %v10117_v50  ;;  %v20121_v30 = vld [vmem:[#allocation76_spill] sm:$0xff] }
 0x57b   : > { %v20118_v61 = vld [vmem:[#allocation69_spill] sm:$0xff]  ;;  %v10410_v29 = vadd.f32 %v20121_v30, %v10119_v12 }
 0x57c   : > { %v10407_v1 = vadd.f32 %v20118_v61, %v10116_v6  ;;  %v20123_v6 = vld [vmem:[#allocation79_spill] sm:$0xff] }
 0x57d   : > { %v19236_v50 = vadd.f32 %v20123_v6, %v10120_v23  ;;  %v20125_v61 = vld [vmem:[#allocation83_spill] sm:$0xff] }
 0x597   : > { %v11020_v56 = vpop.f32.mrf.mxu1 }
 0x598   : > { %v11059_v5 = vadd.f32 %v11020_v56, %v10401_v58  ;;  %v19206_v58 = vpop.permute.xlu1 %11522  ;;  %v10406_v56 = vadd.f32 %v20115_v3, %v10115_v40  ;;  %v20124_v3 = vld [vmem:[#allocation80_spill] sm:$0xff] }
 0x599   : > { %v11022_v38 = vpop.f32.mrf.mxu1 }
 0x59a   : > { %v11060_v35 = vadd.f32 %v11022_v38, %v10402_v51  ;;  %v11461_v19 = vadd.f32 %v19067_v46, %v11059_v5  ;;  %v19211_v46 = vpop.f32.mrf.mxu0  ;;  %v20120_v38 = vld [vmem:[#allocation75_spill] sm:$0xff] }
 0x59b   : > { %v11024_v28 = vpop.f32.mrf.mxu1  ;;  %v10409_v48 = vadd.f32 %v20120_v38, %v10118_v39 }
 0x59c   : > { %v11525_v26 = vmul.f32 %v19079_v41, %v11461_v19  ;;  %v11061_v59 = vadd.f32 %v11024_v28, %v10403_v11  ;;  %v11462_v45 = vadd.f32 %v20112_v0, %v11060_v35  ;;  %v19232_v35 = vpop.f32.mrf.mxu0  ;;  %v20122_v19 = vld [vmem:[#allocation92_spill] sm:$0xff]  ;;  %v11557_v24 = vpop.permute.xlu1 %11556 }
 0x59d   : > { %v11026_v51 = vpop.f32.mrf.mxu1  ;;  %v10121_v18 = vadd.f32 %v20122_v19, %v9719_v7 }
 0x59e   : > { %v11589_v13 = vadd.f32 %v11552_v17, %v11525_v26  ;;  %v11526_v25 = vmul.f32 %v19079_v41, %v11462_v45  ;;  %v11062_v5 = vadd.f32 %v11026_v51, %v10404_v16  ;;  %v11463_v60 = vadd.f32 %v20117_v34, %v11061_v59 }
 0x59f   : > { %v11030_v40 = vpop.f32.mrf.mxu1  ;;  %v10122_v26 = vadd.f32 %v19095_v20, %v9720_v4  ;;  %v10412_v10 = vadd.f32 %v20124_v3, %v10121_v18 }
 0x5a0   : > { %vm11605_vm2 = vcmp.ge.f32.partialorder %v11589_v13, 0.0  ;;  %v11621_v41 = vmul.f32 0.01, %v11589_v13  ;;  %v11590_v47 = vadd.f32 %v11552_v17, %v11526_v25  ;;  %v11527_v11 = vmul.f32 %v19112_v15, %v11463_v60  ;;  %v11567_v38 = vpop.permute.xlu1 %11566 }
 0x5a1   : > { %v11063_v39 = vadd.f32 %v11030_v40, %v10405_v63  ;;  %v11464_v57 = vadd.f32 %v19087_v9, %v11062_v5  ;;  %v11032_v12 = vpop.f32.mrf.mxu1  ;;  %v11446_v63 = vpop.f32.mrf.mxu0 }
 0x5a2   : > { %v11637_v28 = vsel %vm11605_vm2, %v11589_v13, %v11621_v41  ;;  %vm11606_vm6 = vcmp.ge.f32.partialorder %v11590_v47, 0.0  ;;  %v11622_v8 = vmul.f32 0.01, %v11590_v47  ;;  %v11591_v16 = vadd.f32 %v11557_v24, %v11527_v11 }
 0x5a3   : > { %11653 = vst [vmem:[%s19229_s24] sm:$0xff] %v11637_v28  ;;  %v11528_v59 = vmul.f32 %v19112_v15, %v11464_v57  ;;  %v11064_v0 = vadd.f32 %v11032_v12, %v10406_v56  ;;  %v11465_v7 = vadd.f32 %v19119_v21, %v11063_v39  ;;  %v11034_v45 = vpop.f32.mrf.mxu1  ;;  %v10123_v15 = vadd.f32 %v19126_v62, %v19191_v32  ;;  %v11562_v56 = vpop.permute.xlu0 %11561 }
 0x5a4   : > { %v11638_v53 = vsel %vm11606_vm6, %v11590_v47, %v11622_v8  ;;  %vm11607_vm10 = vcmp.ge.f32.partialorder %v11591_v16, 0.0  ;;  %v11623_v22 = vmul.f32 0.01, %v11591_v16  ;;  %v11065_v9 = vadd.f32 %v11034_v45, %v10407_v1  ;;  %v11448_v32 = vpop.f32.mrf.mxu0 }
 0x5a5   : > { %11654 = vst [vmem:[%s19229_s24 + $0x8] sm:$0xff] %v11638_v53  ;;  %v11592_v23 = vadd.f32 %v11557_v24, %v11528_v59  ;;  %v11529_v17 = vmul.f32 %v19097_v42, %v11465_v7  ;;  %v11466_v20 = vadd.f32 %v19143_v54, %v11064_v0  ;;  %v11036_v4 = vpop.f32.mrf.mxu1  ;;  %v10413_v1 = vadd.f32 %v20125_v61, %v10122_v26 }
 0x5a6   : > { %v11639_v21 = vsel %vm11607_vm10, %v11591_v16, %v11623_v22  ;;  %v11066_v51 = vadd.f32 %v11036_v4, %v10408_v33  ;;  %v11467_v13 = vadd.f32 %v19165_v55, %v11065_v9  ;;  %v11452_v57 = vpop.f32.mrf.mxu0  ;;  %v10125_v59 = vadd.f32 %v19171_v14, %v19214_v36  ;;  %v20127_v4 = vld [vmem:[#allocation86_spill] sm:$0xff]  ;;  %v11577_v36 = vpop.permute.xlu1 %11576 }
 0x5a7   : > { %11655 = vst [vmem:[%s19229_s24 + $0x10] sm:$0xff] %v11639_v21  ;;  %vm11608_vm11 = vcmp.ge.f32.partialorder %v11592_v23, 0.0  ;;  %v11624_v25 = vmul.f32 0.01, %v11592_v23  ;;  %v11593_v5 = vadd.f32 %v11562_v56, %v11529_v17  ;;  %v11530_v34 = vmul.f32 %v19097_v42, %v11466_v20  ;;  %v11040_v60 = vpop.f32.mrf.mxu1  ;;  %v11572_v12 = vpop.permute.xlu0 %11571 }
 0x5a8   : > { %v11531_v54 = vmul.f32 %v19137_v2, %v11467_v13  ;;  %v11067_v52 = vadd.f32 %v11040_v60, %v10409_v48  ;;  %v11468_v62 = vadd.f32 %v19188_v31, %v11066_v51  ;;  %v10124_v48 = vadd.f32 %v19149_v37, %v19198_v49  ;;  %v11454_v9 = vpop.f32.mrf.mxu0  ;;  %v20128_v13 = vld [vmem:[#allocation89_spill] sm:$0xff] }
 0x5a9   : > { %v11640_v33 = vsel %vm11608_vm11, %v11592_v23, %v11624_v25  ;;  %vm11609_vm3 = vcmp.ge.f32.partialorder %v11593_v5, 0.0  ;;  %v11625_v55 = vmul.f32 0.01, %v11593_v5  ;;  %v11594_v30 = vadd.f32 %v11562_v56, %v11530_v34  ;;  %v11042_v40 = vpop.f32.mrf.mxu1 }
 0x5aa   : > { %11656 = vst [vmem:[%s19229_s24 + $0x18] sm:$0xff] %v11640_v33  ;;  %v11595_v41 = vadd.f32 %v11567_v38, %v11531_v54  ;;  %v11532_v42 = vmul.f32 %v19137_v2, %v11468_v62  ;;  %v11068_v47 = vadd.f32 %v11042_v40, %v10410_v29  ;;  %v11469_v11 = vadd.f32 %v19211_v46, %v11067_v52  ;;  %v20126_v2 = vld [vmem:[#allocation84_spill] sm:$0xff]  ;;  %v11456_v61 = vpop.f32.mrf.mxu0 }
 0x5ab   : > { %v11641_v19 = vsel %vm11609_vm3, %v11593_v5, %v11625_v55  ;;  %vm11610_vm5 = vcmp.ge.f32.partialorder %v11594_v30, 0.0  ;;  %v11626_v31 = vmul.f32 0.01, %v11594_v30  ;;  %v11044_v18 = vpop.f32.mrf.mxu1  ;;  %v10414_v29 = vadd.f32 %v20126_v2, %v10123_v15 }
 0x5ac   : > { %11657 = vst [vmem:[%s19229_s24 + $0x20] sm:$0xff] %v11641_v19  ;;  %vm11611_vm7 = vcmp.ge.f32.partialorder %v11595_v41, 0.0  ;;  %v11627_v6 = vmul.f32 0.01, %v11595_v41  ;;  %v11596_v24 = vadd.f32 %v11567_v38, %v11532_v42  ;;  %v11533_v39 = vmul.f32 %v19151_v44, %v11469_v11  ;;  %v11458_v11 = vpop.f32.mrf.mxu0 }
 0x5ad   : > { %v11642_v46 = vsel %vm11610_vm5, %v11594_v30, %v11626_v31  ;;  %v11069_v28 = vadd.f32 %v11044_v18, %v19236_v50  ;;  %v11470_v37 = vadd.f32 %v19232_v35, %v11068_v47  ;;  %v11046_v49 = vpop.f32.mrf.mxu1  ;;  %v10415_v14 = vadd.f32 %v20127_v4, %v10124_v48  ;;  %v11587_v48 = vpop.permute.xlu1 %11586 }
 0x5ae   : > { %11658 = vst [vmem:[%s19229_s24 + $0x28] sm:$0xff] %v11642_v46  ;;  %v11643_v8 = vsel %vm11611_vm7, %v11595_v41, %v11627_v6  ;;  %vm11612_vm0 = vcmp.ge.f32.partialorder %v11596_v24, 0.0  ;;  %v11628_v16 = vmul.f32 0.01, %v11596_v24  ;;  %v11597_v26 = vadd.f32 %v11572_v12, %v11533_v39 }
 0x5af   : > { %11659 = vst [vmem:[%s19229_s24 + $0x30] sm:$0xff] %v11643_v8  ;;  %v11534_v0 = vmul.f32 %v19151_v44, %v11470_v37  ;;  %v11070_v7 = vadd.f32 %v11046_v49, %v10412_v10  ;;  %v11471_v45 = vadd.f32 %v11446_v63, %v11069_v28  ;;  %v11050_v53 = vpop.f32.mrf.mxu1  ;;  %v10416_v25 = vadd.f32 %v20128_v13, %v10125_v59 }
 0x5b0   : > { %v11644_v50 = vsel %vm11612_vm0, %v11596_v24, %v11628_v16  ;;  %vm11613_vm1 = vcmp.ge.f32.partialorder %v11597_v26, 0.0  ;;  %v11629_v35 = vmul.f32 0.01, %v11597_v26  ;;  %v11071_v22 = vadd.f32 %v11050_v53, %v10413_v1  ;;  %v11582_v1 = vpop.permute.xlu0 %11581 }
 0x5b1   : > { %11660 = vst [vmem:[%s19229_s24 + $0x38] sm:$0xff] %v11644_v50  ;;  %v11598_v3 = vadd.f32 %v11572_v12, %v11534_v0  ;;  %v11535_v23 = vmul.f32 %v19173_v43, %v11471_v45  ;;  %v11472_v17 = vadd.f32 %v11448_v32, %v11070_v7  ;;  %v11052_v20 = vpop.f32.mrf.mxu1 }
 0x5b2   : > { %v11645_v15 = vsel %vm11613_vm1, %v11597_v26, %v11629_v35  ;;  %v11072_v44 = vadd.f32 %v11052_v20, %v10414_v29  ;;  %v11473_v10 = vadd.f32 %v11452_v57, %v11071_v22 }
 0x5b3   : > { %11661 = vst [vmem:[%s19229_s24 + $0x40] sm:$0xff] %v11645_v15  ;;  %vm11614_vm4 = vcmp.ge.f32.partialorder %v11598_v3, 0.0  ;;  %v11630_v63 = vmul.f32 0.01, %v11598_v3  ;;  %v11599_v21 = vadd.f32 %v11577_v36, %v11535_v23  ;;  %v11536_v56 = vmul.f32 %v19173_v43, %v11472_v17  ;;  %v11054_v51 = vpop.f32.mrf.mxu1 }
 0x5b4   : > { %v11537_v5 = vmul.f32 %v19183_v27, %v11473_v10  ;;  %v11073_v34 = vadd.f32 %v11054_v51, %v10415_v14  ;;  %v11474_v60 = vadd.f32 %v11454_v9, %v11072_v44 }
 0x5b5   : > { %v11646_v54 = vsel %vm11614_vm4, %v11598_v3, %v11630_v63  ;;  %vm11615_vm8 = vcmp.ge.f32.partialorder %v11599_v21, 0.0  ;;  %v11631_v52 = vmul.f32 0.01, %v11599_v21  ;;  %v11600_v62 = vadd.f32 %v11577_v36, %v11536_v56  ;;  %v11056_v32 = vpop.f32.mrf.mxu1 }
 0x5b6   : > { %11662 = vst [vmem:[%s19229_s24 + $0x48] sm:$0xff] %v11646_v54  ;;  %v11601_v38 = vadd.f32 %v11582_v1, %v11537_v5  ;;  %v11538_v43 = vmul.f32 %v19183_v27, %v11474_v60  ;;  %v11074_v33 = vadd.f32 %v11056_v32, %v10416_v25  ;;  %v11475_v55 = vadd.f32 %v11456_v61, %v11073_v34 }
 0x5b7   : > { %v11647_v30 = vsel %vm11615_vm8, %v11599_v21, %v11631_v52  ;;  %vm11616_vm9 = vcmp.ge.f32.partialorder %v11600_v62, 0.0  ;;  %v11632_v40 = vmul.f32 0.01, %v11600_v62 }
 0x5b8   : > { %11663 = vst [vmem:[%s19229_s24 + $0x50] sm:$0xff] %v11647_v30  ;;  %vm11617_vm12 = vcmp.ge.f32.partialorder %v11601_v38, 0.0  ;;  %v11633_v41 = vmul.f32 0.01, %v11601_v38  ;;  %v11602_v42 = vadd.f32 %v11582_v1, %v11538_v43  ;;  %v11539_v47 = vmul.f32 %v19206_v58, %v11475_v55 }
 0x5b9   : > { %v11648_v19 = vsel %vm11616_vm9, %v11600_v62, %v11632_v40  ;;  %v11476_v31 = vadd.f32 %v11458_v11, %v11074_v33 }
 0x5ba   : > { %11664 = vst [vmem:[%s19229_s24 + $0x58] sm:$0xff] %v11648_v19  ;;  %v11649_v27 = vsel %vm11617_vm12, %v11601_v38, %v11633_v41  ;;  %vm11618_vm13 = vcmp.ge.f32.partialorder %v11602_v42, 0.0  ;;  %v11634_v18 = vmul.f32 0.01, %v11602_v42  ;;  %v11603_v6 = vadd.f32 %v11587_v48, %v11539_v47 }
 0x5bb   : > { %11665 = vst [vmem:[%s19229_s24 + $0x60] sm:$0xff] %v11649_v27  ;;  %v11540_v24 = vmul.f32 %v19206_v58, %v11476_v31 }
 0x5bc   : > { %v11650_v39 = vsel %vm11618_vm13, %v11602_v42, %v11634_v18  ;;  %vm11619_vm14 = vcmp.ge.f32.partialorder %v11603_v6, 0.0  ;;  %v11635_v57 = vmul.f32 0.01, %v11603_v6 }
 0x5bd   : > { %11666 = vst [vmem:[%s19229_s24 + $0x68] sm:$0xff] %v11650_v39  ;;  %v11604_v2 = vadd.f32 %v11587_v48, %v11540_v24 }
 0x5be   : > { %v11651_v29 = vsel %vm11619_vm14, %v11603_v6, %v11635_v57 }
 0x5bf   : > { %11667 = vst [vmem:[%s19229_s24 + $0x70] sm:$0xff] %v11651_v29  ;;  %vm11620_vm15 = vcmp.ge.f32.partialorder %v11604_v2, 0.0  ;;  %v11636_v12 = vmul.f32 0.01, %v11604_v2 }
 0x5c1   : > { %v11652_v46 = vsel %vm11620_vm15, %v11604_v2, %v11636_v12 }
 0x5c2   : > { %11668 = vst [vmem:[%s19229_s24 + $0x78] sm:$0xff] %v11652_v46 }
 0x5c3 PF: > { %s17_s26 = sadd.s32 1, %s13851_s26   ;;  %s20129_s24 = smov %s13847_s25 }
 0x5c4   : > { %p14_p5 = scmp.ge.s32.totalorder %s17_s26, 4   ;;  %s20130_s25 = smov %s20132_s27 }
 0x5c6   :  { %16 = sbr.rel (!%p14_p5) target bundleno = 2 (0x2), region = 104 }

</bundles_post_ra>
